<compile_context>
chip_gen: v7x
topology: tpu7x:2x2x1
jax: 0.10.0
libtpu: 0.0.40
codegen_flags: <defaults>
</compile_context>

<pallas_src>
import functools

import numpy as np

import jax
import jax.numpy as jnp
from jax.experimental import pallas as pl
from jax.experimental.pallas import tpu as pltpu


# ----------------------------------------------------------------------------
# Fused conv3x3 + bias + ReLU + maxpool2x2 kernel
# ----------------------------------------------------------------------------
def _conv_pool_kernel(x_ref, wt_ref, b_ref, se_ref, so_ref, o_ref):
    # x_ref : (1, H, W*Cin)            one image, rows x (width*channels)
    # wt_ref: (2, 3, W*Cin, Wp*Cout)   block-Toeplitz weights (even/odd out col)
    # b_ref : (1, Wp*Cout)             bias tiled over output columns
    # se/so : (Hp, 2*Hp)               one-hot selectors of even/odd conv rows
    # o_ref : (1, Hp, Wp*Cout)         pooled output (lane-dense)
    n_rows = se_ref.shape[1]           # 2*Hp conv rows feeding the pool
    kh = wt_ref.shape[1]               # 3 kernel rows
    bias = b_ref[...]

    col_pooled = None
    for xe in range(2):                # even / odd output columns of the conv
        acc = None
        for dy in range(kh):           # 3x3 row taps folded into K via Toeplitz
            t = jnp.dot(x_ref[0, dy:dy + n_rows, :], wt_ref[xe, dy],
                        preferred_element_type=jnp.float32)
            acc = t if acc is None else acc + t
        a = jnp.maximum(acc + bias, 0.0)               # bias + ReLU
        col_pooled = a if col_pooled is None else jnp.maximum(col_pooled, a)

    # Row pairs of the 2x2 pool via exact one-hot selection matmuls.
    pooled = jnp.maximum(
        jnp.dot(se_ref[...], col_pooled, preferred_element_type=jnp.float32),
        jnp.dot(so_ref[...], col_pooled, preferred_element_type=jnp.float32))
    o_ref[0] = pooled.astype(o_ref.dtype)


def conv_pool_stage(x, wt, bias, se, so):
    """x: (B, H, W*Cin) -> pooled (B, Hp, Wp*Cout)."""
    B, H, WC = x.shape
    Hp = se.shape[0]
    N = bias.shape[1]
    return pl.pallas_call(
        _conv_pool_kernel,
        out_shape=jax.ShapeDtypeStruct((B, Hp, N), jnp.float32),
        grid=(B,),
        in_specs=[
            pl.BlockSpec((1, H, WC), lambda b: (b, 0, 0)),
            pl.BlockSpec(wt.shape, lambda b: (0, 0, 0, 0)),   # resident weights
            pl.BlockSpec(bias.shape, lambda b: (0, 0)),
            pl.BlockSpec(se.shape, lambda b: (0, 0)),
            pl.BlockSpec(so.shape, lambda b: (0, 0)),
        ],
        out_specs=pl.BlockSpec((1, Hp, N), lambda b: (b, 0, 0)),
        compiler_params=pltpu.CompilerParams(
            dimension_semantics=("parallel",)),
    )(x, wt, bias, se, so)


# ----------------------------------------------------------------------------
# Fused fc1 + fc2 + fc3 kernel (all weights resident in VMEM)
# ----------------------------------------------------------------------------
def _fc_kernel(x_ref, w1_ref, b1_ref, w2_ref, b2_ref, w3_ref, b3_ref, o_ref):
    h = jnp.dot(x_ref[...], w1_ref[...], preferred_element_type=jnp.float32)
    h = jnp.maximum(h + b1_ref[...], 0.0)
    h = jnp.dot(h, w2_ref[...], preferred_element_type=jnp.float32)
    h = jnp.maximum(h + b2_ref[...], 0.0)
    o = jnp.dot(h, w3_ref[...], preferred_element_type=jnp.float32) + b3_ref[...]
    o_ref[...] = o.astype(o_ref.dtype)


def fc_chain(x, w1, b1, w2, b2, w3, b3, *, block_m=256):
    B, K = x.shape
    N = w3.shape[1]
    tb = min(B, block_m)
    return pl.pallas_call(
        _fc_kernel,
        out_shape=jax.ShapeDtypeStruct((B, N), jnp.float32),
        grid=(pl.cdiv(B, tb),),
        in_specs=[
            pl.BlockSpec((tb, K), lambda i: (i, 0)),
            pl.BlockSpec(w1.shape, lambda i: (0, 0)),   # resident
            pl.BlockSpec(b1.shape, lambda i: (0, 0)),
            pl.BlockSpec(w2.shape, lambda i: (0, 0)),
            pl.BlockSpec(b2.shape, lambda i: (0, 0)),
            pl.BlockSpec(w3.shape, lambda i: (0, 0)),
            pl.BlockSpec(b3.shape, lambda i: (0, 0)),
        ],
        out_specs=pl.BlockSpec((tb, N), lambda i: (i, 0)),
        compiler_params=pltpu.CompilerParams(
            dimension_semantics=("parallel",)),
    )(x, w1, b1, w2, b2, w3, b3)


# ----------------------------------------------------------------------------
# One-time parameter preparation (outside the jitted forward)
# ----------------------------------------------------------------------------
def _toeplitz_conv_weights(w_oihw, w_in, wp):
    """(Cout, Cin, 3, 3) -> (2, 3, w_in*Cin, wp*Cout) block-Toeplitz weights.

    wt[xe, dy][ww*Cin + c, xp*Cout + o] = w[o, c, dy, ww - (2*xp + xe)].
    Even/odd output columns (xe) give the column half of the 2x2 pool.
    """
    w = np.asarray(w_oihw, np.float32)
    cout, cin, kh, kw = w.shape
    wt = np.zeros((2, kh, w_in * cin, wp * cout), np.float32)
    for xe in range(2):
        for dy in range(kh):
            for dx in range(kw):
                blk = w[:, :, dy, dx].T            # (Cin, Cout)
                for xp in range(wp):
                    ww = 2 * xp + xe + dx
                    if ww < w_in:
                        wt[xe, dy, ww * cin:(ww + 1) * cin,
                           xp * cout:(xp + 1) * cout] = blk
    return jnp.asarray(wt)


def _row_selectors(hp):
    se = np.zeros((hp, 2 * hp), np.float32)
    so = np.zeros((hp, 2 * hp), np.float32)
    se[np.arange(hp), 2 * np.arange(hp)] = 1.0
    so[np.arange(hp), 2 * np.arange(hp) + 1] = 1.0
    return jnp.asarray(se), jnp.asarray(so)


def _tiled_bias(b, wp):
    return jnp.asarray(np.tile(np.asarray(b, np.float32), wp)[None, :])


def _fc1_permuted(wf1, c, hs, ws):
    """(512, 1600) torch weight -> (1600, 512) with torch's channel-major
    view(-1, C*H*W) flatten re-mapped to our (h, w, c) activation layout."""
    w = np.asarray(wf1, np.float32)
    k_new = np.arange(hs * ws * c)
    h = k_new // (ws * c)
    x = (k_new % (ws * c)) // c
    ch = k_new % c
    k_old = ch * (hs * ws) + h * ws + x
    return jnp.asarray(w[:, k_old].T)


def prepare_params(p):
    w1p = _fc1_permuted(p["wf1"], c=64, hs=5, ws=5)
    se1, so1 = _row_selectors(13)
    se2, so2 = _row_selectors(5)
    return {
        # conv1: input (28, 28*1) -> pooled (13, 13*32)
        "wt1": _toeplitz_conv_weights(p["w1"], w_in=28, wp=13),
        "bt1": _tiled_bias(p["b1"], 13), "se1": se1, "so1": so1,
        # conv2: input (13, 13*32) -> pooled (5, 5*64)
        "wt2": _toeplitz_conv_weights(p["w2"], w_in=13, wp=5),
        "bt2": _tiled_bias(p["b2"], 5), "se2": se2, "so2": so2,
        # fused FC chain, (K, N) layouts, flatten permutation baked into fc1
        "w1p": w1p,
        "b1p": jnp.asarray(np.asarray(p["bf1"], np.float32)[None, :]),
        "w2p": jnp.asarray(np.asarray(p["wf2"], np.float32).T),
        "b2p": jnp.asarray(np.asarray(p["bf2"], np.float32)[None, :]),
        "w3p": jnp.asarray(np.asarray(p["wf3"], np.float32).T),
        "b3p": jnp.asarray(np.asarray(p["bf3"], np.float32)[None, :]),
    }


# ----------------------------------------------------------------------------
# Net forward (PyTorch semantics)
# ----------------------------------------------------------------------------
def net_forward(x_nchw, kp):
    B = x_nchw.shape[0]
    # NCHW (B,1,28,28) -> (B, H, W*Cin); free reshapes since Cin == 1.
    x = jnp.transpose(x_nchw, (0, 2, 3, 1)).reshape(B, 28, 28)
    h = conv_pool_stage(x, kp["wt1"], kp["bt1"], kp["se1"], kp["so1"])  # (B,13,416)
    h = conv_pool_stage(h, kp["wt2"], kp["bt2"], kp["se2"], kp["so2"])  # (B,5,320)
    h = h.reshape(B, 5 * 320)                                           # free collapse
    return fc_chain(h, kp["w1p"], kp["b1p"], kp["w2p"], kp["b2p"],
                    kp["w3p"], kp["b3p"])                               # (B,10)


def net_reference(x_nchw, p):
    """Pure-JAX reference (XLA conv/reduce_window) for a sanity check."""
    dn = ("NCHW", "OIHW", "NCHW")
    x = jax.lax.conv_general_dilated(x_nchw, p["w1"], (1, 1), "VALID",
                                     dimension_numbers=dn)
    x = jax.nn.relu(x + p["b1"][None, :, None, None])
    x = jax.lax.reduce_window(x, -jnp.inf, jax.lax.max, (1, 1, 2, 2),
                              (1, 1, 2, 2), "VALID")
    x = jax.lax.conv_general_dilated(x, p["w2"], (1, 1), "VALID",
                                     dimension_numbers=dn)
    x = jax.nn.relu(x + p["b2"][None, :, None, None])
    x = jax.lax.reduce_window(x, -jnp.inf, jax.lax.max, (1, 1, 2, 2),
                              (1, 1, 2, 2), "VALID")
    x = x.reshape(x.shape[0], -1)
    x = jax.nn.relu(x @ p["wf1"].T + p["bf1"])
    x = jax.nn.relu(x @ p["wf2"].T + p["bf2"])
    return x @ p["wf3"].T + p["bf3"]


def init_params(key):
    ks = jax.random.split(key, 10)

    def u(k, shape, fan_in):
        bound = 1.0 / (fan_in ** 0.5)
        return jax.random.uniform(k, shape, jnp.float32, -bound, bound)

    return {
        "w1": u(ks[0], (32, 1, 3, 3), 9),       # Conv2d(1, 32, 3)
        "b1": u(ks[1], (32,), 9),
        "w2": u(ks[2], (64, 32, 3, 3), 288),    # Conv2d(32, 64, 3)
        "b2": u(ks[3], (64,), 288),
        "wf1": u(ks[4], (512, 1600), 1600),     # Linear(1600, 512)
        "bf1": u(ks[5], (512,), 1600),
        "wf2": u(ks[6], (128, 512), 512),       # Linear(512, 128)
        "bf2": u(ks[7], (128,), 512),
        "wf3": u(ks[8], (10, 128), 128),        # Linear(128, 10)
        "bf3": u(ks[9], (10,), 128),
    }


if __name__ == "__main__":
    key = jax.random.PRNGKey(0)
    kx, kp = jax.random.split(key)
    params = init_params(kp)
    kernel_params = prepare_params(params)   # one-time prep, outside jit
    x = jax.random.normal(kx, (2, 1, 28, 28), jnp.float32)  # MNIST-shaped batch

    out = jax.block_until_ready(jax.jit(net_forward)(x, kernel_params))
    assert out.shape == (2, 10), out.shape

    ref = jax.block_until_ready(net_reference(x, params))
    max_err = float(jnp.max(jnp.abs(out - ref)))
    # Tolerance covers default-precision MXU/XLA matmul differences while still
    # catching any channel/flatten permutation bug (which would be O(1)).
    assert max_err < 2e-2, f"mismatch vs reference: {max_err}"

    print("KERNEL_OK")
</pallas_src>

<mosaic_0001>
module attributes {stable_mosaic.version = 11 : i64} {
  func.func @_conv_pool_kernel(%arg0: i32, %arg1: memref<1x28x28xf32, #tpu.memory_space<vmem>>, %arg2: memref<2x3x28x416xf32, #tpu.memory_space<vmem>>, %arg3: memref<1x416xf32, #tpu.memory_space<vmem>>, %arg4: memref<13x26xf32, #tpu.memory_space<vmem>>, %arg5: memref<13x26xf32, #tpu.memory_space<vmem>>, %arg6: memref<1x13x416xf32, #tpu.memory_space<vmem>>) attributes {dimension_semantics = [#tpu.dimension_semantics<parallel>], iteration_bounds = array<i64: 2>, scalar_prefetch = 0 : i64, scratch_operands = 0 : i64, tpu.core_type = #tpu.core_type<tc>, window_params = [{transform_indices = @transform_0, window_bounds = array<i64: 1, 28, 28>}, {pipeline_mode = #tpu.pipeline_mode<synchronous>, transform_indices = @transform_1, window_bounds = array<i64: 2, 3, 28, 416>}, {pipeline_mode = #tpu.pipeline_mode<synchronous>, transform_indices = @transform_2, window_bounds = array<i64: 1, 416>}, {pipeline_mode = #tpu.pipeline_mode<synchronous>, transform_indices = @transform_3, window_bounds = array<i64: 13, 26>}, {pipeline_mode = #tpu.pipeline_mode<synchronous>, transform_indices = @transform_4, window_bounds = array<i64: 13, 26>}, {transform_indices = @transform_5, window_bounds = array<i64: 1, 13, 416>}]} {
    %c0 = arith.constant 0 : index
    %c0_0 = arith.constant 0 : index
    %0 = vector.load %arg3[%c0, %c0_0] : memref<1x416xf32, #tpu.memory_space<vmem>>, vector<1x416xf32>
    %c0_1 = arith.constant 0 : index
    %c0_2 = arith.constant 0 : index
    %c0_3 = arith.constant 0 : index
    %1 = vector.load %arg1[%c0_1, %c0_2, %c0_3] : memref<1x28x28xf32, #tpu.memory_space<vmem>>, vector<1x26x28xf32>
    %2 = vector.shape_cast %1 : vector<1x26x28xf32> to vector<26x28xf32>
    %c0_4 = arith.constant 0 : index
    %c0_5 = arith.constant 0 : index
    %c0_6 = arith.constant 0 : index
    %c0_7 = arith.constant 0 : index
    %3 = vector.load %arg2[%c0_4, %c0_5, %c0_6, %c0_7] : memref<2x3x28x416xf32, #tpu.memory_space<vmem>>, vector<1x1x28x416xf32>
    %4 = vector.shape_cast %3 : vector<1x1x28x416xf32> to vector<28x416xf32>
    %cst = arith.constant dense<0.000000e+00> : vector<26x416xf32>
    %5 = tpu.matmul %2, %4, %cst {dimension_numbers = #tpu.dot_dimension_numbers<[1], [0], [0], [1], [0, 0, 1, 1], [], []>} : vector<26x28xf32>, vector<28x416xf32>, vector<26x416xf32> -> vector<26x416xf32>
    %c0_8 = arith.constant 0 : index
    %c1 = arith.constant 1 : index
    %c0_9 = arith.constant 0 : index
    %6 = vector.load %arg1[%c0_8, %c1, %c0_9] : memref<1x28x28xf32, #tpu.memory_space<vmem>>, vector<1x26x28xf32>
    %7 = vector.shape_cast %6 : vector<1x26x28xf32> to vector<26x28xf32>
    %c0_10 = arith.constant 0 : index
    %c1_11 = arith.constant 1 : index
    %c0_12 = arith.constant 0 : index
    %c0_13 = arith.constant 0 : index
    %8 = vector.load %arg2[%c0_10, %c1_11, %c0_12, %c0_13] : memref<2x3x28x416xf32, #tpu.memory_space<vmem>>, vector<1x1x28x416xf32>
    %9 = vector.shape_cast %8 : vector<1x1x28x416xf32> to vector<28x416xf32>
    %cst_14 = arith.constant dense<0.000000e+00> : vector<26x416xf32>
    %10 = tpu.matmul %7, %9, %cst_14 {dimension_numbers = #tpu.dot_dimension_numbers<[1], [0], [0], [1], [0, 0, 1, 1], [], []>} : vector<26x28xf32>, vector<28x416xf32>, vector<26x416xf32> -> vector<26x416xf32>
    %11 = arith.addf %5, %10 : vector<26x416xf32>
    %c0_15 = arith.constant 0 : index
    %c2 = arith.constant 2 : index
    %c0_16 = arith.constant 0 : index
    %12 = vector.load %arg1[%c0_15, %c2, %c0_16] : memref<1x28x28xf32, #tpu.memory_space<vmem>>, vector<1x26x28xf32>
    %13 = vector.shape_cast %12 : vector<1x26x28xf32> to vector<26x28xf32>
    %c0_17 = arith.constant 0 : index
    %c2_18 = arith.constant 2 : index
    %c0_19 = arith.constant 0 : index
    %c0_20 = arith.constant 0 : index
    %14 = vector.load %arg2[%c0_17, %c2_18, %c0_19, %c0_20] : memref<2x3x28x416xf32, #tpu.memory_space<vmem>>, vector<1x1x28x416xf32>
    %15 = vector.shape_cast %14 : vector<1x1x28x416xf32> to vector<28x416xf32>
    %cst_21 = arith.constant dense<0.000000e+00> : vector<26x416xf32>
    %16 = tpu.matmul %13, %15, %cst_21 {dimension_numbers = #tpu.dot_dimension_numbers<[1], [0], [0], [1], [0, 0, 1, 1], [], []>} : vector<26x28xf32>, vector<28x416xf32>, vector<26x416xf32> -> vector<26x416xf32>
    %17 = arith.addf %11, %16 : vector<26x416xf32>
    %18 = vector.broadcast %0 : vector<1x416xf32> to vector<26x416xf32>
    %19 = arith.addf %17, %18 : vector<26x416xf32>
    %cst_22 = arith.constant 0.000000e+00 : f32
    %20 = vector.broadcast %cst_22 : f32 to vector<26x416xf32>
    %21 = arith.maximumf %19, %20 : vector<26x416xf32>
    %c0_23 = arith.constant 0 : index
    %c0_24 = arith.constant 0 : index
    %c0_25 = arith.constant 0 : index
    %22 = vector.load %arg1[%c0_23, %c0_24, %c0_25] : memref<1x28x28xf32, #tpu.memory_space<vmem>>, vector<1x26x28xf32>
    %23 = vector.shape_cast %22 : vector<1x26x28xf32> to vector<26x28xf32>
    %c1_26 = arith.constant 1 : index
    %c0_27 = arith.constant 0 : index
    %c0_28 = arith.constant 0 : index
    %c0_29 = arith.constant 0 : index
    %24 = vector.load %arg2[%c1_26, %c0_27, %c0_28, %c0_29] : memref<2x3x28x416xf32, #tpu.memory_space<vmem>>, vector<1x1x28x416xf32>
    %25 = vector.shape_cast %24 : vector<1x1x28x416xf32> to vector<28x416xf32>
    %cst_30 = arith.constant dense<0.000000e+00> : vector<26x416xf32>
    %26 = tpu.matmul %23, %25, %cst_30 {dimension_numbers = #tpu.dot_dimension_numbers<[1], [0], [0], [1], [0, 0, 1, 1], [], []>} : vector<26x28xf32>, vector<28x416xf32>, vector<26x416xf32> -> vector<26x416xf32>
    %c0_31 = arith.constant 0 : index
    %c1_32 = arith.constant 1 : index
    %c0_33 = arith.constant 0 : index
    %27 = vector.load %arg1[%c0_31, %c1_32, %c0_33] : memref<1x28x28xf32, #tpu.memory_space<vmem>>, vector<1x26x28xf32>
    %28 = vector.shape_cast %27 : vector<1x26x28xf32> to vector<26x28xf32>
    %c1_34 = arith.constant 1 : index
    %c1_35 = arith.constant 1 : index
    %c0_36 = arith.constant 0 : index
    %c0_37 = arith.constant 0 : index
    %29 = vector.load %arg2[%c1_34, %c1_35, %c0_36, %c0_37] : memref<2x3x28x416xf32, #tpu.memory_space<vmem>>, vector<1x1x28x416xf32>
    %30 = vector.shape_cast %29 : vector<1x1x28x416xf32> to vector<28x416xf32>
    %cst_38 = arith.constant dense<0.000000e+00> : vector<26x416xf32>
    %31 = tpu.matmul %28, %30, %cst_38 {dimension_numbers = #tpu.dot_dimension_numbers<[1], [0], [0], [1], [0, 0, 1, 1], [], []>} : vector<26x28xf32>, vector<28x416xf32>, vector<26x416xf32> -> vector<26x416xf32>
    %32 = arith.addf %26, %31 : vector<26x416xf32>
    %c0_39 = arith.constant 0 : index
    %c2_40 = arith.constant 2 : index
    %c0_41 = arith.constant 0 : index
    %33 = vector.load %arg1[%c0_39, %c2_40, %c0_41] : memref<1x28x28xf32, #tpu.memory_space<vmem>>, vector<1x26x28xf32>
    %34 = vector.shape_cast %33 : vector<1x26x28xf32> to vector<26x28xf32>
    %c1_42 = arith.constant 1 : index
    %c2_43 = arith.constant 2 : index
    %c0_44 = arith.constant 0 : index
    %c0_45 = arith.constant 0 : index
    %35 = vector.load %arg2[%c1_42, %c2_43, %c0_44, %c0_45] : memref<2x3x28x416xf32, #tpu.memory_space<vmem>>, vector<1x1x28x416xf32>
    %36 = vector.shape_cast %35 : vector<1x1x28x416xf32> to vector<28x416xf32>
    %cst_46 = arith.constant dense<0.000000e+00> : vector<26x416xf32>
    %37 = tpu.matmul %34, %36, %cst_46 {dimension_numbers = #tpu.dot_dimension_numbers<[1], [0], [0], [1], [0, 0, 1, 1], [], []>} : vector<26x28xf32>, vector<28x416xf32>, vector<26x416xf32> -> vector<26x416xf32>
    %38 = arith.addf %32, %37 : vector<26x416xf32>
    %39 = vector.broadcast %0 : vector<1x416xf32> to vector<26x416xf32>
    %40 = arith.addf %38, %39 : vector<26x416xf32>
    %cst_47 = arith.constant 0.000000e+00 : f32
    %41 = vector.broadcast %cst_47 : f32 to vector<26x416xf32>
    %42 = arith.maximumf %40, %41 : vector<26x416xf32>
    %43 = arith.maximumf %21, %42 : vector<26x416xf32>
    %c0_48 = arith.constant 0 : index
    %c0_49 = arith.constant 0 : index
    %44 = vector.load %arg4[%c0_48, %c0_49] : memref<13x26xf32, #tpu.memory_space<vmem>>, vector<13x26xf32>
    %cst_50 = arith.constant dense<0.000000e+00> : vector<13x416xf32>
    %45 = tpu.matmul %44, %43, %cst_50 {dimension_numbers = #tpu.dot_dimension_numbers<[1], [0], [0], [1], [0, 0, 1, 1], [], []>} : vector<13x26xf32>, vector<26x416xf32>, vector<13x416xf32> -> vector<13x416xf32>
    %c0_51 = arith.constant 0 : index
    %c0_52 = arith.constant 0 : index
    %46 = vector.load %arg5[%c0_51, %c0_52] : memref<13x26xf32, #tpu.memory_space<vmem>>, vector<13x26xf32>
    %cst_53 = arith.constant dense<0.000000e+00> : vector<13x416xf32>
    %47 = tpu.matmul %46, %43, %cst_53 {dimension_numbers = #tpu.dot_dimension_numbers<[1], [0], [0], [1], [0, 0, 1, 1], [], []>} : vector<13x26xf32>, vector<26x416xf32>, vector<13x416xf32> -> vector<13x416xf32>
    %48 = arith.maximumf %45, %47 : vector<13x416xf32>
    %c0_54 = arith.constant 0 : index
    %c0_55 = arith.constant 0 : index
    %c0_56 = arith.constant 0 : index
    %49 = vector.load %arg6[%c0_54, %c0_55, %c0_56] : memref<1x13x416xf32, #tpu.memory_space<vmem>>, vector<1x13x416xf32>
    %50 = vector.shape_cast %49 : vector<1x13x416xf32> to vector<13x416xf32>
    %51 = vector.shape_cast %48 : vector<13x416xf32> to vector<1x13x416xf32>
    tpu.vector_store %arg6[%c0_54, %c0_55, %c0_56], %51 {strides = array<i32>} : memref<1x13x416xf32, #tpu.memory_space<vmem>>, vector<1x13x416xf32>,
    return
  }
  func.func @transform_0(%arg0: i32) -> (i32, i32, i32) {
    %c0_i32 = arith.constant 0 : i32
    %c0_i32_0 = arith.constant 0 : i32
    %c0_i32_1 = arith.constant 0 : i32
    return %arg0, %c0_i32, %c0_i32_0 : i32, i32, i32
  }
  func.func @transform_1(%arg0: i32) -> (i32, i32, i32, i32) {
    %c0_i32 = arith.constant 0 : i32
    %c0_i32_0 = arith.constant 0 : i32
    %c0_i32_1 = arith.constant 0 : i32
    %c0_i32_2 = arith.constant 0 : i32
    %c0_i32_3 = arith.constant 0 : i32
    return %c0_i32, %c0_i32_0, %c0_i32_1, %c0_i32_2 : i32, i32, i32, i32
  }
  func.func @transform_2(%arg0: i32) -> (i32, i32) {
    %c0_i32 = arith.constant 0 : i32
    %c0_i32_0 = arith.constant 0 : i32
    %c0_i32_1 = arith.constant 0 : i32
    return %c0_i32, %c0_i32_0 : i32, i32
  }
  func.func @transform_3(%arg0: i32) -> (i32, i32) {
    %c0_i32 = arith.constant 0 : i32
    %c0_i32_0 = arith.constant 0 : i32
    %c0_i32_1 = arith.constant 0 : i32
    return %c0_i32, %c0_i32_0 : i32, i32
  }
  func.func @transform_4(%arg0: i32) -> (i32, i32) {
    %c0_i32 = arith.constant 0 : i32
    %c0_i32_0 = arith.constant 0 : i32
    %c0_i32_1 = arith.constant 0 : i32
    return %c0_i32, %c0_i32_0 : i32, i32
  }
  func.func @transform_5(%arg0: i32) -> (i32, i32, i32) {
    %c0_i32 = arith.constant 0 : i32
    %c0_i32_0 = arith.constant 0 : i32
    %c0_i32_1 = arith.constant 0 : i32
    return %arg0, %c0_i32, %c0_i32_0 : i32, i32, i32
  }
}

module attributes {stable_mosaic.version = 11 : i64} {
  func.func @_conv_pool_kernel(%arg0: i32, %arg1: memref<1x13x416xf32, #tpu.memory_space<vmem>>, %arg2: memref<2x3x416x320xf32, #tpu.memory_space<vmem>>, %arg3: memref<1x320xf32, #tpu.memory_space<vmem>>, %arg4: memref<5x10xf32, #tpu.memory_space<vmem>>, %arg5: memref<5x10xf32, #tpu.memory_space<vmem>>, %arg6: memref<1x5x320xf32, #tpu.memory_space<vmem>>) attributes {dimension_semantics = [#tpu.dimension_semantics<parallel>], iteration_bounds = array<i64: 2>, scalar_prefetch = 0 : i64, scratch_operands = 0 : i64, tpu.core_type = #tpu.core_type<tc>, window_params = [{transform_indices = @transform_0, window_bounds = array<i64: 1, 13, 416>}, {pipeline_mode = #tpu.pipeline_mode<synchronous>, transform_indices = @transform_1, window_bounds = array<i64: 2, 3, 416, 320>}, {pipeline_mode = #tpu.pipeline_mode<synchronous>, transform_indices = @transform_2, window_bounds = array<i64: 1, 320>}, {pipeline_mode = #tpu.pipeline_mode<synchronous>, transform_indices = @transform_3, window_bounds = array<i64: 5, 10>}, {pipeline_mode = #tpu.pipeline_mode<synchronous>, transform_indices = @transform_4, window_bounds = array<i64: 5, 10>}, {transform_indices = @transform_5, window_bounds = array<i64: 1, 5, 320>}]} {
    %c0 = arith.constant 0 : index
    %c0_0 = arith.constant 0 : index
    %0 = vector.load %arg3[%c0, %c0_0] : memref<1x320xf32, #tpu.memory_space<vmem>>, vector<1x320xf32>
    %c0_1 = arith.constant 0 : index
    %c0_2 = arith.constant 0 : index
    %c0_3 = arith.constant 0 : index
    %1 = vector.load %arg1[%c0_1, %c0_2, %c0_3] : memref<1x13x416xf32, #tpu.memory_space<vmem>>, vector<1x10x416xf32>
    %2 = vector.shape_cast %1 : vector<1x10x416xf32> to vector<10x416xf32>
    %c0_4 = arith.constant 0 : index
    %c0_5 = arith.constant 0 : index
    %c0_6 = arith.constant 0 : index
    %c0_7 = arith.constant 0 : index
    %3 = vector.load %arg2[%c0_4, %c0_5, %c0_6, %c0_7] : memref<2x3x416x320xf32, #tpu.memory_space<vmem>>, vector<1x1x416x320xf32>
    %4 = vector.shape_cast %3 : vector<1x1x416x320xf32> to vector<416x320xf32>
    %cst = arith.constant dense<0.000000e+00> : vector<10x320xf32>
    %5 = tpu.matmul %2, %4, %cst {dimension_numbers = #tpu.dot_dimension_numbers<[1], [0], [0], [1], [0, 0, 1, 1], [], []>} : vector<10x416xf32>, vector<416x320xf32>, vector<10x320xf32> -> vector<10x320xf32>
    %c0_8 = arith.constant 0 : index
    %c1 = arith.constant 1 : index
    %c0_9 = arith.constant 0 : index
    %6 = vector.load %arg1[%c0_8, %c1, %c0_9] : memref<1x13x416xf32, #tpu.memory_space<vmem>>, vector<1x10x416xf32>
    %7 = vector.shape_cast %6 : vector<1x10x416xf32> to vector<10x416xf32>
    %c0_10 = arith.constant 0 : index
    %c1_11 = arith.constant 1 : index
    %c0_12 = arith.constant 0 : index
    %c0_13 = arith.constant 0 : index
    %8 = vector.load %arg2[%c0_10, %c1_11, %c0_12, %c0_13] : memref<2x3x416x320xf32, #tpu.memory_space<vmem>>, vector<1x1x416x320xf32>
    %9 = vector.shape_cast %8 : vector<1x1x416x320xf32> to vector<416x320xf32>
    %cst_14 = arith.constant dense<0.000000e+00> : vector<10x320xf32>
    %10 = tpu.matmul %7, %9, %cst_14 {dimension_numbers = #tpu.dot_dimension_numbers<[1], [0], [0], [1], [0, 0, 1, 1], [], []>} : vector<10x416xf32>, vector<416x320xf32>, vector<10x320xf32> -> vector<10x320xf32>
    %11 = arith.addf %5, %10 : vector<10x320xf32>
    %c0_15 = arith.constant 0 : index
    %c2 = arith.constant 2 : index
    %c0_16 = arith.constant 0 : index
    %12 = vector.load %arg1[%c0_15, %c2, %c0_16] : memref<1x13x416xf32, #tpu.memory_space<vmem>>, vector<1x10x416xf32>
    %13 = vector.shape_cast %12 : vector<1x10x416xf32> to vector<10x416xf32>
    %c0_17 = arith.constant 0 : index
    %c2_18 = arith.constant 2 : index
    %c0_19 = arith.constant 0 : index
    %c0_20 = arith.constant 0 : index
    %14 = vector.load %arg2[%c0_17, %c2_18, %c0_19, %c0_20] : memref<2x3x416x320xf32, #tpu.memory_space<vmem>>, vector<1x1x416x320xf32>
    %15 = vector.shape_cast %14 : vector<1x1x416x320xf32> to vector<416x320xf32>
    %cst_21 = arith.constant dense<0.000000e+00> : vector<10x320xf32>
    %16 = tpu.matmul %13, %15, %cst_21 {dimension_numbers = #tpu.dot_dimension_numbers<[1], [0], [0], [1], [0, 0, 1, 1], [], []>} : vector<10x416xf32>, vector<416x320xf32>, vector<10x320xf32> -> vector<10x320xf32>
    %17 = arith.addf %11, %16 : vector<10x320xf32>
    %18 = vector.broadcast %0 : vector<1x320xf32> to vector<10x320xf32>
    %19 = arith.addf %17, %18 : vector<10x320xf32>
    %cst_22 = arith.constant 0.000000e+00 : f32
    %20 = vector.broadcast %cst_22 : f32 to vector<10x320xf32>
    %21 = arith.maximumf %19, %20 : vector<10x320xf32>
    %c0_23 = arith.constant 0 : index
    %c0_24 = arith.constant 0 : index
    %c0_25 = arith.constant 0 : index
    %22 = vector.load %arg1[%c0_23, %c0_24, %c0_25] : memref<1x13x416xf32, #tpu.memory_space<vmem>>, vector<1x10x416xf32>
    %23 = vector.shape_cast %22 : vector<1x10x416xf32> to vector<10x416xf32>
    %c1_26 = arith.constant 1 : index
    %c0_27 = arith.constant 0 : index
    %c0_28 = arith.constant 0 : index
    %c0_29 = arith.constant 0 : index
    %24 = vector.load %arg2[%c1_26, %c0_27, %c0_28, %c0_29] : memref<2x3x416x320xf32, #tpu.memory_space<vmem>>, vector<1x1x416x320xf32>
    %25 = vector.shape_cast %24 : vector<1x1x416x320xf32> to vector<416x320xf32>
    %cst_30 = arith.constant dense<0.000000e+00> : vector<10x320xf32>
    %26 = tpu.matmul %23, %25, %cst_30 {dimension_numbers = #tpu.dot_dimension_numbers<[1], [0], [0], [1], [0, 0, 1, 1], [], []>} : vector<10x416xf32>, vector<416x320xf32>, vector<10x320xf32> -> vector<10x320xf32>
    %c0_31 = arith.constant 0 : index
    %c1_32 = arith.constant 1 : index
    %c0_33 = arith.constant 0 : index
    %27 = vector.load %arg1[%c0_31, %c1_32, %c0_33] : memref<1x13x416xf32, #tpu.memory_space<vmem>>, vector<1x10x416xf32>
    %28 = vector.shape_cast %27 : vector<1x10x416xf32> to vector<10x416xf32>
    %c1_34 = arith.constant 1 : index
    %c1_35 = arith.constant 1 : index
    %c0_36 = arith.constant 0 : index
    %c0_37 = arith.constant 0 : index
    %29 = vector.load %arg2[%c1_34, %c1_35, %c0_36, %c0_37] : memref<2x3x416x320xf32, #tpu.memory_space<vmem>>, vector<1x1x416x320xf32>
    %30 = vector.shape_cast %29 : vector<1x1x416x320xf32> to vector<416x320xf32>
    %cst_38 = arith.constant dense<0.000000e+00> : vector<10x320xf32>
    %31 = tpu.matmul %28, %30, %cst_38 {dimension_numbers = #tpu.dot_dimension_numbers<[1], [0], [0], [1], [0, 0, 1, 1], [], []>} : vector<10x416xf32>, vector<416x320xf32>, vector<10x320xf32> -> vector<10x320xf32>
    %32 = arith.addf %26, %31 : vector<10x320xf32>
    %c0_39 = arith.constant 0 : index
    %c2_40 = arith.constant 2 : index
    %c0_41 = arith.constant 0 : index
    %33 = vector.load %arg1[%c0_39, %c2_40, %c0_41] : memref<1x13x416xf32, #tpu.memory_space<vmem>>, vector<1x10x416xf32>
    %34 = vector.shape_cast %33 : vector<1x10x416xf32> to vector<10x416xf32>
    %c1_42 = arith.constant 1 : index
    %c2_43 = arith.constant 2 : index
    %c0_44 = arith.constant 0 : index
    %c0_45 = arith.constant 0 : index
    %35 = vector.load %arg2[%c1_42, %c2_43, %c0_44, %c0_45] : memref<2x3x416x320xf32, #tpu.memory_space<vmem>>, vector<1x1x416x320xf32>
    %36 = vector.shape_cast %35 : vector<1x1x416x320xf32> to vector<416x320xf32>
    %cst_46 = arith.constant dense<0.000000e+00> : vector<10x320xf32>
    %37 = tpu.matmul %34, %36, %cst_46 {dimension_numbers = #tpu.dot_dimension_numbers<[1], [0], [0], [1], [0, 0, 1, 1], [], []>} : vector<10x416xf32>, vector<416x320xf32>, vector<10x320xf32> -> vector<10x320xf32>
    %38 = arith.addf %32, %37 : vector<10x320xf32>
    %39 = vector.broadcast %0 : vector<1x320xf32> to vector<10x320xf32>
    %40 = arith.addf %38, %39 : vector<10x320xf32>
    %cst_47 = arith.constant 0.000000e+00 : f32
    %41 = vector.broadcast %cst_47 : f32 to vector<10x320xf32>
    %42 = arith.maximumf %40, %41 : vector<10x320xf32>
    %43 = arith.maximumf %21, %42 : vector<10x320xf32>
    %c0_48 = arith.constant 0 : index
    %c0_49 = arith.constant 0 : index
    %44 = vector.load %arg4[%c0_48, %c0_49] : memref<5x10xf32, #tpu.memory_space<vmem>>, vector<5x10xf32>
    %cst_50 = arith.constant dense<0.000000e+00> : vector<5x320xf32>
    %45 = tpu.matmul %44, %43, %cst_50 {dimension_numbers = #tpu.dot_dimension_numbers<[1], [0], [0], [1], [0, 0, 1, 1], [], []>} : vector<5x10xf32>, vector<10x320xf32>, vector<5x320xf32> -> vector<5x320xf32>
    %c0_51 = arith.constant 0 : index
    %c0_52 = arith.constant 0 : index
    %46 = vector.load %arg5[%c0_51, %c0_52] : memref<5x10xf32, #tpu.memory_space<vmem>>, vector<5x10xf32>
    %cst_53 = arith.constant dense<0.000000e+00> : vector<5x320xf32>
    %47 = tpu.matmul %46, %43, %cst_53 {dimension_numbers = #tpu.dot_dimension_numbers<[1], [0], [0], [1], [0, 0, 1, 1], [], []>} : vector<5x10xf32>, vector<10x320xf32>, vector<5x320xf32> -> vector<5x320xf32>
    %48 = arith.maximumf %45, %47 : vector<5x320xf32>
    %c0_54 = arith.constant 0 : index
    %c0_55 = arith.constant 0 : index
    %c0_56 = arith.constant 0 : index
    %49 = vector.load %arg6[%c0_54, %c0_55, %c0_56] : memref<1x5x320xf32, #tpu.memory_space<vmem>>, vector<1x5x320xf32>
    %50 = vector.shape_cast %49 : vector<1x5x320xf32> to vector<5x320xf32>
    %51 = vector.shape_cast %48 : vector<5x320xf32> to vector<1x5x320xf32>
    tpu.vector_store %arg6[%c0_54, %c0_55, %c0_56], %51 {strides = array<i32>} : memref<1x5x320xf32, #tpu.memory_space<vmem>>, vector<1x5x320xf32>,
    return
  }
  func.func @transform_0(%arg0: i32) -> (i32, i32, i32) {
    %c0_i32 = arith.constant 0 : i32
    %c0_i32_0 = arith.constant 0 : i32
    %c0_i32_1 = arith.constant 0 : i32
    return %arg0, %c0_i32, %c0_i32_0 : i32, i32, i32
  }
  func.func @transform_1(%arg0: i32) -> (i32, i32, i32, i32) {
    %c0_i32 = arith.constant 0 : i32
    %c0_i32_0 = arith.constant 0 : i32
    %c0_i32_1 = arith.constant 0 : i32
    %c0_i32_2 = arith.constant 0 : i32
    %c0_i32_3 = arith.constant 0 : i32
    return %c0_i32, %c0_i32_0, %c0_i32_1, %c0_i32_2 : i32, i32, i32, i32
  }
  func.func @transform_2(%arg0: i32) -> (i32, i32) {
    %c0_i32 = arith.constant 0 : i32
    %c0_i32_0 = arith.constant 0 : i32
    %c0_i32_1 = arith.constant 0 : i32
    return %c0_i32, %c0_i32_0 : i32, i32
  }
  func.func @transform_3(%arg0: i32) -> (i32, i32) {
    %c0_i32 = arith.constant 0 : i32
    %c0_i32_0 = arith.constant 0 : i32
    %c0_i32_1 = arith.constant 0 : i32
    return %c0_i32, %c0_i32_0 : i32, i32
  }
  func.func @transform_4(%arg0: i32) -> (i32, i32) {
    %c0_i32 = arith.constant 0 : i32
    %c0_i32_0 = arith.constant 0 : i32
    %c0_i32_1 = arith.constant 0 : i32
    return %c0_i32, %c0_i32_0 : i32, i32
  }
  func.func @transform_5(%arg0: i32) -> (i32, i32, i32) {
    %c0_i32 = arith.constant 0 : i32
    %c0_i32_0 = arith.constant 0 : i32
    %c0_i32_1 = arith.constant 0 : i32
    return %arg0, %c0_i32, %c0_i32_0 : i32, i32, i32
  }
}

module attributes {stable_mosaic.version = 11 : i64} {
  func.func @_fc_kernel(%arg0: i32, %arg1: memref<2x1600xf32, #tpu.memory_space<vmem>>, %arg2: memref<1600x512xf32, #tpu.memory_space<vmem>>, %arg3: memref<1x512xf32, #tpu.memory_space<vmem>>, %arg4: memref<512x128xf32, #tpu.memory_space<vmem>>, %arg5: memref<1x128xf32, #tpu.memory_space<vmem>>, %arg6: memref<128x10xf32, #tpu.memory_space<vmem>>, %arg7: memref<1x10xf32, #tpu.memory_space<vmem>>, %arg8: memref<2x10xf32, #tpu.memory_space<vmem>>) attributes {dimension_semantics = [#tpu.dimension_semantics<parallel>], iteration_bounds = array<i64: 1>, scalar_prefetch = 0 : i64, scratch_operands = 0 : i64, tpu.core_type = #tpu.core_type<tc>, window_params = [{transform_indices = @transform_0, window_bounds = array<i64: 2, 1600>}, {pipeline_mode = #tpu.pipeline_mode<synchronous>, transform_indices = @transform_1, window_bounds = array<i64: 1600, 512>}, {pipeline_mode = #tpu.pipeline_mode<synchronous>, transform_indices = @transform_2, window_bounds = array<i64: 1, 512>}, {pipeline_mode = #tpu.pipeline_mode<synchronous>, transform_indices = @transform_3, window_bounds = array<i64: 512, 128>}, {pipeline_mode = #tpu.pipeline_mode<synchronous>, transform_indices = @transform_4, window_bounds = array<i64: 1, 128>}, {pipeline_mode = #tpu.pipeline_mode<synchronous>, transform_indices = @transform_5, window_bounds = array<i64: 128, 10>}, {pipeline_mode = #tpu.pipeline_mode<synchronous>, transform_indices = @transform_6, window_bounds = array<i64: 1, 10>}, {transform_indices = @transform_7, window_bounds = array<i64: 2, 10>}]} {
    %c0 = arith.constant 0 : index
    %c0_0 = arith.constant 0 : index
    %0 = vector.load %arg1[%c0, %c0_0] : memref<2x1600xf32, #tpu.memory_space<vmem>>, vector<2x1600xf32>
    %c0_1 = arith.constant 0 : index
    %c0_2 = arith.constant 0 : index
    %1 = vector.load %arg2[%c0_1, %c0_2] : memref<1600x512xf32, #tpu.memory_space<vmem>>, vector<1600x512xf32>
    %cst = arith.constant dense<0.000000e+00> : vector<2x512xf32>
    %2 = tpu.matmul %0, %1, %cst {dimension_numbers = #tpu.dot_dimension_numbers<[1], [0], [0], [1], [0, 0, 1, 1], [], []>} : vector<2x1600xf32>, vector<1600x512xf32>, vector<2x512xf32> -> vector<2x512xf32>
    %c0_3 = arith.constant 0 : index
    %c0_4 = arith.constant 0 : index
    %3 = vector.load %arg3[%c0_3, %c0_4] : memref<1x512xf32, #tpu.memory_space<vmem>>, vector<1x512xf32>
    %4 = vector.broadcast %3 : vector<1x512xf32> to vector<2x512xf32>
    %5 = arith.addf %2, %4 : vector<2x512xf32>
    %cst_5 = arith.constant 0.000000e+00 : f32
    %6 = vector.broadcast %cst_5 : f32 to vector<2x512xf32>
    %7 = arith.maximumf %5, %6 : vector<2x512xf32>
    %c0_6 = arith.constant 0 : index
    %c0_7 = arith.constant 0 : index
    %8 = vector.load %arg4[%c0_6, %c0_7] : memref<512x128xf32, #tpu.memory_space<vmem>>, vector<512x128xf32>
    %cst_8 = arith.constant dense<0.000000e+00> : vector<2x128xf32>
    %9 = tpu.matmul %7, %8, %cst_8 {dimension_numbers = #tpu.dot_dimension_numbers<[1], [0], [0], [1], [0, 0, 1, 1], [], []>} : vector<2x512xf32>, vector<512x128xf32>, vector<2x128xf32> -> vector<2x128xf32>
    %c0_9 = arith.constant 0 : index
    %c0_10 = arith.constant 0 : index
    %10 = vector.load %arg5[%c0_9, %c0_10] : memref<1x128xf32, #tpu.memory_space<vmem>>, vector<1x128xf32>
    %11 = vector.broadcast %10 : vector<1x128xf32> to vector<2x128xf32>
    %12 = arith.addf %9, %11 : vector<2x128xf32>
    %cst_11 = arith.constant 0.000000e+00 : f32
    %13 = vector.broadcast %cst_11 : f32 to vector<2x128xf32>
    %14 = arith.maximumf %12, %13 : vector<2x128xf32>
    %c0_12 = arith.constant 0 : index
    %c0_13 = arith.constant 0 : index
    %15 = vector.load %arg6[%c0_12, %c0_13] : memref<128x10xf32, #tpu.memory_space<vmem>>, vector<128x10xf32>
    %cst_14 = arith.constant dense<0.000000e+00> : vector<2x10xf32>
    %16 = tpu.matmul %14, %15, %cst_14 {dimension_numbers = #tpu.dot_dimension_numbers<[1], [0], [0], [1], [0, 0, 1, 1], [], []>} : vector<2x128xf32>, vector<128x10xf32>, vector<2x10xf32> -> vector<2x10xf32>
    %c0_15 = arith.constant 0 : index
    %c0_16 = arith.constant 0 : index
    %17 = vector.load %arg7[%c0_15, %c0_16] : memref<1x10xf32, #tpu.memory_space<vmem>>, vector<1x10xf32>
    %18 = vector.broadcast %17 : vector<1x10xf32> to vector<2x10xf32>
    %19 = arith.addf %16, %18 : vector<2x10xf32>
    %c0_17 = arith.constant 0 : index
    %c0_18 = arith.constant 0 : index
    %20 = vector.load %arg8[%c0_17, %c0_18] : memref<2x10xf32, #tpu.memory_space<vmem>>, vector<2x10xf32>
    tpu.vector_store %arg8[%c0_17, %c0_18], %19 {strides = array<i32>} : memref<2x10xf32, #tpu.memory_space<vmem>>, vector<2x10xf32>,
    return
  }
  func.func @transform_0(%arg0: i32) -> (i32, i32) {
    %c0_i32 = arith.constant 0 : i32
    %c0_i32_0 = arith.constant 0 : i32
    return %arg0, %c0_i32 : i32, i32
  }
  func.func @transform_1(%arg0: i32) -> (i32, i32) {
    %c0_i32 = arith.constant 0 : i32
    %c0_i32_0 = arith.constant 0 : i32
    %c0_i32_1 = arith.constant 0 : i32
    return %c0_i32, %c0_i32_0 : i32, i32
  }
  func.func @transform_2(%arg0: i32) -> (i32, i32) {
    %c0_i32 = arith.constant 0 : i32
    %c0_i32_0 = arith.constant 0 : i32
    %c0_i32_1 = arith.constant 0 : i32
    return %c0_i32, %c0_i32_0 : i32, i32
  }
  func.func @transform_3(%arg0: i32) -> (i32, i32) {
    %c0_i32 = arith.constant 0 : i32
    %c0_i32_0 = arith.constant 0 : i32
    %c0_i32_1 = arith.constant 0 : i32
    return %c0_i32, %c0_i32_0 : i32, i32
  }
  func.func @transform_4(%arg0: i32) -> (i32, i32) {
    %c0_i32 = arith.constant 0 : i32
    %c0_i32_0 = arith.constant 0 : i32
    %c0_i32_1 = arith.constant 0 : i32
    return %c0_i32, %c0_i32_0 : i32, i32
  }
  func.func @transform_5(%arg0: i32) -> (i32, i32) {
    %c0_i32 = arith.constant 0 : i32
    %c0_i32_0 = arith.constant 0 : i32
    %c0_i32_1 = arith.constant 0 : i32
    return %c0_i32, %c0_i32_0 : i32, i32
  }
  func.func @transform_6(%arg0: i32) -> (i32, i32) {
    %c0_i32 = arith.constant 0 : i32
    %c0_i32_0 = arith.constant 0 : i32
    %c0_i32_1 = arith.constant 0 : i32
    return %c0_i32, %c0_i32_0 : i32, i32
  }
  func.func @transform_7(%arg0: i32) -> (i32, i32) {
    %c0_i32 = arith.constant 0 : i32
    %c0_i32_0 = arith.constant 0 : i32
    return %arg0, %c0_i32 : i32, i32
  }
}

</mosaic_0001>

<bundles_post_ra>
// kernel: net_forward.3
= control target key start
LH: loop header
LB: loop body
LE: loop exit
PB: predicated region body
PF: predicated region fallthrough
CT: control target
= control target key end

     0   :  { %10 = vsyncpa [#allocation3], 0  ;;  %s3482_s0 = inlined_call_operand.vmem [shape: f32[2,28,28], index: 0, kind: input, shape index: {}]   ;;  %s3483_s1 = inlined_call_operand.vmem [shape: f32[2,3,28,416], index: 1, kind: input, shape index: {}]   ;;  %s3484_s2 = inlined_call_operand.hbm [shape: f32[1,416], index: 2, kind: input, shape index: {}]   ;;  %s3485_s3 = inlined_call_operand.hbm [shape: f32[13,26], index: 3, kind: input, shape index: {}]   ;;  %s3486_s4 = inlined_call_operand.hbm [shape: f32[13,26], index: 4, kind: input, shape index: {}]   ;;  %s3487_s5 = inlined_call_operand.vmem [shape: f32[2,13,416], index: 5, kind: output, shape index: {}]  }
   0x1   :  { %11 = vsyncpa [#allocation5], 0  ;;  %s2725_s18 = smov 0  }
   0x2 LB: > { %s2688_s19 = smov [#allocation4]   ;;  %s2731_s21 = sadd.s32 4294967295, %s2686_s18   ;;  %s2686_s18 = sphi %s2725_s18, %s17_s18  }
   0x3   : > { %s184_s20 = sshll.u32 %s2688_s19, 4  ;;  %p2136_p0 = scmp.ge.s32.totalorder %s2686_s18, 1  ;;  %s2740_s20 = int_to_ptr.vmem [resolvable:$true] %s184_s20 }
   0x4   : > { %p158_p1 = scmp.lt.s32.totalorder %s2686_s18, 3  ;;  %p2567_p2 = scmp.eq.s32.totalorder %s2731_s21, 0 }
   0x5   : > { %s2689_s23 = smov [#allocation2]   ;;  %s2690_s26 = smov [#allocation6]  }
   0x6   : > { %p2736_p3 = pnand %p2136_p0, %p158_p1  ;;  %s174_s24 = sshll.u32 %s2689_s23, 4  ;;  %s2750_s24 = int_to_ptr.vmem [resolvable:$true] %s174_s24 }
   0x7   : > { %s197_s27 = sshll.u32 %s2690_s26, 4  ;;  %s2588_s30 = scalar_lea.hbm %s3485_s3, 256  ;;  %s2752_s27 = int_to_ptr.vmem [resolvable:$true] %s197_s27 }
   0x8   : > { %p2557_p4 = pneg %p2736_p3  ;;  %p2589_p6 = scmp.ne.s32.totalorder %s3485_s3, %s2588_s30 }
   0x9   : > { %p2595_p10 = scmp.lt.u32.totalorder %s2588_s30, %s3485_s3 }
   0xa   : > { %p2746_p5 = pnand %p2567_p2, %p2557_p4 }
   0xc   : > { %p2762_p7 = pneg %p2746_p5 }
   0xe   : > { %p2591_p8 = pnand %p2762_p7, %p2589_p6 }
  0x10   : > { %p2592_p9 = pneg %p2591_p8 }
  0x12   : > { %p2597_p11 = pnand %p2595_p10, %p2592_p9 }
  0x14   : > { %2600 = shalt.err (!%p2597_p11)
}
  0x15   : > { %s2601_s11 = scalar_lea.vmem %s2740_s20, 256  ;;  %p2609_p1 = scmp.lt.s32.totalorder %s2740_s20, %s2740_s20 }
  0x16   : > { %p2602_p12 = scmp.ne.s32.totalorder %s2740_s20, %s2601_s11  ;;  %p2610_p4 = scmp.lt.s32.totalorder %s2601_s11, %s2601_s11 }
  0x18   : > { %p2604_p13 = pnand %p2602_p12, %p2762_p7  ;;  %p2611_p6 = por %p2610_p4, %p2609_p1 }
  0x1a   : > { %p2605_p0 = pneg %p2604_p13 }
  0x1c   : > { %p2612_p8 = pnand %p2611_p6, %p2605_p0 }
  0x1e   : > { %2615 = shalt.err (!%p2612_p8)
}
  0x1f   : > { %s2691_s12 = smov 128   ;;  %s2692_s13 = smov 8  }
  0x20   : > { %2563 = dma.hbm_to_vmem [thread:$0]  (!%p2746_p5), %s3485_s3, 256, %s2740_s20, [#allocation5], %s2691_s12, %s2691_s12, %s2692_s13  }
  0x21   : > { %s2616_s19 = scalar_lea.hbm %s3484_s2, 64 }
  0x22   : > { %p2617_p9 = scmp.ne.s32.totalorder %s3484_s2, %s2616_s19  ;;  %p2623_p12 = scmp.lt.u32.totalorder %s2616_s19, %s3484_s2 }
  0x24   : > { %p2619_p10 = pnand %p2617_p9, %p2762_p7 }
  0x26   : > { %p2620_p11 = pneg %p2619_p10 }
  0x28   : > { %p2625_p13 = pnand %p2623_p12, %p2620_p11 }
  0x2a   : > { %2628 = shalt.err (!%p2625_p13)
}
  0x2b   : > { %s2629_s20 = scalar_lea.vmem %s2750_s24, 64  ;;  %p2637_p6 = scmp.lt.s32.totalorder %s2750_s24, %s2750_s24 }
  0x2c   : > { %p2630_p0 = scmp.ne.s32.totalorder %s2750_s24, %s2629_s20  ;;  %p2638_p8 = scmp.lt.s32.totalorder %s2629_s20, %s2629_s20 }
  0x2e   : > { %p2632_p1 = pnand %p2630_p0, %p2762_p7  ;;  %p2639_p9 = por %p2638_p8, %p2637_p6 }
  0x30   : > { %p2633_p4 = pneg %p2632_p1 }
  0x32   : > { %p2640_p10 = pnand %p2639_p9, %p2633_p4 }
  0x34   : > { %2643 = shalt.err (!%p2640_p10)
}
  0x35   : > { %2560 = dma.hbm_to_vmem [thread:$0]  (!%p2746_p5), %s3484_s2, 64, %s2750_s24, [#allocation3]  }
  0x36   : > { %s2644_s10 = scalar_lea.hbm %s3486_s4, 256 }
  0x37   : > { %p2645_p11 = scmp.ne.s32.totalorder %s3486_s4, %s2644_s10  ;;  %p2651_p0 = scmp.lt.u32.totalorder %s2644_s10, %s3486_s4 }
  0x39   : > { %p2647_p12 = pnand %p2645_p11, %p2762_p7 }
  0x3b   : > { %p2648_p13 = pneg %p2647_p12 }
  0x3d   : > { %p2653_p1 = pnand %p2651_p0, %p2648_p13 }
  0x3f   : > { %2656 = shalt.err (!%p2653_p1)
}
  0x40   : > { %s2657_s24 = scalar_lea.vmem %s2752_s27, 256  ;;  %p2665_p9 = scmp.lt.s32.totalorder %s2752_s27, %s2752_s27 }
  0x41   : > { %p2658_p4 = scmp.ne.s32.totalorder %s2752_s27, %s2657_s24  ;;  %p2666_p10 = scmp.lt.s32.totalorder %s2657_s24, %s2657_s24 }
  0x43   : > { %p2660_p6 = pnand %p2658_p4, %p2762_p7  ;;  %p2667_p11 = por %p2666_p10, %p2665_p9 }
  0x45   : > { %p2661_p8 = pneg %p2660_p6 }
  0x47   : > { %p2668_p12 = pnand %p2667_p11, %p2661_p8 }
  0x49   : > { %2671 = shalt.err (!%p2668_p12)
}
  0x4a   : > { %2566 = dma.hbm_to_vmem [thread:$0]  (!%p2746_p5), %s3486_s4, 256, %s2752_s27, [#allocation5], %s2691_s12, %s2691_s12, %s2692_s13  }
  0x4b   : > { %221 = sbr.rel (%p2736_p3) target bundleno = 644 (0x284), region = 40 }
  0x52   : > { %2677 = dma.done.wait (%p2567_p2), [#allocation3], 64  }
  0x53   : > { %2679 = vsyncadd (%p2567_p2), [#allocation3], 4294967232 }
  0x54   : > { %2681 = dma.done.wait (%p2567_p2), [#allocation5], 512  }
  0x55   : > { %2683 = vsyncadd (%p2567_p2), [#allocation5], 4294966784  ;;  %v2693_v0 = vmov 0.0   ;;  %p257_p3 = scmp.lt.s32.totalorder %s2731_s21, 1  ;;  %vm322_vm0 = vcmask 1043456   ;;  %vm2694_vm1 = vmmov 1  }
  0x56   : > { %399 = vmatprep.mubr.f32.mxu0 %v2693_v0  ;;  %488 = vmatprep.mubr.f32.mxu1 %v2693_v0  ;;  %vm2852_vm2 = vmpackc.low %vm322_vm0, %vm2694_vm1  ;;  %v2150_v2 = vld [vmem:[%s3483_s1 + $0x88] sm:$0xff]  ;;  %v2152_v4 = vld [vmem:[%s3483_s1 + $0x98] sm:$0xff]  ;;  %vm309_vm3 = vcmask 228352   ;;  %vm1701_vm4 = vcmask 1041408   ;;  %vm1694_vm6 = vcmask 211968   ;;  %vm2041_vm7 = vcmask 261120  }
  0x57   : > { %s3496_s21 = smov (!%p257_p3, %s2731_s21), 1  ;;  %v2154_v3 = vld [vmem:[%s3483_s1 + $0xa8] sm:$0xff]  ;;  %v2156_v6 = vld [vmem:[%s3483_s1 + $0xb8] sm:$0xff]  ;;  %v2149_v7 = vld [vmem:[%s3483_s1 + $0x80] sm:$0xff]  ;;  %vm2046_vm8 = vcmask 258048  }
  0x58   : > { %v2321_v5 = vpack.c.bf16 %v2154_v3, %v2150_v2  ;;  %v2153_v8 = vld [vmem:[%s3483_s1 + $0xa0] sm:$0xff]  ;;  %v2331_v9 = vpack.c.bf16 %v2156_v6, %v2152_v4  ;;  %v2151_v11 = vld [vmem:[%s3483_s1 + $0x90] sm:$0xff]  ;;  %v2158_v13 = vld [vmem:[%s3483_s1 + $0xc8] sm:$0xff]  ;;  %s2319_s15 = sshll.u32 %s3496_s21, 5  ;;  %s2320_s11 = sshll.u32 %s3496_s21, 6 }
  0x59   : > { %v2323_v10 = vpack.c.bf16 %v2153_v8, %v2149_v7  ;;  %v2155_v12 = vld [vmem:[%s3483_s1 + $0xb0] sm:$0xff]  ;;  %v2162_v15 = vld [vmem:[%s3483_s1 + $0xe8] sm:$0xf]  ;;  %v2160_v16 = vld [vmem:[%s3483_s1 + $0xd8] sm:$0xff]  ;;  %s2908_s6 = scalar_lea.vmem %s3482_s0, %s2319_s15  ;;  %s266_s15 = scalar_lea.vmem %s3487_s5, %s2320_s11 }
  0x5a   : > { %2322 = vmatprep.subr.bf16.mxu0 %v2321_v5  ;;  %v2333_v14 = vpack.c.bf16 %v2155_v12, %v2151_v11  ;;  %v2164_v17 = vld [vmem:[%s3483_s1 + $0xf8] sm:$0xf]  ;;  %2332 = vmatprep.subr.bf16.mxu1 %v2331_v9  ;;  %v2325_v18 = vpack.c.bf16 %v2162_v15, %v2158_v13  ;;  %v2157_v20 = vld [vmem:[%s3483_s1 + $0xc0] sm:$0xff]  ;;  %v2159_v22 = vld [vmem:[%s3483_s1 + $0xd0] sm:$0xff] }
  0x5b   : > { %2324 = vmatpush1.bf16.msra.mxu0 %v2323_v10  ;;  %v2335_v19 = vpack.c.bf16 %v2164_v17, %v2160_v16  ;;  %v2161_v21 = vld [vmem:[%s3483_s1 + $0xe0] sm:$0xf]  ;;  %v2163_v24 = vld [vmem:[%s3483_s1 + $0xf0] sm:$0xf]  ;;  %v273_v26 = vld [vmem:[%s3483_s1 + $0x8] sm:$0xff] }
  0x5c   : > { %2334 = vmatpush1.bf16.msra.mxu1 %v2333_v14  ;;  %v2328_v23 = vpack.c.bf16 %v2161_v21, %v2157_v20  ;;  %2327 = vmatprep.subr.msk.bf16.mxu0 %vm2852_vm2, %v2325_v18  ;;  %v2338_v25 = vpack.c.bf16 %v2163_v24, %v2159_v22  ;;  %v277_v27 = vld [vmem:[%s3483_s1 + $0x28] sm:$0xff]  ;;  %v275_v28 = vld [vmem:[%s3483_s1 + $0x18] sm:$0xff]  ;;  %v272_v31 = vld [vmem:[%s3483_s1] sm:$0xff] }
  0x5d   : > { %2337 = vmatprep.subr.msk.bf16.mxu1 %vm2852_vm2, %v2335_v19  ;;  %v2341_v29 = vpack.c.bf16 %v277_v27, %v273_v26  ;;  %v279_v30 = vld [vmem:[%s3483_s1 + $0x38] sm:$0xff]  ;;  %v276_v32 = vld [vmem:[%s3483_s1 + $0x20] sm:$0xff]  ;;  %v274_v35 = vld [vmem:[%s3483_s1 + $0x10] sm:$0xff] }
  0x5e   : > { %v2935_v33 = vld [vmem:[%s2908_s6 + $0x1] sm:$0xff]  ;;  %v2351_v34 = vpack.c.bf16 %v279_v30, %v275_v28  ;;  %v278_v36 = vld [vmem:[%s3483_s1 + $0x30] sm:$0xff]  ;;  %v2343_v37 = vpack.c.bf16 %v276_v32, %v272_v31  ;;  %v283_v42 = vld [vmem:[%s3483_s1 + $0x58] sm:$0xff] }
  0x5f   : > { %2330 = vmatpush1.bf16.msk.msra.mxu0 %vm2852_vm2, %v2328_v23  ;;  %v281_v38 = vld [vmem:[%s3483_s1 + $0x48] sm:$0xff]  ;;  %v2353_v40 = vpack.c.bf16 %v278_v36, %v274_v35  ;;  %v287_v43 = vld [vmem:[%s3483_s1 + $0x78] sm:$0xf]  ;;  %v280_v44 = vld [vmem:[%s3483_s1 + $0x40] sm:$0xff] }
  0x60   : > { %2340 = vmatpush1.bf16.msk.msra.mxu1 %vm2852_vm2, %v2338_v25  ;;  %2342 = vmatprep.subr.bf16.mxu0 %v2341_v29  ;;  %v285_v39 = vld [vmem:[%s3483_s1 + $0x68] sm:$0xf]  ;;  %v2355_v45 = vpack.c.bf16 %v287_v43, %v283_v42  ;;  %v284_v46 = vld [vmem:[%s3483_s1 + $0x60] sm:$0xf]  ;;  %v282_v47 = vld [vmem:[%s3483_s1 + $0x50] sm:$0xff] }
  0x61   : > { %2352 = vmatprep.subr.bf16.mxu1 %v2351_v34  ;;  %v2345_v41 = vpack.c.bf16 %v285_v39, %v281_v38  ;;  %v286_v48 = vld [vmem:[%s3483_s1 + $0x70] sm:$0xf]  ;;  %v2190_v50 = vld [vmem:[%s3483_s1 + $0x108] sm:$0xff]  ;;  %v2348_v51 = vpack.c.bf16 %v284_v46, %v280_v44  ;;  %v2192_v53 = vld [vmem:[%s3483_s1 + $0x118] sm:$0xff] }
  0x62   : > { %2167 = vmatmul.mubr.msk.f32.vlgmr.msra.gmra.mrb[0].mxu0 %vm309_vm3, %v2935_v33  ;;  %v2975_v49 = vld [vmem:[%s2908_s6 + $0x9] sm:$0xff]  ;;  %v2196_v54 = vld [vmem:[%s3483_s1 + $0x138] sm:$0xff]  ;;  %v2358_v55 = vpack.c.bf16 %v286_v48, %v282_v47  ;;  %v2189_v60 = vld [vmem:[%s3483_s1 + $0x100] sm:$0xff] }
  0x63   : > { %2173 = vmatmul.mubr.msk.f32.vlgmr.msra.gmra.mrb[0].mxu1 %vm309_vm3, %v2935_v33  ;;  %405 = vmatprep.mubr.f32.mxu0 %v2693_v0  ;;  %v2194_v52 = vld [vmem:[%s3483_s1 + $0x128] sm:$0xff]  ;;  %v2371_v57 = vpack.c.bf16 %v2196_v54, %v2192_v53  ;;  %v3000_v58 = vld [vmem:[%s2908_s6 + $0x11] sm:$0xff]  ;;  %v3013_v59 = vld [vmem:[%s2908_s6 + $0x19] sm:$0x3] }
  0x64   : > { %494 = vmatprep.mubr.f32.mxu1 %v2693_v0  ;;  %2344 = vmatpush1.bf16.msra.mxu0 %v2343_v37  ;;  %v2361_v56 = vpack.c.bf16 %v2194_v52, %v2190_v50  ;;  %v2193_v61 = vld [vmem:[%s3483_s1 + $0x120] sm:$0xff]  ;;  %v2191_v62 = vld [vmem:[%s3483_s1 + $0x110] sm:$0xff]  ;;  %v2198_v2 = vld [vmem:[%s3483_s1 + $0x148] sm:$0xff] }
  0x65   : > { %2354 = vmatpush1.bf16.msra.mxu1 %v2353_v40  ;;  %2347 = vmatprep.subr.msk.bf16.mxu0 %vm2852_vm2, %v2345_v41  ;;  %v2195_v63 = vld [vmem:[%s3483_s1 + $0x130] sm:$0xff]  ;;  %v2202_v3 = vld [vmem:[%s3483_s1 + $0x168] sm:$0xf]  ;;  %v3040_v4 = vld [vmem:[%s2908_s6] sm:$0xff]  ;;  %v2363_v7 = vpack.c.bf16 %v2193_v61, %v2189_v60 }
  0x66   : > { %2168 = vmatmul.mubr.msk.f32.gmra.mrb[2].mxu0 %vm309_vm3, %v2975_v49  ;;  %2357 = vmatprep.subr.msk.bf16.mxu1 %vm2852_vm2, %v2355_v45  ;;  %v2200_v5 = vld [vmem:[%s3483_s1 + $0x158] sm:$0xff]  ;;  %v2373_v8 = vpack.c.bf16 %v2195_v63, %v2191_v62  ;;  %v2365_v9 = vpack.c.bf16 %v2202_v3, %v2198_v2  ;;  %v2197_v10 = vld [vmem:[%s3483_s1 + $0x140] sm:$0xff]  ;;  %v2199_v12 = vld [vmem:[%s3483_s1 + $0x150] sm:$0xff] }
  0x67   : > { %2174 = vmatmul.mubr.msk.f32.gmra.mrb[2].mxu1 %vm309_vm3, %v2975_v49  ;;  %411 = vmatprep.mubr.f32.mxu0 %v2693_v0  ;;  %v2204_v6 = vld [vmem:[%s3483_s1 + $0x178] sm:$0xf]  ;;  %v2201_v11 = vld [vmem:[%s3483_s1 + $0x160] sm:$0xf]  ;;  %v2203_v14 = vld [vmem:[%s3483_s1 + $0x170] sm:$0xf] }
  0x68   : > { %500 = vmatprep.mubr.f32.mxu1 %v2693_v0  ;;  %2350 = vmatpush1.bf16.msk.msra.mxu0 %vm2852_vm2, %v2348_v51  ;;  %v2375_v13 = vpack.c.bf16 %v2204_v6, %v2200_v5  ;;  %v2234_v15 = vld [vmem:[%s3483_s1 + $0x208] sm:$0xff]  ;;  %v2236_v18 = vld [vmem:[%s3483_s1 + $0x218] sm:$0xff]  ;;  %v2368_v20 = vpack.c.bf16 %v2201_v11, %v2197_v10  ;;  %v2378_v21 = vpack.c.bf16 %v2203_v14, %v2199_v12  ;;  %v3092_v24 = vld [vmem:[%s2908_s6 + $0x10] sm:$0xff] }
  0x69   : > { %2360 = vmatpush1.bf16.msk.msra.mxu1 %vm2852_vm2, %v2358_v55  ;;  %2362 = vmatprep.subr.bf16.mxu0 %v2361_v56  ;;  %v2238_v16 = vld [vmem:[%s3483_s1 + $0x228] sm:$0xff]  ;;  %v2240_v19 = vld [vmem:[%s3483_s1 + $0x238] sm:$0xff]  ;;  %v2233_v26 = vld [vmem:[%s3483_s1 + $0x200] sm:$0xff] }
  0x6a   : > { %2169 = vmatmul.mubr.msk.f32.gmra.mrb[4].mxu0 %vm309_vm3, %v3000_v58  ;;  %2372 = vmatprep.subr.bf16.mxu1 %v2371_v57  ;;  %v3073_v17 = vld [vmem:[%s2908_s6 + $0x8] sm:$0xff]  ;;  %v2381_v22 = vpack.c.bf16 %v2238_v16, %v2234_v15  ;;  %v2391_v23 = vpack.c.bf16 %v2240_v19, %v2236_v18  ;;  %v3105_v25 = vld [vmem:[%s2908_s6 + $0x18] sm:$0x3]  ;;  %v2237_v27 = vld [vmem:[%s3483_s1 + $0x220] sm:$0xff] }
  0x6b   : > { %2175 = vmatmul.mubr.msk.f32.gmra.mrb[4].mxu1 %vm309_vm3, %v3000_v58  ;;  %417 = vmatprep.mubr.f32.mxu0 %v2693_v0  ;;  %v2235_v28 = vld [vmem:[%s3483_s1 + $0x210] sm:$0xff]  ;;  %v2242_v30 = vld [vmem:[%s3483_s1 + $0x248] sm:$0xff]  ;;  %v2244_v34 = vld [vmem:[%s3483_s1 + $0x258] sm:$0xff]  ;;  %v2383_v36 = vpack.c.bf16 %v2237_v27, %v2233_v26 }
  0x6c   : > { %506 = vmatprep.mubr.f32.mxu1 %v2693_v0  ;;  %v2239_v29 = vld [vmem:[%s3483_s1 + $0x230] sm:$0xff]  ;;  %v2246_v31 = vld [vmem:[%s3483_s1 + $0x268] sm:$0xf]  ;;  %v2248_v35 = vld [vmem:[%s3483_s1 + $0x278] sm:$0xf] }
  0x6d   : > { %v3132_v32 = vld [vmem:[%s2908_s6 + $0x2] sm:$0xff]  ;;  %v2393_v37 = vpack.c.bf16 %v2239_v29, %v2235_v28  ;;  %v2385_v38 = vpack.c.bf16 %v2246_v31, %v2242_v30  ;;  %v2243_v41 = vld [vmem:[%s3483_s1 + $0x250] sm:$0xff]  ;;  %v2395_v42 = vpack.c.bf16 %v2248_v35, %v2244_v34  ;;  %v2220_v47 = vld [vmem:[%s3483_s1 + $0x198] sm:$0xff] }
  0x6e   : > { %2170 = vmatmul.mubr.msk.f32.gmra.mrb[6].mxu0 %vm309_vm3, %v3013_v59  ;;  %v2241_v39 = vld [vmem:[%s3483_s1 + $0x240] sm:$0xff]  ;;  %v2247_v43 = vld [vmem:[%s3483_s1 + $0x270] sm:$0xf]  ;;  %v2218_v44 = vld [vmem:[%s3483_s1 + $0x188] sm:$0xff] }
  0x6f   : > { %2176 = vmatmul.mubr.msk.f32.gmra.mrb[6].mxu1 %vm309_vm3, %v3013_v59  ;;  %601 = vmatprep.mubr.f32.mxu0 %v2693_v0  ;;  %v2245_v40 = vld [vmem:[%s3483_s1 + $0x260] sm:$0xf]  ;;  %v2222_v45 = vld [vmem:[%s3483_s1 + $0x1a8] sm:$0xff]  ;;  %v2224_v48 = vld [vmem:[%s3483_s1 + $0x1b8] sm:$0xff]  ;;  %v2398_v51 = vpack.c.bf16 %v2247_v43, %v2243_v41 }
  0x70   : > { %690 = vmatprep.mubr.f32.mxu1 %v2693_v0  ;;  %v3165_v46 = vld [vmem:[%s2908_s6 + $0xa] sm:$0xff]  ;;  %v2388_v50 = vpack.c.bf16 %v2245_v40, %v2241_v39  ;;  %v2401_v52 = vpack.c.bf16 %v2222_v45, %v2218_v44  ;;  %v2411_v53 = vpack.c.bf16 %v2224_v48, %v2220_v47  ;;  %v3184_v54 = vld [vmem:[%s2908_s6 + $0x12] sm:$0xff]  ;;  %v3197_v55 = vld [vmem:[%s2908_s6 + $0x1a] sm:$0x3] }
  0x71   : > { %v2217_v56 = vld [vmem:[%s3483_s1 + $0x180] sm:$0xff]  ;;  %v2219_v60 = vld [vmem:[%s3483_s1 + $0x190] sm:$0xff]  ;;  %v2226_v62 = vld [vmem:[%s3483_s1 + $0x1c8] sm:$0xff] }
  0x72   : > { %2179 = vmatmul.mubr.msk.f32.vlgmr.msra.gmra.mrb[0].mxu0 %vm309_vm3, %v3040_v4  ;;  %v2221_v57 = vld [vmem:[%s3483_s1 + $0x1a0] sm:$0xff]  ;;  %v2223_v61 = vld [vmem:[%s3483_s1 + $0x1b0] sm:$0xff]  ;;  %v2230_v63 = vld [vmem:[%s3483_s1 + $0x1e8] sm:$0xf] }
  0x73   : > { %2185 = vmatmul.mubr.msk.f32.vlgmr.msra.gmra.mrb[0].mxu1 %vm309_vm3, %v3040_v4  ;;  %607 = vmatprep.mubr.f32.mxu0 %v2693_v0  ;;  %v2228_v2 = vld [vmem:[%s3483_s1 + $0x1d8] sm:$0xff]  ;;  %v2403_v5 = vpack.c.bf16 %v2221_v57, %v2217_v56  ;;  %v2413_v6 = vpack.c.bf16 %v2223_v61, %v2219_v60  ;;  %v2227_v10 = vld [vmem:[%s3483_s1 + $0x1d0] sm:$0xff]  ;;  %v2278_v14 = vld [vmem:[%s3483_s1 + $0x2a8] sm:$0xff] }
  0x74   : > { %696 = vmatprep.mubr.f32.mxu1 %v2693_v0  ;;  %2364 = vmatpush1.bf16.msra.mxu0 %v2363_v7  ;;  %v2232_v3 = vld [vmem:[%s3483_s1 + $0x1f8] sm:$0xf]  ;;  %v2405_v7 = vpack.c.bf16 %v2230_v63, %v2226_v62  ;;  %v2231_v12 = vld [vmem:[%s3483_s1 + $0x1f0] sm:$0xf]  ;;  %v2286_v26 = vld [vmem:[%s3483_s1 + $0x2e8] sm:$0xf] }
  0x75   : > { %2374 = vmatpush1.bf16.msra.mxu1 %v2373_v8  ;;  %2367 = vmatprep.subr.msk.bf16.mxu0 %vm2852_vm2, %v2365_v9  ;;  %v2225_v8 = vld [vmem:[%s3483_s1 + $0x1c0] sm:$0xff]  ;;  %v2415_v11 = vpack.c.bf16 %v2232_v3, %v2228_v2  ;;  %v2276_v15 = vld [vmem:[%s3483_s1 + $0x298] sm:$0xff]  ;;  %v2418_v19 = vpack.c.bf16 %v2231_v12, %v2227_v10  ;;  %vm3441_vm5 = vmpackc.low %vm1701_vm4, %vm2694_vm1 }
  0x76   : > { %2180 = vmatmul.mubr.msk.f32.gmra.mrb[2].mxu0 %vm309_vm3, %v3073_v17  ;;  %2377 = vmatprep.subr.msk.bf16.mxu1 %vm2852_vm2, %v2375_v13  ;;  %v2229_v9 = vld [vmem:[%s3483_s1 + $0x1e0] sm:$0xf]  ;;  %v2274_v13 = vld [vmem:[%s3483_s1 + $0x288] sm:$0xff]  ;;  %v2280_v16 = vld [vmem:[%s3483_s1 + $0x2b8] sm:$0xff] }
  0x77   : > { %2186 = vmatmul.mubr.msk.f32.gmra.mrb[2].mxu1 %vm309_vm3, %v3073_v17  ;;  %613 = vmatprep.mubr.f32.mxu0 %v2693_v0  ;;  %v2408_v18 = vpack.c.bf16 %v2229_v9, %v2225_v8  ;;  %v2284_v27 = vld [vmem:[%s3483_s1 + $0x2d8] sm:$0xff]  ;;  %v2281_v34 = vld [vmem:[%s3483_s1 + $0x2c0] sm:$0xff] }
  0x78   : > { %702 = vmatprep.mubr.f32.mxu1 %v2693_v0  ;;  %2370 = vmatpush1.bf16.msk.msra.mxu0 %vm2852_vm2, %v2368_v20  ;;  %v2431_v20 = vpack.c.bf16 %v2280_v16, %v2276_v15  ;;  %v2288_v28 = vld [vmem:[%s3483_s1 + $0x2f8] sm:$0xf] }
  0x79   : > { %2380 = vmatpush1.bf16.msk.msra.mxu1 %vm2852_vm2, %v2378_v21  ;;  %2382 = vmatprep.subr.bf16.mxu0 %v2381_v22  ;;  %v2277_v21 = vld [vmem:[%s3483_s1 + $0x2a0] sm:$0xff]  ;;  %v2275_v22 = vld [vmem:[%s3483_s1 + $0x290] sm:$0xff]  ;;  %v2435_v35 = vpack.c.bf16 %v2288_v28, %v2284_v27 }
  0x7a   : > { %2181 = vmatmul.mubr.msk.f32.gmra.mrb[4].mxu0 %vm309_vm3, %v3092_v24  ;;  %2392 = vmatprep.subr.bf16.mxu1 %v2391_v23  ;;  %v2282_v23 = vld [vmem:[%s3483_s1 + $0x2c8] sm:$0xff] }
  0x7b   : > { %2187 = vmatmul.mubr.msk.f32.gmra.mrb[4].mxu1 %vm309_vm3, %v3092_v24  ;;  %619 = vmatprep.mubr.f32.mxu0 %v2693_v0  ;;  %v2425_v31 = vpack.c.bf16 %v2286_v26, %v2282_v23 }
  0x7c   : > { %708 = vmatprep.mubr.f32.mxu1 %v2693_v0 }
  0x7e   : > { %2182 = vmatmul.mubr.msk.f32.gmra.mrb[6].mxu0 %vm309_vm3, %v3105_v25 }
  0x7f   : > { %2188 = vmatmul.mubr.msk.f32.gmra.mrb[6].mxu1 %vm309_vm3, %v3105_v25  ;;  %824 = vmatprep.mubr.f32.mxu0 %v2693_v0 }
  0x80   : > { %913 = vmatprep.mubr.f32.mxu1 %v2693_v0 }
  0x82   : > { %2207 = vmatmul.mubr.msk.f32.vlgmr.msra.gmra.mrb[0].mxu0 %vm309_vm3, %v3132_v32 }
  0x83   : > { %2213 = vmatmul.mubr.msk.f32.vlgmr.msra.gmra.mrb[0].mxu1 %vm309_vm3, %v3132_v32  ;;  %830 = vmatprep.mubr.f32.mxu0 %v2693_v0 }
  0x84   : > { %919 = vmatprep.mubr.f32.mxu1 %v2693_v0  ;;  %2384 = vmatpush1.bf16.msra.mxu0 %v2383_v36  ;;  %v2283_v36 = vld [vmem:[%s3483_s1 + $0x2d0] sm:$0xff] }
  0x85   : > { %2394 = vmatpush1.bf16.msra.mxu1 %v2393_v37  ;;  %2387 = vmatprep.subr.msk.bf16.mxu0 %vm2852_vm2, %v2385_v38  ;;  %v2287_v37 = vld [vmem:[%s3483_s1 + $0x2f0] sm:$0xf] }
  0x86   : > { %2208 = vmatmul.mubr.msk.f32.gmra.mrb[2].mxu0 %vm309_vm3, %v3165_v46  ;;  %2397 = vmatprep.subr.msk.bf16.mxu1 %vm2852_vm2, %v2395_v42  ;;  %v2438_v39 = vpack.c.bf16 %v2287_v37, %v2283_v36 }
  0x87   : > { %2214 = vmatmul.mubr.msk.f32.gmra.mrb[2].mxu1 %vm309_vm3, %v3165_v46  ;;  %836 = vmatprep.mubr.f32.mxu0 %v2693_v0 }
  0x88   : > { %925 = vmatprep.mubr.f32.mxu1 %v2693_v0  ;;  %2390 = vmatpush1.bf16.msk.msra.mxu0 %vm2852_vm2, %v2388_v50 }
  0x89   : > { %2400 = vmatpush1.bf16.msk.msra.mxu1 %vm2852_vm2, %v2398_v51  ;;  %2402 = vmatprep.subr.bf16.mxu0 %v2401_v52  ;;  %v955_v51 = vlaneseq }
  0x8a   : > { %2209 = vmatmul.mubr.msk.f32.gmra.mrb[4].mxu0 %vm309_vm3, %v3184_v54  ;;  %2412 = vmatprep.subr.bf16.mxu1 %v2411_v53 }
  0x8b   : > { %2215 = vmatmul.mubr.msk.f32.gmra.mrb[4].mxu1 %vm309_vm3, %v3184_v54  ;;  %842 = vmatprep.mubr.f32.mxu0 %v2693_v0  ;;  %v956_v52 = vshrl.u32 %v955_v51, 7 }
  0x8c   : > { %931 = vmatprep.mubr.f32.mxu1 %v2693_v0 }
  0x8d   : > { %v957_v53 = vsub.s32 0, %v956_v52  ;;  %v961_v56 = vsub.s32 1, %v956_v52  ;;  %v969_v57 = vsub.s32 3, %v956_v52 }
  0x8e   : > { %2210 = vmatmul.mubr.msk.f32.gmra.mrb[6].mxu0 %vm309_vm3, %v3197_v55 }
  0x8f   : > { %2216 = vmatmul.mubr.msk.f32.gmra.mrb[6].mxu1 %vm309_vm3, %v3197_v55  ;;  %1117 = vmatprep.mubr.f32.mxu0 %v2693_v0 }
  0x90   : > { %1206 = vmatprep.mubr.f32.mxu1 %v2693_v0 }
  0x92   : > { %2251 = vmatmul.mubr.msk.f32.vlgmr.msra.gmra.mrb[8].mxu0 %vm309_vm3, %v2935_v33 }
  0x93   : > { %2257 = vmatmul.mubr.msk.f32.vlgmr.msra.gmra.mrb[8].mxu1 %vm309_vm3, %v2935_v33  ;;  %1123 = vmatprep.mubr.f32.mxu0 %v2693_v0  ;;  %v2421_v33 = vpack.c.bf16 %v2278_v14, %v2274_v13 }
  0x94   : > { %1212 = vmatprep.mubr.f32.mxu1 %v2693_v0  ;;  %2404 = vmatpush1.bf16.msra.mxu0 %v2403_v5 }
  0x95   : > { %2414 = vmatpush1.bf16.msra.mxu1 %v2413_v6  ;;  %2407 = vmatprep.subr.msk.bf16.mxu0 %vm2852_vm2, %v2405_v7 }
  0x96   : > { %2252 = vmatmul.mubr.msk.f32.gmra.mrb[10].mxu0 %vm309_vm3, %v2975_v49  ;;  %2417 = vmatprep.subr.msk.bf16.mxu1 %vm2852_vm2, %v2415_v11 }
  0x97   : > { %2258 = vmatmul.mubr.msk.f32.gmra.mrb[10].mxu1 %vm309_vm3, %v2975_v49  ;;  %1129 = vmatprep.mubr.f32.mxu0 %v2693_v0  ;;  %v2273_v49 = vld [vmem:[%s3483_s1 + $0x280] sm:$0xff] }
  0x98   : > { %1218 = vmatprep.mubr.f32.mxu1 %v2693_v0  ;;  %2410 = vmatpush1.bf16.msk.msra.mxu0 %vm2852_vm2, %v2408_v18  ;;  %v2423_v29 = vpack.c.bf16 %v2277_v21, %v2273_v49 }
  0x99   : > { %2420 = vmatpush1.bf16.msk.msra.mxu1 %vm2852_vm2, %v2418_v19  ;;  %2422 = vmatprep.subr.bf16.mxu0 %v2421_v33 }
  0x9a   : > { %2253 = vmatmul.mubr.msk.f32.gmra.mrb[12].mxu0 %vm309_vm3, %v3000_v58  ;;  %2432 = vmatprep.subr.bf16.mxu1 %v2431_v20 }
  0x9b   : > { %2259 = vmatmul.mubr.msk.f32.gmra.mrb[12].mxu1 %vm309_vm3, %v3000_v58  ;;  %1135 = vmatprep.mubr.f32.mxu0 %v2693_v0  ;;  %v2279_v58 = vld [vmem:[%s3483_s1 + $0x2b0] sm:$0xff] }
  0x9c   : > { %1224 = vmatprep.mubr.f32.mxu1 %v2693_v0  ;;  %v2433_v30 = vpack.c.bf16 %v2279_v58, %v2275_v22 }
  0x9e   : > { %2254 = vmatmul.mubr.msk.f32.gmra.mrb[14].mxu0 %vm309_vm3, %v3013_v59 }
  0x9f   : > { %2260 = vmatmul.mubr.msk.f32.gmra.mrb[14].mxu1 %vm309_vm3, %v3013_v59  ;;  %1307 = vmatprep.mubr.f32.mxu0 %v2693_v0  ;;  %v2285_v59 = vld [vmem:[%s3483_s1 + $0x2e0] sm:$0xf] }
  0xa0   : > { %1396 = vmatprep.mubr.f32.mxu1 %v2693_v0  ;;  %v2428_v38 = vpack.c.bf16 %v2285_v59, %v2281_v34 }
  0xa2   : > { %2263 = vmatmul.mubr.msk.f32.vlgmr.msra.gmra.mrb[8].mxu0 %vm309_vm3, %v3040_v4 }
  0xa3   : > { %2269 = vmatmul.mubr.msk.f32.vlgmr.msra.gmra.mrb[8].mxu1 %vm309_vm3, %v3040_v4  ;;  %1313 = vmatprep.mubr.f32.mxu0 %v2693_v0 }
  0xa4   : > { %1402 = vmatprep.mubr.f32.mxu1 %v2693_v0  ;;  %2424 = vmatpush1.bf16.msra.mxu0 %v2423_v29 }
  0xa5   : > { %2434 = vmatpush1.bf16.msra.mxu1 %v2433_v30  ;;  %2427 = vmatprep.subr.msk.bf16.mxu0 %vm2852_vm2, %v2425_v31 }
  0xa6   : > { %2264 = vmatmul.mubr.msk.f32.gmra.mrb[10].mxu0 %vm309_vm3, %v3073_v17  ;;  %2437 = vmatprep.subr.msk.bf16.mxu1 %vm2852_vm2, %v2435_v35 }
  0xa7   : > { %2270 = vmatmul.mubr.msk.f32.gmra.mrb[10].mxu1 %vm309_vm3, %v3073_v17  ;;  %1319 = vmatprep.mubr.f32.mxu0 %v2693_v0 }
  0xa8   : > { %1408 = vmatprep.mubr.f32.mxu1 %v2693_v0  ;;  %2430 = vmatpush1.bf16.msk.msra.mxu0 %vm2852_vm2, %v2428_v38 }
  0xa9   : > { %2440 = vmatpush1.bf16.msk.msra.mxu1 %vm2852_vm2, %v2438_v39 }
  0xaa   : > { %2265 = vmatmul.mubr.msk.f32.gmra.mrb[12].mxu0 %vm309_vm3, %v3092_v24 }
  0xab   : > { %2271 = vmatmul.mubr.msk.f32.gmra.mrb[12].mxu1 %vm309_vm3, %v3092_v24  ;;  %1325 = vmatprep.mubr.f32.mxu0 %v2693_v0 }
  0xac   : > { %1414 = vmatprep.mubr.f32.mxu1 %v2693_v0 }
  0xae   : > { %2266 = vmatmul.mubr.msk.f32.gmra.mrb[14].mxu0 %vm309_vm3, %v3105_v25 }
  0xaf   : > { %2272 = vmatmul.mubr.msk.f32.gmra.mrb[14].mxu1 %vm309_vm3, %v3105_v25  ;;  %1514 = vmatprep.mubr.f32.mxu0 %v2693_v0 }
  0xb0   : > { %1603 = vmatprep.mubr.f32.mxu1 %v2693_v0 }
  0xb2   : > { %2291 = vmatmul.mubr.msk.f32.vlgmr.msra.gmra.mrb[8].mxu0 %vm309_vm3, %v3132_v32 }
  0xb3   : > { %2297 = vmatmul.mubr.msk.f32.vlgmr.msra.gmra.mrb[8].mxu1 %vm309_vm3, %v3132_v32  ;;  %1520 = vmatprep.mubr.f32.mxu0 %v2693_v0 }
  0xb4   : > { %1609 = vmatprep.mubr.f32.mxu1 %v2693_v0 }
  0xb6   : > { %2292 = vmatmul.mubr.msk.f32.gmra.mrb[10].mxu0 %vm309_vm3, %v3165_v46 }
  0xb7   : > { %2298 = vmatmul.mubr.msk.f32.gmra.mrb[10].mxu1 %vm309_vm3, %v3165_v46  ;;  %1526 = vmatprep.mubr.f32.mxu0 %v2693_v0 }
  0xb8   : > { %1615 = vmatprep.mubr.f32.mxu1 %v2693_v0 }
  0xba   : > { %2293 = vmatmul.mubr.msk.f32.gmra.mrb[12].mxu0 %vm309_vm3, %v3184_v54 }
  0xbb   : > { %2299 = vmatmul.mubr.msk.f32.gmra.mrb[12].mxu1 %vm309_vm3, %v3184_v54  ;;  %1532 = vmatprep.mubr.f32.mxu0 %v2693_v0  ;;  %v267_v54 = vld [vmem:[#allocation2] sm:$0xf] }
  0xbc   : > { %1621 = vmatprep.mubr.f32.mxu1 %v2693_v0  ;;  %v3384_v60 = vrot.slane %v267_v54, %v957_v53  ;;  %v3388_v62 = vrot.slane %v267_v54, %v961_v56  ;;  %v3390_v63 = vrot.slane %v267_v54, %v969_v57 }
  0xbe   : > { %2294 = vmatmul.mubr.msk.f32.gmra.mrb[14].mxu0 %vm309_vm3, %v3197_v55 }
  0xbf   : > { %2300 = vmatmul.mubr.msk.f32.gmra.mrb[14].mxu1 %vm309_vm3, %v3197_v55  ;;  %1778 = vmatprep.mubr.f32.mxu0 %v2693_v0  ;;  %v965_v55 = vsub.s32 2, %v956_v52 }
  0xc0   : > { %1855 = vmatprep.mubr.f32.mxu1 %v2693_v0 }
  0xc1   : > { %v3386_v61 = vrot.slane %v267_v54, %v965_v55 }
 0x155   : > { %v826_v1 = vpop.f32.mrb[0].mxu0 }
 0x156   : > { %v915_v4 = vpop.f32.mrb[0].mxu1  ;;  %v828_v17 = vpop.f32.mrb[1].mxu0  ;;  %v975_v2 = vadd.f32 %v3384_v60, %v826_v1 }
 0x157   : > { %v917_v24 = vpop.f32.mrb[1].mxu1  ;;  %v977_v3 = vadd.f32 %v3386_v61, %v915_v4  ;;  %v976_v5 = vadd.f32 %v3388_v62, %v828_v17 }
 0x158   : > { %v978_v6 = vadd.f32 %v3390_v63, %v917_v24  ;;  %v991_v10 = vmax.f32 %v975_v2, 0.0 }
 0x159   : > { %v832_v25 = vpop.f32.mrb[2].mxu0  ;;  %v993_v13 = vmax.f32 %v977_v3, 0.0  ;;  %v992_v14 = vmax.f32 %v976_v5, 0.0 }
 0x15a   : > { %v921_v32 = vpop.f32.mrb[2].mxu1  ;;  %v834_v40 = vpop.f32.mrb[3].mxu0  ;;  %v979_v7 = vadd.f32 %v3384_v60, %v832_v25  ;;  %v994_v19 = vmax.f32 %v978_v6, 0.0 }
 0x15b   : > { %v923_v41 = vpop.f32.mrb[3].mxu1  ;;  %v981_v8 = vadd.f32 %v3386_v61, %v921_v32  ;;  %v980_v9 = vadd.f32 %v3388_v62, %v834_v40 }
 0x15c   : > { %v982_v11 = vadd.f32 %v3390_v63, %v923_v41  ;;  %v995_v33 = vmax.f32 %v979_v7, 0.0 }
 0x15d   : > { %v838_v42 = vpop.f32.mrb[4].mxu0  ;;  %v997_v58 = vmax.f32 %v981_v8, 0.0  ;;  %v996_v23 = vmax.f32 %v980_v9, 0.0 }
 0x15e   : > { %v927_v43 = vpop.f32.mrb[4].mxu1  ;;  %v840_v44 = vpop.f32.mrb[5].mxu0  ;;  %v3401_v12 = vadd.f32 %v3384_v60, %v838_v42  ;;  %v998_v29 = vmax.f32 %v982_v11, 0.0 }
 0x15f   : > { %v929_v45 = vpop.f32.mrb[5].mxu1  ;;  %v3404_v15 = vadd.f32 %v3386_v61, %v927_v43  ;;  %v3407_v16 = vadd.f32 %v3388_v62, %v840_v44 }
 0x160   : > { %v3410_v20 = vadd.f32 %v3390_v63, %v929_v45  ;;  %v999_v30 = vmax.f32 %v3401_v12, 0.0 }
 0x161   : > { %v844_v46 = vpop.f32.mrb[6].mxu0  ;;  %v1001_v59 = vmax.f32 %v3404_v15, 0.0  ;;  %v1000_v35 = vmax.f32 %v3407_v16, 0.0 }
 0x162   : > { %v3378_v47 = vpop.f32.mrb[6].mxu1  ;;  %v3380_v48 = vpop.f32.mrb[7].mxu0  ;;  %v1002_v39 = vmax.f32 %v3410_v20, 0.0  ;;  %v987_v44 = vadd.f32 %v3384_v60, %v844_v46 }
 0x163   : > { %v3382_v50 = vpop.f32.mrb[7].mxu1  ;;  %v989_v53 = vadd.f32 %v3386_v61, %v3378_v47  ;;  %v988_v54 = vadd.f32 %v3388_v62, %v3380_v48 }
 0x164   : > { %v990_v2 = vadd.f32 %v3390_v63, %v3382_v50 }
 0x185   : > { %v1516_v18 = vpop.f32.mrb[8].mxu0 }
 0x186   : > { %v1644_v49 = vadd.f32 %v1516_v18, %v3384_v60  ;;  %v1605_v21 = vpop.f32.mrb[8].mxu1  ;;  %v1518_v22 = vpop.f32.mrb[9].mxu0 }
 0x187   : > { %v1646_v26 = vadd.f32 %v1605_v21, %v3386_v61  ;;  %v1645_v27 = vadd.f32 %v1518_v22, %v3388_v62  ;;  %v1607_v28 = vpop.f32.mrb[9].mxu1 }
 0x188   : > { %v1660_v31 = vmax.f32 %v1644_v49, 0.0  ;;  %v1647_v34 = vadd.f32 %v1607_v28, %v3390_v63 }
 0x189   : > { %v1662_v36 = vmax.f32 %v1646_v26, 0.0  ;;  %v1661_v37 = vmax.f32 %v1645_v27, 0.0  ;;  %v1522_v38 = vpop.f32.mrb[10].mxu0 }
 0x18a   : > { %v1676_v1 = vmax.f32 %v991_v10, %v1660_v31  ;;  %v1663_v4 = vmax.f32 %v1647_v34, 0.0  ;;  %v1648_v17 = vadd.f32 %v1522_v38, %v3384_v60  ;;  %v1611_v24 = vpop.f32.mrb[10].mxu1  ;;  %v1524_v25 = vpop.f32.mrb[11].mxu0  ;;  %v1003_v31 = vmax.f32 %v987_v44, 0.0 }
 0x18b   : > { %v1678_v32 = vmax.f32 %v993_v13, %v1662_v36  ;;  %v1677_v40 = vmax.f32 %v992_v14, %v1661_v37  ;;  %v1650_v41 = vadd.f32 %v1611_v24, %v3386_v61  ;;  %v1649_v42 = vadd.f32 %v1524_v25, %v3388_v62  ;;  %v1613_v43 = vpop.f32.mrb[11].mxu1 }
 0x18c   : > { %v1679_v45 = vmax.f32 %v994_v19, %v1663_v4  ;;  %v1664_v51 = vmax.f32 %v1648_v17, 0.0  ;;  %v1651_v52 = vadd.f32 %v1613_v43, %v3390_v63  ;;  %v1869_v43 = vld [vmem:[#allocation6 + $0x8] sm:$0x1f] }
 0x18d   : > { %v1666_v55 = vmax.f32 %v1650_v41, 0.0  ;;  %v1665_v56 = vmax.f32 %v1649_v42, 0.0  ;;  %v1528_v57 = vpop.f32.mrb[12].mxu0  ;;  %v1693_v41 = vld [vmem:[#allocation4 + $0x8] sm:$0x1f]  ;;  %v1868_v42 = vld [vmem:[#allocation6] sm:$0xff] }
 0x18e   : > { %v1680_v3 = vmax.f32 %v995_v33, %v1664_v51  ;;  %v1667_v5 = vmax.f32 %v1651_v52, 0.0  ;;  %v1652_v46 = vadd.f32 %v1528_v57, %v3384_v60  ;;  %v1617_v6 = vpop.f32.mrb[12].mxu1  ;;  %v1530_v7 = vpop.f32.mrb[13].mxu0 }
 0x18f   : > { %v1682_v8 = vmax.f32 %v997_v58, %v1666_v55  ;;  %v1681_v9 = vmax.f32 %v996_v23, %v1665_v56  ;;  %v1654_v47 = vadd.f32 %v1617_v6, %v3386_v61  ;;  %v1653_v10 = vadd.f32 %v1530_v7, %v3388_v62  ;;  %v1619_v48 = vpop.f32.mrb[13].mxu1 }
 0x190   : > { %v2443_v11 = vpack.c.bf16 %v1680_v3, %v1676_v1  ;;  %v1683_v12 = vmax.f32 %v998_v29, %v1667_v5  ;;  %v1668_v13 = vmax.f32 %v1652_v46, 0.0  ;;  %v1655_v14 = vadd.f32 %v1619_v48, %v3390_v63 }
 0x191   : > { %v2453_v15 = vpack.c.bf16 %v1682_v8, %v1678_v32  ;;  %v1670_v50 = vmax.f32 %v1654_v47, 0.0  ;;  %v1669_v16 = vmax.f32 %v1653_v10, 0.0  ;;  %v1534_v18 = vpop.f32.mrb[14].mxu0  ;;  %v2441_v19 = vpack.c.bf16 %v1681_v9, %v1677_v40  ;;  %v1692_v40 = vld [vmem:[#allocation4] sm:$0xff] }
 0x192   : > { %v1684_v33 = vmax.f32 %v999_v30, %v1668_v13  ;;  %v1671_v20 = vmax.f32 %v1655_v14, 0.0  ;;  %v1656_v49 = vadd.f32 %v1534_v18, %v3384_v60  ;;  %v1623_v21 = vpop.f32.mrb[14].mxu1  ;;  %v1536_v22 = vpop.f32.mrb[15].mxu0  ;;  %v2451_v58 = vpack.c.bf16 %v1683_v12, %v1679_v45 }
 0x193   : > { %v1686_v23 = vmax.f32 %v1001_v59, %v1670_v50  ;;  %v1685_v26 = vmax.f32 %v1000_v35, %v1669_v16  ;;  %v1658_v27 = vadd.f32 %v1623_v21, %v3386_v61  ;;  %v1657_v28 = vadd.f32 %v1536_v22, %v3388_v62  ;;  %v1625_v29 = vpop.f32.mrb[15].mxu1  ;;  %2442 = vmatprep.subr.bf16.mxu0 %v2441_v19 }
 0x194   : > { %v1687_v34 = vmax.f32 %v1002_v39, %v1671_v20  ;;  %v1672_v36 = vmax.f32 %v1656_v49, 0.0  ;;  %v1659_v37 = vadd.f32 %v1625_v29, %v3390_v63  ;;  %2452 = vmatprep.subr.bf16.mxu1 %v2451_v58  ;;  %2444 = vmatpush1.bf16.msra.mxu0 %v2443_v11  ;;  %v1005_v30 = vmax.f32 %v989_v53, 0.0 }
 0x195   : > { %v1004_v60 = vmax.f32 %v988_v54, 0.0  ;;  %v1674_v38 = vmax.f32 %v1658_v27, 0.0  ;;  %v1673_v1 = vmax.f32 %v1657_v28, 0.0  ;;  %2454 = vmatpush1.bf16.msra.mxu1 %v2453_v15  ;;  %v1006_v59 = vmax.f32 %v990_v2, 0.0 }
 0x196   : > { %v1688_v35 = vmax.f32 %v1003_v31, %v1672_v36  ;;  %v1675_v4 = vmax.f32 %v1659_v37, 0.0 }
 0x197   : > { %v1690_v61 = vmax.f32 %v1005_v30, %v1674_v38  ;;  %v1689_v17 = vmax.f32 %v1004_v60, %v1673_v1 }
 0x198   : > { %v2448_v62 = vpack.c.bf16 %v1688_v35, %v1684_v33  ;;  %v1691_v24 = vmax.f32 %v1006_v59, %v1675_v4 }
 0x199   : > { %v2458_v63 = vpack.c.bf16 %v1690_v61, %v1686_v23  ;;  %v2445_v25 = vpack.c.bf16 %v1689_v17, %v1685_v26 }
 0x19a   : > { %v2455_v32 = vpack.c.bf16 %v1691_v24, %v1687_v34 }
 0x19b   : > { %2447 = vmatprep.subr.msk.bf16.mxu0 %vm3441_vm5, %v2445_v25 }
 0x19c   : > { %2457 = vmatprep.subr.msk.bf16.mxu1 %vm3441_vm5, %v2455_v32  ;;  %2450 = vmatpush1.bf16.msk.msra.mxu0 %vm3441_vm5, %v2448_v62 }
 0x19d   : > { %2460 = vmatpush1.bf16.msk.msra.mxu1 %vm3441_vm5, %v2458_v63  ;;  %2462 = vmatprep.subr.bf16.mxu0 %v2441_v19 }
 0x19e   : > { %2472 = vmatprep.subr.bf16.mxu1 %v2451_v58 }
 0x19f   : > { %2303 = vmatmul.mubr.msk.f32.vlgmr.msra.gmra.mrb[16].mxu0 %vm1694_vm6, %v1692_v40 }
 0x1a0   : > { %2307 = vmatmul.mubr.msk.f32.vlgmr.msra.gmra.mrb[16].mxu1 %vm1694_vm6, %v1692_v40  ;;  %2464 = vmatpush1.bf16.msra.mxu0 %v2443_v11 }
 0x1a1   : > { %2474 = vmatpush1.bf16.msra.mxu1 %v2453_v15  ;;  %2467 = vmatprep.subr.msk.bf16.mxu0 %vm3441_vm5, %v2445_v25 }
 0x1a2   : > { %2477 = vmatprep.subr.msk.bf16.mxu1 %vm3441_vm5, %v2455_v32  ;;  %1784 = vmatprep.mubr.f32.mxu0 %v2693_v0 }
 0x1a3   : > { %1861 = vmatprep.mubr.f32.mxu1 %v2693_v0  ;;  %2304 = vmatmul.mubr.msk.f32.gmra.mrb[18].mxu0 %vm1694_vm6, %v1693_v41 }
 0x1a4   : > { %2308 = vmatmul.mubr.msk.f32.gmra.mrb[18].mxu1 %vm1694_vm6, %v1693_v41  ;;  %2470 = vmatpush1.bf16.msk.msra.mxu0 %vm3441_vm5, %v2448_v62 }
 0x1a5   : > { %2480 = vmatpush1.bf16.msk.msra.mxu1 %vm3441_vm5, %v2458_v63  ;;  %1940 = vmatprep.mubr.f32.mxu0 %v2693_v0 }
 0x1a6   : > { %2017 = vmatprep.mubr.f32.mxu1 %v2693_v0 }
 0x1a7   : > { %2311 = vmatmul.mubr.msk.f32.vlgmr.msra.gmra.mrb[20].mxu0 %vm1694_vm6, %v1868_v42 }
 0x1a8   : > { %2315 = vmatmul.mubr.msk.f32.vlgmr.msra.gmra.mrb[20].mxu1 %vm1694_vm6, %v1868_v42  ;;  %1946 = vmatprep.mubr.f32.mxu0 %v2693_v0 }
 0x1a9   : > { %2023 = vmatprep.mubr.f32.mxu1 %v2693_v0 }
 0x1ab   : > { %2312 = vmatmul.mubr.msk.f32.gmra.mrb[22].mxu0 %vm1694_vm6, %v1869_v43 }
 0x1ac   : > { %2316 = vmatmul.mubr.msk.f32.gmra.mrb[22].mxu1 %vm1694_vm6, %v1869_v43 }
 0x272   : > { %v1780_v44 = vpop.f32.mrb[16].mxu0 }
 0x273   : > { %v1857_v45 = vpop.f32.mrb[16].mxu1  ;;  %v1782_v51 = vpop.f32.mrb[17].mxu0 }
 0x274   : > { %v1859_v52 = vpop.f32.mrb[17].mxu1 }
 0x276   : > { %v1786_v53 = vpop.f32.mrb[18].mxu0 }
 0x277   : > { %v1863_v54 = vpop.f32.mrb[18].mxu1  ;;  %v1788_v55 = vpop.f32.mrb[19].mxu0 }
 0x278   : > { %v1865_v56 = vpop.f32.mrb[19].mxu1 }
 0x27a   : > { %v1942_v57 = vpop.f32.mrb[20].mxu0 }
 0x27b   : > { %v2030_v2 = vmax.f32 %v1780_v44, %v1942_v57  ;;  %v2019_v0 = vpop.f32.mrb[20].mxu1  ;;  %v1944_v3 = vpop.f32.mrb[21].mxu0 }
 0x27c   : > { %v2032_v5 = vmax.f32 %v1857_v45, %v2019_v0  ;;  %v2031_v46 = vmax.f32 %v1782_v51, %v1944_v3  ;;  %v2021_v6 = vpop.f32.mrb[21].mxu1 }
 0x27d   : > { %2038 = vst [vmem:[%s266_s15] sm:$0xff] %v2030_v2  ;;  %v2033_v7 = vmax.f32 %v1859_v52, %v2021_v6 }
 0x27e   : > { %2040 = vst [vmem:[%s266_s15 + $0x10] sm:$0xff] %v2032_v5  ;;  %2039 = vst [vmem:[%s266_s15 + $0x8] sm:$0xff] %v2031_v46  ;;  %v1948_v8 = vpop.f32.mrb[22].mxu0 }
 0x27f   : > { %2042 = vst.msk [vmem:[%s266_s15 + $0x18] sm:$0xff] %vm2041_vm7, %v2033_v7  ;;  %v2034_v9 = vmax.f32 %v1786_v53, %v1948_v8  ;;  %v2025_v47 = vpop.f32.mrb[22].mxu1  ;;  %v1950_v10 = vpop.f32.mrb[23].mxu0 }
 0x280   : > { %v2036_v48 = vmax.f32 %v1863_v54, %v2025_v47  ;;  %v2035_v11 = vmax.f32 %v1788_v55, %v1950_v10  ;;  %v2027_v12 = vpop.f32.mrb[23].mxu1 }
 0x281   : > { %2043 = vst [vmem:[%s266_s15 + $0x20] sm:$0x1f] %v2034_v9  ;;  %v2037_v13 = vmax.f32 %v1865_v56, %v2027_v12 }
 0x282   : > { %2045 = vst [vmem:[%s266_s15 + $0x30] sm:$0x1f] %v2036_v48  ;;  %2044 = vst [vmem:[%s266_s15 + $0x28] sm:$0x1f] %v2035_v11 }
 0x283   : > { %2047 = vst.msk [vmem:[%s266_s15 + $0x38] sm:$0x1f] %vm2046_vm8, %v2037_v13 }
 0x284 PF: > { %s17_s18 = sadd.s32 1, %s2686_s18  }
 0x285   : > { %p14_p2 = scmp.ge.s32.totalorder %s17_s18, 4  }
 0x287   :  { %16 = sbr.rel (!%p14_p2) target bundleno = 2 (0x2), region = 88 }
 0x28e   :  { %2069 = vsyncpa [#allocation3], 1 }
 0x28f   :  { %2071 = vsyncpa [#allocation3 + $0x1], 1 }
 0x290   :  { %2072 = vsyncpa [#allocation5], 1 }

// kernel: net_forward.5
= control target key start
LH: loop header
LB: loop body
LE: loop exit
PB: predicated region body
PF: predicated region fallthrough
CT: control target
= control target key end

     0   :  { %v3325_v7 = vmov 0.0   ;;  %vm927_vm0 = vcmask 523264   ;;  %s6143_s0 = inlined_call_operand.vmem [shape: f32[2,1600], index: 0, kind: input, shape index: {}]   ;;  %s6144_s1 = inlined_call_operand.vmem [shape: f32[1600,512], index: 1, kind: input, shape index: {}]   ;;  %s6145_s2 = inlined_call_operand.vmem [shape: f32[1,512], index: 2, kind: input, shape index: {}]   ;;  %s6146_s3 = inlined_call_operand.vmem [shape: f32[512,128], index: 3, kind: input, shape index: {}]   ;;  %s6147_s4 = inlined_call_operand.vmem [shape: f32[1,128], index: 4, kind: input, shape index: {}]   ;;  %s6148_s5 = inlined_call_operand.vmem [shape: f32[128,10], index: 5, kind: input, shape index: {}]   ;;  %s6149_s6 = inlined_call_operand.vmem [shape: f32[1,10], index: 6, kind: input, shape index: {}]   ;;  %s6150_s7 = inlined_call_operand.hbm [shape: f32[2,10], index: 7, kind: output, shape index: {}]  }
   0x1   :  { %v32_v0 = vld [vmem:[%s6144_s1 + $0x8] sm:$0xff]  ;;  %v31_v5 = vld [vmem:[%s6144_s1] sm:$0xff]  ;;  %1420 = vmatprep.mubr.f32.mxu1 %v3325_v7  ;;  %v34_v49 = vld [vmem:[%s6144_s1 + $0x18] sm:$0xff] }
   0x2   :  { %v36_v1 = vld [vmem:[%s6144_s1 + $0x28] sm:$0xff]  ;;  %v35_v6 = vld [vmem:[%s6144_s1 + $0x20] sm:$0xff]  ;;  %v38_v51 = vld [vmem:[%s6144_s1 + $0x38] sm:$0xff] }
   0x3   :  { %v800_v2 = vld [vmem:[%s6144_s1 + $0x1808] sm:$0xff]  ;;  %v2376_v3 = vpack.c.bf16 %v36_v1, %v32_v0  ;;  %v2378_v9 = vpack.c.bf16 %v35_v6, %v31_v5  ;;  %v799_v10 = vld [vmem:[%s6144_s1 + $0x1800] sm:$0xff]  ;;  %v33_v56 = vld [vmem:[%s6144_s1 + $0x10] sm:$0xff]  ;;  %v2776_v57 = vpack.c.bf16 %v38_v51, %v34_v49  ;;  %v3326_v51 = vmov 1983009808  }
   0x4   :  { %v804_v4 = vld [vmem:[%s6144_s1 + $0x1828] sm:$0xff]  ;;  %v803_v11 = vld [vmem:[%s6144_s1 + $0x1820] sm:$0xff]  ;;  %v37_v58 = vld [vmem:[%s6144_s1 + $0x30] sm:$0xff] }
   0x5   :  { %v2760_v8 = vpack.c.bf16 %v804_v4, %v800_v2  ;;  %v40_v12 = vld [vmem:[%s6144_s1 + $0x48] sm:$0xff]  ;;  %2377 = vmatprep.subr.bf16.mxu0 %v2376_v3  ;;  %v2762_v13 = vpack.c.bf16 %v803_v11, %v799_v10  ;;  %v39_v19 = vld [vmem:[%s6144_s1 + $0x40] sm:$0xff]  ;;  %v42_v61 = vld [vmem:[%s6144_s1 + $0x58] sm:$0xff]  ;;  %v2778_v1 = vpack.c.bf16 %v37_v58, %v33_v56 }
   0x6   :  { %v44_v14 = vld [vmem:[%s6144_s1 + $0x68] sm:$0xff]  ;;  %2379 = vmatpush1.bf16.msra.mxu0 %v2378_v9  ;;  %v43_v20 = vld [vmem:[%s6144_s1 + $0x60] sm:$0xff]  ;;  %v46_v62 = vld [vmem:[%s6144_s1 + $0x78] sm:$0xff] }
   0x7   :  { %v808_v15 = vld [vmem:[%s6144_s1 + $0x1848] sm:$0xff]  ;;  %2761 = vmatprep.subr.bf16.mxu1 %v2760_v8  ;;  %v2380_v17 = vpack.c.bf16 %v44_v14, %v40_v12  ;;  %v807_v21 = vld [vmem:[%s6144_s1 + $0x1840] sm:$0xff]  ;;  %v2382_v22 = vpack.c.bf16 %v43_v20, %v39_v19  ;;  %v2249_v63 = vld.sshfl [vmem:[%s6143_s0 + $0x18] sm:$0x3 pattern:$0x76325410]  ;;  %v2780_v6 = vpack.c.bf16 %v46_v62, %v42_v61 }
   0x8   :  { %v812_v16 = vld [vmem:[%s6144_s1 + $0x1868] sm:$0xff]  ;;  %2763 = vmatpush1.bf16.msra.mxu1 %v2762_v13  ;;  %v811_v23 = vld [vmem:[%s6144_s1 + $0x1860] sm:$0xff]  ;;  %v41_v5 = vld [vmem:[%s6144_s1 + $0x50] sm:$0xff] }
   0x9   :  { %v2764_v18 = vpack.c.bf16 %v812_v16, %v808_v15  ;;  %v48_v24 = vld [vmem:[%s6144_s1 + $0x88] sm:$0xff]  ;;  %2381 = vmatprep.subr.bf16.mxu0 %v2380_v17  ;;  %v2766_v26 = vpack.c.bf16 %v811_v23, %v807_v21  ;;  %v47_v30 = vld [vmem:[%s6144_s1 + $0x80] sm:$0xff]  ;;  %v45_v8 = vld [vmem:[%s6144_s1 + $0x70] sm:$0xff] }
   0xa   :  { %v52_v25 = vld [vmem:[%s6144_s1 + $0xa8] sm:$0xff]  ;;  %v51_v32 = vld [vmem:[%s6144_s1 + $0xa0] sm:$0xff]  ;;  %2383 = vmatpush1.bf16.msra.mxu0 %v2382_v22  ;;  %v50_v11 = vld [vmem:[%s6144_s1 + $0x98] sm:$0xff]  ;;  %v2782_v14 = vpack.c.bf16 %v45_v8, %v41_v5 }
   0xb   :  { %2765 = vmatprep.subr.bf16.mxu1 %v2764_v18  ;;  %v2384_v27 = vpack.c.bf16 %v52_v25, %v48_v24  ;;  %v816_v28 = vld [vmem:[%s6144_s1 + $0x1888] sm:$0xff]  ;;  %v815_v33 = vld [vmem:[%s6144_s1 + $0x1880] sm:$0xff]  ;;  %v2386_v35 = vpack.c.bf16 %v51_v32, %v47_v30  ;;  %v54_v12 = vld [vmem:[%s6144_s1 + $0xb8] sm:$0xff] }
   0xc   :  { %v820_v29 = vld [vmem:[%s6144_s1 + $0x18a8] sm:$0xff]  ;;  %v819_v34 = vld [vmem:[%s6144_s1 + $0x18a0] sm:$0xff]  ;;  %2767 = vmatpush1.bf16.msra.mxu1 %v2766_v26  ;;  %v49_v18 = vld [vmem:[%s6144_s1 + $0x90] sm:$0xff]  ;;  %v2784_v19 = vpack.c.bf16 %v54_v12, %v50_v11 }
   0xd   :  { %v2768_v31 = vpack.c.bf16 %v820_v29, %v816_v28  ;;  %v56_v36 = vld [vmem:[%s6144_s1 + $0xc8] sm:$0xff]  ;;  %2385 = vmatprep.subr.bf16.mxu0 %v2384_v27  ;;  %v2770_v39 = vpack.c.bf16 %v819_v34, %v815_v33  ;;  %v55_v42 = vld [vmem:[%s6144_s1 + $0xc0] sm:$0xff]  ;;  %v53_v20 = vld [vmem:[%s6144_s1 + $0xb0] sm:$0xff] }
   0xe   :  { %v60_v37 = vld [vmem:[%s6144_s1 + $0xe8] sm:$0xff]  ;;  %v59_v43 = vld [vmem:[%s6144_s1 + $0xe0] sm:$0xff]  ;;  %2387 = vmatpush1.bf16.msra.mxu0 %v2386_v35  ;;  %v58_v23 = vld [vmem:[%s6144_s1 + $0xd8] sm:$0xff]  ;;  %v2786_v26 = vpack.c.bf16 %v53_v20, %v49_v18 }
   0xf   :  { %v824_v38 = vld [vmem:[%s6144_s1 + $0x18c8] sm:$0xff]  ;;  %v2388_v40 = vpack.c.bf16 %v60_v37, %v56_v36  ;;  %2769 = vmatprep.subr.bf16.mxu1 %v2768_v31  ;;  %v823_v45 = vld [vmem:[%s6144_s1 + $0x18c0] sm:$0xff]  ;;  %v2390_v50 = vpack.c.bf16 %v59_v43, %v55_v42  ;;  %v62_v24 = vld [vmem:[%s6144_s1 + $0xf8] sm:$0xff] }
  0x10   :  { %v828_v41 = vld [vmem:[%s6144_s1 + $0x18e8] sm:$0xff]  ;;  %v827_v46 = vld [vmem:[%s6144_s1 + $0x18e0] sm:$0xff]  ;;  %2771 = vmatpush1.bf16.msra.mxu1 %v2770_v39  ;;  %v57_v30 = vld [vmem:[%s6144_s1 + $0xd0] sm:$0xff]  ;;  %v2788_v31 = vpack.c.bf16 %v62_v24, %v58_v23 }
  0x11   :  { %v2772_v44 = vpack.c.bf16 %v828_v41, %v824_v38  ;;  %v64_v47 = vld [vmem:[%s6144_s1 + $0x108] sm:$0xff]  ;;  %2389 = vmatprep.subr.bf16.mxu0 %v2388_v40  ;;  %v2774_v52 = vpack.c.bf16 %v827_v46, %v823_v45  ;;  %v63_v54 = vld [vmem:[%s6144_s1 + $0x100] sm:$0xff]  ;;  %v61_v32 = vld [vmem:[%s6144_s1 + $0xf0] sm:$0xff] }
  0x12   :  { %v68_v48 = vld [vmem:[%s6144_s1 + $0x128] sm:$0xff]  ;;  %v67_v55 = vld [vmem:[%s6144_s1 + $0x120] sm:$0xff]  ;;  %2391 = vmatpush1.bf16.msra.mxu0 %v2390_v50  ;;  %v66_v35 = vld [vmem:[%s6144_s1 + $0x118] sm:$0xff]  ;;  %v2790_v38 = vpack.c.bf16 %v61_v32, %v57_v30  ;;  %v833_v50 = vlaneseq }
  0x13   :  { %v2392_v53 = vpack.c.bf16 %v68_v48, %v64_v47  ;;  %2773 = vmatprep.subr.bf16.mxu1 %v2772_v44  ;;  %v72_v59 = vld [vmem:[%s6144_s1 + $0x148] sm:$0xff]  ;;  %v2394_v0 = vpack.c.bf16 %v67_v55, %v63_v54  ;;  %v71_v3 = vld [vmem:[%s6144_s1 + $0x140] sm:$0xff]  ;;  %v70_v36 = vld [vmem:[%s6144_s1 + $0x138] sm:$0xff] }
  0x14   :  { %v76_v60 = vld [vmem:[%s6144_s1 + $0x168] sm:$0xff]  ;;  %2775 = vmatpush1.bf16.msra.mxu1 %v2774_v52  ;;  %v75_v4 = vld [vmem:[%s6144_s1 + $0x160] sm:$0xff]  ;;  %v65_v42 = vld [vmem:[%s6144_s1 + $0x110] sm:$0xff]  ;;  %v2792_v43 = vpack.c.bf16 %v70_v36, %v66_v35  ;;  %v859_v52 = vunpack.c.l.s4 %v3326_v51 }
  0x15   :  { %2393 = vmatprep.subr.bf16.mxu0 %v2392_v53  ;;  %v2396_v2 = vpack.c.bf16 %v76_v60, %v72_v59  ;;  %2777 = vmatprep.subr.bf16.mxu1 %v2776_v57  ;;  %v80_v9 = vld [vmem:[%s6144_s1 + $0x188] sm:$0xff]  ;;  %v2398_v13 = vpack.c.bf16 %v75_v4, %v71_v3  ;;  %v79_v16 = vld [vmem:[%s6144_s1 + $0x180] sm:$0xff]  ;;  %v69_v44 = vld [vmem:[%s6144_s1 + $0x130] sm:$0xff] }
  0x16   :  { %v84_v10 = vld [vmem:[%s6144_s1 + $0x1a8] sm:$0xff]  ;;  %2395 = vmatpush1.bf16.msra.mxu0 %v2394_v0  ;;  %v83_v17 = vld [vmem:[%s6144_s1 + $0x1a0] sm:$0xff]  ;;  %v74_v47 = vld [vmem:[%s6144_s1 + $0x158] sm:$0xff]  ;;  %v2794_v53 = vpack.c.bf16 %v69_v44, %v65_v42 }
  0x17   :  { %2250 = vmatmul.mubr.msk.f32.vlgmr.msra.gmra.mrb[0].mxu1 %vm927_vm0, %v2249_v63  ;;  %2397 = vmatprep.subr.bf16.mxu0 %v2396_v2  ;;  %v2400_v15 = vpack.c.bf16 %v84_v10, %v80_v9  ;;  %v88_v21 = vld [vmem:[%s6144_s1 + $0x1c8] sm:$0xff]  ;;  %v2402_v25 = vpack.c.bf16 %v83_v17, %v79_v16  ;;  %v87_v28 = vld [vmem:[%s6144_s1 + $0x1c0] sm:$0xff]  ;;  %v78_v48 = vld [vmem:[%s6144_s1 + $0x178] sm:$0xff]  ;;  %v860_v2 = vunpack.c.0.s8 %v859_v52 }
  0x18   :  { %2779 = vmatpush1.bf16.msra.mxu1 %v2778_v1  ;;  %v92_v22 = vld [vmem:[%s6144_s1 + $0x1e8] sm:$0xff]  ;;  %v91_v29 = vld [vmem:[%s6144_s1 + $0x1e0] sm:$0xff]  ;;  %v73_v57 = vld [vmem:[%s6144_s1 + $0x150] sm:$0xff]  ;;  %v2796_v58 = vpack.c.bf16 %v78_v48, %v74_v47  ;;  %v3627_v1 = vshrl.u32 %v833_v50, 7 }
  0x19   :  { %2781 = vmatprep.subr.bf16.mxu1 %v2780_v6  ;;  %v2404_v27 = vpack.c.bf16 %v92_v22, %v88_v21  ;;  %v96_v33 = vld [vmem:[%s6144_s1 + $0x208] sm:$0xff]  ;;  %v2406_v37 = vpack.c.bf16 %v91_v29, %v87_v28  ;;  %v95_v40 = vld [vmem:[%s6144_s1 + $0x200] sm:$0xff]  ;;  %v77_v59 = vld [vmem:[%s6144_s1 + $0x170] sm:$0xff] }
  0x1a   :  { %2399 = vmatpush1.bf16.msra.mxu0 %v2398_v13  ;;  %v100_v34 = vld [vmem:[%s6144_s1 + $0x228] sm:$0xff]  ;;  %v99_v41 = vld [vmem:[%s6144_s1 + $0x220] sm:$0xff]  ;;  %v82_v62 = vld [vmem:[%s6144_s1 + $0x198] sm:$0xff]  ;;  %v2798_v3 = vpack.c.bf16 %v77_v59, %v73_v57  ;;  %v3654_v16 = vsub.s32 %v860_v2, %v3627_v1 }
  0x1b   :  { %2401 = vmatprep.subr.bf16.mxu0 %v2400_v15  ;;  %v2408_v39 = vpack.c.bf16 %v100_v34, %v96_v33  ;;  %v104_v45 = vld [vmem:[%s6144_s1 + $0x248] sm:$0xff]  ;;  %v2410_v49 = vpack.c.bf16 %v99_v41, %v95_v40  ;;  %v103_v55 = vld [vmem:[%s6144_s1 + $0x240] sm:$0xff]  ;;  %v86_v63 = vld [vmem:[%s6144_s1 + $0x1b8] sm:$0xff] }
  0x1c   :  { %2783 = vmatpush1.bf16.msra.mxu1 %v2782_v14  ;;  %v108_v46 = vld [vmem:[%s6144_s1 + $0x268] sm:$0xff]  ;;  %v107_v56 = vld [vmem:[%s6144_s1 + $0x260] sm:$0xff]  ;;  %v81_v8 = vld [vmem:[%s6144_s1 + $0x190] sm:$0xff]  ;;  %v2800_v9 = vpack.c.bf16 %v86_v63, %v82_v62 }
  0x1d   :  { %2785 = vmatprep.subr.bf16.mxu1 %v2784_v19  ;;  %v2412_v54 = vpack.c.bf16 %v108_v46, %v104_v45  ;;  %v112_v60 = vld [vmem:[%s6144_s1 + $0x288] sm:$0xff]  ;;  %v2414_v0 = vpack.c.bf16 %v107_v56, %v103_v55  ;;  %v111_v5 = vld [vmem:[%s6144_s1 + $0x280] sm:$0xff]  ;;  %v85_v10 = vld [vmem:[%s6144_s1 + $0x1b0] sm:$0xff] }
  0x1e   :  { %2403 = vmatpush1.bf16.msra.mxu0 %v2402_v25  ;;  %v116_v61 = vld [vmem:[%s6144_s1 + $0x2a8] sm:$0xff]  ;;  %v115_v6 = vld [vmem:[%s6144_s1 + $0x2a0] sm:$0xff]  ;;  %v90_v13 = vld [vmem:[%s6144_s1 + $0x1d8] sm:$0xff]  ;;  %v2802_v17 = vpack.c.bf16 %v85_v10, %v81_v8 }
  0x1f   :  { %2405 = vmatprep.subr.bf16.mxu0 %v2404_v27  ;;  %v2416_v4 = vpack.c.bf16 %v116_v61, %v112_v60  ;;  %v120_v11 = vld [vmem:[%s6144_s1 + $0x2c8] sm:$0xff]  ;;  %v94_v14 = vld [vmem:[%s6144_s1 + $0x1f8] sm:$0xff]  ;;  %v2418_v15 = vpack.c.bf16 %v115_v6, %v111_v5  ;;  %v119_v19 = vld [vmem:[%s6144_s1 + $0x2c0] sm:$0xff] }
  0x20   :  { %2787 = vmatpush1.bf16.msra.mxu1 %v2786_v26  ;;  %v124_v12 = vld [vmem:[%s6144_s1 + $0x2e8] sm:$0xff]  ;;  %v123_v20 = vld [vmem:[%s6144_s1 + $0x2e0] sm:$0xff]  ;;  %v89_v21 = vld [vmem:[%s6144_s1 + $0x1d0] sm:$0xff]  ;;  %v2804_v22 = vpack.c.bf16 %v94_v14, %v90_v13 }
  0x21   :  { %2789 = vmatprep.subr.bf16.mxu1 %v2788_v31  ;;  %v2420_v18 = vpack.c.bf16 %v124_v12, %v120_v11  ;;  %v93_v23 = vld [vmem:[%s6144_s1 + $0x1f0] sm:$0xff]  ;;  %v128_v24 = vld [vmem:[%s6144_s1 + $0x308] sm:$0xff]  ;;  %v98_v26 = vld [vmem:[%s6144_s1 + $0x218] sm:$0xff]  ;;  %v2422_v29 = vpack.c.bf16 %v123_v20, %v119_v19 }
  0x22   :  { %2407 = vmatpush1.bf16.msra.mxu0 %v2406_v37  ;;  %v132_v25 = vld [vmem:[%s6144_s1 + $0x328] sm:$0xff]  ;;  %v102_v27 = vld [vmem:[%s6144_s1 + $0x238] sm:$0xff]  ;;  %v3683_v28 = vld [vmem:[%s6143_s0] sm:$0xff]  ;;  %v2806_v31 = vpack.c.bf16 %v93_v23, %v89_v21 }
  0x23   :  { %2409 = vmatprep.subr.bf16.mxu0 %v2408_v39  ;;  %v3687_v30 = vrot.slane %v3683_v28, %v3654_v16  ;;  %v2424_v32 = vpack.c.bf16 %v132_v25, %v128_v24  ;;  %v127_v33 = vld [vmem:[%s6144_s1 + $0x300] sm:$0xff]  ;;  %v97_v35 = vld [vmem:[%s6144_s1 + $0x210] sm:$0xff]  ;;  %v2808_v36 = vpack.c.bf16 %v102_v27, %v98_v26  ;;  %v140_v39 = vld [vmem:[%s6144_s1 + $0x368] sm:$0xff]  ;;  %v857_v5 = vcombine.high %v3683_v28, %v3683_v28 }
  0x24   :  { %2791 = vmatpush1.bf16.msra.mxu1 %v2790_v38  ;;  %v131_v34 = vld [vmem:[%s6144_s1 + $0x320] sm:$0xff]  ;;  %v101_v37 = vld [vmem:[%s6144_s1 + $0x230] sm:$0xff]  ;;  %v136_v38 = vld [vmem:[%s6144_s1 + $0x348] sm:$0xff] }
  0x25   :  { %2793 = vmatprep.subr.bf16.mxu1 %v2792_v43  ;;  %v872_v40 = vcombine.high %v3687_v30, %v3687_v30  ;;  %v106_v41 = vld [vmem:[%s6144_s1 + $0x258] sm:$0xff]  ;;  %v2426_v43 = vpack.c.bf16 %v131_v34, %v127_v33  ;;  %v2810_v44 = vpack.c.bf16 %v101_v37, %v97_v35  ;;  %v2428_v45 = vpack.c.bf16 %v140_v39, %v136_v38  ;;  %v135_v46 = vld [vmem:[%s6144_s1 + $0x340] sm:$0xff]  ;;  %v105_v48 = vld [vmem:[%s6144_s1 + $0x250] sm:$0xff] }
  0x26   :  { %2411 = vmatpush1.bf16.msra.mxu0 %v2410_v49  ;;  %v110_v42 = vld [vmem:[%s6144_s1 + $0x278] sm:$0xff]  ;;  %v139_v47 = vld [vmem:[%s6144_s1 + $0x360] sm:$0xff]  ;;  %v109_v50 = vld [vmem:[%s6144_s1 + $0x270] sm:$0xff]  ;;  %v3790_v20 = vrot.slane %v857_v5, %v3654_v16 }
  0x27   :  { %2413 = vmatprep.subr.bf16.mxu0 %v2412_v54  ;;  %994 = vmatprep.mubr.f32.mxu0 %v872_v40  ;;  %v2812_v49 = vpack.c.bf16 %v110_v42, %v106_v41  ;;  %v144_v51 = vld [vmem:[%s6144_s1 + $0x388] sm:$0xff]  ;;  %v118_v54 = vld [vmem:[%s6144_s1 + $0x2b8] sm:$0xff]  ;;  %v2430_v55 = vpack.c.bf16 %v139_v47, %v135_v46  ;;  %v2814_v56 = vpack.c.bf16 %v109_v50, %v105_v48  ;;  %v147_v59 = vld [vmem:[%s6144_s1 + $0x3a0] sm:$0xff] }
  0x28   :  { %2795 = vmatpush1.bf16.msra.mxu1 %v2794_v53  ;;  %v148_v52 = vld [vmem:[%s6144_s1 + $0x3a8] sm:$0xff]  ;;  %1491 = vmatprep.mubr.f32.mxu1 %v872_v40  ;;  %v114_v53 = vld [vmem:[%s6144_s1 + $0x298] sm:$0xff]  ;;  %v113_v60 = vld [vmem:[%s6144_s1 + $0x290] sm:$0xff]  ;;  %v3818_v34 = vcombine.high %v3790_v20, %v3790_v20 }
  0x29   :  { %2797 = vmatprep.subr.bf16.mxu1 %v2796_v58  ;;  %v2432_v57 = vpack.c.bf16 %v148_v52, %v144_v51  ;;  %v143_v58 = vld [vmem:[%s6144_s1 + $0x380] sm:$0xff]  ;;  %v2816_v61 = vpack.c.bf16 %v118_v54, %v114_v53  ;;  %v117_v62 = vld [vmem:[%s6144_s1 + $0x2b0] sm:$0xff]  ;;  %v152_v63 = vld [vmem:[%s6144_s1 + $0x3c8] sm:$0xff] }
  0x2a   :  { %2415 = vmatpush1.bf16.msra.mxu0 %v2414_v0  ;;  %v156_v0 = vld [vmem:[%s6144_s1 + $0x3e8] sm:$0xff]  ;;  %v122_v2 = vld [vmem:[%s6144_s1 + $0x2d8] sm:$0xff]  ;;  %v2818_v6 = vpack.c.bf16 %v117_v62, %v113_v60  ;;  %v155_v10 = vld [vmem:[%s6144_s1 + $0x3e0] sm:$0xff] }
  0x2b   :  { %2417 = vmatprep.subr.bf16.mxu0 %v2416_v4  ;;  %v2434_v4 = vpack.c.bf16 %v147_v59, %v143_v58  ;;  %v2436_v8 = vpack.c.bf16 %v156_v0, %v152_v63  ;;  %v121_v11 = vld [vmem:[%s6144_s1 + $0x2d0] sm:$0xff]  ;;  %v160_v14 = vld [vmem:[%s6144_s1 + $0x408] sm:$0xff]  ;;  %v159_v23 = vld [vmem:[%s6144_s1 + $0x400] sm:$0xff] }
  0x2c   :  { %2799 = vmatpush1.bf16.msra.mxu1 %v2798_v3  ;;  %v126_v3 = vld [vmem:[%s6144_s1 + $0x2f8] sm:$0xff]  ;;  %v125_v13 = vld [vmem:[%s6144_s1 + $0x2f0] sm:$0xff]  ;;  %v163_v24 = vld [vmem:[%s6144_s1 + $0x420] sm:$0xff] }
  0x2d   :  { %2801 = vmatprep.subr.bf16.mxu1 %v2800_v9  ;;  %v151_v9 = vld [vmem:[%s6144_s1 + $0x3c0] sm:$0xff]  ;;  %v2820_v12 = vpack.c.bf16 %v126_v3, %v122_v2  ;;  %v2822_v21 = vpack.c.bf16 %v125_v13, %v121_v11  ;;  %v129_v25 = vld [vmem:[%s6144_s1 + $0x310] sm:$0xff]  ;;  %v168_v28 = vld [vmem:[%s6144_s1 + $0x448] sm:$0xff]  ;;  %v2442_v33 = vpack.c.bf16 %v163_v24, %v159_v23 }
  0x2e   :  { %2419 = vmatpush1.bf16.msra.mxu0 %v2418_v15  ;;  %v164_v15 = vld [vmem:[%s6144_s1 + $0x428] sm:$0xff]  ;;  %v2438_v19 = vpack.c.bf16 %v155_v10, %v151_v9  ;;  %v133_v27 = vld [vmem:[%s6144_s1 + $0x330] sm:$0xff]  ;;  %v167_v37 = vld [vmem:[%s6144_s1 + $0x440] sm:$0xff] }
  0x2f   :  { %2421 = vmatprep.subr.bf16.mxu0 %v2420_v18  ;;  %v134_v18 = vld [vmem:[%s6144_s1 + $0x338] sm:$0xff]  ;;  %v2826_v35 = vpack.c.bf16 %v133_v27, %v129_v25  ;;  %v171_v38 = vld [vmem:[%s6144_s1 + $0x460] sm:$0xff]  ;;  %v137_v39 = vld [vmem:[%s6144_s1 + $0x350] sm:$0xff] }
  0x30   :  { %2803 = vmatpush1.bf16.msra.mxu1 %v2802_v17  ;;  %v130_v17 = vld [vmem:[%s6144_s1 + $0x318] sm:$0xff]  ;;  %v141_v41 = vld [vmem:[%s6144_s1 + $0x370] sm:$0xff]  ;;  %v176_v42 = vld [vmem:[%s6144_s1 + $0x488] sm:$0xff]  ;;  %v2446_v46 = vpack.c.bf16 %v171_v38, %v167_v37 }
  0x31   :  { %2805 = vmatprep.subr.bf16.mxu1 %v2804_v22  ;;  %v2440_v22 = vpack.c.bf16 %v164_v15, %v160_v14  ;;  %v2824_v26 = vpack.c.bf16 %v134_v18, %v130_v17  ;;  %v2830_v47 = vpack.c.bf16 %v141_v41, %v137_v39  ;;  %v179_v50 = vld [vmem:[%s6144_s1 + $0x4a0] sm:$0xff]  ;;  %v145_v51 = vld [vmem:[%s6144_s1 + $0x390] sm:$0xff]  ;;  %v184_v54 = vld [vmem:[%s6144_s1 + $0x4c8] sm:$0xff] }
  0x32   :  { %2423 = vmatpush1.bf16.msra.mxu0 %v2422_v29  ;;  %v172_v29 = vld [vmem:[%s6144_s1 + $0x468] sm:$0xff]  ;;  %v149_v53 = vld [vmem:[%s6144_s1 + $0x3b0] sm:$0xff]  ;;  %v187_v62 = vld [vmem:[%s6144_s1 + $0x4e0] sm:$0xff] }
  0x33   :  { %2425 = vmatprep.subr.bf16.mxu0 %v2424_v32  ;;  %v142_v32 = vld [vmem:[%s6144_s1 + $0x378] sm:$0xff]  ;;  %v2834_v59 = vpack.c.bf16 %v149_v53, %v145_v51  ;;  %v153_v63 = vld [vmem:[%s6144_s1 + $0x3d0] sm:$0xff]  ;;  %v192_v3 = vld [vmem:[%s6144_s1 + $0x508] sm:$0xff] }
  0x34   :  { %2807 = vmatpush1.bf16.msra.mxu1 %v2806_v31  ;;  %v138_v31 = vld [vmem:[%s6144_s1 + $0x358] sm:$0xff]  ;;  %v157_v2 = vld [vmem:[%s6144_s1 + $0x3f0] sm:$0xff]  ;;  %v191_v11 = vld [vmem:[%s6144_s1 + $0x500] sm:$0xff] }
  0x35   :  { %2809 = vmatprep.subr.bf16.mxu1 %v2808_v36  ;;  %v2444_v36 = vpack.c.bf16 %v172_v29, %v168_v28  ;;  %v2828_v40 = vpack.c.bf16 %v142_v32, %v138_v31  ;;  %v162_v5 = vld [vmem:[%s6144_s1 + $0x418] sm:$0xff]  ;;  %v2838_v9 = vpack.c.bf16 %v157_v2, %v153_v63  ;;  %v161_v13 = vld [vmem:[%s6144_s1 + $0x410] sm:$0xff]  ;;  %v200_v17 = vld [vmem:[%s6144_s1 + $0x548] sm:$0xff] }
  0x36   :  { %2427 = vmatpush1.bf16.msra.mxu0 %v2426_v43  ;;  %v180_v43 = vld [vmem:[%s6144_s1 + $0x4a8] sm:$0xff]  ;;  %v165_v15 = vld [vmem:[%s6144_s1 + $0x430] sm:$0xff]  ;;  %v199_v25 = vld [vmem:[%s6144_s1 + $0x540] sm:$0xff] }
  0x37   :  { %2429 = vmatprep.subr.bf16.mxu0 %v2428_v45  ;;  %v150_v45 = vld [vmem:[%s6144_s1 + $0x3b8] sm:$0xff]  ;;  %v2448_v48 = vpack.c.bf16 %v180_v43, %v176_v42  ;;  %v204_v18 = vld [vmem:[%s6144_s1 + $0x568] sm:$0xff]  ;;  %v2842_v23 = vpack.c.bf16 %v165_v15, %v161_v13  ;;  %v169_v27 = vld [vmem:[%s6144_s1 + $0x450] sm:$0xff] }
  0x38   :  { %2811 = vmatpush1.bf16.msra.mxu1 %v2810_v44  ;;  %v146_v44 = vld [vmem:[%s6144_s1 + $0x398] sm:$0xff]  ;;  %v2460_v24 = vpack.c.bf16 %v204_v18, %v200_v17  ;;  %v173_v29 = vld [vmem:[%s6144_s1 + $0x470] sm:$0xff]  ;;  %v208_v31 = vld [vmem:[%s6144_s1 + $0x588] sm:$0xff] }
  0x39   :  { %2813 = vmatprep.subr.bf16.mxu1 %v2812_v49  ;;  %v175_v49 = vld [vmem:[%s6144_s1 + $0x480] sm:$0xff]  ;;  %v2832_v52 = vpack.c.bf16 %v150_v45, %v146_v44  ;;  %v212_v32 = vld [vmem:[%s6144_s1 + $0x5a8] sm:$0xff]  ;;  %v2846_v37 = vpack.c.bf16 %v173_v29, %v169_v27  ;;  %v177_v41 = vld [vmem:[%s6144_s1 + $0x490] sm:$0xff] }
  0x3a   :  { %2431 = vmatpush1.bf16.msra.mxu0 %v2430_v55  ;;  %v188_v55 = vld [vmem:[%s6144_s1 + $0x4e8] sm:$0xff]  ;;  %v2450_v58 = vpack.c.bf16 %v179_v50, %v175_v49  ;;  %v2464_v38 = vpack.c.bf16 %v212_v32, %v208_v31  ;;  %v207_v39 = vld [vmem:[%s6144_s1 + $0x580] sm:$0xff]  ;;  %v186_v45 = vld [vmem:[%s6144_s1 + $0x4d8] sm:$0xff] }
  0x3b   :  { %2433 = vmatprep.subr.bf16.mxu0 %v2432_v57  ;;  %v158_v57 = vld [vmem:[%s6144_s1 + $0x3f8] sm:$0xff]  ;;  %v2452_v60 = vpack.c.bf16 %v188_v55, %v184_v54  ;;  %v216_v43 = vld [vmem:[%s6144_s1 + $0x5c8] sm:$0xff]  ;;  %v215_v50 = vld [vmem:[%s6144_s1 + $0x5c0] sm:$0xff] }
  0x3c   :  { %2815 = vmatpush1.bf16.msra.mxu1 %v2814_v56  ;;  %v154_v56 = vld [vmem:[%s6144_s1 + $0x3d8] sm:$0xff]  ;;  %v220_v44 = vld [vmem:[%s6144_s1 + $0x5e8] sm:$0xff]  ;;  %v185_v51 = vld [vmem:[%s6144_s1 + $0x4d0] sm:$0xff] }
  0x3d   :  { %2817 = vmatprep.subr.bf16.mxu1 %v2816_v61  ;;  %v183_v61 = vld [vmem:[%s6144_s1 + $0x4c0] sm:$0xff]  ;;  %v2836_v0 = vpack.c.bf16 %v158_v57, %v154_v56  ;;  %v2468_v49 = vpack.c.bf16 %v220_v44, %v216_v43  ;;  %v189_v53 = vld [vmem:[%s6144_s1 + $0x4f0] sm:$0xff]  ;;  %v224_v54 = vld [vmem:[%s6144_s1 + $0x608] sm:$0xff] }
  0x3e   :  { %2435 = vmatpush1.bf16.msra.mxu0 %v2434_v4  ;;  %v196_v4 = vld [vmem:[%s6144_s1 + $0x528] sm:$0xff]  ;;  %v194_v56 = vld [vmem:[%s6144_s1 + $0x518] sm:$0xff]  ;;  %v193_v63 = vld [vmem:[%s6144_s1 + $0x510] sm:$0xff] }
  0x3f   :  { %2437 = vmatprep.subr.bf16.mxu0 %v2436_v8  ;;  %v2454_v8 = vpack.c.bf16 %v187_v62, %v183_v61  ;;  %v2456_v10 = vpack.c.bf16 %v196_v4, %v192_v3  ;;  %v228_v55 = vld [vmem:[%s6144_s1 + $0x628] sm:$0xff]  ;;  %v198_v57 = vld [vmem:[%s6144_s1 + $0x538] sm:$0xff]  ;;  %v223_v61 = vld [vmem:[%s6144_s1 + $0x600] sm:$0xff] }
  0x40   :  { %2819 = vmatpush1.bf16.msra.mxu1 %v2818_v6  ;;  %v166_v6 = vld [vmem:[%s6144_s1 + $0x438] sm:$0xff]  ;;  %v227_v62 = vld [vmem:[%s6144_s1 + $0x620] sm:$0xff]  ;;  %v197_v2 = vld [vmem:[%s6144_s1 + $0x530] sm:$0xff] }
  0x41   :  { %2821 = vmatprep.subr.bf16.mxu1 %v2820_v12  ;;  %v195_v12 = vld [vmem:[%s6144_s1 + $0x520] sm:$0xff]  ;;  %v2840_v14 = vpack.c.bf16 %v166_v6, %v162_v5  ;;  %v232_v3 = vld [vmem:[%s6144_s1 + $0x648] sm:$0xff]  ;;  %v202_v5 = vld [vmem:[%s6144_s1 + $0x558] sm:$0xff] }
  0x42   :  { %2439 = vmatpush1.bf16.msra.mxu0 %v2438_v19  ;;  %v170_v19 = vld [vmem:[%s6144_s1 + $0x458] sm:$0xff]  ;;  %v236_v4 = vld [vmem:[%s6144_s1 + $0x668] sm:$0xff]  ;;  %v201_v13 = vld [vmem:[%s6144_s1 + $0x550] sm:$0xff] }
  0x43   :  { %2441 = vmatprep.subr.bf16.mxu0 %v2440_v22  ;;  %v2458_v22 = vpack.c.bf16 %v195_v12, %v191_v11  ;;  %v206_v6 = vld [vmem:[%s6144_s1 + $0x578] sm:$0xff]  ;;  %v231_v11 = vld [vmem:[%s6144_s1 + $0x640] sm:$0xff]  ;;  %v205_v15 = vld [vmem:[%s6144_s1 + $0x570] sm:$0xff] }
  0x44   :  { %2823 = vmatpush1.bf16.msra.mxu1 %v2822_v21  ;;  %v174_v21 = vld [vmem:[%s6144_s1 + $0x478] sm:$0xff]  ;;  %v235_v12 = vld [vmem:[%s6144_s1 + $0x660] sm:$0xff]  ;;  %v240_v17 = vld [vmem:[%s6144_s1 + $0x688] sm:$0xff] }
  0x45   :  { %2825 = vmatprep.subr.bf16.mxu1 %v2824_v26  ;;  %995 = vmatmul.mubr.f32.vlgmr.msra.gmra.mrb[0].mxu0 %v3687_v30  ;;  %v203_v26 = vld [vmem:[%s6144_s1 + $0x560] sm:$0xff]  ;;  %v2844_v28 = vpack.c.bf16 %v174_v21, %v170_v19  ;;  %v244_v18 = vld [vmem:[%s6144_s1 + $0x6a8] sm:$0xff]  ;;  %v210_v19 = vld [vmem:[%s6144_s1 + $0x598] sm:$0xff] }
  0x46   :  { %2443 = vmatpush1.bf16.msra.mxu0 %v2442_v33  ;;  %1065 = vmatprep.mubr.f32.mxu0 %v3818_v34  ;;  %v178_v33 = vld [vmem:[%s6144_s1 + $0x498] sm:$0xff]  ;;  %v209_v27 = vld [vmem:[%s6144_s1 + $0x590] sm:$0xff]  ;;  %v248_v31 = vld [vmem:[%s6144_s1 + $0x6c8] sm:$0xff] }
  0x47   :  { %2445 = vmatprep.subr.bf16.mxu0 %v2444_v36  ;;  %v2462_v36 = vpack.c.bf16 %v203_v26, %v199_v25  ;;  %v214_v21 = vld [vmem:[%s6144_s1 + $0x5b8] sm:$0xff]  ;;  %v239_v25 = vld [vmem:[%s6144_s1 + $0x680] sm:$0xff]  ;;  %v213_v29 = vld [vmem:[%s6144_s1 + $0x5b0] sm:$0xff] }
  0x48   :  { %2827 = vmatpush1.bf16.msra.mxu1 %v2826_v35  ;;  %v182_v35 = vld [vmem:[%s6144_s1 + $0x4b8] sm:$0xff]  ;;  %v243_v26 = vld [vmem:[%s6144_s1 + $0x6a0] sm:$0xff]  ;;  %v252_v32 = vld [vmem:[%s6144_s1 + $0x6e8] sm:$0xff] }
  0x49   :  { %2829 = vmatprep.subr.bf16.mxu1 %v2828_v40  ;;  %v211_v40 = vld [vmem:[%s6144_s1 + $0x5a0] sm:$0xff]  ;;  %v2848_v42 = vpack.c.bf16 %v182_v35, %v178_v33  ;;  %v218_v33 = vld [vmem:[%s6144_s1 + $0x5d8] sm:$0xff]  ;;  %v256_v43 = vld [vmem:[%s6144_s1 + $0x708] sm:$0xff] }
  0x4a   :  { %2447 = vmatpush1.bf16.msra.mxu0 %v2446_v46  ;;  %v190_v46 = vld [vmem:[%s6144_s1 + $0x4f8] sm:$0xff]  ;;  %v260_v44 = vld [vmem:[%s6144_s1 + $0x728] sm:$0xff] }
  0x4b   :  { %2449 = vmatprep.subr.bf16.mxu0 %v2448_v48  ;;  %v222_v35 = vld [vmem:[%s6144_s1 + $0x5f8] sm:$0xff] }
  0x4c   :  { %2831 = vmatpush1.bf16.msra.mxu1 %v2830_v47  ;;  %v2466_v47 = vpack.c.bf16 %v211_v40, %v207_v39  ;;  %v247_v39 = vld [vmem:[%s6144_s1 + $0x6c0] sm:$0xff] }
  0x4d   :  { %2833 = vmatprep.subr.bf16.mxu1 %v2832_v52  ;;  %v2852_v52 = vpack.c.bf16 %v190_v46, %v186_v45  ;;  %v251_v40 = vld [vmem:[%s6144_s1 + $0x6e0] sm:$0xff]  ;;  %v226_v45 = vld [vmem:[%s6144_s1 + $0x618] sm:$0xff] }
  0x4e   :  { %2451 = vmatpush1.bf16.msra.mxu0 %v2450_v58  ;;  %v230_v46 = vld [vmem:[%s6144_s1 + $0x638] sm:$0xff] }
  0x4f   :  { %2453 = vmatprep.subr.bf16.mxu0 %v2452_v60  ;;  %v2472_v60 = vpack.c.bf16 %v228_v55, %v224_v54  ;;  %v264_v54 = vld [vmem:[%s6144_s1 + $0x748] sm:$0xff] }
  0x50   :  { %2835 = vmatpush1.bf16.msra.mxu1 %v2834_v59  ;;  %v2854_v59 = vpack.c.bf16 %v189_v53, %v185_v51  ;;  %v225_v51 = vld [vmem:[%s6144_s1 + $0x610] sm:$0xff]  ;;  %v268_v55 = vld [vmem:[%s6144_s1 + $0x768] sm:$0xff] }
  0x51   :  { %2837 = vmatprep.subr.bf16.mxu1 %v2836_v0  ;;  %v2856_v0 = vpack.c.bf16 %v198_v57, %v194_v56  ;;  %v229_v53 = vld [vmem:[%s6144_s1 + $0x630] sm:$0xff]  ;;  %v234_v56 = vld [vmem:[%s6144_s1 + $0x658] sm:$0xff] }
  0x52   :  { %2455 = vmatpush1.bf16.msra.mxu0 %v2454_v8  ;;  %v2474_v8 = vpack.c.bf16 %v227_v62, %v223_v61  ;;  %v238_v57 = vld [vmem:[%s6144_s1 + $0x678] sm:$0xff]  ;;  %v263_v61 = vld [vmem:[%s6144_s1 + $0x740] sm:$0xff] }
  0x53   :  { %2457 = vmatprep.subr.bf16.mxu0 %v2456_v10  ;;  %v2476_v10 = vpack.c.bf16 %v236_v4, %v232_v3  ;;  %v267_v62 = vld [vmem:[%s6144_s1 + $0x760] sm:$0xff]  ;;  %v272_v3 = vld [vmem:[%s6144_s1 + $0x788] sm:$0xff] }
  0x54   :  { %2839 = vmatpush1.bf16.msra.mxu1 %v2838_v9  ;;  %v2858_v9 = vpack.c.bf16 %v197_v2, %v193_v63  ;;  %v233_v63 = vld [vmem:[%s6144_s1 + $0x650] sm:$0xff]  ;;  %v276_v4 = vld [vmem:[%s6144_s1 + $0x7a8] sm:$0xff] }
  0x55   :  { %2841 = vmatprep.subr.bf16.mxu1 %v2840_v14  ;;  %v2860_v14 = vpack.c.bf16 %v206_v6, %v202_v5  ;;  %v237_v2 = vld [vmem:[%s6144_s1 + $0x670] sm:$0xff]  ;;  %v242_v5 = vld [vmem:[%s6144_s1 + $0x698] sm:$0xff] }
  0x56   :  { %2459 = vmatpush1.bf16.msra.mxu0 %v2458_v22  ;;  %v2478_v22 = vpack.c.bf16 %v235_v12, %v231_v11  ;;  %v246_v6 = vld [vmem:[%s6144_s1 + $0x6b8] sm:$0xff]  ;;  %v271_v11 = vld [vmem:[%s6144_s1 + $0x780] sm:$0xff] }
  0x57   :  { %1492 = vmatmul.mubr.f32.vlgmr.msra.gmra.mrb[2].mxu1 %v3687_v30  ;;  %2461 = vmatprep.subr.bf16.mxu0 %v2460_v24  ;;  %v181_v30 = vld [vmem:[%s6144_s1 + $0x4b0] sm:$0xff]  ;;  %v2480_v24 = vpack.c.bf16 %v244_v18, %v240_v17  ;;  %v275_v12 = vld [vmem:[%s6144_s1 + $0x7a0] sm:$0xff]  ;;  %v280_v17 = vld [vmem:[%s6144_s1 + $0x7c8] sm:$0xff] }
  0x58   :  { %2843 = vmatpush1.bf16.msra.mxu1 %v2842_v23  ;;  %1562 = vmatprep.mubr.f32.mxu1 %v3818_v34  ;;  %v2850_v48 = vpack.c.bf16 %v181_v30, %v177_v41  ;;  %v219_v34 = vld [vmem:[%s6144_s1 + $0x5e0] sm:$0xff]  ;;  %v2862_v23 = vpack.c.bf16 %v205_v15, %v201_v13  ;;  %v217_v41 = vld [vmem:[%s6144_s1 + $0x5d0] sm:$0xff]  ;;  %v284_v18 = vld [vmem:[%s6144_s1 + $0x7e8] sm:$0xff] }
  0x59   :  { %2845 = vmatprep.subr.bf16.mxu1 %v2844_v28  ;;  %v2470_v58 = vpack.c.bf16 %v219_v34, %v215_v50  ;;  %v2864_v28 = vpack.c.bf16 %v214_v21, %v210_v19  ;;  %v221_v30 = vld [vmem:[%s6144_s1 + $0x5f0] sm:$0xff]  ;;  %v255_v50 = vld [vmem:[%s6144_s1 + $0x700] sm:$0xff]  ;;  %v250_v19 = vld [vmem:[%s6144_s1 + $0x6d8] sm:$0xff] }
  0x5a   :  { %2463 = vmatpush1.bf16.msra.mxu0 %v2462_v36  ;;  %v2482_v36 = vpack.c.bf16 %v243_v26, %v239_v25  ;;  %v259_v34 = vld [vmem:[%s6144_s1 + $0x720] sm:$0xff]  ;;  %v241_v13 = vld [vmem:[%s6144_s1 + $0x690] sm:$0xff]  ;;  %v254_v21 = vld [vmem:[%s6144_s1 + $0x6f8] sm:$0xff] }
  0x5b   :  { %2465 = vmatprep.subr.bf16.mxu0 %v2464_v38  ;;  %v2484_v38 = vpack.c.bf16 %v252_v32, %v248_v31  ;;  %v245_v15 = vld [vmem:[%s6144_s1 + $0x6b0] sm:$0xff]  ;;  %v279_v25 = vld [vmem:[%s6144_s1 + $0x7c0] sm:$0xff]  ;;  %v288_v31 = vld [vmem:[%s6144_s1 + $0x808] sm:$0xff] }
  0x5c   :  { %2847 = vmatpush1.bf16.msra.mxu1 %v2846_v37  ;;  %v2866_v37 = vpack.c.bf16 %v213_v29, %v209_v27  ;;  %v283_v26 = vld [vmem:[%s6144_s1 + $0x7e0] sm:$0xff]  ;;  %v249_v27 = vld [vmem:[%s6144_s1 + $0x6d0] sm:$0xff]  ;;  %v292_v32 = vld [vmem:[%s6144_s1 + $0x828] sm:$0xff] }
  0x5d   :  { %2849 = vmatprep.subr.bf16.mxu1 %v2848_v42  ;;  %v2868_v42 = vpack.c.bf16 %v222_v35, %v218_v33  ;;  %v253_v29 = vld [vmem:[%s6144_s1 + $0x6f0] sm:$0xff]  ;;  %v258_v33 = vld [vmem:[%s6144_s1 + $0x718] sm:$0xff] }
  0x5e   :  { %2467 = vmatpush1.bf16.msra.mxu0 %v2466_v47  ;;  %v2486_v47 = vpack.c.bf16 %v251_v40, %v247_v39  ;;  %v262_v35 = vld [vmem:[%s6144_s1 + $0x738] sm:$0xff]  ;;  %v287_v39 = vld [vmem:[%s6144_s1 + $0x800] sm:$0xff] }
  0x5f   :  { %2469 = vmatprep.subr.bf16.mxu0 %v2468_v49  ;;  %v2488_v49 = vpack.c.bf16 %v260_v44, %v256_v43  ;;  %v291_v40 = vld [vmem:[%s6144_s1 + $0x820] sm:$0xff]  ;;  %v296_v43 = vld [vmem:[%s6144_s1 + $0x848] sm:$0xff] }
  0x60   :  { %2851 = vmatpush1.bf16.msra.mxu1 %v2850_v48  ;;  %v2870_v48 = vpack.c.bf16 %v221_v30, %v217_v41  ;;  %v257_v41 = vld [vmem:[%s6144_s1 + $0x710] sm:$0xff]  ;;  %v300_v44 = vld [vmem:[%s6144_s1 + $0x868] sm:$0xff] }
  0x61   :  { %2853 = vmatprep.subr.bf16.mxu1 %v2852_v52  ;;  %v2872_v52 = vpack.c.bf16 %v230_v46, %v226_v45  ;;  %v261_v30 = vld [vmem:[%s6144_s1 + $0x730] sm:$0xff]  ;;  %v266_v45 = vld [vmem:[%s6144_s1 + $0x758] sm:$0xff] }
  0x62   :  { %2471 = vmatpush1.bf16.msra.mxu0 %v2470_v58  ;;  %v2490_v58 = vpack.c.bf16 %v259_v34, %v255_v50  ;;  %v270_v46 = vld [vmem:[%s6144_s1 + $0x778] sm:$0xff]  ;;  %v2508_v50 = vpack.c.bf16 %v300_v44, %v296_v43  ;;  %v295_v34 = vld [vmem:[%s6144_s1 + $0x840] sm:$0xff]  ;;  %v297_v43 = vld [vmem:[%s6144_s1 + $0x850] sm:$0xff] }
  0x63   :  { %2473 = vmatprep.subr.bf16.mxu0 %v2472_v60  ;;  %v2492_v60 = vpack.c.bf16 %v268_v55, %v264_v54  ;;  %v2892_v54 = vpack.c.bf16 %v270_v46, %v266_v45  ;;  %v269_v55 = vld [vmem:[%s6144_s1 + $0x770] sm:$0xff]  ;;  %v336_v46 = vld [vmem:[%s6144_s1 + $0x988] sm:$0xff] }
  0x64   :  { %2855 = vmatpush1.bf16.msra.mxu1 %v2854_v59  ;;  %v2874_v59 = vpack.c.bf16 %v229_v53, %v225_v51  ;;  %v299_v51 = vld [vmem:[%s6144_s1 + $0x860] sm:$0xff]  ;;  %v301_v45 = vld [vmem:[%s6144_s1 + $0x870] sm:$0xff] }
  0x65   :  { %2857 = vmatprep.subr.bf16.mxu1 %v2856_v0  ;;  %v2876_v0 = vpack.c.bf16 %v238_v57, %v234_v56  ;;  %v304_v56 = vld [vmem:[%s6144_s1 + $0x888] sm:$0xff] }
  0x66   :  { %2475 = vmatpush1.bf16.msra.mxu0 %v2474_v8  ;;  %v2494_v8 = vpack.c.bf16 %v267_v62, %v263_v61  ;;  %v308_v57 = vld [vmem:[%s6144_s1 + $0x8a8] sm:$0xff]  ;;  %v2510_v61 = vpack.c.bf16 %v299_v51, %v295_v34  ;;  %v2910_v51 = vpack.c.bf16 %v301_v45, %v297_v43  ;;  %v371_v43 = vld [vmem:[%s6144_s1 + $0xaa0] sm:$0xff] }
  0x67   :  { %2477 = vmatprep.subr.bf16.mxu0 %v2476_v10  ;;  %v2496_v10 = vpack.c.bf16 %v276_v4, %v272_v3  ;;  %v273_v3 = vld [vmem:[%s6144_s1 + $0x790] sm:$0xff] }
  0x68   :  { %2859 = vmatpush1.bf16.msra.mxu1 %v2858_v9  ;;  %v2878_v9 = vpack.c.bf16 %v237_v2, %v233_v63  ;;  %v2512_v63 = vpack.c.bf16 %v308_v57, %v304_v56  ;;  %v307_v2 = vld [vmem:[%s6144_s1 + $0x8a0] sm:$0xff]  ;;  %v305_v56 = vld [vmem:[%s6144_s1 + $0x890] sm:$0xff] }
  0x69   :  { %2861 = vmatprep.subr.bf16.mxu1 %v2860_v14  ;;  %v2880_v14 = vpack.c.bf16 %v246_v6, %v242_v5  ;;  %v277_v5 = vld [vmem:[%s6144_s1 + $0x7b0] sm:$0xff]  ;;  %v312_v6 = vld [vmem:[%s6144_s1 + $0x8c8] sm:$0xff] }
  0x6a   :  { %2479 = vmatpush1.bf16.msra.mxu0 %v2478_v22  ;;  %v2498_v22 = vpack.c.bf16 %v275_v12, %v271_v11  ;;  %v2898_v12 = vpack.c.bf16 %v277_v5, %v273_v3  ;;  %v343_v3 = vld [vmem:[%s6144_s1 + $0x9c0] sm:$0xff] }
  0x6b   :  { %2481 = vmatprep.subr.bf16.mxu0 %v2480_v24  ;;  %v2500_v24 = vpack.c.bf16 %v284_v18, %v280_v17  ;;  %v281_v17 = vld [vmem:[%s6144_s1 + $0x7d0] sm:$0xff] }
  0x6c   :  { %2863 = vmatpush1.bf16.msra.mxu1 %v2862_v23  ;;  %v2882_v23 = vpack.c.bf16 %v245_v15, %v241_v13  ;;  %v315_v15 = vld [vmem:[%s6144_s1 + $0x8e0] sm:$0xff] }
  0x6d   :  { %2865 = vmatprep.subr.bf16.mxu1 %v2864_v28  ;;  %v2884_v28 = vpack.c.bf16 %v254_v21, %v250_v19  ;;  %v285_v19 = vld [vmem:[%s6144_s1 + $0x7f0] sm:$0xff]  ;;  %v320_v21 = vld [vmem:[%s6144_s1 + $0x908] sm:$0xff] }
  0x6e   :  { %2483 = vmatpush1.bf16.msra.mxu0 %v2482_v36  ;;  %v2502_v36 = vpack.c.bf16 %v283_v26, %v279_v25  ;;  %v2902_v26 = vpack.c.bf16 %v285_v19, %v281_v17  ;;  %v355_v17 = vld [vmem:[%s6144_s1 + $0xa20] sm:$0xff] }
  0x6f   :  { %2485 = vmatprep.subr.bf16.mxu0 %v2484_v38  ;;  %v2504_v38 = vpack.c.bf16 %v292_v32, %v288_v31  ;;  %v289_v31 = vld [vmem:[%s6144_s1 + $0x810] sm:$0xff] }
  0x70   :  { %2867 = vmatpush1.bf16.msra.mxu1 %v2866_v37  ;;  %v2886_v37 = vpack.c.bf16 %v253_v29, %v249_v27  ;;  %v323_v29 = vld [vmem:[%s6144_s1 + $0x920] sm:$0xff] }
  0x71   :  { %2869 = vmatprep.subr.bf16.mxu1 %v2868_v42  ;;  %v2888_v42 = vpack.c.bf16 %v262_v35, %v258_v33  ;;  %v293_v33 = vld [vmem:[%s6144_s1 + $0x830] sm:$0xff]  ;;  %v328_v35 = vld [vmem:[%s6144_s1 + $0x948] sm:$0xff] }
  0x72   :  { %2487 = vmatpush1.bf16.msra.mxu0 %v2486_v47  ;;  %v2506_v47 = vpack.c.bf16 %v291_v40, %v287_v39  ;;  %v2906_v40 = vpack.c.bf16 %v293_v33, %v289_v31  ;;  %v363_v31 = vld [vmem:[%s6144_s1 + $0xa60] sm:$0xff] }
  0x73   :  { %2489 = vmatprep.subr.bf16.mxu0 %v2488_v49  ;;  %v2890_v49 = vpack.c.bf16 %v261_v30, %v257_v41  ;;  %v331_v30 = vld [vmem:[%s6144_s1 + $0x960] sm:$0xff] }
  0x74   :  { %2871 = vmatpush1.bf16.msra.mxu1 %v2870_v48  ;;  %v4211_v48 = vld [vmem:[%s6143_s0 + $0x8] sm:$0xff] }
  0x75   :  { %2873 = vmatprep.subr.bf16.mxu1 %v2872_v52  ;;  %v265_v52 = vld [vmem:[%s6144_s1 + $0x750] sm:$0xff]  ;;  %v4224_v53 = vrot.slane %v4211_v48, %v3654_v16 }
  0x76   :  { %2491 = vmatpush1.bf16.msra.mxu0 %v2490_v58  ;;  %v274_v58 = vld [vmem:[%s6144_s1 + $0x798] sm:$0xff]  ;;  %v2894_v62 = vpack.c.bf16 %v269_v55, %v265_v52  ;;  %v339_v55 = vld [vmem:[%s6144_s1 + $0x9a0] sm:$0xff] }
  0x77   :  { %2493 = vmatprep.subr.bf16.mxu0 %v2492_v60  ;;  %v4244_v60 = vcombine.high %v4224_v53, %v4224_v53 }
  0x78   :  { %2875 = vmatpush1.bf16.msra.mxu1 %v2874_v59  ;;  %v278_v59 = vld [vmem:[%s6144_s1 + $0x7b8] sm:$0xff] }
  0x79   :  { %2877 = vmatprep.subr.bf16.mxu1 %v2876_v0  ;;  %v303_v0 = vld [vmem:[%s6144_s1 + $0x880] sm:$0xff]  ;;  %v2896_v4 = vpack.c.bf16 %v278_v59, %v274_v58  ;;  %v344_v58 = vld [vmem:[%s6144_s1 + $0x9c8] sm:$0xff] }
  0x7a   :  { %2495 = vmatpush1.bf16.msra.mxu0 %v2494_v8  ;;  %v316_v8 = vld [vmem:[%s6144_s1 + $0x8e8] sm:$0xff]  ;;  %v2514_v11 = vpack.c.bf16 %v307_v2, %v303_v0 }
  0x7b   :  { %2497 = vmatprep.subr.bf16.mxu0 %v2496_v10  ;;  %v286_v10 = vld [vmem:[%s6144_s1 + $0x7f8] sm:$0xff]  ;;  %v2516_v13 = vpack.c.bf16 %v316_v8, %v312_v6  ;;  %v348_v59 = vld [vmem:[%s6144_s1 + $0x9e8] sm:$0xff]  ;;  %v317_v6 = vld [vmem:[%s6144_s1 + $0x8f0] sm:$0xff] }
  0x7c   :  { %2879 = vmatpush1.bf16.msra.mxu1 %v2878_v9  ;;  %v282_v9 = vld [vmem:[%s6144_s1 + $0x7d8] sm:$0xff]  ;;  %v2532_v2 = vpack.c.bf16 %v348_v59, %v344_v58  ;;  %v352_v8 = vld [vmem:[%s6144_s1 + $0xa08] sm:$0xff]  ;;  %v349_v58 = vld [vmem:[%s6144_s1 + $0x9f0] sm:$0xff] }
  0x7d   :  { %2881 = vmatprep.subr.bf16.mxu1 %v2880_v14  ;;  %v311_v14 = vld [vmem:[%s6144_s1 + $0x8c0] sm:$0xff]  ;;  %v2900_v18 = vpack.c.bf16 %v286_v10, %v282_v9  ;;  %v356_v9 = vld [vmem:[%s6144_s1 + $0xa28] sm:$0xff]  ;;  %v322_v10 = vld [vmem:[%s6144_s1 + $0x918] sm:$0xff] }
  0x7e   :  { %2499 = vmatpush1.bf16.msra.mxu0 %v2498_v22  ;;  %v324_v22 = vld [vmem:[%s6144_s1 + $0x928] sm:$0xff]  ;;  %v2518_v25 = vpack.c.bf16 %v315_v15, %v311_v14  ;;  %v2536_v14 = vpack.c.bf16 %v356_v9, %v352_v8  ;;  %v351_v15 = vld [vmem:[%s6144_s1 + $0xa00] sm:$0xff]  ;;  %v357_v8 = vld [vmem:[%s6144_s1 + $0xa30] sm:$0xff] }
  0x7f   :  { %2501 = vmatprep.subr.bf16.mxu0 %v2500_v24  ;;  %v294_v24 = vld [vmem:[%s6144_s1 + $0x838] sm:$0xff]  ;;  %v2520_v27 = vpack.c.bf16 %v324_v22, %v320_v21  ;;  %v325_v21 = vld [vmem:[%s6144_s1 + $0x930] sm:$0xff]  ;;  %v360_v22 = vld [vmem:[%s6144_s1 + $0xa48] sm:$0xff] }
  0x80   :  { %2883 = vmatpush1.bf16.msra.mxu1 %v2882_v23  ;;  %v290_v23 = vld [vmem:[%s6144_s1 + $0x818] sm:$0xff]  ;;  %v384_v59 = vld [vmem:[%s6144_s1 + $0xb08] sm:$0xff] }
  0x81   :  { %2885 = vmatprep.subr.bf16.mxu1 %v2884_v28  ;;  %v319_v28 = vld [vmem:[%s6144_s1 + $0x900] sm:$0xff]  ;;  %v2904_v32 = vpack.c.bf16 %v294_v24, %v290_v23  ;;  %v364_v23 = vld [vmem:[%s6144_s1 + $0xa68] sm:$0xff]  ;;  %v330_v24 = vld [vmem:[%s6144_s1 + $0x958] sm:$0xff] }
  0x82   :  { %2503 = vmatpush1.bf16.msra.mxu0 %v2502_v36  ;;  %v332_v36 = vld [vmem:[%s6144_s1 + $0x968] sm:$0xff]  ;;  %v2522_v39 = vpack.c.bf16 %v323_v29, %v319_v28  ;;  %v2540_v28 = vpack.c.bf16 %v364_v23, %v360_v22  ;;  %v359_v29 = vld [vmem:[%s6144_s1 + $0xa40] sm:$0xff]  ;;  %v365_v22 = vld [vmem:[%s6144_s1 + $0xa70] sm:$0xff] }
  0x83   :  { %2505 = vmatprep.subr.bf16.mxu0 %v2504_v38  ;;  %v302_v38 = vld [vmem:[%s6144_s1 + $0x878] sm:$0xff]  ;;  %v2524_v41 = vpack.c.bf16 %v332_v36, %v328_v35  ;;  %v333_v35 = vld [vmem:[%s6144_s1 + $0x970] sm:$0xff]  ;;  %v368_v36 = vld [vmem:[%s6144_s1 + $0xa88] sm:$0xff] }
  0x84   :  { %2887 = vmatpush1.bf16.msra.mxu1 %v2886_v37  ;;  %v298_v37 = vld [vmem:[%s6144_s1 + $0x858] sm:$0xff]  ;;  %v392_v9 = vld [vmem:[%s6144_s1 + $0xb48] sm:$0xff] }
  0x85   :  { %2889 = vmatprep.subr.bf16.mxu1 %v2888_v42  ;;  %1066 = vmatmul.mubr.f32.vlgmr.msra.gmra.mrb[0].mxu0 %v3790_v20  ;;  %v327_v42 = vld [vmem:[%s6144_s1 + $0x940] sm:$0xff]  ;;  %v2908_v44 = vpack.c.bf16 %v302_v38, %v298_v37  ;;  %v372_v37 = vld [vmem:[%s6144_s1 + $0xaa8] sm:$0xff]  ;;  %v338_v38 = vld [vmem:[%s6144_s1 + $0x998] sm:$0xff] }
  0x86   :  { %2507 = vmatpush1.bf16.msra.mxu0 %v2506_v47  ;;  %1136 = vmatprep.mubr.f32.mxu0 %v4244_v60  ;;  %v340_v47 = vld [vmem:[%s6144_s1 + $0x9a8] sm:$0xff]  ;;  %v2526_v34 = vpack.c.bf16 %v331_v30, %v327_v42  ;;  %v2544_v42 = vpack.c.bf16 %v372_v37, %v368_v36  ;;  %v367_v30 = vld [vmem:[%s6144_s1 + $0xa80] sm:$0xff]  ;;  %v373_v36 = vld [vmem:[%s6144_s1 + $0xab0] sm:$0xff] }
  0x87   :  { %2509 = vmatprep.subr.bf16.mxu0 %v2508_v50  ;;  %v310_v50 = vld [vmem:[%s6144_s1 + $0x8b8] sm:$0xff]  ;;  %v2528_v52 = vpack.c.bf16 %v340_v47, %v336_v46  ;;  %v341_v46 = vld [vmem:[%s6144_s1 + $0x9b0] sm:$0xff]  ;;  %v376_v47 = vld [vmem:[%s6144_s1 + $0xac8] sm:$0xff] }
  0x88   :  { %2891 = vmatpush1.bf16.msra.mxu1 %v2890_v49  ;;  %v306_v49 = vld [vmem:[%s6144_s1 + $0x898] sm:$0xff]  ;;  %v400_v23 = vld [vmem:[%s6144_s1 + $0xb88] sm:$0xff] }
  0x89   :  { %2893 = vmatprep.subr.bf16.mxu1 %v2892_v54  ;;  %v335_v54 = vld [vmem:[%s6144_s1 + $0x980] sm:$0xff]  ;;  %v2912_v57 = vpack.c.bf16 %v310_v50, %v306_v49  ;;  %v380_v49 = vld [vmem:[%s6144_s1 + $0xae8] sm:$0xff]  ;;  %v346_v50 = vld [vmem:[%s6144_s1 + $0x9d8] sm:$0xff] }
  0x8a   :  { %2511 = vmatpush1.bf16.msra.mxu0 %v2510_v61  ;;  %v314_v61 = vld [vmem:[%s6144_s1 + $0x8d8] sm:$0xff]  ;;  %v408_v37 = vld [vmem:[%s6144_s1 + $0xbc8] sm:$0xff] }
  0x8b   :  { %2513 = vmatprep.subr.bf16.mxu0 %v2512_v63  ;;  %v2530_v63 = vpack.c.bf16 %v339_v55, %v335_v54  ;;  %v2548_v54 = vpack.c.bf16 %v380_v49, %v376_v47  ;;  %v375_v55 = vld [vmem:[%s6144_s1 + $0xac0] sm:$0xff]  ;;  %v416_v49 = vld [vmem:[%s6144_s1 + $0xc08] sm:$0xff] }
  0x8c   :  { %2895 = vmatpush1.bf16.msra.mxu1 %v2894_v62  ;;  %v318_v62 = vld [vmem:[%s6144_s1 + $0x8f8] sm:$0xff] }
  0x8d   :  { %2897 = vmatprep.subr.bf16.mxu1 %v2896_v4  ;;  %v313_v4 = vld [vmem:[%s6144_s1 + $0x8d0] sm:$0xff]  ;;  %v2916_v5 = vpack.c.bf16 %v318_v62, %v314_v61  ;;  %v388_v61 = vld [vmem:[%s6144_s1 + $0xb28] sm:$0xff]  ;;  %v354_v62 = vld [vmem:[%s6144_s1 + $0xa18] sm:$0xff] }
  0x8e   :  { %2515 = vmatpush1.bf16.msra.mxu0 %v2514_v11  ;;  %v326_v11 = vld [vmem:[%s6144_s1 + $0x938] sm:$0xff] }
  0x8f   :  { %2517 = vmatprep.subr.bf16.mxu0 %v2516_v13  ;;  %v2918_v13 = vpack.c.bf16 %v317_v6, %v313_v4  ;;  %v2920_v19 = vpack.c.bf16 %v326_v11, %v322_v10  ;;  %v387_v4 = vld [vmem:[%s6144_s1 + $0xb20] sm:$0xff]  ;;  %v396_v10 = vld [vmem:[%s6144_s1 + $0xb68] sm:$0xff]  ;;  %v362_v11 = vld [vmem:[%s6144_s1 + $0xa58] sm:$0xff] }
  0x90   :  { %2899 = vmatpush1.bf16.msra.mxu1 %v2898_v12 }
  0x91   :  { %2901 = vmatprep.subr.bf16.mxu1 %v2900_v18  ;;  %v321_v18 = vld [vmem:[%s6144_s1 + $0x910] sm:$0xff] }
  0x92   :  { %2519 = vmatpush1.bf16.msra.mxu0 %v2518_v25  ;;  %v334_v25 = vld [vmem:[%s6144_s1 + $0x978] sm:$0xff] }
  0x93   :  { %2521 = vmatprep.subr.bf16.mxu0 %v2520_v27  ;;  %v2922_v27 = vpack.c.bf16 %v325_v21, %v321_v18  ;;  %v2924_v33 = vpack.c.bf16 %v334_v25, %v330_v24  ;;  %v395_v18 = vld [vmem:[%s6144_s1 + $0xb60] sm:$0xff]  ;;  %v404_v24 = vld [vmem:[%s6144_s1 + $0xba8] sm:$0xff]  ;;  %v370_v25 = vld [vmem:[%s6144_s1 + $0xa98] sm:$0xff] }
  0x94   :  { %2903 = vmatpush1.bf16.msra.mxu1 %v2902_v26  ;;  %v2538_v26 = vpack.c.bf16 %v355_v17, %v351_v15  ;;  %v2556_v15 = vpack.c.bf16 %v396_v10, %v392_v9  ;;  %v391_v17 = vld [vmem:[%s6144_s1 + $0xb40] sm:$0xff]  ;;  %v393_v9 = vld [vmem:[%s6144_s1 + $0xb50] sm:$0xff] }
  0x95   :  { %2905 = vmatprep.subr.bf16.mxu1 %v2904_v32  ;;  %v329_v32 = vld [vmem:[%s6144_s1 + $0x950] sm:$0xff] }
  0x96   :  { %2523 = vmatpush1.bf16.msra.mxu0 %v2522_v39  ;;  %v342_v39 = vld [vmem:[%s6144_s1 + $0x9b8] sm:$0xff] }
  0x97   :  { %1563 = vmatmul.mubr.f32.vlgmr.msra.gmra.mrb[2].mxu1 %v3790_v20  ;;  %2525 = vmatprep.subr.bf16.mxu0 %v2524_v41  ;;  %v309_v20 = vld [vmem:[%s6144_s1 + $0x8b0] sm:$0xff]  ;;  %v2926_v41 = vpack.c.bf16 %v333_v35, %v329_v32  ;;  %v2928_v45 = vpack.c.bf16 %v342_v39, %v338_v38  ;;  %v403_v32 = vld [vmem:[%s6144_s1 + $0xba0] sm:$0xff]  ;;  %v412_v38 = vld [vmem:[%s6144_s1 + $0xbe8] sm:$0xff] }
  0x98   :  { %2907 = vmatpush1.bf16.msra.mxu1 %v2906_v40  ;;  %1633 = vmatprep.mubr.f32.mxu1 %v4244_v60  ;;  %v2914_v0 = vpack.c.bf16 %v309_v20, %v305_v56  ;;  %v347_v60 = vld [vmem:[%s6144_s1 + $0x9e0] sm:$0xff]  ;;  %v2542_v40 = vpack.c.bf16 %v363_v31, %v359_v29  ;;  %v2560_v29 = vpack.c.bf16 %v404_v24, %v400_v23  ;;  %v378_v39 = vld [vmem:[%s6144_s1 + $0xad8] sm:$0xff]  ;;  %v401_v23 = vld [vmem:[%s6144_s1 + $0xb90] sm:$0xff] }
  0x99   :  { %2909 = vmatprep.subr.bf16.mxu1 %v2908_v44  ;;  %v2534_v12 = vpack.c.bf16 %v347_v60, %v343_v3  ;;  %v337_v44 = vld [vmem:[%s6144_s1 + $0x990] sm:$0xff]  ;;  %v379_v56 = vld [vmem:[%s6144_s1 + $0xae0] sm:$0xff]  ;;  %v2552_v3 = vpack.c.bf16 %v388_v61, %v384_v59 }
  0x9a   :  { %2527 = vmatpush1.bf16.msra.mxu0 %v2526_v34  ;;  %v350_v34 = vld [vmem:[%s6144_s1 + $0x9f8] sm:$0xff]  ;;  %v383_v60 = vld [vmem:[%s6144_s1 + $0xb00] sm:$0xff]  ;;  %v389_v61 = vld [vmem:[%s6144_s1 + $0xb30] sm:$0xff] }
  0x9b   :  { %2529 = vmatprep.subr.bf16.mxu0 %v2528_v52  ;;  %v2930_v52 = vpack.c.bf16 %v341_v46, %v337_v44  ;;  %v2932_v20 = vpack.c.bf16 %v350_v34, %v346_v50  ;;  %v399_v31 = vld [vmem:[%s6144_s1 + $0xb80] sm:$0xff]  ;;  %v377_v46 = vld [vmem:[%s6144_s1 + $0xad0] sm:$0xff]  ;;  %v420_v50 = vld [vmem:[%s6144_s1 + $0xc28] sm:$0xff] }
  0x9c   :  { %2911 = vmatpush1.bf16.msra.mxu1 %v2910_v51  ;;  %v2546_v51 = vpack.c.bf16 %v371_v43, %v367_v30  ;;  %v2564_v43 = vpack.c.bf16 %v412_v38, %v408_v37  ;;  %v407_v44 = vld [vmem:[%s6144_s1 + $0xbc0] sm:$0xff]  ;;  %v386_v34 = vld [vmem:[%s6144_s1 + $0xb18] sm:$0xff]  ;;  %v409_v37 = vld [vmem:[%s6144_s1 + $0xbd0] sm:$0xff] }
  0x9d   :  { %2913 = vmatprep.subr.bf16.mxu1 %v2912_v57  ;;  %v345_v57 = vld [vmem:[%s6144_s1 + $0x9d0] sm:$0xff] }
  0x9e   :  { %2531 = vmatpush1.bf16.msra.mxu0 %v2530_v63  ;;  %v358_v63 = vld [vmem:[%s6144_s1 + $0xa38] sm:$0xff] }
  0x9f   :  { %2533 = vmatprep.subr.bf16.mxu0 %v2532_v2  ;;  %v2934_v2 = vpack.c.bf16 %v349_v58, %v345_v57  ;;  %v2936_v6 = vpack.c.bf16 %v358_v63, %v354_v62  ;;  %v415_v57 = vld [vmem:[%s6144_s1 + $0xc00] sm:$0xff]  ;;  %v385_v58 = vld [vmem:[%s6144_s1 + $0xb10] sm:$0xff]  ;;  %v424_v62 = vld [vmem:[%s6144_s1 + $0xc48] sm:$0xff] }
  0xa0   :  { %2915 = vmatpush1.bf16.msra.mxu1 %v2914_v0  ;;  %v2550_v0 = vpack.c.bf16 %v379_v56, %v375_v55  ;;  %v2568_v56 = vpack.c.bf16 %v420_v50, %v416_v49  ;;  %v428_v63 = vld [vmem:[%s6144_s1 + $0xc68] sm:$0xff]  ;;  %v421_v50 = vld [vmem:[%s6144_s1 + $0xc30] sm:$0xff] }
  0xa1   :  { %2917 = vmatprep.subr.bf16.mxu1 %v2916_v5  ;;  %v353_v5 = vld [vmem:[%s6144_s1 + $0xa10] sm:$0xff] }
  0xa2   :  { %2535 = vmatpush1.bf16.msra.mxu0 %v2534_v12  ;;  %v366_v12 = vld [vmem:[%s6144_s1 + $0xa78] sm:$0xff] }
  0xa3   :  { %2537 = vmatprep.subr.bf16.mxu0 %v2536_v14  ;;  %v2938_v14 = vpack.c.bf16 %v357_v8, %v353_v5  ;;  %v2940_v21 = vpack.c.bf16 %v366_v12, %v362_v11  ;;  %v2572_v5 = vpack.c.bf16 %v428_v63, %v424_v62  ;;  %v427_v8 = vld [vmem:[%s6144_s1 + $0xc60] sm:$0xff]  ;;  %v397_v11 = vld [vmem:[%s6144_s1 + $0xb70] sm:$0xff]  ;;  %v432_v12 = vld [vmem:[%s6144_s1 + $0xc88] sm:$0xff] }
  0xa4   :  { %2919 = vmatpush1.bf16.msra.mxu1 %v2918_v13  ;;  %v2554_v13 = vpack.c.bf16 %v387_v4, %v383_v60  ;;  %v2954_v4 = vpack.c.bf16 %v389_v61, %v385_v58  ;;  %v455_v58 = vld [vmem:[%s6144_s1 + $0xd40] sm:$0xff]  ;;  %v425_v61 = vld [vmem:[%s6144_s1 + $0xc50] sm:$0xff] }
  0xa5   :  { %2921 = vmatprep.subr.bf16.mxu1 %v2920_v19  ;;  %v361_v19 = vld [vmem:[%s6144_s1 + $0xa50] sm:$0xff] }
  0xa6   :  { %2539 = vmatpush1.bf16.msra.mxu0 %v2538_v26  ;;  %v374_v26 = vld [vmem:[%s6144_s1 + $0xab8] sm:$0xff]  ;;  %v429_v63 = vld [vmem:[%s6144_s1 + $0xc70] sm:$0xff] }
  0xa7   :  { %2541 = vmatprep.subr.bf16.mxu0 %v2540_v28  ;;  %v2942_v28 = vpack.c.bf16 %v365_v22, %v361_v19  ;;  %v2944_v35 = vpack.c.bf16 %v374_v26, %v370_v25  ;;  %v435_v22 = vld [vmem:[%s6144_s1 + $0xca0] sm:$0xff]  ;;  %v405_v25 = vld [vmem:[%s6144_s1 + $0xbb0] sm:$0xff]  ;;  %v440_v26 = vld [vmem:[%s6144_s1 + $0xcc8] sm:$0xff] }
  0xa8   :  { %2923 = vmatpush1.bf16.msra.mxu1 %v2922_v27  ;;  %v2558_v27 = vpack.c.bf16 %v395_v18, %v391_v17  ;;  %v2958_v18 = vpack.c.bf16 %v397_v11, %v393_v9  ;;  %v463_v9 = vld [vmem:[%s6144_s1 + $0xd80] sm:$0xff]  ;;  %v433_v11 = vld [vmem:[%s6144_s1 + $0xc90] sm:$0xff] }
  0xa9   :  { %2925 = vmatprep.subr.bf16.mxu1 %v2924_v33  ;;  %v369_v33 = vld [vmem:[%s6144_s1 + $0xa90] sm:$0xff] }
  0xaa   :  { %2543 = vmatpush1.bf16.msra.mxu0 %v2542_v40  ;;  %v382_v40 = vld [vmem:[%s6144_s1 + $0xaf8] sm:$0xff]  ;;  %v2946_v30 = vpack.c.bf16 %v373_v36, %v369_v33  ;;  %v443_v36 = vld [vmem:[%s6144_s1 + $0xce0] sm:$0xff] }
  0xab   :  { %2545 = vmatprep.subr.bf16.mxu0 %v2544_v42  ;;  %v874_v42 = vcombine.high %v4211_v48, %v4211_v48  ;;  %v2948_v47 = vpack.c.bf16 %v382_v40, %v378_v39  ;;  %v381_v48 = vld [vmem:[%s6144_s1 + $0xaf0] sm:$0xff]  ;;  %v448_v40 = vld [vmem:[%s6144_s1 + $0xd08] sm:$0xff] }
  0xac   :  { %2927 = vmatpush1.bf16.msra.mxu1 %v2926_v41  ;;  %v2562_v41 = vpack.c.bf16 %v403_v32, %v399_v31  ;;  %v2950_v55 = vpack.c.bf16 %v381_v48, %v377_v46  ;;  %v2962_v32 = vpack.c.bf16 %v405_v25, %v401_v23  ;;  %v413_v39 = vld [vmem:[%s6144_s1 + $0xbf0] sm:$0xff]  ;;  %v447_v46 = vld [vmem:[%s6144_s1 + $0xd00] sm:$0xff] }
  0xad   :  { %2929 = vmatprep.subr.bf16.mxu1 %v2928_v45  ;;  %v411_v45 = vld [vmem:[%s6144_s1 + $0xbe0] sm:$0xff]  ;;  %v417_v48 = vld [vmem:[%s6144_s1 + $0xc10] sm:$0xff] }
  0xae   :  { %2547 = vmatpush1.bf16.msra.mxu0 %v2546_v51  ;;  %v390_v51 = vld [vmem:[%s6144_s1 + $0xb38] sm:$0xff]  ;;  %v441_v23 = vld [vmem:[%s6144_s1 + $0xcd0] sm:$0xff] }
  0xaf   :  { %2549 = vmatprep.subr.bf16.mxu0 %v2548_v54  ;;  %v4588_v54 = vrot.slane %v874_v42, %v3654_v16  ;;  %v2952_v59 = vpack.c.bf16 %v390_v51, %v386_v34  ;;  %v418_v42 = vld [vmem:[%s6144_s1 + $0xc18] sm:$0xff]  ;;  %v456_v34 = vld [vmem:[%s6144_s1 + $0xd48] sm:$0xff]  ;;  %v445_v25 = vld [vmem:[%s6144_s1 + $0xcf0] sm:$0xff] }
  0xb0   :  { %2931 = vmatpush1.bf16.msra.mxu1 %v2930_v52  ;;  %v2566_v52 = vpack.c.bf16 %v411_v45, %v407_v44  ;;  %v2966_v44 = vpack.c.bf16 %v413_v39, %v409_v37  ;;  %v460_v51 = vld [vmem:[%s6144_s1 + $0xd68] sm:$0xff]  ;;  %v449_v37 = vld [vmem:[%s6144_s1 + $0xd10] sm:$0xff] }
  0xb1   :  { %2933 = vmatprep.subr.bf16.mxu1 %v2932_v20  ;;  %v419_v20 = vld [vmem:[%s6144_s1 + $0xc20] sm:$0xff]  ;;  %v4616_v60 = vcombine.high %v4588_v54, %v4588_v54  ;;  %v453_v39 = vld [vmem:[%s6144_s1 + $0xd30] sm:$0xff] }
  0xb2   :  { %2551 = vmatpush1.bf16.msra.mxu0 %v2550_v0  ;;  %v394_v0 = vld [vmem:[%s6144_s1 + $0xb58] sm:$0xff] }
  0xb3   :  { %2553 = vmatprep.subr.bf16.mxu0 %v2552_v3  ;;  %v2570_v3 = vpack.c.bf16 %v419_v20, %v415_v57  ;;  %v2970_v57 = vpack.c.bf16 %v421_v50, %v417_v48  ;;  %v2588_v20 = vpack.c.bf16 %v460_v51, %v456_v34  ;;  %v457_v48 = vld [vmem:[%s6144_s1 + $0xd50] sm:$0xff]  ;;  %v496_v34 = vld [vmem:[%s6144_s1 + $0xe88] sm:$0xff] }
  0xb4   :  { %2935 = vmatpush1.bf16.msra.mxu1 %v2934_v2  ;;  %v398_v2 = vld [vmem:[%s6144_s1 + $0xb78] sm:$0xff]  ;;  %v461_v50 = vld [vmem:[%s6144_s1 + $0xd70] sm:$0xff]  ;;  %v500_v51 = vld [vmem:[%s6144_s1 + $0xea8] sm:$0xff] }
  0xb5   :  { %2937 = vmatprep.subr.bf16.mxu1 %v2936_v6  ;;  %v423_v6 = vld [vmem:[%s6144_s1 + $0xc40] sm:$0xff]  ;;  %v2956_v10 = vpack.c.bf16 %v398_v2, %v394_v0  ;;  %v464_v0 = vld [vmem:[%s6144_s1 + $0xd88] sm:$0xff] }
  0xb6   :  { %2555 = vmatpush1.bf16.msra.mxu0 %v2554_v13  ;;  %v436_v13 = vld [vmem:[%s6144_s1 + $0xca8] sm:$0xff]  ;;  %v2574_v17 = vpack.c.bf16 %v427_v8, %v423_v6  ;;  %v2974_v6 = vpack.c.bf16 %v429_v63, %v425_v61  ;;  %v465_v61 = vld [vmem:[%s6144_s1 + $0xd90] sm:$0xff] }
  0xb7   :  { %2557 = vmatprep.subr.bf16.mxu0 %v2556_v15  ;;  %v406_v15 = vld [vmem:[%s6144_s1 + $0xbb8] sm:$0xff]  ;;  %v2576_v19 = vpack.c.bf16 %v436_v13, %v432_v12  ;;  %v468_v2 = vld [vmem:[%s6144_s1 + $0xda8] sm:$0xff]  ;;  %v469_v63 = vld [vmem:[%s6144_s1 + $0xdb0] sm:$0xff] }
  0xb8   :  { %2939 = vmatpush1.bf16.msra.mxu1 %v2938_v14  ;;  %v402_v14 = vld [vmem:[%s6144_s1 + $0xb98] sm:$0xff]  ;;  %v2592_v8 = vpack.c.bf16 %v468_v2, %v464_v0  ;;  %v472_v13 = vld [vmem:[%s6144_s1 + $0xdc8] sm:$0xff] }
  0xb9   :  { %2941 = vmatprep.subr.bf16.mxu1 %v2940_v21  ;;  %v431_v21 = vld [vmem:[%s6144_s1 + $0xc80] sm:$0xff]  ;;  %v2960_v24 = vpack.c.bf16 %v406_v15, %v402_v14  ;;  %v476_v14 = vld [vmem:[%s6144_s1 + $0xde8] sm:$0xff]  ;;  %v442_v15 = vld [vmem:[%s6144_s1 + $0xcd8] sm:$0xff] }
  0xba   :  { %2559 = vmatpush1.bf16.msra.mxu0 %v2558_v27  ;;  %v444_v27 = vld [vmem:[%s6144_s1 + $0xce8] sm:$0xff]  ;;  %v2578_v31 = vpack.c.bf16 %v435_v22, %v431_v21  ;;  %v2596_v21 = vpack.c.bf16 %v476_v14, %v472_v13  ;;  %v471_v22 = vld [vmem:[%s6144_s1 + $0xdc0] sm:$0xff]  ;;  %v477_v14 = vld [vmem:[%s6144_s1 + $0xdf0] sm:$0xff] }
  0xbb   :  { %2561 = vmatprep.subr.bf16.mxu0 %v2560_v29  ;;  %v414_v29 = vld [vmem:[%s6144_s1 + $0xbf8] sm:$0xff]  ;;  %v2580_v33 = vpack.c.bf16 %v444_v27, %v440_v26  ;;  %v480_v26 = vld [vmem:[%s6144_s1 + $0xe08] sm:$0xff] }
  0xbc   :  { %2943 = vmatpush1.bf16.msra.mxu1 %v2942_v28  ;;  %v410_v28 = vld [vmem:[%s6144_s1 + $0xbd8] sm:$0xff]  ;;  %v484_v27 = vld [vmem:[%s6144_s1 + $0xe28] sm:$0xff] }
  0xbd   :  { %2945 = vmatprep.subr.bf16.mxu1 %v2944_v35  ;;  %v439_v35 = vld [vmem:[%s6144_s1 + $0xcc0] sm:$0xff]  ;;  %v2964_v38 = vpack.c.bf16 %v414_v29, %v410_v28  ;;  %v450_v28 = vld [vmem:[%s6144_s1 + $0xd18] sm:$0xff]  ;;  %v504_v0 = vld [vmem:[%s6144_s1 + $0xec8] sm:$0xff] }
  0xbe   :  { %2563 = vmatpush1.bf16.msra.mxu0 %v2562_v41  ;;  %v452_v41 = vld [vmem:[%s6144_s1 + $0xd28] sm:$0xff]  ;;  %v454_v29 = vld [vmem:[%s6144_s1 + $0xd38] sm:$0xff] }
  0xbf   :  { %2565 = vmatprep.subr.bf16.mxu0 %v2564_v43  ;;  %v2582_v43 = vpack.c.bf16 %v443_v36, %v439_v35  ;;  %v2584_v45 = vpack.c.bf16 %v452_v41, %v448_v40  ;;  %v479_v35 = vld [vmem:[%s6144_s1 + $0xe00] sm:$0xff]  ;;  %v488_v40 = vld [vmem:[%s6144_s1 + $0xe48] sm:$0xff] }
  0xc0   :  { %2947 = vmatpush1.bf16.msra.mxu1 %v2946_v30  ;;  %v422_v30 = vld [vmem:[%s6144_s1 + $0xc38] sm:$0xff]  ;;  %v483_v36 = vld [vmem:[%s6144_s1 + $0xe20] sm:$0xff]  ;;  %v492_v41 = vld [vmem:[%s6144_s1 + $0xe68] sm:$0xff] }
  0xc1   :  { %2949 = vmatprep.subr.bf16.mxu1 %v2948_v47  ;;  %v451_v47 = vld [vmem:[%s6144_s1 + $0xd20] sm:$0xff]  ;;  %v2968_v49 = vpack.c.bf16 %v422_v30, %v418_v42  ;;  %v458_v42 = vld [vmem:[%s6144_s1 + $0xd58] sm:$0xff]  ;;  %v508_v2 = vld [vmem:[%s6144_s1 + $0xee8] sm:$0xff] }
  0xc2   :  { %2567 = vmatpush1.bf16.msra.mxu0 %v2566_v52  ;;  %v426_v52 = vld [vmem:[%s6144_s1 + $0xc58] sm:$0xff] }
  0xc3   :  { %2569 = vmatprep.subr.bf16.mxu0 %v2568_v56  ;;  %v2586_v56 = vpack.c.bf16 %v451_v47, %v447_v46  ;;  %v462_v30 = vld [vmem:[%s6144_s1 + $0xd78] sm:$0xff]  ;;  %v487_v46 = vld [vmem:[%s6144_s1 + $0xe40] sm:$0xff] }
  0xc4   :  { %2951 = vmatpush1.bf16.msra.mxu1 %v2950_v55  ;;  %v430_v55 = vld [vmem:[%s6144_s1 + $0xc78] sm:$0xff]  ;;  %v491_v47 = vld [vmem:[%s6144_s1 + $0xe60] sm:$0xff] }
  0xc5   :  { %2953 = vmatprep.subr.bf16.mxu1 %v2952_v59  ;;  %1137 = vmatmul.mubr.f32.vlgmr.msra.gmra.mrb[0].mxu0 %v4224_v53  ;;  %v459_v59 = vld [vmem:[%s6144_s1 + $0xd60] sm:$0xff]  ;;  %v2972_v62 = vpack.c.bf16 %v430_v55, %v426_v52  ;;  %v466_v52 = vld [vmem:[%s6144_s1 + $0xd98] sm:$0xff] }
  0xc6   :  { %2571 = vmatpush1.bf16.msra.mxu0 %v2570_v3  ;;  %1207 = vmatprep.mubr.f32.mxu0 %v4616_v60  ;;  %v434_v3 = vld [vmem:[%s6144_s1 + $0xc98] sm:$0xff] }
  0xc7   :  { %2573 = vmatprep.subr.bf16.mxu0 %v2572_v5  ;;  %v2590_v5 = vpack.c.bf16 %v459_v59, %v455_v58  ;;  %v470_v55 = vld [vmem:[%s6144_s1 + $0xdb8] sm:$0xff]  ;;  %v495_v58 = vld [vmem:[%s6144_s1 + $0xe80] sm:$0xff] }
  0xc8   :  { %2955 = vmatpush1.bf16.msra.mxu1 %v2954_v4  ;;  %v438_v4 = vld [vmem:[%s6144_s1 + $0xcb8] sm:$0xff]  ;;  %v499_v59 = vld [vmem:[%s6144_s1 + $0xea0] sm:$0xff] }
  0xc9   :  { %2957 = vmatprep.subr.bf16.mxu1 %v2956_v10  ;;  %v467_v10 = vld [vmem:[%s6144_s1 + $0xda0] sm:$0xff]  ;;  %v2976_v12 = vpack.c.bf16 %v438_v4, %v434_v3  ;;  %v474_v4 = vld [vmem:[%s6144_s1 + $0xdd8] sm:$0xff] }
  0xca   :  { %2575 = vmatpush1.bf16.msra.mxu0 %v2574_v17  ;;  %v446_v17 = vld [vmem:[%s6144_s1 + $0xcf8] sm:$0xff] }
  0xcb   :  { %2577 = vmatprep.subr.bf16.mxu0 %v2576_v19 }
  0xcc   :  { %2959 = vmatpush1.bf16.msra.mxu1 %v2958_v18  ;;  %v2594_v18 = vpack.c.bf16 %v467_v10, %v463_v9  ;;  %v2994_v9 = vpack.c.bf16 %v469_v63, %v465_v61  ;;  %v2612_v10 = vpack.c.bf16 %v508_v2, %v504_v0  ;;  %v505_v63 = vld [vmem:[%s6144_s1 + $0xed0] sm:$0xff] }
  0xcd   :  { %2961 = vmatprep.subr.bf16.mxu1 %v2960_v24  ;;  %v2980_v24 = vpack.c.bf16 %v446_v17, %v442_v15  ;;  %v512_v15 = vld [vmem:[%s6144_s1 + $0xf08] sm:$0xff]  ;;  %v4974_v0 = vld [vmem:[%s6143_s0 + $0x10] sm:$0xff] }
  0xce   :  { %2579 = vmatpush1.bf16.msra.mxu0 %v2578_v31  ;;  %v516_v17 = vld [vmem:[%s6144_s1 + $0xf28] sm:$0xff] }
  0xcf   :  { %2581 = vmatprep.subr.bf16.mxu0 %v2580_v33  ;;  %v2600_v33 = vpack.c.bf16 %v484_v27, %v480_v26  ;;  %v485_v27 = vld [vmem:[%s6144_s1 + $0xe30] sm:$0xff] }
  0xd0   :  { %2963 = vmatpush1.bf16.msra.mxu1 %v2962_v32  ;;  %v2982_v32 = vpack.c.bf16 %v445_v25, %v441_v23  ;;  %v511_v23 = vld [vmem:[%s6144_s1 + $0xf00] sm:$0xff]  ;;  %v481_v25 = vld [vmem:[%s6144_s1 + $0xe10] sm:$0xff] }
  0xd1   :  { %2965 = vmatprep.subr.bf16.mxu1 %v2964_v38  ;;  %v2984_v38 = vpack.c.bf16 %v454_v29, %v450_v28  ;;  %v520_v28 = vld [vmem:[%s6144_s1 + $0xf48] sm:$0xff] }
  0xd2   :  { %2583 = vmatpush1.bf16.msra.mxu0 %v2582_v43  ;;  %v2602_v43 = vpack.c.bf16 %v483_v36, %v479_v35  ;;  %v524_v29 = vld [vmem:[%s6144_s1 + $0xf68] sm:$0xff]  ;;  %v3002_v35 = vpack.c.bf16 %v485_v27, %v481_v25  ;;  %v551_v25 = vld [vmem:[%s6144_s1 + $0x1040] sm:$0xff] }
  0xd3   :  { %2585 = vmatprep.subr.bf16.mxu0 %v2584_v45  ;;  %v2604_v45 = vpack.c.bf16 %v492_v41, %v488_v40  ;;  %v2620_v36 = vpack.c.bf16 %v524_v29, %v520_v28  ;;  %v493_v41 = vld [vmem:[%s6144_s1 + $0xe70] sm:$0xff]  ;;  %v555_v29 = vld [vmem:[%s6144_s1 + $0x1060] sm:$0xff] }
  0xd4   :  { %2967 = vmatpush1.bf16.msra.mxu1 %v2966_v44  ;;  %v2986_v44 = vpack.c.bf16 %v453_v39, %v449_v37  ;;  %v519_v37 = vld [vmem:[%s6144_s1 + $0xf40] sm:$0xff]  ;;  %v489_v39 = vld [vmem:[%s6144_s1 + $0xe50] sm:$0xff] }
  0xd5   :  { %2969 = vmatprep.subr.bf16.mxu1 %v2968_v49  ;;  %v2988_v49 = vpack.c.bf16 %v462_v30, %v458_v42  ;;  %v528_v42 = vld [vmem:[%s6144_s1 + $0xf88] sm:$0xff] }
  0xd6   :  { %2587 = vmatpush1.bf16.msra.mxu0 %v2586_v56  ;;  %v2606_v56 = vpack.c.bf16 %v491_v47, %v487_v46  ;;  %v532_v30 = vld [vmem:[%s6144_s1 + $0xfa8] sm:$0xff]  ;;  %v3006_v46 = vpack.c.bf16 %v493_v41, %v489_v39 }
  0xd7   :  { %1634 = vmatmul.mubr.f32.vlgmr.msra.gmra.mrb[2].mxu1 %v4224_v53  ;;  %2589 = vmatprep.subr.bf16.mxu0 %v2588_v20  ;;  %v437_v53 = vld [vmem:[%s6144_s1 + $0xcb0] sm:$0xff]  ;;  %v2608_v20 = vpack.c.bf16 %v500_v51, %v496_v34  ;;  %v2624_v47 = vpack.c.bf16 %v532_v30, %v528_v42 }
  0xd8   :  { %2971 = vmatpush1.bf16.msra.mxu1 %v2970_v57  ;;  %1704 = vmatprep.mubr.f32.mxu1 %v4616_v60  ;;  %v2978_v19 = vpack.c.bf16 %v437_v53, %v433_v11  ;;  %v475_v60 = vld [vmem:[%s6144_s1 + $0xde0] sm:$0xff]  ;;  %v2990_v57 = vpack.c.bf16 %v461_v50, %v457_v48  ;;  %v473_v53 = vld [vmem:[%s6144_s1 + $0xdd0] sm:$0xff] }
  0xd9   :  { %2973 = vmatprep.subr.bf16.mxu1 %v2972_v62  ;;  %v2598_v31 = vpack.c.bf16 %v475_v60, %v471_v22  ;;  %v2992_v62 = vpack.c.bf16 %v470_v55, %v466_v52  ;;  %v503_v11 = vld [vmem:[%s6144_s1 + $0xec0] sm:$0xff]  ;;  %v2998_v22 = vpack.c.bf16 %v477_v14, %v473_v53  ;;  %v2616_v60 = vpack.c.bf16 %v516_v17, %v512_v15  ;;  %v497_v50 = vld [vmem:[%s6144_s1 + $0xe90] sm:$0xff]  ;;  %v536_v52 = vld [vmem:[%s6144_s1 + $0xfc8] sm:$0xff] }
  0xda   :  { %2591 = vmatpush1.bf16.msra.mxu0 %v2590_v5  ;;  %v478_v5 = vld [vmem:[%s6144_s1 + $0xdf8] sm:$0xff]  ;;  %v527_v48 = vld [vmem:[%s6144_s1 + $0xf80] sm:$0xff]  ;;  %v501_v51 = vld [vmem:[%s6144_s1 + $0xeb0] sm:$0xff] }
  0xdb   :  { %2593 = vmatprep.subr.bf16.mxu0 %v2592_v8  ;;  %v2610_v8 = vpack.c.bf16 %v499_v59, %v495_v58  ;;  %v2996_v13 = vpack.c.bf16 %v478_v5, %v474_v4  ;;  %v540_v55 = vld [vmem:[%s6144_s1 + $0xfe8] sm:$0xff]  ;;  %v535_v58 = vld [vmem:[%s6144_s1 + $0xfc0] sm:$0xff]  ;;  %v3010_v59 = vpack.c.bf16 %v501_v51, %v497_v50  ;;  %v509_v4 = vld [vmem:[%s6144_s1 + $0xef0] sm:$0xff] }
  0xdc   :  { %2975 = vmatpush1.bf16.msra.mxu1 %v2974_v6  ;;  %v2628_v61 = vpack.c.bf16 %v540_v55, %v536_v52  ;;  %v544_v5 = vld [vmem:[%s6144_s1 + $0x1008] sm:$0xff]  ;;  %v3014_v53 = vpack.c.bf16 %v509_v4, %v505_v63  ;;  %v543_v14 = vld [vmem:[%s6144_s1 + $0x1000] sm:$0xff]  ;;  %v513_v17 = vld [vmem:[%s6144_s1 + $0xf10] sm:$0xff] }
  0xdd   :  { %2977 = vmatprep.subr.bf16.mxu1 %v2976_v12  ;;  %v507_v12 = vld [vmem:[%s6144_s1 + $0xee0] sm:$0xff] }
  0xde   :  { %2595 = vmatpush1.bf16.msra.mxu0 %v2594_v18  ;;  %v482_v18 = vld [vmem:[%s6144_s1 + $0xe18] sm:$0xff]  ;;  %v547_v15 = vld [vmem:[%s6144_s1 + $0x1020] sm:$0xff] }
  0xdf   :  { %2597 = vmatprep.subr.bf16.mxu0 %v2596_v21  ;;  %v2614_v21 = vpack.c.bf16 %v507_v12, %v503_v11  ;;  %v4993_v12 = vrot.slane %v4974_v0, %v3654_v16 }
  0xe0   :  { %2979 = vmatpush1.bf16.msra.mxu1 %v2978_v19  ;;  %v486_v19 = vld [vmem:[%s6144_s1 + $0xe38] sm:$0xff] }
  0xe1   :  { %2981 = vmatprep.subr.bf16.mxu1 %v2980_v24  ;;  %v515_v24 = vld [vmem:[%s6144_s1 + $0xf20] sm:$0xff]  ;;  %v3000_v26 = vpack.c.bf16 %v486_v19, %v482_v18  ;;  %v517_v19 = vld [vmem:[%s6144_s1 + $0xf30] sm:$0xff] }
  0xe2   :  { %2599 = vmatpush1.bf16.msra.mxu0 %v2598_v31  ;;  %v490_v31 = vld [vmem:[%s6144_s1 + $0xe58] sm:$0xff]  ;;  %v3018_v27 = vpack.c.bf16 %v517_v19, %v513_v17 }
  0xe3   :  { %2601 = vmatprep.subr.bf16.mxu0 %v2600_v33  ;;  %v2618_v33 = vpack.c.bf16 %v515_v24, %v511_v23  ;;  %v526_v23 = vld [vmem:[%s6144_s1 + $0xf78] sm:$0xff]  ;;  %v2634_v24 = vpack.c.bf16 %v547_v15, %v543_v14 }
  0xe4   :  { %2983 = vmatpush1.bf16.msra.mxu1 %v2982_v32  ;;  %v494_v32 = vld [vmem:[%s6144_s1 + $0xe78] sm:$0xff] }
  0xe5   :  { %2985 = vmatprep.subr.bf16.mxu1 %v2984_v38  ;;  %v523_v38 = vld [vmem:[%s6144_s1 + $0xf60] sm:$0xff]  ;;  %v3004_v40 = vpack.c.bf16 %v494_v32, %v490_v31  ;;  %v521_v31 = vld [vmem:[%s6144_s1 + $0xf50] sm:$0xff] }
  0xe6   :  { %2603 = vmatpush1.bf16.msra.mxu0 %v2602_v43  ;;  %v498_v43 = vld [vmem:[%s6144_s1 + $0xe98] sm:$0xff]  ;;  %v525_v32 = vld [vmem:[%s6144_s1 + $0xf70] sm:$0xff] }
  0xe7   :  { %2605 = vmatprep.subr.bf16.mxu0 %v2604_v45  ;;  %v2622_v45 = vpack.c.bf16 %v523_v38, %v519_v37 }
  0xe8   :  { %2987 = vmatpush1.bf16.msra.mxu1 %v2986_v44  ;;  %v502_v44 = vld [vmem:[%s6144_s1 + $0xeb8] sm:$0xff] }
  0xe9   :  { %2989 = vmatprep.subr.bf16.mxu1 %v2988_v49  ;;  %v531_v49 = vld [vmem:[%s6144_s1 + $0xfa0] sm:$0xff]  ;;  %v3008_v34 = vpack.c.bf16 %v502_v44, %v498_v43 }
  0xea   :  { %v4856_v3 = vpop.f32.mrb[0].mxu1  ;;  %2607 = vmatpush1.bf16.msra.mxu0 %v2606_v56  ;;  %v506_v56 = vld [vmem:[%s6144_s1 + $0xed8] sm:$0xff] }
  0xeb   :  { %v4864_v6 = vpop.f32.mrb[1].mxu1  ;;  %2609 = vmatprep.subr.bf16.mxu0 %v2608_v20  ;;  %v2626_v20 = vpack.c.bf16 %v531_v49, %v527_v48 }
  0xec   :  { %2991 = vmatpush1.bf16.msra.mxu1 %v2990_v57  ;;  %v510_v57 = vld [vmem:[%s6144_s1 + $0xef8] sm:$0xff] }
  0xed   :  { %2993 = vmatprep.subr.bf16.mxu1 %v2992_v62  ;;  %v539_v62 = vld [vmem:[%s6144_s1 + $0xfe0] sm:$0xff]  ;;  %v3012_v2 = vpack.c.bf16 %v510_v57, %v506_v56 }
  0xee   :  { %2611 = vmatpush1.bf16.msra.mxu0 %v2610_v8  ;;  %v548_v8 = vld [vmem:[%s6144_s1 + $0x1028] sm:$0xff]  ;;  %v2630_v11 = vpack.c.bf16 %v539_v62, %v535_v58 }
  0xef   :  { %2613 = vmatprep.subr.bf16.mxu0 %v2612_v10  ;;  %v518_v10 = vld [vmem:[%s6144_s1 + $0xf38] sm:$0xff] }
  0xf0   :  { %2995 = vmatpush1.bf16.msra.mxu1 %v2994_v9  ;;  %v514_v9 = vld [vmem:[%s6144_s1 + $0xf18] sm:$0xff] }
  0xf1   :  { %2997 = vmatprep.subr.bf16.mxu1 %v2996_v13  ;;  %v2632_v13 = vpack.c.bf16 %v548_v8, %v544_v5  ;;  %v3016_v18 = vpack.c.bf16 %v518_v10, %v514_v9 }
  0xf2   :  { %2615 = vmatpush1.bf16.msra.mxu0 %v2614_v21  ;;  %v552_v21 = vld [vmem:[%s6144_s1 + $0x1048] sm:$0xff] }
  0xf3   :  { %2617 = vmatprep.subr.bf16.mxu0 %v2616_v60  ;;  %v522_v60 = vld [vmem:[%s6144_s1 + $0xf58] sm:$0xff] }
  0xf4   :  { %2999 = vmatpush1.bf16.msra.mxu1 %v2998_v22  ;;  %v556_v22 = vld [vmem:[%s6144_s1 + $0x1068] sm:$0xff] }
  0xf5   :  { %3001 = vmatprep.subr.bf16.mxu1 %v3000_v26  ;;  %v5024_v26 = vcombine.high %v4993_v12, %v4993_v12  ;;  %v2636_v28 = vpack.c.bf16 %v556_v22, %v552_v21 }
  0xf6   :  { %2619 = vmatpush1.bf16.msra.mxu0 %v2618_v33  ;;  %v3020_v33 = vpack.c.bf16 %v526_v23, %v522_v60 }
  0xf7   :  { %2621 = vmatprep.subr.bf16.mxu0 %v2620_v36  ;;  %v564_v36 = vld [vmem:[%s6144_s1 + $0x10a8] sm:$0xff] }
  0xf8   :  { %3003 = vmatpush1.bf16.msra.mxu1 %v3002_v35  ;;  %v560_v35 = vld [vmem:[%s6144_s1 + $0x1088] sm:$0xff] }
  0xf9   :  { %3005 = vmatprep.subr.bf16.mxu1 %v3004_v40 }
  0xfa   :  { %2623 = vmatpush1.bf16.msra.mxu0 %v2622_v45 }
  0xfb   :  { %2625 = vmatprep.subr.bf16.mxu0 %v2624_v47 }
  0xfc   :  { %3007 = vmatpush1.bf16.msra.mxu1 %v3006_v46 }
  0xfd   :  { %3009 = vmatprep.subr.bf16.mxu1 %v3008_v34 }
  0xfe   :  { %2627 = vmatpush1.bf16.msra.mxu0 %v2626_v20 }
  0xff   :  { %2629 = vmatprep.subr.bf16.mxu0 %v2628_v61 }
 0x100   :  { %3011 = vmatpush1.bf16.msra.mxu1 %v3010_v59 }
 0x101   :  { %3013 = vmatprep.subr.bf16.mxu1 %v3012_v2 }
 0x102   :  { %2631 = vmatpush1.bf16.msra.mxu0 %v2630_v11 }
 0x103   :  { %2633 = vmatprep.subr.bf16.mxu0 %v2632_v13 }
 0x104   :  { %3015 = vmatpush1.bf16.msra.mxu1 %v3014_v53 }
 0x105   :  { %3017 = vmatprep.subr.bf16.mxu1 %v3016_v18 }
 0x106   :  { %12 = vsyncpa [#allocation3], 0  ;;  %1208 = vmatmul.mubr.f32.vlgmr.msra.gmra.mrb[0].mxu0 %v4588_v54  ;;  %v530_v37 = vld [vmem:[%s6144_s1 + $0xf98] sm:$0xff]  ;;  %v2638_v39 = vpack.c.bf16 %v555_v29, %v551_v25  ;;  %v3022_v40 = vpack.c.bf16 %v525_v32, %v521_v31  ;;  %v2640_v41 = vpack.c.bf16 %v564_v36, %v560_v35  ;;  %v559_v42 = vld [vmem:[%s6144_s1 + $0x1080] sm:$0xff]  ;;  %vm3328_vm1 = vmmov 0   ;;  %s3329_s14 = smov [#allocation2]  }
 0x107   :  { %v534_v38 = vld [vmem:[%s6144_s1 + $0xfb8] sm:$0xff]  ;;  %2635 = vmatpush1.bf16.msra.mxu0 %v2634_v24  ;;  %1278 = vmatprep.mubr.f32.mxu0 %v5024_v26  ;;  %v563_v30 = vld [vmem:[%s6144_s1 + $0x10a0] sm:$0xff]  ;;  %v529_v43 = vld [vmem:[%s6144_s1 + $0xf90] sm:$0xff]  ;;  %s2241_s15 = sshll.u32 %s3329_s14, 4  ;;  %vm2233_vm2 = vcmask 74752   ;;  %s2242_s15 = int_to_ptr.vmem [resolvable:$true] %s2241_s15 }
 0x108   :  { %3019 = vmatpush1.bf16.msra.mxu1 %v3018_v27  ;;  %2637 = vmatprep.subr.bf16.mxu0 %v2636_v28  ;;  %v3024_v44 = vpack.c.bf16 %v534_v38, %v530_v37  ;;  %v533_v45 = vld [vmem:[%s6144_s1 + $0xfb0] sm:$0xff]  ;;  %v568_v46 = vld [vmem:[%s6144_s1 + $0x10c8] sm:$0xff]  ;;  %v538_v48 = vld [vmem:[%s6144_s1 + $0xfd8] sm:$0xff]  ;;  %v2642_v50 = vpack.c.bf16 %v563_v30, %v559_v42  ;;  %p3306_p1 = scmp.lt.s32.totalorder %s2242_s15, %s2242_s15 }
 0x109   :  { %3021 = vmatprep.subr.bf16.mxu1 %v3020_v33  ;;  %v572_v47 = vld [vmem:[%s6144_s1 + $0x10e8] sm:$0xff]  ;;  %v542_v49 = vld [vmem:[%s6144_s1 + $0xff8] sm:$0xff]  ;;  %v3026_v34 = vpack.c.bf16 %v533_v45, %v529_v43  ;;  %v567_v52 = vld [vmem:[%s6144_s1 + $0x10c0] sm:$0xff] }
 0x10a   :  { %v2644_v51 = vpack.c.bf16 %v572_v47, %v568_v46  ;;  %v571_v55 = vld [vmem:[%s6144_s1 + $0x10e0] sm:$0xff]  ;;  %v537_v56 = vld [vmem:[%s6144_s1 + $0xfd0] sm:$0xff]  ;;  %v3028_v57 = vpack.c.bf16 %v542_v49, %v538_v48  ;;  %v576_v58 = vld [vmem:[%s6144_s1 + $0x1108] sm:$0xff] }
 0x10b   :  { %2639 = vmatpush1.bf16.msra.mxu0 %v2638_v39  ;;  %v541_v20 = vld [vmem:[%s6144_s1 + $0xff0] sm:$0xff]  ;;  %v580_v59 = vld [vmem:[%s6144_s1 + $0x1128] sm:$0xff]  ;;  %v546_v61 = vld [vmem:[%s6144_s1 + $0x1018] sm:$0xff]  ;;  %v2646_v63 = vpack.c.bf16 %v571_v55, %v567_v52 }
 0x10c   :  { %3023 = vmatpush1.bf16.msra.mxu1 %v3022_v40  ;;  %2641 = vmatprep.subr.bf16.mxu0 %v2640_v41  ;;  %v550_v62 = vld [vmem:[%s6144_s1 + $0x1038] sm:$0xff]  ;;  %v3030_v2 = vpack.c.bf16 %v541_v20, %v537_v56  ;;  %v2648_v4 = vpack.c.bf16 %v580_v59, %v576_v58  ;;  %v575_v5 = vld [vmem:[%s6144_s1 + $0x1100] sm:$0xff]  ;;  %v545_v9 = vld [vmem:[%s6144_s1 + $0x1010] sm:$0xff] }
 0x10d   :  { %3025 = vmatprep.subr.bf16.mxu1 %v3024_v44  ;;  %v579_v8 = vld [vmem:[%s6144_s1 + $0x1120] sm:$0xff]  ;;  %v3032_v10 = vpack.c.bf16 %v550_v62, %v546_v61  ;;  %v549_v11 = vld [vmem:[%s6144_s1 + $0x1030] sm:$0xff]  ;;  %v584_v53 = vld [vmem:[%s6144_s1 + $0x1148] sm:$0xff] }
 0x10e   :  { %v588_v13 = vld [vmem:[%s6144_s1 + $0x1168] sm:$0xff]  ;;  %v554_v14 = vld [vmem:[%s6144_s1 + $0x1058] sm:$0xff]  ;;  %v2650_v17 = vpack.c.bf16 %v579_v8, %v575_v5  ;;  %v3034_v18 = vpack.c.bf16 %v549_v11, %v545_v9  ;;  %v583_v21 = vld [vmem:[%s6144_s1 + $0x1140] sm:$0xff] }
 0x10f   :  { %2643 = vmatpush1.bf16.msra.mxu0 %v2642_v50  ;;  %v558_v15 = vld [vmem:[%s6144_s1 + $0x1078] sm:$0xff]  ;;  %v2652_v19 = vpack.c.bf16 %v588_v13, %v584_v53  ;;  %v587_v22 = vld [vmem:[%s6144_s1 + $0x1160] sm:$0xff]  ;;  %v553_v60 = vld [vmem:[%s6144_s1 + $0x1050] sm:$0xff] }
 0x110   :  { %3027 = vmatpush1.bf16.msra.mxu1 %v3026_v34  ;;  %2645 = vmatprep.subr.bf16.mxu0 %v2644_v51  ;;  %v3036_v23 = vpack.c.bf16 %v558_v15, %v554_v14  ;;  %v557_v24 = vld [vmem:[%s6144_s1 + $0x1070] sm:$0xff]  ;;  %v592_v25 = vld [vmem:[%s6144_s1 + $0x1188] sm:$0xff]  ;;  %v562_v28 = vld [vmem:[%s6144_s1 + $0x1098] sm:$0xff]  ;;  %v2654_v31 = vpack.c.bf16 %v587_v22, %v583_v21 }
 0x111   :  { %3029 = vmatprep.subr.bf16.mxu1 %v3028_v57  ;;  %v596_v27 = vld [vmem:[%s6144_s1 + $0x11a8] sm:$0xff]  ;;  %v566_v29 = vld [vmem:[%s6144_s1 + $0x10b8] sm:$0xff]  ;;  %v3038_v32 = vpack.c.bf16 %v557_v24, %v553_v60  ;;  %v591_v35 = vld [vmem:[%s6144_s1 + $0x1180] sm:$0xff] }
 0x112   :  { %v2656_v33 = vpack.c.bf16 %v596_v27, %v592_v25  ;;  %v595_v36 = vld [vmem:[%s6144_s1 + $0x11a0] sm:$0xff]  ;;  %v561_v37 = vld [vmem:[%s6144_s1 + $0x1090] sm:$0xff]  ;;  %v3040_v38 = vpack.c.bf16 %v566_v29, %v562_v28  ;;  %v600_v39 = vld [vmem:[%s6144_s1 + $0x11c8] sm:$0xff] }
 0x113   :  { %2647 = vmatpush1.bf16.msra.mxu0 %v2646_v63  ;;  %v604_v40 = vld [vmem:[%s6144_s1 + $0x11e8] sm:$0xff]  ;;  %v570_v41 = vld [vmem:[%s6144_s1 + $0x10d8] sm:$0xff]  ;;  %v2658_v30 = vpack.c.bf16 %v595_v36, %v591_v35  ;;  %v599_v45 = vld [vmem:[%s6144_s1 + $0x11c0] sm:$0xff] }
 0x114   :  { %3031 = vmatpush1.bf16.msra.mxu1 %v3030_v2  ;;  %2649 = vmatprep.subr.bf16.mxu0 %v2648_v4  ;;  %v574_v42 = vld [vmem:[%s6144_s1 + $0x10f8] sm:$0xff]  ;;  %v2660_v44 = vpack.c.bf16 %v604_v40, %v600_v39  ;;  %v569_v46 = vld [vmem:[%s6144_s1 + $0x10d0] sm:$0xff]  ;;  %v608_v49 = vld [vmem:[%s6144_s1 + $0x1208] sm:$0xff] }
 0x115   :  { %3033 = vmatprep.subr.bf16.mxu1 %v3032_v10  ;;  %v3044_v47 = vpack.c.bf16 %v574_v42, %v570_v41  ;;  %v573_v48 = vld [vmem:[%s6144_s1 + $0x10f0] sm:$0xff]  ;;  %v612_v50 = vld [vmem:[%s6144_s1 + $0x1228] sm:$0xff]  ;;  %v578_v34 = vld [vmem:[%s6144_s1 + $0x1118] sm:$0xff] }
 0x116   :  { %v582_v51 = vld [vmem:[%s6144_s1 + $0x1138] sm:$0xff]  ;;  %v3046_v55 = vpack.c.bf16 %v573_v48, %v569_v46  ;;  %v2664_v56 = vpack.c.bf16 %v612_v50, %v608_v49  ;;  %v607_v57 = vld [vmem:[%s6144_s1 + $0x1200] sm:$0xff]  ;;  %v577_v58 = vld [vmem:[%s6144_s1 + $0x1110] sm:$0xff] }
 0x117   :  { %2651 = vmatpush1.bf16.msra.mxu0 %v2650_v17  ;;  %1705 = vmatmul.mubr.f32.vlgmr.msra.gmra.mrb[2].mxu1 %v4588_v54  ;;  %v565_v54 = vld [vmem:[%s6144_s1 + $0x10b0] sm:$0xff]  ;;  %v611_v20 = vld [vmem:[%s6144_s1 + $0x1220] sm:$0xff]  ;;  %v3048_v59 = vpack.c.bf16 %v582_v51, %v578_v34  ;;  %v616_v62 = vld [vmem:[%s6144_s1 + $0x1248] sm:$0xff] }
 0x118   :  { %3035 = vmatpush1.bf16.msra.mxu1 %v3034_v18  ;;  %2653 = vmatprep.subr.bf16.mxu0 %v2652_v19  ;;  %v3042_v43 = vpack.c.bf16 %v565_v54, %v561_v37  ;;  %v581_v61 = vld [vmem:[%s6144_s1 + $0x1130] sm:$0xff]  ;;  %v620_v63 = vld [vmem:[%s6144_s1 + $0x1268] sm:$0xff]  ;;  %v586_v2 = vld [vmem:[%s6144_s1 + $0x1158] sm:$0xff]  ;;  %v2666_v5 = vpack.c.bf16 %v611_v20, %v607_v57 }
 0x119   :  { %3037 = vmatprep.subr.bf16.mxu1 %v3036_v23  ;;  %1775 = vmatprep.mubr.f32.mxu1 %v5024_v26  ;;  %v603_v26 = vld [vmem:[%s6144_s1 + $0x11e0] sm:$0xff]  ;;  %v590_v4 = vld [vmem:[%s6144_s1 + $0x1178] sm:$0xff]  ;;  %v3050_v8 = vpack.c.bf16 %v581_v61, %v577_v58  ;;  %v2668_v9 = vpack.c.bf16 %v620_v63, %v616_v62  ;;  %v585_v53 = vld [vmem:[%s6144_s1 + $0x1150] sm:$0xff] }
 0x11a   :  { %v2662_v52 = vpack.c.bf16 %v603_v26, %v599_v45  ;;  %v615_v10 = vld [vmem:[%s6144_s1 + $0x1240] sm:$0xff]  ;;  %v3052_v13 = vpack.c.bf16 %v590_v4, %v586_v2  ;;  %v589_v14 = vld [vmem:[%s6144_s1 + $0x1170] sm:$0xff]  ;;  %v624_v15 = vld [vmem:[%s6144_s1 + $0x1288] sm:$0xff] }
 0x11b   :  { %2655 = vmatpush1.bf16.msra.mxu0 %v2654_v31  ;;  %v619_v11 = vld [vmem:[%s6144_s1 + $0x1260] sm:$0xff]  ;;  %v628_v17 = vld [vmem:[%s6144_s1 + $0x12a8] sm:$0xff]  ;;  %v594_v18 = vld [vmem:[%s6144_s1 + $0x1198] sm:$0xff]  ;;  %v3054_v22 = vpack.c.bf16 %v589_v14, %v585_v53 }
 0x11c   :  { %3039 = vmatpush1.bf16.msra.mxu1 %v3038_v32  ;;  %2657 = vmatprep.subr.bf16.mxu0 %v2656_v33  ;;  %v598_v19 = vld [vmem:[%s6144_s1 + $0x11b8] sm:$0xff]  ;;  %v2670_v21 = vpack.c.bf16 %v619_v11, %v615_v10  ;;  %v2672_v60 = vpack.c.bf16 %v628_v17, %v624_v15  ;;  %v623_v23 = vld [vmem:[%s6144_s1 + $0x1280] sm:$0xff]  ;;  %v593_v25 = vld [vmem:[%s6144_s1 + $0x1190] sm:$0xff] }
 0x11d   :  { %3041 = vmatprep.subr.bf16.mxu1 %v3040_v38  ;;  %v627_v24 = vld [vmem:[%s6144_s1 + $0x12a0] sm:$0xff]  ;;  %v3056_v27 = vpack.c.bf16 %v598_v19, %v594_v18  ;;  %v597_v28 = vld [vmem:[%s6144_s1 + $0x11b0] sm:$0xff]  ;;  %v632_v29 = vld [vmem:[%s6144_s1 + $0x12c8] sm:$0xff] }
 0x11e   :  { %v636_v31 = vld [vmem:[%s6144_s1 + $0x12e8] sm:$0xff]  ;;  %v602_v32 = vld [vmem:[%s6144_s1 + $0x11d8] sm:$0xff]  ;;  %v2674_v35 = vpack.c.bf16 %v627_v24, %v623_v23  ;;  %v3058_v36 = vpack.c.bf16 %v597_v28, %v593_v25  ;;  %v631_v38 = vld [vmem:[%s6144_s1 + $0x12c0] sm:$0xff]  ;;  %v891_v24 = vcombine.high %v4974_v0, %v4974_v0 }
 0x11f   :  { %2659 = vmatpush1.bf16.msra.mxu0 %v2658_v30  ;;  %v606_v33 = vld [vmem:[%s6144_s1 + $0x11f8] sm:$0xff]  ;;  %v2676_v37 = vpack.c.bf16 %v636_v31, %v632_v29  ;;  %v635_v54 = vld [vmem:[%s6144_s1 + $0x12e0] sm:$0xff]  ;;  %v601_v39 = vld [vmem:[%s6144_s1 + $0x11d0] sm:$0xff] }
 0x120   :  { %3043 = vmatpush1.bf16.msra.mxu1 %v3042_v43  ;;  %2661 = vmatprep.subr.bf16.mxu0 %v2660_v44  ;;  %v3060_v40 = vpack.c.bf16 %v606_v33, %v602_v32  ;;  %v605_v41 = vld [vmem:[%s6144_s1 + $0x11f0] sm:$0xff]  ;;  %v640_v42 = vld [vmem:[%s6144_s1 + $0x1308] sm:$0xff]  ;;  %v610_v43 = vld [vmem:[%s6144_s1 + $0x1218] sm:$0xff]  ;;  %v2678_v45 = vpack.c.bf16 %v635_v54, %v631_v38  ;;  %v5390_v54 = vrot.slane %v891_v24, %v3654_v16 }
 0x121   :  { %3045 = vmatprep.subr.bf16.mxu1 %v3044_v47  ;;  %v644_v30 = vld [vmem:[%s6144_s1 + $0x1328] sm:$0xff]  ;;  %v614_v44 = vld [vmem:[%s6144_s1 + $0x1238] sm:$0xff]  ;;  %v3062_v26 = vpack.c.bf16 %v605_v41, %v601_v39  ;;  %v639_v47 = vld [vmem:[%s6144_s1 + $0x1300] sm:$0xff] }
 0x122   :  { %v2680_v46 = vpack.c.bf16 %v644_v30, %v640_v42  ;;  %v643_v48 = vld [vmem:[%s6144_s1 + $0x1320] sm:$0xff]  ;;  %v609_v49 = vld [vmem:[%s6144_s1 + $0x1210] sm:$0xff]  ;;  %v3064_v50 = vpack.c.bf16 %v614_v44, %v610_v43  ;;  %v648_v51 = vld [vmem:[%s6144_s1 + $0x1348] sm:$0xff] }
 0x123   :  { %2663 = vmatpush1.bf16.msra.mxu0 %v2662_v52  ;;  %v613_v34 = vld [vmem:[%s6144_s1 + $0x1230] sm:$0xff]  ;;  %v652_v52 = vld [vmem:[%s6144_s1 + $0x1368] sm:$0xff]  ;;  %v2682_v57 = vpack.c.bf16 %v643_v48, %v639_v47  ;;  %v651_v61 = vld [vmem:[%s6144_s1 + $0x1360] sm:$0xff]  ;;  %v5418_v48 = vcombine.high %v5390_v54, %v5390_v54 }
 0x124   :  { %3047 = vmatpush1.bf16.msra.mxu1 %v3046_v55  ;;  %2665 = vmatprep.subr.bf16.mxu0 %v2664_v56  ;;  %v618_v55 = vld [vmem:[%s6144_s1 + $0x1258] sm:$0xff]  ;;  %v3066_v20 = vpack.c.bf16 %v613_v34, %v609_v49  ;;  %v2684_v58 = vpack.c.bf16 %v652_v52, %v648_v51  ;;  %v617_v62 = vld [vmem:[%s6144_s1 + $0x1250] sm:$0xff]  ;;  %v656_v4 = vld [vmem:[%s6144_s1 + $0x1388] sm:$0xff] }
 0x125   :  { %3049 = vmatprep.subr.bf16.mxu1 %v3048_v59  ;;  %v622_v56 = vld [vmem:[%s6144_s1 + $0x1278] sm:$0xff]  ;;  %v647_v59 = vld [vmem:[%s6144_s1 + $0x1340] sm:$0xff]  ;;  %v621_v2 = vld [vmem:[%s6144_s1 + $0x1270] sm:$0xff] }
 0x126   :  { %v3068_v63 = vpack.c.bf16 %v622_v56, %v618_v55  ;;  %v2686_v10 = vpack.c.bf16 %v651_v61, %v647_v59  ;;  %v3070_v11 = vpack.c.bf16 %v621_v2, %v617_v62  ;;  %v659_v14 = vld [vmem:[%s6144_s1 + $0x13a0] sm:$0xff]  ;;  %v625_v15 = vld [vmem:[%s6144_s1 + $0x1290] sm:$0xff]  ;;  %v664_v19 = vld [vmem:[%s6144_s1 + $0x13c8] sm:$0xff] }
 0x127   :  { %2667 = vmatpush1.bf16.msra.mxu0 %v2666_v5  ;;  %v660_v5 = vld [vmem:[%s6144_s1 + $0x13a8] sm:$0xff]  ;;  %v629_v18 = vld [vmem:[%s6144_s1 + $0x12b0] sm:$0xff]  ;;  %v663_v28 = vld [vmem:[%s6144_s1 + $0x13c0] sm:$0xff] }
 0x128   :  { %3051 = vmatpush1.bf16.msra.mxu1 %v3050_v8  ;;  %2669 = vmatprep.subr.bf16.mxu0 %v2668_v9  ;;  %v626_v8 = vld [vmem:[%s6144_s1 + $0x1298] sm:$0xff]  ;;  %v2688_v53 = vpack.c.bf16 %v660_v5, %v656_v4  ;;  %v3074_v25 = vpack.c.bf16 %v629_v18, %v625_v15  ;;  %v667_v29 = vld [vmem:[%s6144_s1 + $0x13e0] sm:$0xff]  ;;  %v633_v31 = vld [vmem:[%s6144_s1 + $0x12d0] sm:$0xff] }
 0x129   :  { %3053 = vmatprep.subr.bf16.mxu1 %v3052_v13  ;;  %v630_v9 = vld [vmem:[%s6144_s1 + $0x12b8] sm:$0xff]  ;;  %v655_v13 = vld [vmem:[%s6144_s1 + $0x1380] sm:$0xff]  ;;  %v637_v0 = vld [vmem:[%s6144_s1 + $0x12f0] sm:$0xff]  ;;  %v2694_v38 = vpack.c.bf16 %v667_v29, %v663_v28 }
 0x12a   :  { %v3072_v17 = vpack.c.bf16 %v630_v9, %v626_v8  ;;  %v2690_v23 = vpack.c.bf16 %v659_v14, %v655_v13  ;;  %v672_v33 = vld [vmem:[%s6144_s1 + $0x1408] sm:$0xff]  ;;  %v3078_v39 = vpack.c.bf16 %v637_v0, %v633_v31  ;;  %v671_v41 = vld [vmem:[%s6144_s1 + $0x1400] sm:$0xff]  ;;  %v641_v30 = vld [vmem:[%s6144_s1 + $0x1310] sm:$0xff] }
 0x12b   :  { %2671 = vmatpush1.bf16.msra.mxu0 %v2670_v21  ;;  %v668_v21 = vld [vmem:[%s6144_s1 + $0x13e8] sm:$0xff]  ;;  %v675_v42 = vld [vmem:[%s6144_s1 + $0x1420] sm:$0xff]  ;;  %v645_v16 = vld [vmem:[%s6144_s1 + $0x1330] sm:$0xff] }
 0x12c   :  { %3055 = vmatpush1.bf16.msra.mxu1 %v3054_v22  ;;  %2673 = vmatprep.subr.bf16.mxu0 %v2672_v60  ;;  %v634_v22 = vld [vmem:[%s6144_s1 + $0x12d8] sm:$0xff]  ;;  %v680_v44 = vld [vmem:[%s6144_s1 + $0x1448] sm:$0xff]  ;;  %v2698_v47 = vpack.c.bf16 %v675_v42, %v671_v41  ;;  %v3082_v49 = vpack.c.bf16 %v645_v16, %v641_v30  ;;  %v679_v34 = vld [vmem:[%s6144_s1 + $0x1440] sm:$0xff] }
 0x12d   :  { %3057 = vmatprep.subr.bf16.mxu1 %v3056_v27  ;;  %v638_v60 = vld [vmem:[%s6144_s1 + $0x12f8] sm:$0xff]  ;;  %v2692_v27 = vpack.c.bf16 %v668_v21, %v664_v19  ;;  %v683_v51 = vld [vmem:[%s6144_s1 + $0x1460] sm:$0xff]  ;;  %v649_v52 = vld [vmem:[%s6144_s1 + $0x1350] sm:$0xff] }
 0x12e   :  { %v3076_v32 = vpack.c.bf16 %v638_v60, %v634_v22  ;;  %v653_v56 = vld [vmem:[%s6144_s1 + $0x1370] sm:$0xff]  ;;  %v662_v59 = vld [vmem:[%s6144_s1 + $0x13b8] sm:$0xff]  ;;  %v2702_v61 = vpack.c.bf16 %v683_v51, %v679_v34  ;;  %v687_v2 = vld [vmem:[%s6144_s1 + $0x1480] sm:$0xff] }
 0x12f   :  { %2675 = vmatpush1.bf16.msra.mxu0 %v2674_v35  ;;  %v676_v35 = vld [vmem:[%s6144_s1 + $0x1428] sm:$0xff]  ;;  %v3086_v62 = vpack.c.bf16 %v653_v56, %v649_v52  ;;  %v691_v4 = vld [vmem:[%s6144_s1 + $0x14a0] sm:$0xff]  ;;  %v657_v5 = vld [vmem:[%s6144_s1 + $0x1390] sm:$0xff] }
 0x130   :  { %3059 = vmatpush1.bf16.msra.mxu1 %v3058_v36  ;;  %2677 = vmatprep.subr.bf16.mxu0 %v2676_v37  ;;  %v642_v36 = vld [vmem:[%s6144_s1 + $0x1318] sm:$0xff]  ;;  %v661_v9 = vld [vmem:[%s6144_s1 + $0x13b0] sm:$0xff]  ;;  %v2706_v14 = vpack.c.bf16 %v691_v4, %v687_v2  ;;  %v695_v18 = vld [vmem:[%s6144_s1 + $0x14c0] sm:$0xff] }
 0x131   :  { %3061 = vmatprep.subr.bf16.mxu1 %v3060_v40  ;;  %v646_v37 = vld [vmem:[%s6144_s1 + $0x1338] sm:$0xff]  ;;  %v2696_v40 = vpack.c.bf16 %v676_v35, %v672_v33  ;;  %v3090_v15 = vpack.c.bf16 %v661_v9, %v657_v5  ;;  %v699_v19 = vld [vmem:[%s6144_s1 + $0x14e0] sm:$0xff]  ;;  %v665_v21 = vld [vmem:[%s6144_s1 + $0x13d0] sm:$0xff] }
 0x132   :  { %v3080_v43 = vpack.c.bf16 %v646_v37, %v642_v36  ;;  %v670_v13 = vld [vmem:[%s6144_s1 + $0x13f8] sm:$0xff]  ;;  %v669_v60 = vld [vmem:[%s6144_s1 + $0x13f0] sm:$0xff]  ;;  %v708_v24 = vld [vmem:[%s6144_s1 + $0x1528] sm:$0xff]  ;;  %v2710_v28 = vpack.c.bf16 %v699_v19, %v695_v18 }
 0x133   :  { %2679 = vmatpush1.bf16.msra.mxu0 %v2678_v45  ;;  %v684_v45 = vld [vmem:[%s6144_s1 + $0x1468] sm:$0xff]  ;;  %v3094_v29 = vpack.c.bf16 %v669_v60, %v665_v21  ;;  %v707_v0 = vld [vmem:[%s6144_s1 + $0x1520] sm:$0xff]  ;;  %v673_v33 = vld [vmem:[%s6144_s1 + $0x1410] sm:$0xff] }
 0x134   :  { %3063 = vmatpush1.bf16.msra.mxu1 %v3062_v26  ;;  %2681 = vmatprep.subr.bf16.mxu0 %v2680_v46  ;;  %v650_v26 = vld [vmem:[%s6144_s1 + $0x1358] sm:$0xff]  ;;  %v677_v36 = vld [vmem:[%s6144_s1 + $0x1430] sm:$0xff]  ;;  %v712_v37 = vld [vmem:[%s6144_s1 + $0x1548] sm:$0xff] }
 0x135   :  { %3065 = vmatprep.subr.bf16.mxu1 %v3064_v50  ;;  %v654_v46 = vld [vmem:[%s6144_s1 + $0x1378] sm:$0xff]  ;;  %v2700_v50 = vpack.c.bf16 %v684_v45, %v680_v44  ;;  %v3098_v42 = vpack.c.bf16 %v677_v36, %v673_v33  ;;  %v715_v16 = vld [vmem:[%s6144_s1 + $0x1560] sm:$0xff]  ;;  %v681_v44 = vld [vmem:[%s6144_s1 + $0x1450] sm:$0xff] }
 0x136   :  { %v3084_v55 = vpack.c.bf16 %v654_v46, %v650_v26  ;;  %v685_v26 = vld [vmem:[%s6144_s1 + $0x1470] sm:$0xff]  ;;  %v720_v46 = vld [vmem:[%s6144_s1 + $0x1588] sm:$0xff]  ;;  %v723_v56 = vld [vmem:[%s6144_s1 + $0x15a0] sm:$0xff] }
 0x137   :  { %2683 = vmatpush1.bf16.msra.mxu0 %v2682_v57  ;;  %v688_v57 = vld [vmem:[%s6144_s1 + $0x1488] sm:$0xff]  ;;  %v3102_v51 = vpack.c.bf16 %v685_v26, %v681_v44  ;;  %v727_v5 = vld [vmem:[%s6144_s1 + $0x15c0] sm:$0xff] }
 0x138   :  { %3067 = vmatpush1.bf16.msra.mxu1 %v3066_v20  ;;  %2685 = vmatprep.subr.bf16.mxu0 %v2684_v58  ;;  %v692_v20 = vld [vmem:[%s6144_s1 + $0x14a8] sm:$0xff]  ;;  %v658_v58 = vld [vmem:[%s6144_s1 + $0x1398] sm:$0xff]  ;;  %v735_v19 = vld [vmem:[%s6144_s1 + $0x1600] sm:$0xff] }
 0x139   :  { %3069 = vmatprep.subr.bf16.mxu1 %v3068_v63  ;;  %v2704_v63 = vpack.c.bf16 %v692_v20, %v688_v57  ;;  %v3088_v8 = vpack.c.bf16 %v662_v59, %v658_v58  ;;  %v689_v57 = vld [vmem:[%s6144_s1 + $0x1490] sm:$0xff]  ;;  %v728_v58 = vld [vmem:[%s6144_s1 + $0x15c8] sm:$0xff]  ;;  %v739_v21 = vld [vmem:[%s6144_s1 + $0x1620] sm:$0xff] }
 0x13a   :  { %v732_v59 = vld [vmem:[%s6144_s1 + $0x15e8] sm:$0xff]  ;;  %v747_v33 = vld [vmem:[%s6144_s1 + $0x1660] sm:$0xff] }
 0x13b   :  { %2687 = vmatpush1.bf16.msra.mxu0 %v2686_v10  ;;  %v696_v10 = vld [vmem:[%s6144_s1 + $0x14c8] sm:$0xff]  ;;  %v2724_v4 = vpack.c.bf16 %v732_v59, %v728_v58  ;;  %v755_v44 = vld [vmem:[%s6144_s1 + $0x16a0] sm:$0xff]  ;;  %v733_v58 = vld [vmem:[%s6144_s1 + $0x15f0] sm:$0xff] }
 0x13c   :  { %3071 = vmatpush1.bf16.msra.mxu1 %v3070_v11  ;;  %2689 = vmatprep.subr.bf16.mxu0 %v2688_v53  ;;  %v700_v11 = vld [vmem:[%s6144_s1 + $0x14e8] sm:$0xff]  ;;  %v666_v53 = vld [vmem:[%s6144_s1 + $0x13d8] sm:$0xff] }
 0x13d   :  { %3073 = vmatprep.subr.bf16.mxu1 %v3072_v17  ;;  %v2708_v17 = vpack.c.bf16 %v700_v11, %v696_v10  ;;  %v3092_v22 = vpack.c.bf16 %v670_v13, %v666_v53  ;;  %v701_v10 = vld [vmem:[%s6144_s1 + $0x14f0] sm:$0xff]  ;;  %v736_v11 = vld [vmem:[%s6144_s1 + $0x1608] sm:$0xff]  ;;  %v706_v13 = vld [vmem:[%s6144_s1 + $0x1518] sm:$0xff] }
 0x13e   :  { %v740_v53 = vld [vmem:[%s6144_s1 + $0x1628] sm:$0xff] }
 0x13f   :  { %2691 = vmatpush1.bf16.msra.mxu0 %v2690_v23  ;;  %v704_v23 = vld [vmem:[%s6144_s1 + $0x1508] sm:$0xff]  ;;  %v2728_v18 = vpack.c.bf16 %v740_v53, %v736_v11  ;;  %v741_v11 = vld [vmem:[%s6144_s1 + $0x1630] sm:$0xff] }
 0x140   :  { %3075 = vmatpush1.bf16.msra.mxu1 %v3074_v25  ;;  %2693 = vmatprep.subr.bf16.mxu0 %v2692_v27  ;;  %v674_v25 = vld [vmem:[%s6144_s1 + $0x1418] sm:$0xff]  ;;  %v2712_v31 = vpack.c.bf16 %v708_v24, %v704_v23  ;;  %v709_v23 = vld [vmem:[%s6144_s1 + $0x1530] sm:$0xff]  ;;  %v744_v24 = vld [vmem:[%s6144_s1 + $0x1648] sm:$0xff] }
 0x141   :  { %3077 = vmatprep.subr.bf16.mxu1 %v3076_v32  ;;  %v678_v27 = vld [vmem:[%s6144_s1 + $0x1438] sm:$0xff]  ;;  %v703_v32 = vld [vmem:[%s6144_s1 + $0x1500] sm:$0xff]  ;;  %v768_v59 = vld [vmem:[%s6144_s1 + $0x1708] sm:$0xff] }
 0x142   :  { %v3096_v35 = vpack.c.bf16 %v678_v27, %v674_v25  ;;  %v2714_v41 = vpack.c.bf16 %v707_v0, %v703_v32  ;;  %v748_v25 = vld [vmem:[%s6144_s1 + $0x1668] sm:$0xff]  ;;  %v714_v27 = vld [vmem:[%s6144_s1 + $0x1558] sm:$0xff]  ;;  %v743_v0 = vld [vmem:[%s6144_s1 + $0x1640] sm:$0xff] }
 0x143   :  { %2695 = vmatpush1.bf16.msra.mxu0 %v2694_v38  ;;  %v716_v38 = vld [vmem:[%s6144_s1 + $0x1568] sm:$0xff]  ;;  %v2732_v32 = vpack.c.bf16 %v748_v25, %v744_v24  ;;  %v749_v24 = vld [vmem:[%s6144_s1 + $0x1670] sm:$0xff] }
 0x144   :  { %3079 = vmatpush1.bf16.msra.mxu1 %v3078_v39  ;;  %2697 = vmatprep.subr.bf16.mxu0 %v2696_v40  ;;  %v682_v39 = vld [vmem:[%s6144_s1 + $0x1458] sm:$0xff]  ;;  %v2716_v30 = vpack.c.bf16 %v716_v38, %v712_v37  ;;  %v717_v37 = vld [vmem:[%s6144_s1 + $0x1570] sm:$0xff]  ;;  %v752_v38 = vld [vmem:[%s6144_s1 + $0x1688] sm:$0xff] }
 0x145   :  { %3081 = vmatprep.subr.bf16.mxu1 %v3080_v43  ;;  %v686_v40 = vld [vmem:[%s6144_s1 + $0x1478] sm:$0xff]  ;;  %v711_v43 = vld [vmem:[%s6144_s1 + $0x1540] sm:$0xff]  ;;  %v776_v53 = vld [vmem:[%s6144_s1 + $0x1748] sm:$0xff] }
 0x146   :  { %1279 = vmatmul.mubr.f32.vlgmr.msra.gmra.mrb[0].mxu0 %v4993_v12  ;;  %v3100_v45 = vpack.c.bf16 %v686_v40, %v682_v39  ;;  %v2718_v34 = vpack.c.bf16 %v715_v16, %v711_v43  ;;  %v756_v39 = vld [vmem:[%s6144_s1 + $0x16a8] sm:$0xff]  ;;  %v722_v40 = vld [vmem:[%s6144_s1 + $0x1598] sm:$0xff]  ;;  %v751_v16 = vld [vmem:[%s6144_s1 + $0x1680] sm:$0xff] }
 0x147   :  { %2699 = vmatpush1.bf16.msra.mxu0 %v2698_v47  ;;  %1349 = vmatprep.mubr.f32.mxu0 %v5418_v48  ;;  %v724_v47 = vld [vmem:[%s6144_s1 + $0x15a8] sm:$0xff]  ;;  %v2736_v43 = vpack.c.bf16 %v756_v39, %v752_v38  ;;  %v757_v38 = vld [vmem:[%s6144_s1 + $0x16b0] sm:$0xff] }
 0x148   :  { %3083 = vmatpush1.bf16.msra.mxu1 %v3082_v49  ;;  %2701 = vmatprep.subr.bf16.mxu0 %v2700_v50  ;;  %v690_v49 = vld [vmem:[%s6144_s1 + $0x1498] sm:$0xff]  ;;  %v2720_v52 = vpack.c.bf16 %v724_v47, %v720_v46  ;;  %v725_v46 = vld [vmem:[%s6144_s1 + $0x15b0] sm:$0xff]  ;;  %v760_v47 = vld [vmem:[%s6144_s1 + $0x16c8] sm:$0xff] }
 0x149   :  { %3085 = vmatprep.subr.bf16.mxu1 %v3084_v55  ;;  %v694_v50 = vld [vmem:[%s6144_s1 + $0x14b8] sm:$0xff]  ;;  %v719_v55 = vld [vmem:[%s6144_s1 + $0x1580] sm:$0xff]  ;;  %v784_v25 = vld [vmem:[%s6144_s1 + $0x1788] sm:$0xff] }
 0x14a   :  { %v3104_v20 = vpack.c.bf16 %v694_v50, %v690_v49  ;;  %v764_v49 = vld [vmem:[%s6144_s1 + $0x16e8] sm:$0xff]  ;;  %v730_v50 = vld [vmem:[%s6144_s1 + $0x15d8] sm:$0xff] }
 0x14b   :  { %2703 = vmatpush1.bf16.msra.mxu0 %v2702_v61  ;;  %v698_v61 = vld [vmem:[%s6144_s1 + $0x14d8] sm:$0xff]  ;;  %v792_v39 = vld [vmem:[%s6144_s1 + $0x17c8] sm:$0xff] }
 0x14c   :  { %3087 = vmatpush1.bf16.msra.mxu1 %v3086_v62  ;;  %2705 = vmatprep.subr.bf16.mxu0 %v2704_v63  ;;  %v702_v62 = vld [vmem:[%s6144_s1 + $0x14f8] sm:$0xff]  ;;  %v2722_v63 = vpack.c.bf16 %v723_v56, %v719_v55  ;;  %v2740_v55 = vpack.c.bf16 %v764_v49, %v760_v47  ;;  %v759_v56 = vld [vmem:[%s6144_s1 + $0x16c0] sm:$0xff]  ;;  %v765_v47 = vld [vmem:[%s6144_s1 + $0x16f0] sm:$0xff] }
 0x14d   :  { %3089 = vmatprep.subr.bf16.mxu1 %v3088_v8  ;;  %v697_v8 = vld [vmem:[%s6144_s1 + $0x14d0] sm:$0xff]  ;;  %v3108_v9 = vpack.c.bf16 %v702_v62, %v698_v61  ;;  %v772_v61 = vld [vmem:[%s6144_s1 + $0x1728] sm:$0xff]  ;;  %v738_v62 = vld [vmem:[%s6144_s1 + $0x1618] sm:$0xff] }
 0x14e   :  { %v1944_v49 = vld [vmem:[%s6146_s3 + $0x80] sm:$0xff] }
 0x14f   :  { %2707 = vmatpush1.bf16.msra.mxu0 %v2706_v14  ;;  %v710_v14 = vld [vmem:[%s6144_s1 + $0x1538] sm:$0xff] }
 0x150   :  { %3091 = vmatpush1.bf16.msra.mxu1 %v3090_v15  ;;  %2709 = vmatprep.subr.bf16.mxu0 %v2708_v17  ;;  %v3110_v17 = vpack.c.bf16 %v701_v10, %v697_v8  ;;  %v3112_v60 = vpack.c.bf16 %v710_v14, %v706_v13  ;;  %v771_v8 = vld [vmem:[%s6144_s1 + $0x1720] sm:$0xff]  ;;  %v780_v13 = vld [vmem:[%s6144_s1 + $0x1768] sm:$0xff]  ;;  %v746_v14 = vld [vmem:[%s6144_s1 + $0x1658] sm:$0xff] }
 0x151   :  { %3093 = vmatprep.subr.bf16.mxu1 %v3092_v22  ;;  %v705_v22 = vld [vmem:[%s6144_s1 + $0x1510] sm:$0xff] }
 0x153   :  { %2711 = vmatpush1.bf16.msra.mxu0 %v2710_v28  ;;  %v718_v28 = vld [vmem:[%s6144_s1 + $0x1578] sm:$0xff] }
 0x154   :  { %3095 = vmatpush1.bf16.msra.mxu1 %v3094_v29  ;;  %2713 = vmatprep.subr.bf16.mxu0 %v2712_v31  ;;  %v2730_v29 = vpack.c.bf16 %v739_v21, %v735_v19  ;;  %v3114_v31 = vpack.c.bf16 %v709_v23, %v705_v22  ;;  %v3116_v36 = vpack.c.bf16 %v718_v28, %v714_v27  ;;  %v775_v21 = vld [vmem:[%s6144_s1 + $0x1740] sm:$0xff]  ;;  %v788_v27 = vld [vmem:[%s6144_s1 + $0x17a8] sm:$0xff]  ;;  %v754_v28 = vld [vmem:[%s6144_s1 + $0x1698] sm:$0xff] }
 0x155   :  { %3097 = vmatprep.subr.bf16.mxu1 %v3096_v35  ;;  %v713_v35 = vld [vmem:[%s6144_s1 + $0x1550] sm:$0xff]  ;;  %v2748_v19 = vpack.c.bf16 %v780_v13, %v776_v53  ;;  %v779_v22 = vld [vmem:[%s6144_s1 + $0x1760] sm:$0xff] }
 0x156   :  { %v781_v53 = vld [vmem:[%s6144_s1 + $0x1770] sm:$0xff]  ;;  %v1948_v13 = vld [vmem:[%s6146_s3 + $0xa0] sm:$0xff] }
 0x157   :  { %2715 = vmatpush1.bf16.msra.mxu0 %v2714_v41  ;;  %1776 = vmatmul.mubr.f32.vlgmr.msra.gmra.mrb[2].mxu1 %v4993_v12  ;;  %v693_v12 = vld [vmem:[%s6144_s1 + $0x14b0] sm:$0xff]  ;;  %v726_v41 = vld [vmem:[%s6144_s1 + $0x15b8] sm:$0xff] }
 0x158   :  { %3099 = vmatpush1.bf16.msra.mxu1 %v3098_v42  ;;  %2717 = vmatprep.subr.bf16.mxu0 %v2716_v30  ;;  %v3106_v2 = vpack.c.bf16 %v693_v12, %v689_v57  ;;  %v2734_v42 = vpack.c.bf16 %v747_v33, %v743_v0  ;;  %v3118_v30 = vpack.c.bf16 %v717_v37, %v713_v35  ;;  %v763_v57 = vld [vmem:[%s6144_s1 + $0x16e0] sm:$0xff] }
 0x159   :  { %3101 = vmatprep.subr.bf16.mxu1 %v3100_v45  ;;  %1846 = vmatprep.mubr.f32.mxu1 %v5418_v48  ;;  %v731_v48 = vld [vmem:[%s6144_s1 + $0x15e0] sm:$0xff]  ;;  %v721_v45 = vld [vmem:[%s6144_s1 + $0x1590] sm:$0xff]  ;;  %v3120_v26 = vpack.c.bf16 %v726_v41, %v722_v40  ;;  %v2752_v0 = vpack.c.bf16 %v788_v27, %v784_v25  ;;  %v796_v40 = vld [vmem:[%s6144_s1 + $0x17e8] sm:$0xff] }
 0x15a   :  { %v2726_v15 = vpack.c.bf16 %v731_v48, %v727_v5  ;;  %v2744_v5 = vpack.c.bf16 %v772_v61, %v768_v59  ;;  %v767_v48 = vld [vmem:[%s6144_s1 + $0x1700] sm:$0xff]  ;;  %v762_v41 = vld [vmem:[%s6144_s1 + $0x16d8] sm:$0xff]  ;;  %v773_v59 = vld [vmem:[%s6144_s1 + $0x1730] sm:$0xff] }
 0x15b   :  { %2719 = vmatpush1.bf16.msra.mxu0 %v2718_v34  ;;  %v734_v34 = vld [vmem:[%s6144_s1 + $0x15f8] sm:$0xff]  ;;  %v783_v33 = vld [vmem:[%s6144_s1 + $0x1780] sm:$0xff]  ;;  %v1946_v61 = vld [vmem:[%s6146_s3 + $0x90] sm:$0xff] }
 0x15c   :  { %3103 = vmatpush1.bf16.msra.mxu1 %v3102_v51  ;;  %2721 = vmatprep.subr.bf16.mxu0 %v2720_v52  ;;  %v2738_v51 = vpack.c.bf16 %v755_v44, %v751_v16  ;;  %v3122_v52 = vpack.c.bf16 %v725_v46, %v721_v45  ;;  %v3124_v12 = vpack.c.bf16 %v734_v34, %v730_v50  ;;  %v787_v35 = vld [vmem:[%s6144_s1 + $0x17a0] sm:$0xff]  ;;  %v1945_v50 = vld [vmem:[%s6146_s3 + $0x88] sm:$0xff]  ;;  %v770_v34 = vld [vmem:[%s6144_s1 + $0x1718] sm:$0xff] }
 0x15d   :  { %3105 = vmatprep.subr.bf16.mxu1 %v3104_v20  ;;  %v729_v20 = vld [vmem:[%s6144_s1 + $0x15d0] sm:$0xff]  ;;  %v2756_v16 = vpack.c.bf16 %v796_v40, %v792_v39  ;;  %v791_v44 = vld [vmem:[%s6144_s1 + $0x17c0] sm:$0xff] }
 0x15e   :  { %v795_v45 = vld [vmem:[%s6144_s1 + $0x17e0] sm:$0xff]  ;;  %v789_v25 = vld [vmem:[%s6144_s1 + $0x17b0] sm:$0xff] }
 0x15f   :  { %2723 = vmatpush1.bf16.msra.mxu0 %v2722_v63  ;;  %v742_v63 = vld [vmem:[%s6144_s1 + $0x1638] sm:$0xff]  ;;  %v1950_v27 = vld [vmem:[%s6146_s3 + $0xb0] sm:$0xff]  ;;  %v1952_v40 = vld [vmem:[%s6146_s3 + $0xc0] sm:$0xff] }
 0x160   :  { %3107 = vmatpush1.bf16.msra.mxu1 %v3106_v2  ;;  %2725 = vmatprep.subr.bf16.mxu0 %v2724_v4  ;;  %v2742_v2 = vpack.c.bf16 %v763_v57, %v759_v56  ;;  %v3126_v4 = vpack.c.bf16 %v733_v58, %v729_v20  ;;  %v3128_v10 = vpack.c.bf16 %v742_v63, %v738_v62  ;;  %v769_v56 = vld [vmem:[%s6144_s1 + $0x1710] sm:$0xff]  ;;  %v1928_v20 = vld [vmem:[%s6146_s3] sm:$0xff]  ;;  %v1947_v62 = vld [vmem:[%s6146_s3 + $0x98] sm:$0xff] }
 0x161   :  { %3109 = vmatprep.subr.bf16.mxu1 %v3108_v9  ;;  %v737_v9 = vld [vmem:[%s6144_s1 + $0x1610] sm:$0xff]  ;;  %v3176_v57 = vpack.c.bf16 %v1945_v50, %v1944_v49  ;;  %v778_v63 = vld [vmem:[%s6144_s1 + $0x1758] sm:$0xff] }
 0x162   :  { %v797_v39 = vld [vmem:[%s6144_s1 + $0x17f0] sm:$0xff]  ;;  %v810_v50 = vld [vmem:[%s6144_s1 + $0x1858] sm:$0xff] }
 0x163   :  { %2727 = vmatpush1.bf16.msra.mxu0 %v2726_v15  ;;  %v750_v15 = vld [vmem:[%s6144_s1 + $0x1678] sm:$0xff]  ;;  %v805_v49 = vld [vmem:[%s6144_s1 + $0x1830] sm:$0xff] }
 0x164   :  { %3111 = vmatpush1.bf16.msra.mxu1 %v3110_v17  ;;  %2729 = vmatprep.subr.bf16.mxu0 %v2728_v18  ;;  %v2746_v17 = vpack.c.bf16 %v771_v8, %v767_v48  ;;  %v3130_v18 = vpack.c.bf16 %v741_v11, %v737_v9  ;;  %v3132_v23 = vpack.c.bf16 %v750_v15, %v746_v14  ;;  %v777_v48 = vld [vmem:[%s6144_s1 + $0x1750] sm:$0xff]  ;;  %v1949_v14 = vld [vmem:[%s6146_s3 + $0xa8] sm:$0xff]  ;;  %v786_v15 = vld [vmem:[%s6144_s1 + $0x1798] sm:$0xff] }
 0x165   :  { %3113 = vmatprep.subr.bf16.mxu1 %v3112_v60  ;;  %v745_v60 = vld [vmem:[%s6144_s1 + $0x1650] sm:$0xff]  ;;  %v3180_v8 = vpack.c.bf16 %v1947_v62, %v1946_v61  ;;  %v818_v62 = vld [vmem:[%s6144_s1 + $0x1898] sm:$0xff] }
 0x166   :  { %v1930_v9 = vld [vmem:[%s6146_s3 + $0x10] sm:$0xff] }
 0x167   :  { %2731 = vmatpush1.bf16.msra.mxu0 %v2730_v29  ;;  %v758_v29 = vld [vmem:[%s6144_s1 + $0x16b8] sm:$0xff] }
 0x168   :  { %3115 = vmatpush1.bf16.msra.mxu1 %v3114_v31  ;;  %2733 = vmatprep.subr.bf16.mxu0 %v2732_v32  ;;  %v2750_v31 = vpack.c.bf16 %v779_v22, %v775_v21  ;;  %v3134_v32 = vpack.c.bf16 %v749_v24, %v745_v60  ;;  %v3136_v37 = vpack.c.bf16 %v758_v29, %v754_v28  ;;  %v785_v21 = vld [vmem:[%s6144_s1 + $0x1790] sm:$0xff]  ;;  %v1932_v60 = vld [vmem:[%s6146_s3 + $0x20] sm:$0xff]  ;;  %v1951_v28 = vld [vmem:[%s6146_s3 + $0xb8] sm:$0xff] }
 0x169   :  { %3117 = vmatprep.subr.bf16.mxu1 %v3116_v36  ;;  %v753_v36 = vld [vmem:[%s6144_s1 + $0x1690] sm:$0xff]  ;;  %v3184_v22 = vpack.c.bf16 %v1949_v14, %v1948_v13  ;;  %v794_v29 = vld [vmem:[%s6144_s1 + $0x17d8] sm:$0xff] }
 0x16a   :  { %v829_v13 = vld [vmem:[%s6144_s1 + $0x18f0] sm:$0xff] }
 0x16b   :  { %2735 = vmatpush1.bf16.msra.mxu0 %v2734_v42  ;;  %v766_v42 = vld [vmem:[%s6144_s1 + $0x16f8] sm:$0xff] }
 0x16c   :  { %3119 = vmatpush1.bf16.msra.mxu1 %v3118_v30  ;;  %2737 = vmatprep.subr.bf16.mxu0 %v2736_v43  ;;  %v2754_v30 = vpack.c.bf16 %v787_v35, %v783_v33  ;;  %v3138_v43 = vpack.c.bf16 %v757_v38, %v753_v36  ;;  %v3140_v46 = vpack.c.bf16 %v766_v42, %v762_v41  ;;  %v793_v33 = vld [vmem:[%s6144_s1 + $0x17d0] sm:$0xff]  ;;  %v1953_v41 = vld [vmem:[%s6146_s3 + $0xc8] sm:$0xff]  ;;  %v802_v42 = vld [vmem:[%s6144_s1 + $0x1818] sm:$0xff] }
 0x16d   :  { %3121 = vmatprep.subr.bf16.mxu1 %v3120_v26  ;;  %v761_v26 = vld [vmem:[%s6144_s1 + $0x16d0] sm:$0xff]  ;;  %v3188_v35 = vpack.c.bf16 %v1951_v28, %v1950_v27  ;;  %v1943_v28 = vld [vmem:[%s6146_s3 + $0x78] sm:$0xff] }
 0x16e   :  { %v1934_v36 = vld [vmem:[%s6146_s3 + $0x30] sm:$0xff] }
 0x16f   :  { %2739 = vmatpush1.bf16.msra.mxu0 %v2738_v51  ;;  %v774_v51 = vld [vmem:[%s6144_s1 + $0x1738] sm:$0xff]  ;;  %v1942_v27 = vld [vmem:[%s6146_s3 + $0x70] sm:$0xff] }
 0x170   :  { %3123 = vmatpush1.bf16.msra.mxu1 %v3122_v52  ;;  %2741 = vmatprep.subr.bf16.mxu0 %v2740_v55  ;;  %v2758_v52 = vpack.c.bf16 %v795_v45, %v791_v44  ;;  %v3142_v55 = vpack.c.bf16 %v765_v47, %v761_v26  ;;  %v3144_v58 = vpack.c.bf16 %v774_v51, %v770_v34  ;;  %v1936_v45 = vld [vmem:[%s6146_s3 + $0x40] sm:$0xff]  ;;  %v1937_v26 = vld [vmem:[%s6146_s3 + $0x48] sm:$0xff]  ;;  %v801_v47 = vld [vmem:[%s6144_s1 + $0x1810] sm:$0xff] }
 0x171   :  { %3125 = vmatprep.subr.bf16.mxu1 %v3124_v12  ;;  %v1929_v12 = vld [vmem:[%s6146_s3 + $0x8] sm:$0xff]  ;;  %v3192_v44 = vpack.c.bf16 %v1953_v41, %v1952_v40  ;;  %v814_v34 = vld [vmem:[%s6144_s1 + $0x1878] sm:$0xff]  ;;  %v1954_v51 = vld [vmem:[%s6146_s3 + $0xd0] sm:$0xff] }
 0x172   :  { %v1963_v41 = vld [vmem:[%s6146_s3 + $0x118] sm:$0xff] }
 0x173   :  { %2743 = vmatpush1.bf16.msra.mxu0 %v2742_v2  ;;  %v782_v2 = vld [vmem:[%s6144_s1 + $0x1778] sm:$0xff] }
 0x174   :  { %3127 = vmatpush1.bf16.msra.mxu1 %v3126_v4  ;;  %2745 = vmatprep.subr.bf16.mxu0 %v2744_v5  ;;  %v3178_v4 = vpack.c.bf16 %v1929_v12, %v1928_v20  ;;  %v3146_v5 = vpack.c.bf16 %v773_v59, %v769_v56  ;;  %v3148_v11 = vpack.c.bf16 %v782_v2, %v778_v63  ;;  %v1939_v20 = vld [vmem:[%s6146_s3 + $0x58] sm:$0xff]  ;;  %v813_v59 = vld [vmem:[%s6144_s1 + $0x1870] sm:$0xff] }
 0x175   :  { %3129 = vmatprep.subr.bf16.mxu1 %v3128_v10  ;;  %v1931_v10 = vld [vmem:[%s6146_s3 + $0x18] sm:$0xff]  ;;  %v3162_v56 = vpack.c.bf16 %v805_v49, %v801_v47  ;;  %v3164_v12 = vpack.c.bf16 %v814_v34, %v810_v50  ;;  %v1966_v50 = vld [vmem:[%s6146_s3 + $0x130] sm:$0xff] }
 0x176   :  { %v822_v63 = vld [vmem:[%s6144_s1 + $0x18b8] sm:$0xff] }
 0x177   :  { %2747 = vmatpush1.bf16.msra.mxu0 %v2746_v17  ;;  %v790_v17 = vld [vmem:[%s6144_s1 + $0x17b8] sm:$0xff] }
 0x178   :  { %3131 = vmatpush1.bf16.msra.mxu1 %v3130_v18  ;;  %2749 = vmatprep.subr.bf16.mxu0 %v2748_v19  ;;  %v3182_v18 = vpack.c.bf16 %v1931_v10, %v1930_v9  ;;  %v3150_v19 = vpack.c.bf16 %v781_v53, %v777_v48  ;;  %v3152_v24 = vpack.c.bf16 %v790_v17, %v786_v15  ;;  %v817_v48 = vld [vmem:[%s6144_s1 + $0x1890] sm:$0xff]  ;;  %v830_v9 = vld [vmem:[%s6144_s1 + $0x18f8] sm:$0xff]  ;;  %v1956_v17 = vld [vmem:[%s6146_s3 + $0xe0] sm:$0xff] }
 0x179   :  { %3133 = vmatprep.subr.bf16.mxu1 %v3132_v23  ;;  %v1933_v23 = vld [vmem:[%s6146_s3 + $0x28] sm:$0xff]  ;;  %v825_v53 = vld [vmem:[%s6144_s1 + $0x18d0] sm:$0xff]  ;;  %v3300_v15 = vld.sshfl [vmem:[%s6143_s0 + $0x18] sm:$0x3 pattern:$0x76325410] }
 0x17a   :  { %v3174_v14 = vpack.c.bf16 %v829_v13, %v825_v53  ;;  %v1967_v34 = vld [vmem:[%s6146_s3 + $0x138] sm:$0xff]  ;;  %v1974_v13 = vld [vmem:[%s6146_s3 + $0x170] sm:$0xff] }
 0x17b   :  { %2751 = vmatpush1.bf16.msra.mxu0 %v2750_v31  ;;  %v798_v31 = vld [vmem:[%s6144_s1 + $0x17f8] sm:$0xff] }
 0x17c   :  { %3135 = vmatpush1.bf16.msra.mxu1 %v3134_v32  ;;  %2753 = vmatprep.subr.bf16.mxu0 %v2752_v0  ;;  %v3186_v32 = vpack.c.bf16 %v1933_v23, %v1932_v60  ;;  %v3154_v0 = vpack.c.bf16 %v789_v25, %v785_v21  ;;  %v3156_v38 = vpack.c.bf16 %v798_v31, %v794_v29  ;;  %v1940_v21 = vld [vmem:[%s6146_s3 + $0x60] sm:$0xff]  ;;  %v1958_v23 = vld [vmem:[%s6146_s3 + $0xf0] sm:$0xff] }
 0x17d   :  { %3137 = vmatprep.subr.bf16.mxu1 %v3136_v37  ;;  %v1935_v37 = vld [vmem:[%s6146_s3 + $0x38] sm:$0xff]  ;;  %v3206_v29 = vpack.c.bf16 %v1943_v28, %v1942_v27  ;;  %v1976_v31 = vld [vmem:[%s6146_s3 + $0x180] sm:$0xff] }
 0x17f   :  { %2755 = vmatpush1.bf16.msra.mxu0 %v2754_v30  ;;  %v806_v30 = vld [vmem:[%s6144_s1 + $0x1838] sm:$0xff] }
 0x180   :  { %3139 = vmatpush1.bf16.msra.mxu1 %v3138_v43  ;;  %2757 = vmatprep.subr.bf16.mxu0 %v2756_v16  ;;  %v3190_v43 = vpack.c.bf16 %v1935_v37, %v1934_v36  ;;  %v3158_v16 = vpack.c.bf16 %v797_v39, %v793_v33  ;;  %v1960_v33 = vld [vmem:[%s6146_s3 + $0x100] sm:$0xff]  ;;  %v1978_v37 = vld [vmem:[%s6146_s3 + $0x190] sm:$0xff] }
 0x181   :  { %3141 = vmatprep.subr.bf16.mxu1 %v3140_v46  ;;  %v3160_v46 = vpack.c.bf16 %v806_v30, %v802_v42  ;;  %v1962_v39 = vld [vmem:[%s6146_s3 + $0x110] sm:$0xff]  ;;  %v1980_v42 = vld [vmem:[%s6146_s3 + $0x1a0] sm:$0xff]  ;;  %v1981_v30 = vld [vmem:[%s6146_s3 + $0x1a8] sm:$0xff] }
 0x183   :  { %2759 = vmatpush1.bf16.msra.mxu0 %v2758_v52  ;;  %v1955_v52 = vld [vmem:[%s6146_s3 + $0xd8] sm:$0xff] }
 0x184   :  { %3143 = vmatpush1.bf16.msra.mxu1 %v3142_v55  ;;  %3177 = vmatprep.subr.bf16.mxu0 %v3176_v57  ;;  %v3194_v55 = vpack.c.bf16 %v1937_v26, %v1936_v45  ;;  %v1938_v57 = vld [vmem:[%s6146_s3 + $0x50] sm:$0xff]  ;;  %v3196_v61 = vpack.c.bf16 %v1955_v52, %v1954_v51  ;;  %v1965_v45 = vld [vmem:[%s6146_s3 + $0x128] sm:$0xff]  ;;  %v1984_v51 = vld [vmem:[%s6146_s3 + $0x1c0] sm:$0xff] }
 0x185   :  { %3145 = vmatprep.subr.bf16.mxu1 %v3144_v58  ;;  %v809_v58 = vld [vmem:[%s6144_s1 + $0x1850] sm:$0xff]  ;;  %v3198_v2 = vpack.c.bf16 %v1939_v20, %v1938_v57  ;;  %v1985_v52 = vld [vmem:[%s6146_s3 + $0x1c8] sm:$0xff]  ;;  %v1968_v57 = vld [vmem:[%s6146_s3 + $0x140] sm:$0xff] }
 0x186   :  { %1350 = vmatmul.mubr.f32.vlgmr.msra.gmra.mrb[0].mxu0 %v5390_v54  ;;  %v1982_v26 = vld [vmem:[%s6146_s3 + $0x1b0] sm:$0xff]  ;;  %v1969_v20 = vld [vmem:[%s6146_s3 + $0x148] sm:$0xff] }
 0x187   :  { %3179 = vmatpush3.bf16.msra.mxu0 %v3178_v4  ;;  %v3166_v4 = vpack.c.bf16 %v813_v59, %v809_v58  ;;  %v1987_v58 = vld [vmem:[%s6146_s3 + $0x1d8] sm:$0xff]  ;;  %v3226_v59 = vpack.c.bf16 %v1969_v20, %v1968_v57  ;;  %v2152_v57 = vld [vmem:[%s6148_s5 + $0x60] sm:$0xff]  ;;  %v2153_v20 = vld [vmem:[%s6148_s5 + $0x68] sm:$0xff] }
 0x188   :  { %3147 = vmatpush1.bf16.msra.mxu1 %v3146_v5  ;;  %3181 = vmatprep.subr.bf16.mxu0 %v3180_v8  ;;  %v3168_v5 = vpack.c.bf16 %v822_v63, %v818_v62  ;;  %v821_v8 = vld [vmem:[%s6144_s1 + $0x18b0] sm:$0xff]  ;;  %v1971_v63 = vld [vmem:[%s6146_s3 + $0x158] sm:$0xff] }
 0x189   :  { %3149 = vmatprep.subr.bf16.mxu1 %v3148_v11  ;;  %v3170_v10 = vpack.c.bf16 %v821_v8, %v817_v48  ;;  %v1970_v62 = vld [vmem:[%s6146_s3 + $0x150] sm:$0xff]  ;;  %v1972_v8 = vld [vmem:[%s6146_s3 + $0x160] sm:$0xff] }
 0x18b   :  { %3183 = vmatpush3.bf16.msra.mxu0 %v3182_v18  ;;  %v1957_v18 = vld [vmem:[%s6146_s3 + $0xe8] sm:$0xff] }
 0x18c   :  { %3151 = vmatpush1.bf16.msra.mxu1 %v3150_v19  ;;  %3185 = vmatprep.subr.bf16.mxu0 %v3184_v22  ;;  %v3200_v19 = vpack.c.bf16 %v1957_v18, %v1956_v17  ;;  %v1941_v22 = vld [vmem:[%s6146_s3 + $0x68] sm:$0xff]  ;;  %v835_v17 = vsub.s32 0, %v3627_v1  ;;  %v831_v18 = vld [vmem:[%s6145_s2] sm:$0xf] }
 0x18d   :  { %3153 = vmatprep.subr.bf16.mxu1 %v3152_v24  ;;  %v3202_v60 = vpack.c.bf16 %v1941_v22, %v1940_v21  ;;  %v1959_v24 = vld [vmem:[%s6146_s3 + $0xf8] sm:$0xff] }
 0x18e   :  { %v3204_v25 = vpack.c.bf16 %v1959_v24, %v1958_v23  ;;  %v836_v21 = vrot.slane %v831_v18, %v835_v17 }
 0x18f   :  { %3187 = vmatpush3.bf16.msra.mxu0 %v3186_v32  ;;  %v1977_v32 = vld [vmem:[%s6146_s3 + $0x188] sm:$0xff] }
 0x190   :  { %3155 = vmatpush1.bf16.msra.mxu1 %v3154_v0  ;;  %3189 = vmatprep.subr.bf16.mxu0 %v3188_v35  ;;  %v3208_v0 = vpack.c.bf16 %v1977_v32, %v1976_v31  ;;  %v1961_v35 = vld [vmem:[%s6146_s3 + $0x108] sm:$0xff]  ;;  %v843_v32 = vsub.s32 2, %v3627_v1 }
 0x191   :  { %3157 = vmatprep.subr.bf16.mxu1 %v3156_v38  ;;  %v3210_v36 = vpack.c.bf16 %v1961_v35, %v1960_v33  ;;  %v1979_v38 = vld [vmem:[%s6146_s3 + $0x198] sm:$0xff] }
 0x192   :  { %v3212_v40 = vpack.c.bf16 %v1979_v38, %v1978_v37  ;;  %v844_v33 = vrot.slane %v831_v18, %v843_v32 }
 0x193   :  { %3191 = vmatpush3.bf16.msra.mxu0 %v3190_v43  ;;  %v3214_v43 = vpack.c.bf16 %v1963_v41, %v1962_v39 }
 0x194   :  { %3159 = vmatpush1.bf16.msra.mxu1 %v3158_v16  ;;  %3193 = vmatprep.subr.bf16.mxu0 %v3192_v44  ;;  %v3216_v16 = vpack.c.bf16 %v1981_v30, %v1980_v42  ;;  %v1964_v44 = vld [vmem:[%s6146_s3 + $0x120] sm:$0xff]  ;;  %v3327_v42 = vmov 0.0|0.0  }
 0x195   :  { %3161 = vmatprep.subr.bf16.mxu1 %v3160_v46  ;;  %v1983_v46 = vld [vmem:[%s6146_s3 + $0x1b8] sm:$0xff]  ;;  %v3218_v47 = vpack.c.bf16 %v1965_v45, %v1964_v44  ;;  %v2144_v44 = vld [vmem:[%s6148_s5 + $0x20] sm:$0xff]  ;;  %v2145_v45 = vld [vmem:[%s6148_s5 + $0x28] sm:$0xff] }
 0x196   :  { %v3220_v49 = vpack.c.bf16 %v1983_v46, %v1982_v26  ;;  %v3247_v26 = vpack.c.bf16 %v2145_v45, %v2144_v44  ;;  %v2146_v46 = vld [vmem:[%s6148_s5 + $0x30] sm:$0xff] }
 0x197   :  { %1847 = vmatmul.mubr.f32.vlgmr.msra.gmra.mrb[2].mxu1 %v5390_v54  ;;  %3195 = vmatpush3.bf16.msra.mxu0 %v3194_v55  ;;  %v826_v54 = vld [vmem:[%s6144_s1 + $0x18d8] sm:$0xff]  ;;  %v3222_v55 = vpack.c.bf16 %v1967_v34, %v1966_v50  ;;  %v2148_v50 = vld [vmem:[%s6148_s5 + $0x40] sm:$0xff]  ;;  %v2149_v34 = vld [vmem:[%s6148_s5 + $0x48] sm:$0xff] }
 0x198   :  { %3163 = vmatpush1.bf16.msra.mxu1 %v3162_v56  ;;  %1917 = vmatprep.mubr.f32.mxu1 %v3325_v7  ;;  %v3172_v11 = vpack.c.bf16 %v830_v9, %v826_v54  ;;  %v3224_v56 = vpack.c.bf16 %v1985_v52, %v1984_v51  ;;  %v1973_v54 = vld [vmem:[%s6146_s3 + $0x168] sm:$0xff]  ;;  %v3253_v51 = vpack.c.bf16 %v2149_v34, %v2148_v50  ;;  %v2150_v52 = vld [vmem:[%s6148_s5 + $0x50] sm:$0xff] }
 0x199   :  { %3165 = vmatprep.subr.bf16.mxu1 %v3164_v12  ;;  %3197 = vmatprep.subr.bf16.mxu0 %v3196_v61  ;;  %v1986_v12 = vld [vmem:[%s6146_s3 + $0x1d0] sm:$0xff]  ;;  %v3234_v9 = vpack.c.bf16 %v1973_v54, %v1972_v8 }
 0x19a   :  { %v3228_v61 = vpack.c.bf16 %v1987_v58, %v1986_v12  ;;  %v3259_v12 = vpack.c.bf16 %v2153_v20, %v2152_v57  ;;  %v2154_v58 = vld [vmem:[%s6148_s5 + $0x70] sm:$0xff] }
 0x19b   :  { %3199 = vmatpush3.bf16.msra.mxu0 %v3198_v2  ;;  %v1988_v2 = vld [vmem:[%s6146_s3 + $0x1e0] sm:$0xff] }
 0x19c   :  { %3167 = vmatpush1.bf16.msra.mxu1 %v3166_v4  ;;  %3201 = vmatprep.subr.bf16.mxu0 %v3200_v19  ;;  %v1989_v4 = vld [vmem:[%s6146_s3 + $0x1e8] sm:$0xff]  ;;  %v839_v19 = vsub.s32 1, %v3627_v1 }
 0x19d   :  { %3169 = vmatprep.subr.bf16.mxu1 %v3168_v5  ;;  %v3230_v5 = vpack.c.bf16 %v1971_v63, %v1970_v62  ;;  %v3232_v48 = vpack.c.bf16 %v1989_v4, %v1988_v2  ;;  %v2252_v4 = vld [vmem:[%s6147_s4] ss:$0 sm:$0xff]  ;;  %s3301_s4 = scalar_lea.vmem %s2242_s15, 32 }
 0x19e   :  { %v840_v22 = vrot.slane %v831_v18, %v839_v19  ;;  %p3302_p0 = scmp.ne.s32.totalorder %s2242_s15, %s3301_s4  ;;  %p3307_p2 = scmp.lt.s32.totalorder %s3301_s4, %s3301_s4 }
 0x19f   :  { %3203 = vmatpush3.bf16.msra.mxu0 %v3202_v60 }
 0x1a0   :  { %3171 = vmatpush1.bf16.msra.mxu1 %v3170_v10  ;;  %3205 = vmatprep.subr.bf16.mxu0 %v3204_v25  ;;  %v1990_v10 = vld [vmem:[%s6146_s3 + $0x1f0] sm:$0xff]  ;;  %p3308_p3 = por %p3307_p2, %p3306_p1 }
 0x1a1   :  { %3173 = vmatprep.subr.bf16.mxu1 %v3172_v11  ;;  %v1991_v11 = vld [vmem:[%s6146_s3 + $0x1f8] sm:$0xff] }
 0x1a2   :  { %v3236_v53 = vpack.c.bf16 %v1991_v11, %v1990_v10  ;;  %v2253_v11 = vld [vmem:[%s6149_s6] ss:$0 sm:$0xff]  ;;  %p3309_p4 = pnand %p3308_p3, %p3302_p0 }
 0x1a3   :  { %3207 = vmatpush3.bf16.msra.mxu0 %v3206_v29 }
 0x1a4   :  { %3175 = vmatpush1.bf16.msra.mxu1 %v3174_v14  ;;  %v1975_v14 = vld [vmem:[%s6146_s3 + $0x178] sm:$0xff]  ;;  %3240 = vmatprep.subr.bf16.mxu0 %v3327_v42 }
 0x1a5   :  { %3209 = vmatprep.subr.bf16.mxu1 %v3208_v0  ;;  %v847_v0 = vsub.s32 3, %v3627_v1  ;;  %v2142_v1 = vld [vmem:[%s6148_s5 + $0x10] sm:$0xff] }
 0x1a7   :  { %2251 = vmatmul.mubr.msk.f32.vlgmr.msra.gmra.mrb[2].mxu1 %vm927_vm0, %v3300_v15  ;;  %v3238_v15 = vpack.c.bf16 %v1975_v14, %v1974_v13  ;;  %v848_v35 = vrot.slane %v831_v18, %v847_v0 }
 0x1a8   :  { %3211 = vmatpush3.bf16.msra.mxu1 %v3210_v36 }
 0x1a9   :  { %3213 = vmatprep.subr.bf16.mxu1 %v3212_v40 }
 0x1ac   :  { %3215 = vmatpush3.bf16.msra.mxu1 %v3214_v43  ;;  %v2143_v43 = vld [vmem:[%s6148_s5 + $0x18] sm:$0xff] }
 0x1ad   :  { %3217 = vmatprep.subr.bf16.mxu1 %v3216_v16  ;;  %v3244_v16 = vpack.c.bf16 %v2143_v43, %v2142_v1 }
 0x1b0   :  { %3219 = vmatpush3.bf16.msra.mxu1 %v3218_v47  ;;  %v2147_v47 = vld [vmem:[%s6148_s5 + $0x38] sm:$0xff] }
 0x1b1   :  { %3221 = vmatprep.subr.bf16.mxu1 %v3220_v49  ;;  %v3250_v49 = vpack.c.bf16 %v2147_v47, %v2146_v46 }
 0x1b4   :  { %3223 = vmatpush3.bf16.msra.mxu1 %v3222_v55  ;;  %v2151_v55 = vld [vmem:[%s6148_s5 + $0x58] sm:$0xff] }
 0x1b5   :  { %3225 = vmatprep.subr.bf16.mxu1 %v3224_v56  ;;  %v3256_v56 = vpack.c.bf16 %v2151_v55, %v2150_v52 }
 0x1b8   :  { %3227 = vmatpush3.bf16.msra.mxu1 %v3226_v59  ;;  %v2155_v59 = vld [vmem:[%s6148_s5 + $0x78] sm:$0xff] }
 0x1b9   :  { %3229 = vmatprep.subr.bf16.mxu1 %v3228_v61  ;;  %v3262_v61 = vpack.c.bf16 %v2155_v59, %v2154_v58 }
 0x1bc   :  { %3231 = vmatpush3.bf16.msra.mxu1 %v3230_v5 }
 0x1bd   :  { %3233 = vmatprep.subr.bf16.mxu1 %v3232_v48 }
 0x1c0   :  { %3235 = vmatpush3.bf16.msra.mxu1 %v3234_v9 }
 0x1c1   :  { %3237 = vmatprep.subr.bf16.mxu1 %v3236_v53 }
 0x1c4   :  { %3239 = vmatpush3.bf16.msra.mxu1 %v3238_v15 }
 0x259   :  { %v1351_v60 = vpop.f32.mrb[0].mxu0 }
 0x25a   :  { %v3264_v23 = vadd.f32 %v1351_v60, %v836_v21  ;;  %v1353_v24 = vpop.f32.mrb[1].mxu0 }
 0x25b   :  { %v3266_v25 = vadd.f32 %v1353_v24, %v840_v22 }
 0x25c   :  { %v3265_v27 = vadd.f32 %v3264_v23, %v4856_v3  ;;  %v2140_v3 = vld [vmem:[%s6148_s5] sm:$0xff] }
 0x25d   :  { %v3267_v28 = vadd.f32 %v3266_v25, %v4864_v6  ;;  %v2141_v6 = vld [vmem:[%s6148_s5 + $0x8] sm:$0xff] }
 0x25e   :  { %v1924_v31 = vmax.f32 %v3265_v27, 0.0  ;;  %v3241_v30 = vpack.c.bf16 %v2141_v6, %v2140_v3 }
 0x25f   :  { %v1925_v29 = vmax.f32 %v3267_v28, 0.0 }
 0x261   :  { %2063 = vmatprep.mubr.f32.mxu0 %v1925_v29 }
 0x262   :  { %2064 = vmatmul.mubr.f32.vlgmr.msra.gmra.mrb[2].mxu0 %v1924_v31 }
 0x263   :  { %3242 = vmatpush3.bf16.msra.mxu0 %v3241_v30  ;;  %2373 = vmatprep.mubr.msk.f32.mxu0 %vm3328_vm1, %v3325_v7 }
 0x264   :  { %3243 = vmatprep.subr.bf16.mxu0 %v3327_v42 }
 0x267   :  { %3245 = vmatpush3.bf16.msra.mxu0 %v3244_v16 }
 0x268   :  { %3246 = vmatprep.subr.bf16.mxu0 %v3327_v42 }
 0x26b   :  { %3248 = vmatpush3.bf16.msra.mxu0 %v3247_v26 }
 0x26c   :  { %3249 = vmatprep.subr.bf16.mxu0 %v3327_v42 }
 0x26f   :  { %3251 = vmatpush3.bf16.msra.mxu0 %v3250_v49 }
 0x270   :  { %3252 = vmatprep.subr.bf16.mxu0 %v3327_v42 }
 0x273   :  { %3254 = vmatpush3.bf16.msra.mxu0 %v3253_v51 }
 0x274   :  { %3255 = vmatprep.subr.bf16.mxu0 %v3327_v42 }
 0x277   :  { %3257 = vmatpush3.bf16.msra.mxu0 %v3256_v56 }
 0x278   :  { %3258 = vmatprep.subr.bf16.mxu0 %v3327_v42 }
 0x27a   :  { %v1919_v36 = vpop.f32.mrb[2].mxu1 }
 0x27b   :  { %v3268_v37 = vadd.f32 %v1919_v36, %v844_v33  ;;  %v1921_v38 = vpop.f32.mrb[3].mxu1  ;;  %3260 = vmatpush3.bf16.msra.mxu0 %v3259_v12 }
 0x27c   :  { %v3269_v39 = vadd.f32 %v1921_v38, %v848_v35  ;;  %3261 = vmatprep.subr.bf16.mxu0 %v3327_v42 }
 0x27d   :  { %v1926_v41 = vmax.f32 %v3268_v37, 0.0 }
 0x27e   :  { %v1927_v40 = vmax.f32 %v3269_v39, 0.0 }
 0x27f   :  { %3263 = vmatpush3.bf16.msra.mxu0 %v3262_v61 }
 0x280   :  { %2133 = vmatprep.mubr.f32.mxu1 %v1927_v40 }
 0x281   :  { %2134 = vmatmul.mubr.f32.vlgmr.msra.gmra.mrb[4].mxu1 %v1926_v41 }
 0x335   :  { %v2286_v62 = vpop.f32.mrb[2].mxu0 }
 0x336   :  { %v2287_v63 = vpop.f32.mrb[3].mxu0 }
 0x337   :  { %v2288_v2 = vadd.f32 %v2287_v63, %v2286_v62 }
 0x339   :  { %v2066_v8 = vadd.f32 %v2288_v2, %v2252_v4 }
 0x354   :  { %v2321_v5 = vpop.f32.mrb[4].mxu1 }
 0x355   :  { %v2322_v48 = vpop.f32.mrb[5].mxu1 }
 0x356   :  { %v2323_v54 = vadd.f32 %v2322_v48, %v2321_v5 }
 0x358   :  { %v2136_v9 = vadd.f32 %v2323_v54, %v2066_v8 }
 0x35a   :  { %v2139_v10 = vmax.f32 %v2136_v9, 0.0 }
 0x35c   :  { %2374 = vmatmul.mubr.f32.vlgmr.msra.gmra.mrb[4].mxu0 %v2139_v10 }
 0x42f   :  { %v2229_v7 = vpop.f32.mrb[4].mxu0 }
 0x430   :  { %v2230_v53 = vadd.f32 %v2253_v11, %v2229_v7  ;;  %v2375_v13 = vpop.f32.mrb[5].mxu0 }
 0x432   :  { %2234 = vst.msk [vmem:[#allocation2] sm:$0x3] %vm2233_vm2, %v2230_v53 }
 0x433   :  { %3312 = shalt.err (!%p3309_p4)
}
 0x434   :  { %s3313_s18 = scalar_lea.hbm %s6150_s7, 32 }
 0x435   :  { %p3314_p5 = scmp.ne.s32.totalorder %s6150_s7, %s3313_s18  ;;  %p3317_p6 = scmp.lt.u32.totalorder %s3313_s18, %s6150_s7 }
 0x437   :  { %p3319_p7 = pnand %p3317_p6, %p3314_p5 }
 0x439   :  { %3322 = shalt.err (!%p3319_p7)
}
 0x43a   :  { %2244 = dma.vmem_to_hbm [thread:$0]  %s2242_s15, 32, %s6150_s7, [#allocation3]  }
 0x43b   :  { %3323 = dma.done.wait [#allocation3], 32  }
 0x43c   :  { %3324 = vsyncadd [#allocation3], 4294967264 }
 0x43d   :  { %2248 = vsyncpa [#allocation3], 1 }

// kernel: net_forward.4
= control target key start
LH: loop header
LB: loop body
LE: loop exit
PB: predicated region body
PF: predicated region fallthrough
CT: control target
= control target key end

     0   :  { %10 = vsyncpa [#allocation3], 0  ;;  %s5681_s0 = inlined_call_operand.vmem [shape: f32[2,13,416], index: 0, kind: input, shape index: {}]   ;;  %s5682_s1 = inlined_call_operand.hbm [shape: f32[2,3,416,320], index: 1, kind: input, shape index: {}]   ;;  %s5683_s2 = inlined_call_operand.hbm [shape: f32[1,320], index: 2, kind: input, shape index: {}]   ;;  %s5684_s3 = inlined_call_operand.hbm [shape: f32[5,10], index: 3, kind: input, shape index: {}]   ;;  %s5685_s4 = inlined_call_operand.hbm [shape: f32[5,10], index: 4, kind: input, shape index: {}]   ;;  %s5686_s5 = inlined_call_operand.vmem [shape: f32[2,5,320], index: 5, kind: output, shape index: {}]  }
   0x1   :  { %11 = vsyncpa [#allocation5], 0 }
   0x2   :  { %12 = vsyncpa [#allocation8], 0  ;;  %s5199_s18 = smov 0  }
   0x3 LB: > { %s5159_s19 = smov [#allocation4]   ;;  %s5205_s21 = sadd.s32 4294967295, %s5157_s18   ;;  %s5157_s18 = sphi %s5199_s18, %s18_s18  }
   0x4   : > { %s185_s20 = sshll.u32 %s5159_s19, 4  ;;  %p3601_p0 = scmp.ge.s32.totalorder %s5157_s18, 1  ;;  %s5210_s20 = int_to_ptr.vmem [resolvable:$true] %s185_s20 }
   0x5   : > { %p159_p1 = scmp.lt.s32.totalorder %s5157_s18, 3  ;;  %p5687_p2 = scmp.eq.s32.totalorder %s5205_s21, 0 }
   0x6   : > { %s5160_s23 = smov [#allocation2]   ;;  %s5161_s26 = smov [#allocation6]  }
   0x7   : > { %p5212_p3 = pnand %p3601_p0, %p159_p1  ;;  %s171_s24 = sshll.u32 %s5160_s23, 4  ;;  %s5218_s24 = int_to_ptr.vmem [resolvable:$true] %s171_s24 }
   0x8   : > { %s196_s27 = sshll.u32 %s5161_s26, 4  ;;  %s5162_s28 = smov [#allocation7]   ;;  %s5226_s27 = int_to_ptr.vmem [resolvable:$true] %s196_s27 }
   0x9   : > { %s5689_s22 = scalar_select %p5212_p3, 1, 0 }
   0xa   : > { %p4973_p4 = pneg %p5212_p3  ;;  %s5228_s29 = sshll.u32 %s5162_s28, 4  ;;  %s208_s29 = int_to_ptr.vmem [resolvable:$true] %s5228_s29 }
   0xb   : > { %s5027_s7 = scalar_lea.hbm %s5683_s2, 48 }
   0xc   : > { %p5222_p5 = pnand %p5687_p2, %p4973_p4  ;;  %p5028_p6 = scmp.ne.s32.totalorder %s5683_s2, %s5027_s7 }
   0xd   : > { %p5034_p10 = scmp.lt.u32.totalorder %s5027_s7, %s5683_s2 }
   0xe   : > { %p5238_p7 = pneg %p5222_p5 }
  0x10   : > { %p5030_p8 = pnand %p5238_p7, %p5028_p6 }
  0x12   : > { %p5031_p9 = pneg %p5030_p8 }
  0x14   : > { %p5036_p11 = pnand %p5034_p10, %p5031_p9 }
  0x16   : > { %5039 = shalt.err (!%p5036_p11)
}
  0x17   : > { %s5040_s13 = scalar_lea.vmem %s5210_s20, 48  ;;  %s5047_s14 = scalar_lea.vmem %s5210_s20, 64 }
  0x18   : > { %p5041_p12 = scmp.ne.s32.totalorder %s5210_s20, %s5040_s13  ;;  %p5048_p1 = scmp.lt.s32.totalorder %s5210_s20, %s5210_s20 }
  0x19   : > { %p5049_p4 = scmp.lt.s32.totalorder %s5047_s14, %s5040_s13 }
  0x1a   : > { %p5043_p13 = pnand %p5041_p12, %p5238_p7 }
  0x1b   : > { %p5050_p6 = por %p5049_p4, %p5048_p1 }
  0x1c   : > { %p5044_p0 = pneg %p5043_p13 }
  0x1e   : > { %p5051_p8 = pnand %p5050_p6, %p5044_p0 }
  0x20   : > { %5054 = shalt.err (!%p5051_p8)
}
  0x21   : > { %4979 = dma.hbm_to_vmem [thread:$0]  (!%p5222_p5), %s5683_s2, 48, %s5210_s20, [#allocation5]  }
  0x22   : > { %s5055_s23 = scalar_lea.hbm %s5682_s1, 119808 }
  0x23   : > { %p5056_p9 = scmp.ne.s32.totalorder %s5682_s1, %s5055_s23  ;;  %p5062_p12 = scmp.lt.u32.totalorder %s5055_s23, %s5682_s1 }
  0x25   : > { %p5058_p10 = pnand %p5056_p9, %p5238_p7 }
  0x27   : > { %p5059_p11 = pneg %p5058_p10 }
  0x29   : > { %p5064_p13 = pnand %p5062_p12, %p5059_p11 }
  0x2b   : > { %5067 = shalt.err (!%p5064_p13)
}
  0x2c   : > { %s5068_s20 = scalar_lea.vmem %s5218_s24, 119808  ;;  %p5076_p6 = scmp.lt.s32.totalorder %s5218_s24, %s5218_s24 }
  0x2d   : > { %p5069_p0 = scmp.ne.s32.totalorder %s5218_s24, %s5068_s20  ;;  %p5077_p8 = scmp.lt.s32.totalorder %s5068_s20, %s5068_s20 }
  0x2f   : > { %p5071_p1 = pnand %p5069_p0, %p5238_p7  ;;  %p5078_p9 = por %p5077_p8, %p5076_p6 }
  0x31   : > { %p5072_p4 = pneg %p5071_p1 }
  0x33   : > { %p5079_p10 = pnand %p5078_p9, %p5072_p4 }
  0x35   : > { %5082 = shalt.err (!%p5079_p10)
}
  0x36   : > { %s5163_s7 = smov 384   ;;  %s5164_s8 = smov 24  }
  0x37   : > { %4976 = dma.hbm_to_vmem [thread:$0]  (!%p5222_p5), %s5682_s1, 119808, %s5218_s24, [#allocation3], %s5163_s7, %s5163_s7, %s5164_s8  }
  0x38   : > { %s5083_s14 = scalar_lea.hbm %s5684_s3, 128 }
  0x39   : > { %p5084_p11 = scmp.ne.s32.totalorder %s5684_s3, %s5083_s14  ;;  %p5090_p0 = scmp.lt.u32.totalorder %s5083_s14, %s5684_s3 }
  0x3b   : > { %p5086_p12 = pnand %p5084_p11, %p5238_p7 }
  0x3d   : > { %p5087_p13 = pneg %p5086_p12 }
  0x3f   : > { %p5092_p1 = pnand %p5090_p0, %p5087_p13 }
  0x41   : > { %5095 = shalt.err (!%p5092_p1)
}
  0x42   : > { %s5096_s24 = scalar_lea.vmem %s5226_s27, 128  ;;  %p5104_p9 = scmp.lt.s32.totalorder %s5226_s27, %s5226_s27 }
  0x43   : > { %p5097_p4 = scmp.ne.s32.totalorder %s5226_s27, %s5096_s24  ;;  %p5105_p10 = scmp.lt.s32.totalorder %s5096_s24, %s5096_s24 }
  0x45   : > { %p5099_p6 = pnand %p5097_p4, %p5238_p7  ;;  %p5106_p11 = por %p5105_p10, %p5104_p9 }
  0x47   : > { %p5100_p8 = pneg %p5099_p6 }
  0x49   : > { %p5107_p12 = pnand %p5106_p11, %p5100_p8 }
  0x4b   : > { %5110 = shalt.err (!%p5107_p12)
}
  0x4c   : > { %4982 = dma.hbm_to_vmem [thread:$0]  (!%p5222_p5), %s5684_s3, 128, %s5226_s27, [#allocation5]  }
  0x4d   : > { %s5111_s6 = scalar_lea.hbm %s5685_s4, 128 }
  0x4e   : > { %p5112_p13 = scmp.ne.s32.totalorder %s5685_s4, %s5111_s6  ;;  %p5118_p4 = scmp.lt.u32.totalorder %s5111_s6, %s5685_s4 }
  0x50   : > { %p5114_p0 = pnand %p5112_p13, %p5238_p7 }
  0x52   : > { %p5115_p1 = pneg %p5114_p0 }
  0x54   : > { %p5120_p6 = pnand %p5118_p4, %p5115_p1 }
  0x56   : > { %5123 = shalt.err (!%p5120_p6)
}
  0x57   : > { %s5124_s11 = scalar_lea.vmem %s208_s29, 128  ;;  %p5132_p11 = scmp.lt.s32.totalorder %s208_s29, %s208_s29 }
  0x58   : > { %p5125_p8 = scmp.ne.s32.totalorder %s208_s29, %s5124_s11  ;;  %p5133_p12 = scmp.lt.s32.totalorder %s5124_s11, %s5124_s11 }
  0x5a   : > { %p5127_p9 = pnand %p5125_p8, %p5238_p7  ;;  %p5134_p2 = por %p5133_p12, %p5132_p11 }
  0x5c   : > { %p5128_p10 = pneg %p5127_p9 }
  0x5e   : > { %p5135_p3 = pnand %p5134_p2, %p5128_p10 }
  0x60   : > { %5138 = shalt.err (!%p5135_p3)
}
  0x61   : > { %4985 = dma.hbm_to_vmem [thread:$0]  (!%p5222_p5), %s5685_s4, 128, %s208_s29, [#allocation8]  }
  0x62   : > { %p5692_p13 = scmp.ne.s32.totalorder %s5689_s22, 0 }
  0x63   : > { %p5693_p0 = scmp.eq.s32.totalorder (!%p5692_p13), %s5205_s21, 0 }
  0x64   : > { %228 = sbr.rel (%p5692_p13) target bundleno = 1109 (0x455), region = 40 }
  0x6b   : > { %5144 = dma.done.wait (%p5693_p0), [#allocation3], 119808   ;;  %p5694_p7 = pmov %p5693_p0 }
  0x6c   : > { %p5695_p1 = pmov %p5693_p0 }
  0x6d   : > { %5146 = vsyncadd (%p5694_p7), [#allocation3], 4294847488 }
  0x6e   : > { %5148 = dma.done.wait (%p5695_p1), [#allocation5], 176   ;;  %p5696_p2 = pmov %p5693_p0 }
  0x6f   : > { %p5697_p3 = pmov %p5693_p0 }
  0x70   : > { %5150 = vsyncadd (%p5696_p2), [#allocation5], 4294967120 }
  0x71   : > { %5152 = dma.done.wait (%p5697_p3), [#allocation8], 128   ;;  %p5698_p5 = pmov %p5693_p0 }
  0x72   : > { %v5165_v0 = vmov 0.0|0.0   ;;  %v453_v1 = vld [vmem:[#allocation2 + $0x4e8] sm:$0xff]  ;;  %v456_v2 = vld [vmem:[#allocation2 + $0x500] sm:$0xff]  ;;  %v550_v3 = vld [vmem:[#allocation2 + $0x7f0] sm:$0xff]  ;;  %p268_p4 = scmp.lt.s32.totalorder %s5205_s21, 1  ;;  %vm616_vm0 = vcmask 1046528  }
  0x73   : > { %5154 = vsyncadd (%p5698_p5), [#allocation8], 4294967168  ;;  %4036 = vmatprep.subr.bf16.mxu1 %v5165_v0  ;;  %v3900_v4 = vpack.c.bf16 %v456_v2, %v453_v1  ;;  %v553_v5 = vld [vmem:[#allocation2 + $0x808] sm:$0xff]  ;;  %v452_v6 = vld [vmem:[#allocation2 + $0x4e0] sm:$0xff]  ;;  %vm635_vm1 = vcmask 261120   ;;  %vm1427_vm2 = vcmask 1045504  }
  0x74   : > { %v455_v7 = vld [vmem:[#allocation2 + $0x4f8] sm:$0xff]  ;;  %v4037_v8 = vpack.c.bf16 %v553_v5, %v550_v3  ;;  %v462_v11 = vld [vmem:[#allocation2 + $0x530] sm:$0xff]  ;;  %v556_v12 = vld [vmem:[#allocation2 + $0x820] sm:$0xff]  ;;  %s5702_s21 = smov (!%p268_p4, %s5205_s21), 1  ;;  %vm3200_vm3 = vcmask 1041408   ;;  %vm5167_vm4 = vmmov 1  }
  0x75   : > { %v3902_v9 = vpack.c.bf16 %v455_v7, %v452_v6  ;;  %v459_v10 = vld [vmem:[#allocation2 + $0x518] sm:$0xff]  ;;  %3901 = vmatprep.subr.bf16.mxu0 %v3900_v4  ;;  %v458_v15 = vld [vmem:[#allocation2 + $0x510] sm:$0xff]  ;;  %v461_v16 = vld [vmem:[#allocation2 + $0x528] sm:$0xff]  ;;  %s3651_s22 = sshll.u32 %s5702_s21, 6  ;;  %vm3196_vm6 = vcmask 80896   ;;  %vm5168_vm7 = vmmov 0  }
  0x76   : > { %v3904_v13 = vpack.c.bf16 %v462_v11, %v459_v10  ;;  %v559_v14 = vld [vmem:[#allocation2 + $0x838] sm:$0xff]  ;;  %4038 = vmatpush1.bf16.msra.mxu1 %v4037_v8  ;;  %v3906_v18 = vpack.c.bf16 %v461_v16, %v458_v15  ;;  %v465_v19 = vld [vmem:[#allocation2 + $0x548] sm:$0xff]  ;;  %v468_v20 = vld [vmem:[#allocation2 + $0x560] sm:$0xff]  ;;  %s5354_s10 = scalar_lea.vmem %s5681_s0, %s3651_s22  ;;  %s4956_s13 = smul.u32 24, %s5702_s21  ;;  %vm3501_vm8 = vcmask 520192  }
  0x77   : > { %3903 = vmatpush1.bf16.msra.mxu0 %v3902_v9  ;;  %v4040_v17 = vpack.c.bf16 %v559_v14, %v556_v12  ;;  %v562_v21 = vld [vmem:[#allocation2 + $0x850] sm:$0xff]  ;;  %4039 = vmatprep.subr.bf16.mxu1 %v5165_v0  ;;  %v3908_v22 = vpack.c.bf16 %v468_v20, %v465_v19  ;;  %v565_v23 = vld [vmem:[#allocation2 + $0x868] sm:$0xff]  ;;  %v464_v24 = vld [vmem:[#allocation2 + $0x540] sm:$0xff] }
  0x78   : > { %3905 = vmatprep.subr.bf16.mxu0 %v3904_v13  ;;  %v467_v25 = vld [vmem:[#allocation2 + $0x558] sm:$0xff]  ;;  %v474_v27 = vld [vmem:[#allocation2 + $0x590] sm:$0xff]  ;;  %v4043_v28 = vpack.c.bf16 %v565_v23, %v562_v21  ;;  %v568_v30 = vld [vmem:[#allocation2 + $0x880] sm:$0xff]  ;;  %s277_s16 = scalar_lea.vmem %s5686_s5, %s4956_s13 }
  0x79   : > { %v471_v26 = vld [vmem:[#allocation2 + $0x578] sm:$0xff]  ;;  %v3910_v29 = vpack.c.bf16 %v467_v25, %v464_v24  ;;  %v470_v33 = vld [vmem:[#allocation2 + $0x570] sm:$0xff]  ;;  %v473_v34 = vld [vmem:[#allocation2 + $0x588] sm:$0xff] }
  0x7a   : > { %4041 = vmatpush1.bf16.msra.mxu1 %v4040_v17  ;;  %v3912_v31 = vpack.c.bf16 %v474_v27, %v471_v26  ;;  %v571_v32 = vld [vmem:[#allocation2 + $0x898] sm:$0xff]  ;;  %v477_v35 = vld [vmem:[#allocation2 + $0x5a8] sm:$0xff]  ;;  %v480_v36 = vld [vmem:[#allocation2 + $0x5c0] sm:$0xff]  ;;  %v3914_v38 = vpack.c.bf16 %v473_v34, %v470_v33 }
  0x7b   : > { %3907 = vmatpush1.bf16.msra.mxu0 %v3906_v18  ;;  %4042 = vmatprep.subr.bf16.mxu1 %v5165_v0  ;;  %v4046_v37 = vpack.c.bf16 %v571_v32, %v568_v30  ;;  %v574_v39 = vld [vmem:[#allocation2 + $0x8b0] sm:$0xff]  ;;  %v3916_v40 = vpack.c.bf16 %v480_v36, %v477_v35  ;;  %v577_v41 = vld [vmem:[#allocation2 + $0x8c8] sm:$0xff]  ;;  %v476_v42 = vld [vmem:[#allocation2 + $0x5a0] sm:$0xff] }
  0x7c   : > { %3909 = vmatprep.subr.bf16.mxu0 %v3908_v22  ;;  %v479_v43 = vld [vmem:[#allocation2 + $0x5b8] sm:$0xff]  ;;  %v486_v45 = vld [vmem:[#allocation2 + $0x5f0] sm:$0xff]  ;;  %v4049_v46 = vpack.c.bf16 %v577_v41, %v574_v39  ;;  %v580_v48 = vld [vmem:[#allocation2 + $0x8e0] sm:$0xff] }
  0x7d   : > { %v483_v44 = vld [vmem:[#allocation2 + $0x5d8] sm:$0xff]  ;;  %v3918_v47 = vpack.c.bf16 %v479_v43, %v476_v42  ;;  %v482_v51 = vld [vmem:[#allocation2 + $0x5d0] sm:$0xff]  ;;  %v485_v52 = vld [vmem:[#allocation2 + $0x5e8] sm:$0xff] }
  0x7e   : > { %4044 = vmatpush1.bf16.msra.mxu1 %v4043_v28  ;;  %v3920_v49 = vpack.c.bf16 %v486_v45, %v483_v44  ;;  %v583_v50 = vld [vmem:[#allocation2 + $0x8f8] sm:$0xff]  ;;  %v489_v53 = vld [vmem:[#allocation2 + $0x608] sm:$0xff]  ;;  %v492_v54 = vld [vmem:[#allocation2 + $0x620] sm:$0xff]  ;;  %v3922_v56 = vpack.c.bf16 %v485_v52, %v482_v51 }
  0x7f   : > { %3911 = vmatpush1.bf16.msra.mxu0 %v3910_v29  ;;  %4045 = vmatprep.subr.bf16.mxu1 %v5165_v0  ;;  %v4052_v55 = vpack.c.bf16 %v583_v50, %v580_v48  ;;  %v586_v57 = vld [vmem:[#allocation2 + $0x910] sm:$0xff]  ;;  %v446_v58 = vld [vmem:[%s5354_s10 + $0x18] sm:$0xfe]  ;;  %v3924_v60 = vpack.c.bf16 %v492_v54, %v489_v53  ;;  %v589_v61 = vld [vmem:[#allocation2 + $0x928] sm:$0xff] }
  0x80   : > { %3913 = vmatprep.subr.bf16.mxu0 %v3912_v31  ;;  %v450_v59 = vld [vmem:[%s5354_s10 + $0x38] sm:$0x7]  ;;  %v488_v62 = vld [vmem:[#allocation2 + $0x600] sm:$0xff]  ;;  %v626_v1 = vrot.slane %v446_v58, 1  ;;  %v498_v4 = vld [vmem:[#allocation2 + $0x650] sm:$0xff]  ;;  %v4055_v6 = vpack.c.bf16 %v589_v61, %v586_v57 }
  0x81   : > { %v491_v63 = vld [vmem:[#allocation2 + $0x618] sm:$0xff]  ;;  %v5359_v2 = vrot.slane %v450_v59, 1  ;;  %v592_v8 = vld [vmem:[#allocation2 + $0x940] sm:$0xff]  ;;  %v494_v11 = vld [vmem:[#allocation2 + $0x630] sm:$0xff] }
  0x82   : > { %4047 = vmatpush1.bf16.msra.mxu1 %v4046_v37  ;;  %v495_v3 = vld [vmem:[#allocation2 + $0x638] sm:$0xff]  ;;  %v3926_v7 = vpack.c.bf16 %v491_v63, %v488_v62  ;;  %v497_v12 = vld [vmem:[#allocation2 + $0x648] sm:$0xff]  ;;  %v504_v14 = vld [vmem:[#allocation2 + $0x680] sm:$0xff] }
  0x83   : > { %3915 = vmatpush1.bf16.msra.mxu0 %v3914_v38  ;;  %4048 = vmatprep.subr.bf16.mxu1 %v5165_v0  ;;  %v5363_v5 = vsel %vm616_vm0, %v626_v1, %v5359_v2  ;;  %v3928_v9 = vpack.c.bf16 %v498_v4, %v495_v3  ;;  %v595_v10 = vld [vmem:[#allocation2 + $0x958] sm:$0xff]  ;;  %v501_v13 = vld [vmem:[#allocation2 + $0x668] sm:$0xff]  ;;  %v3930_v16 = vpack.c.bf16 %v497_v12, %v494_v11  ;;  %v598_v17 = vld [vmem:[#allocation2 + $0x970] sm:$0xff] }
  0x84   : > { %3917 = vmatprep.subr.bf16.mxu0 %v3916_v40  ;;  %3617 = vmatprep.mubr.msk.f32.mxu1 %vm635_vm1, %v5363_v5  ;;  %v4058_v15 = vpack.c.bf16 %v595_v10, %v592_v8  ;;  %v3932_v18 = vpack.c.bf16 %v504_v14, %v501_v13  ;;  %v601_v19 = vld [vmem:[#allocation2 + $0x988] sm:$0xff]  ;;  %v500_v20 = vld [vmem:[#allocation2 + $0x660] sm:$0xff]  ;;  %v503_v21 = vld [vmem:[#allocation2 + $0x678] sm:$0xff] }
  0x85   : > { %v507_v22 = vld [vmem:[#allocation2 + $0x698] sm:$0xff]  ;;  %v510_v23 = vld [vmem:[#allocation2 + $0x6b0] sm:$0xff]  ;;  %v604_v24 = vld [vmem:[#allocation2 + $0x9a0] sm:$0xff]  ;;  %v4061_v25 = vpack.c.bf16 %v601_v19, %v598_v17  ;;  %v3934_v26 = vpack.c.bf16 %v503_v21, %v500_v20 }
  0x86   : > { %4050 = vmatpush1.bf16.msra.mxu1 %v4049_v46  ;;  %v607_v27 = vld [vmem:[#allocation2 + $0x9b8] sm:$0xff]  ;;  %v506_v28 = vld [vmem:[#allocation2 + $0x690] sm:$0xff]  ;;  %v509_v29 = vld [vmem:[#allocation2 + $0x6a8] sm:$0xff]  ;;  %v3936_v30 = vpack.c.bf16 %v510_v23, %v507_v22 }
  0x87   : > { %3919 = vmatpush1.bf16.msra.mxu0 %v3918_v47  ;;  %4051 = vmatprep.subr.bf16.mxu1 %v5165_v0  ;;  %v445_v31 = vld [vmem:[%s5354_s10 + $0x10] sm:$0xfe]  ;;  %v340_v34 = vld [vmem:[#allocation2 + $0x1a8] sm:$0xff]  ;;  %v516_v36 = vld [vmem:[#allocation2 + $0x6e0] sm:$0xff]  ;;  %v4064_v38 = vpack.c.bf16 %v607_v27, %v604_v24  ;;  %v3938_v39 = vpack.c.bf16 %v509_v29, %v506_v28 }
  0x88   : > { %3921 = vmatprep.subr.bf16.mxu0 %v3920_v49  ;;  %v449_v32 = vld [vmem:[%s5354_s10 + $0x30] sm:$0x7]  ;;  %v513_v35 = vld [vmem:[#allocation2 + $0x6c8] sm:$0xff]  ;;  %v623_v40 = vrot.slane %v445_v31, 1  ;;  %v512_v43 = vld [vmem:[#allocation2 + $0x6c0] sm:$0xff] }
  0x89   : > { %v337_v33 = vld [vmem:[#allocation2 + $0x190] sm:$0xff]  ;;  %v5372_v41 = vrot.slane %v449_v32, 1  ;;  %v292_v42 = vld [vmem:[#allocation2 + $0x28] sm:$0xff]  ;;  %v515_v44 = vld [vmem:[#allocation2 + $0x6d8] sm:$0xff]  ;;  %v3940_v46 = vpack.c.bf16 %v516_v36, %v513_v35 }
  0x8a   : > { %4053 = vmatpush1.bf16.msra.mxu1 %v4052_v55  ;;  %v289_v37 = vld [vmem:[#allocation2 + $0x10] sm:$0xff]  ;;  %v4170_v45 = vpack.c.bf16 %v340_v34, %v337_v33  ;;  %v343_v47 = vld [vmem:[#allocation2 + $0x1c0] sm:$0xff]  ;;  %v346_v48 = vld [vmem:[#allocation2 + $0x1d8] sm:$0xff]  ;;  %v3942_v57 = vpack.c.bf16 %v515_v44, %v512_v43 }
  0x8b   : > { %3923 = vmatpush1.bf16.msra.mxu0 %v3922_v56  ;;  %4054 = vmatprep.subr.bf16.mxu1 %v5165_v0  ;;  %v519_v49 = vld [vmem:[#allocation2 + $0x6f8] sm:$0xff]  ;;  %v522_v50 = vld [vmem:[#allocation2 + $0x710] sm:$0xff]  ;;  %v444_v51 = vld [vmem:[%s5354_s10 + $0x8] sm:$0xfe]  ;;  %v5381_v55 = vsel %vm616_vm0, %v623_v40, %v5372_v41  ;;  %v4172_v56 = vpack.c.bf16 %v292_v42, %v289_v37 }
  0x8c   : > { %3925 = vmatprep.subr.bf16.mxu0 %v3924_v60  ;;  %v448_v52 = vld [vmem:[%s5354_s10 + $0x28] sm:$0x7]  ;;  %v620_v53 = vrot.slane %v444_v51, 1  ;;  %v295_v58 = vld [vmem:[#allocation2 + $0x40] sm:$0xff]  ;;  %v298_v59 = vld [vmem:[#allocation2 + $0x58] sm:$0xff]  ;;  %v4174_v60 = vpack.c.bf16 %v346_v48, %v343_v47  ;;  %v3944_v61 = vpack.c.bf16 %v522_v50, %v519_v49 }
  0x8d   : > { %v5377_v54 = vrot.slane %v448_v52, 1  ;;  %v518_v62 = vld [vmem:[#allocation2 + $0x6f0] sm:$0xff]  ;;  %v521_v63 = vld [vmem:[#allocation2 + $0x708] sm:$0xff]  ;;  %v4176_v8 = vpack.c.bf16 %v298_v59, %v295_v58  ;;  %v524_v14 = vld [vmem:[#allocation2 + $0x720] sm:$0xff] }
  0x8e   : > { %4056 = vmatpush1.bf16.msra.mxu1 %v4055_v6  ;;  %v349_v1 = vld [vmem:[#allocation2 + $0x1f0] sm:$0xff]  ;;  %v352_v4 = vld [vmem:[#allocation2 + $0x208] sm:$0xff]  ;;  %v358_v17 = vld [vmem:[#allocation2 + $0x238] sm:$0xff] }
  0x8f   : > { %3927 = vmatpush1.bf16.msra.mxu0 %v3926_v7  ;;  %4057 = vmatprep.subr.bf16.mxu1 %v5165_v0  ;;  %v5385_v3 = vsel %vm616_vm0, %v620_v53, %v5377_v54  ;;  %v525_v6 = vld [vmem:[#allocation2 + $0x728] sm:$0xff]  ;;  %v528_v7 = vld [vmem:[#allocation2 + $0x740] sm:$0xff]  ;;  %v301_v10 = vld [vmem:[#allocation2 + $0x70] sm:$0xff]  ;;  %v4178_v12 = vpack.c.bf16 %v352_v4, %v349_v1 }
  0x90   : > { %3929 = vmatprep.subr.bf16.mxu0 %v3928_v9  ;;  %704 = vmatprep.mubr.f32.mxu0 %v5385_v3  ;;  %v3946_v9 = vpack.c.bf16 %v521_v63, %v518_v62  ;;  %v304_v11 = vld [vmem:[#allocation2 + $0x88] sm:$0xff]  ;;  %v3948_v13 = vpack.c.bf16 %v528_v7, %v525_v6  ;;  %v534_v19 = vld [vmem:[#allocation2 + $0x770] sm:$0xff]  ;;  %v307_v23 = vld [vmem:[#allocation2 + $0xa0] sm:$0xff] }
  0x91   : > { %v5393_v20 = vld [vmem:[%s5354_s10 + $0x8] sm:$0xff]  ;;  %v4180_v21 = vpack.c.bf16 %v304_v11, %v301_v10  ;;  %v310_v24 = vld [vmem:[#allocation2 + $0xb8] sm:$0xff]  ;;  %v530_v27 = vld [vmem:[#allocation2 + $0x750] sm:$0xff] }
  0x92   : > { %4059 = vmatpush1.bf16.msra.mxu1 %v4058_v15  ;;  %v527_v15 = vld [vmem:[#allocation2 + $0x738] sm:$0xff]  ;;  %v533_v28 = vld [vmem:[#allocation2 + $0x768] sm:$0xff]  ;;  %v361_v29 = vld [vmem:[#allocation2 + $0x250] sm:$0xff]  ;;  %v4184_v33 = vpack.c.bf16 %v310_v24, %v307_v23 }
  0x93   : > { %3931 = vmatpush1.bf16.msra.mxu0 %v3930_v16  ;;  %4060 = vmatprep.subr.bf16.mxu1 %v5165_v0  ;;  %v355_v16 = vld [vmem:[#allocation2 + $0x220] sm:$0xff]  ;;  %v3950_v22 = vpack.c.bf16 %v527_v15, %v524_v14  ;;  %v537_v31 = vld [vmem:[#allocation2 + $0x788] sm:$0xff]  ;;  %v3954_v34 = vpack.c.bf16 %v533_v28, %v530_v27  ;;  %v313_v35 = vld [vmem:[#allocation2 + $0xd0] sm:$0xff] }
  0x94   : > { %3933 = vmatprep.subr.bf16.mxu0 %v3932_v18  ;;  %v531_v18 = vld [vmem:[#allocation2 + $0x758] sm:$0xff]  ;;  %v540_v32 = vld [vmem:[#allocation2 + $0x7a0] sm:$0xff]  ;;  %v316_v36 = vld [vmem:[#allocation2 + $0xe8] sm:$0xff] }
  0x95   : > { %v539_v40 = vld [vmem:[#allocation2 + $0x798] sm:$0xff]  ;;  %v367_v42 = vld [vmem:[#allocation2 + $0x280] sm:$0xff]  ;;  %v4188_v47 = vpack.c.bf16 %v316_v36, %v313_v35  ;;  %v542_v50 = vld [vmem:[#allocation2 + $0x7b0] sm:$0xff] }
  0x96   : > { %4062 = vmatpush1.bf16.msra.mxu1 %v4061_v25  ;;  %v4182_v25 = vpack.c.bf16 %v358_v17, %v355_v16  ;;  %v370_v43 = vld [vmem:[#allocation2 + $0x298] sm:$0xff]  ;;  %v545_v51 = vld [vmem:[#allocation2 + $0x7c8] sm:$0xff]  ;;  %v447_v58 = vld [vmem:[%s5354_s10 + $0x20] sm:$0x7] }
  0x97   : > { %3935 = vmatpush1.bf16.msra.mxu0 %v3934_v26  ;;  %4063 = vmatprep.subr.bf16.mxu1 %v5165_v0  ;;  %v3952_v26 = vpack.c.bf16 %v534_v19, %v531_v18  ;;  %v543_v44 = vld [vmem:[#allocation2 + $0x7b8] sm:$0xff]  ;;  %v4190_v52 = vpack.c.bf16 %v370_v43, %v367_v42  ;;  %v376_v59 = vld [vmem:[#allocation2 + $0x2c8] sm:$0xff]  ;;  %v3962_v63 = vpack.c.bf16 %v545_v51, %v542_v50  ;;  %v325_v1 = vld [vmem:[#allocation2 + $0x130] sm:$0xff]  ;;  %v5398_v7 = vrot.slane %v447_v58, 1 }
  0x98   : > { %3937 = vmatprep.subr.bf16.mxu0 %v3936_v30  ;;  %v364_v30 = vld [vmem:[#allocation2 + $0x268] sm:$0xff]  ;;  %v322_v49 = vld [vmem:[#allocation2 + $0x118] sm:$0xff]  ;;  %v548_v10 = vld [vmem:[#allocation2 + $0x7e0] sm:$0xff] }
  0x99   : > { %v4186_v37 = vpack.c.bf16 %v364_v30, %v361_v29  ;;  %v328_v4 = vld [vmem:[#allocation2 + $0x148] sm:$0xff]  ;;  %v551_v11 = vld [vmem:[#allocation2 + $0x7f8] sm:$0xff]  ;;  %v558_v15 = vld [vmem:[#allocation2 + $0x830] sm:$0xff] }
  0x9a   : > { %4065 = vmatpush1.bf16.msra.mxu1 %v4064_v38  ;;  %v3956_v38 = vpack.c.bf16 %v540_v32, %v537_v31  ;;  %v555_v14 = vld [vmem:[#allocation2 + $0x818] sm:$0xff]  ;;  %v4196_v16 = vpack.c.bf16 %v328_v4, %v325_v1  ;;  %v3966_v18 = vpack.c.bf16 %v551_v11, %v548_v10  ;;  %v331_v19 = vld [vmem:[#allocation2 + $0x160] sm:$0xff]  ;;  %v554_v24 = vld [vmem:[#allocation2 + $0x810] sm:$0xff] }
  0x9b   : > { %3939 = vmatpush1.bf16.msra.mxu0 %v3938_v39  ;;  %4171 = vmatprep.subr.bf16.mxu1 %v4170_v45  ;;  %v536_v39 = vld [vmem:[#allocation2 + $0x780] sm:$0xff]  ;;  %v546_v45 = vld [vmem:[#allocation2 + $0x7d0] sm:$0xff]  ;;  %v334_v23 = vld [vmem:[#allocation2 + $0x178] sm:$0xff] }
  0x9c   : > { %3941 = vmatprep.subr.bf16.mxu0 %v3940_v46  ;;  %v319_v46 = vld [vmem:[#allocation2 + $0x100] sm:$0xff]  ;;  %v3958_v48 = vpack.c.bf16 %v539_v40, %v536_v39  ;;  %v3960_v53 = vpack.c.bf16 %v546_v45, %v543_v44  ;;  %v4200_v28 = vpack.c.bf16 %v334_v23, %v331_v19  ;;  %v385_v30 = vld [vmem:[#allocation2 + $0x310] sm:$0xff]  ;;  %v388_v32 = vld [vmem:[#allocation2 + $0x328] sm:$0xff] }
  0x9d   : > { %934 = vmatmul.mubr.f32.vlgmr.msra.gmra.mrb[0].mxu1 %v5381_v55  ;;  %v4192_v62 = vpack.c.bf16 %v322_v49, %v319_v46  ;;  %v564_v27 = vld [vmem:[#allocation2 + $0x860] sm:$0xff]  ;;  %v567_v35 = vld [vmem:[#allocation2 + $0x878] sm:$0xff]  ;;  %v570_v36 = vld [vmem:[#allocation2 + $0x890] sm:$0xff] }
  0x9e   : > { %4173 = vmatpush3.bf16.msra.mxu1 %v4172_v56  ;;  %3618 = vmatprep.mubr.msk.f32.mxu1 %vm635_vm1, %v5359_v2  ;;  %v373_v56 = vld [vmem:[#allocation2 + $0x2b0] sm:$0xff]  ;;  %v391_v40 = vld [vmem:[#allocation2 + $0x340] sm:$0xff]  ;;  %v3976_v42 = vpack.c.bf16 %v570_v36, %v567_v35  ;;  %v394_v43 = vld [vmem:[#allocation2 + $0x358] sm:$0xff] }
  0x9f   : > { %3943 = vmatpush1.bf16.msra.mxu0 %v3942_v57  ;;  %4175 = vmatprep.subr.bf16.mxu1 %v4174_v60  ;;  %v443_v57 = vld [vmem:[%s5354_s10] sm:$0xfe]  ;;  %v549_v60 = vld [vmem:[#allocation2 + $0x7e8] sm:$0xff]  ;;  %v566_v44 = vld [vmem:[#allocation2 + $0x870] sm:$0xff]  ;;  %v4206_v49 = vpack.c.bf16 %v394_v43, %v391_v40 }
  0xa0   : > { %3945 = vmatprep.subr.bf16.mxu0 %v3944_v61  ;;  %v552_v61 = vld [vmem:[#allocation2 + $0x800] sm:$0xff]  ;;  %v617_v6 = vrot.slane %v443_v57, 1  ;;  %v569_v45 = vld [vmem:[#allocation2 + $0x888] sm:$0xff]  ;;  %v397_v51 = vld [vmem:[#allocation2 + $0x370] sm:$0xff] }
  0xa1   : > { %939 = vmatmul.mubr.f32.gmra.mrb[2].mxu1 %v5372_v41  ;;  %v573_v46 = vld [vmem:[#allocation2 + $0x8a8] sm:$0xff]  ;;  %v3978_v50 = vpack.c.bf16 %v569_v45, %v566_v44  ;;  %v572_v57 = vld [vmem:[#allocation2 + $0x8a0] sm:$0xff]  ;;  %v575_v58 = vld [vmem:[#allocation2 + $0x8b8] sm:$0xff] }
  0xa2   : > { %4177 = vmatpush3.bf16.msra.mxu1 %v4176_v8  ;;  %1168 = vmatprep.mubr.f32.mxu1 %v5393_v20  ;;  %v4194_v8 = vpack.c.bf16 %v376_v59, %v373_v56  ;;  %v5402_v17 = vsel %vm616_vm0, %v617_v6, %v5398_v7  ;;  %v400_v56 = vld [vmem:[#allocation2 + $0x388] sm:$0xff]  ;;  %v579_v59 = vld [vmem:[#allocation2 + $0x8d8] sm:$0xff]  ;;  %v403_v1 = vld [vmem:[#allocation2 + $0x3a0] sm:$0xff] }
  0xa3   : > { %3947 = vmatpush1.bf16.msra.mxu0 %v3946_v9  ;;  %4179 = vmatprep.subr.bf16.mxu1 %v4178_v12  ;;  %v3964_v9 = vpack.c.bf16 %v552_v61, %v549_v60  ;;  %v379_v12 = vld [vmem:[#allocation2 + $0x2e0] sm:$0xff]  ;;  %v582_v60 = vld [vmem:[#allocation2 + $0x8f0] sm:$0xff]  ;;  %v282_v61 = vld [vmem:[%s5354_s10 + $0x18] sm:$0xff] }
  0xa4   : > { %3949 = vmatprep.subr.bf16.mxu0 %v3948_v13  ;;  %v382_v13 = vld [vmem:[#allocation2 + $0x2f8] sm:$0xff]  ;;  %v3984_v4 = vpack.c.bf16 %v582_v60, %v579_v59  ;;  %v585_v10 = vld [vmem:[#allocation2 + $0x908] sm:$0xff]  ;;  %v588_v11 = vld [vmem:[#allocation2 + $0x920] sm:$0xff] }
  0xa5   : > { %v406_v6 = vld [vmem:[#allocation2 + $0x3b8] sm:$0xff]  ;;  %v424_v36 = vld [vmem:[#allocation2 + $0x448] sm:$0xff]  ;;  %v606_v40 = vld [vmem:[#allocation2 + $0x9b0] sm:$0xff] }
  0xa6   : > { %4181 = vmatpush3.bf16.msra.mxu1 %v4180_v21  ;;  %v4198_v21 = vpack.c.bf16 %v382_v13, %v379_v12  ;;  %v4212_v12 = vpack.c.bf16 %v406_v6, %v403_v1  ;;  %v587_v19 = vld [vmem:[#allocation2 + $0x918] sm:$0xff]  ;;  %v427_v44 = vld [vmem:[#allocation2 + $0x460] sm:$0xff]  ;;  %v457_v59 = vld [vmem:[#allocation2 + $0x508] sm:$0xff] }
  0xa7   : > { %3951 = vmatpush1.bf16.msra.mxu0 %v3950_v22  ;;  %4183 = vmatprep.subr.bf16.mxu1 %v4182_v25  ;;  %v3968_v22 = vpack.c.bf16 %v558_v15, %v555_v14  ;;  %v557_v25 = vld [vmem:[#allocation2 + $0x828] sm:$0xff]  ;;  %v409_v14 = vld [vmem:[#allocation2 + $0x3d0] sm:$0xff]  ;;  %v3988_v15 = vpack.c.bf16 %v588_v11, %v585_v10  ;;  %v508_v60 = vld [vmem:[#allocation2 + $0x6a0] sm:$0xff] }
  0xa8   : > { %3953 = vmatprep.subr.bf16.mxu0 %v3952_v26  ;;  %v561_v26 = vld [vmem:[#allocation2 + $0x848] sm:$0xff]  ;;  %v3970_v29 = vpack.c.bf16 %v557_v25, %v554_v24  ;;  %v415_v25 = vld [vmem:[#allocation2 + $0x400] sm:$0xff]  ;;  %v1313_v10 = vld [vmem:[#allocation2 + $0xb50] sm:$0xff] }
  0xa9   : > { %v3972_v31 = vpack.c.bf16 %v564_v27, %v561_v26  ;;  %v418_v27 = vld [vmem:[#allocation2 + $0x418] sm:$0xff]  ;;  %v439_v1 = vld [vmem:[#allocation2 + $0x4c0] sm:$0xff]  ;;  %v1316_v11 = vld [vmem:[#allocation2 + $0xb68] sm:$0xff] }
  0xaa   : > { %4185 = vmatpush3.bf16.msra.mxu1 %v4184_v33  ;;  %v560_v33 = vld [vmem:[#allocation2 + $0x840] sm:$0xff]  ;;  %vm5653_vm5 = vmpackc.low %vm3200_vm3, %vm5167_vm4 }
  0xab   : > { %3955 = vmatpush1.bf16.msra.mxu0 %v3954_v34  ;;  %4187 = vmatprep.subr.bf16.mxu1 %v4186_v37  ;;  %v563_v34 = vld [vmem:[#allocation2 + $0x858] sm:$0xff]  ;;  %v279_v37 = vld [vmem:[%s5354_s10] sm:$0xff] }
  0xac   : > { %3957 = vmatprep.subr.bf16.mxu0 %v3956_v38  ;;  %v4203_v38 = vpack.c.bf16 %v388_v32, %v385_v30  ;;  %v3974_v39 = vpack.c.bf16 %v563_v34, %v560_v33  ;;  %v597_v30 = vld [vmem:[#allocation2 + $0x968] sm:$0xff]  ;;  %v4218_v32 = vpack.c.bf16 %v418_v27, %v415_v25  ;;  %v421_v34 = vld [vmem:[#allocation2 + $0x430] sm:$0xff]  ;;  %v1322_v25 = vld [vmem:[#allocation2 + $0xb98] sm:$0xff] }
  0xad   : > { %v523_v27 = vld [vmem:[#allocation2 + $0x718] sm:$0xff] }
  0xae   : > { %4189 = vmatpush3.bf16.msra.mxu1 %v4188_v47  ;;  %v576_v47 = vld [vmem:[#allocation2 + $0x8c0] sm:$0xff] }
  0xaf   : > { %3959 = vmatpush1.bf16.msra.mxu0 %v3958_v48  ;;  %4191 = vmatprep.subr.bf16.mxu1 %v4190_v52  ;;  %v284_v48 = vld [vmem:[%s5354_s10 + $0x28] sm:$0x3]  ;;  %v283_v52 = vld [vmem:[%s5354_s10 + $0x20] sm:$0x3] }
  0xb0   : > { %3961 = vmatprep.subr.bf16.mxu0 %v3960_v53  ;;  %v3980_v53 = vpack.c.bf16 %v576_v47, %v573_v46  ;;  %v430_v46 = vld [vmem:[#allocation2 + $0x478] sm:$0xff]  ;;  %v602_v47 = vld [vmem:[#allocation2 + $0x990] sm:$0xff] }
  0xb2   : > { %4193 = vmatpush3.bf16.msra.mxu1 %v4192_v62  ;;  %v4209_v62 = vpack.c.bf16 %v400_v56, %v397_v51  ;;  %v4224_v51 = vpack.c.bf16 %v430_v46, %v427_v44  ;;  %v286_v44 = vld [vmem:[%s5354_s10 + $0x38] sm:$0x3] }
  0xb3   : > { %3963 = vmatpush1.bf16.msra.mxu0 %v3962_v63  ;;  %4195 = vmatprep.subr.bf16.mxu1 %v4194_v8  ;;  %v3982_v63 = vpack.c.bf16 %v575_v58, %v572_v57  ;;  %v578_v8 = vld [vmem:[#allocation2 + $0x8d0] sm:$0xff]  ;;  %v436_v57 = vld [vmem:[#allocation2 + $0x4a8] sm:$0xff] }
  0xb4   : > { %3965 = vmatprep.subr.bf16.mxu0 %v3964_v9  ;;  %v581_v9 = vld [vmem:[#allocation2 + $0x8e8] sm:$0xff]  ;;  %v454_v58 = vld [vmem:[#allocation2 + $0x4f0] sm:$0xff] }
  0xb5   : > { %v3986_v13 = vpack.c.bf16 %v581_v9, %v578_v8  ;;  %v460_v8 = vld [vmem:[#allocation2 + $0x520] sm:$0xff]  ;;  %v463_v9 = vld [vmem:[#allocation2 + $0x538] sm:$0xff] }
  0xb6   : > { %705 = vmatmul.mubr.f32.vlgmr.msra.gmra.mrb[0].mxu0 %v5402_v17  ;;  %4197 = vmatpush3.bf16.msra.mxu1 %v4196_v16  ;;  %v412_v16 = vld [vmem:[#allocation2 + $0x3e8] sm:$0xff] }
  0xb7   : > { %3967 = vmatpush1.bf16.msra.mxu0 %v3966_v18  ;;  %4199 = vmatprep.subr.bf16.mxu1 %v4198_v21  ;;  %v584_v18 = vld [vmem:[#allocation2 + $0x900] sm:$0xff]  ;;  %v591_v21 = vld [vmem:[#allocation2 + $0x938] sm:$0xff]  ;;  %v4215_v23 = vpack.c.bf16 %v412_v16, %v409_v14  ;;  %v1265_v16 = vld [vmem:[#allocation2 + $0x9d0] sm:$0xff] }
  0xb8   : > { %3969 = vmatprep.subr.bf16.mxu0 %v3968_v22  ;;  %710 = vmatprep.mubr.f32.mxu0 %v5377_v54  ;;  %v594_v22 = vld [vmem:[#allocation2 + $0x950] sm:$0xff]  ;;  %v3990_v24 = vpack.c.bf16 %v587_v19, %v584_v18  ;;  %v1268_v18 = vld [vmem:[#allocation2 + $0x9e8] sm:$0xff]  ;;  %v4336_v19 = vpack.c.bf16 %v1316_v11, %v1313_v10  ;;  %v484_v10 = vld [vmem:[#allocation2 + $0x5e0] sm:$0xff] }
  0xb9   : > { %v3992_v26 = vpack.c.bf16 %v594_v22, %v591_v21  ;;  %v466_v22 = vld [vmem:[#allocation2 + $0x550] sm:$0xff]  ;;  %v487_v11 = vld [vmem:[#allocation2 + $0x5f8] sm:$0xff] }
  0xba   : > { %711 = vmatmul.mubr.f32.gmra.mrb[2].mxu0 %v5398_v7  ;;  %4201 = vmatpush3.bf16.msra.mxu1 %v4200_v28  ;;  %v590_v28 = vld [vmem:[#allocation2 + $0x930] sm:$0xff] }
  0xbb   : > { %3971 = vmatpush1.bf16.msra.mxu0 %v3970_v29  ;;  %4202 = vmatprep.subr.bf16.mxu1 %v5165_v0  ;;  %v593_v29 = vld [vmem:[#allocation2 + $0x948] sm:$0xff] }
  0xbc   : > { %3973 = vmatprep.subr.bf16.mxu0 %v3972_v31  ;;  %3615 = vmatprep.mubr.msk.f32.mxu0 %vm635_vm1, %v5363_v5  ;;  %v600_v31 = vld [vmem:[#allocation2 + $0x980] sm:$0xff]  ;;  %v3994_v33 = vpack.c.bf16 %v593_v29, %v590_v28  ;;  %v281_v28 = vld [vmem:[%s5354_s10 + $0x10] sm:$0xff] }
  0xbd   : > { %1169 = vmatmul.mubr.f32.vlgmr.msra.gmra.mrb[4].mxu1 %v279_v37  ;;  %v3996_v35 = vpack.c.bf16 %v600_v31, %v597_v30  ;;  %v596_v37 = vld [vmem:[#allocation2 + $0x960] sm:$0xff]  ;;  %v4338_v30 = vpack.c.bf16 %v1268_v18, %v1265_v16  ;;  %v4026_v18 = vpack.c.bf16 %v487_v11, %v484_v10  ;;  %v300_v10 = vld [vmem:[#allocation2 + $0x68] sm:$0xff] }
  0xbe   : > { %4204 = vmatpush1.bf16.msra.mxu1 %v4203_v38  ;;  %1173 = vmatprep.mubr.f32.mxu1 %v284_v48  ;;  %v599_v38 = vld [vmem:[#allocation2 + $0x978] sm:$0xff]  ;;  %v605_v48 = vld [vmem:[#allocation2 + $0x9a8] sm:$0xff]  ;;  %v1271_v29 = vld [vmem:[#allocation2 + $0xa00] sm:$0xff] }
  0xbf   : > { %3975 = vmatpush1.bf16.msra.mxu0 %v3974_v39  ;;  %4205 = vmatprep.subr.bf16.mxu1 %v5165_v0  ;;  %v603_v39 = vld [vmem:[#allocation2 + $0x998] sm:$0xff]  ;;  %v3998_v43 = vpack.c.bf16 %v599_v38, %v596_v37  ;;  %v472_v37 = vld [vmem:[#allocation2 + $0x580] sm:$0xff] }
  0xc0   : > { %3977 = vmatprep.subr.bf16.mxu0 %v3976_v42  ;;  %v4221_v42 = vpack.c.bf16 %v424_v36, %v421_v34  ;;  %v4000_v45 = vpack.c.bf16 %v606_v40, %v603_v39  ;;  %v1259_v34 = vld [vmem:[%s5354_s10 + $0x28] sm:$0xf]  ;;  %v475_v38 = vld [vmem:[#allocation2 + $0x598] sm:$0xff]  ;;  %v1325_v39 = vld [vmem:[#allocation2 + $0xbb0] sm:$0xff] }
  0xc1   : > { %1174 = vmatmul.mubr.f32.gmra.mrb[6].mxu1 %v283_v52  ;;  %v4002_v52 = vpack.c.bf16 %v605_v48, %v602_v47  ;;  %v1328_v40 = vld [vmem:[#allocation2 + $0xbc8] sm:$0xff]  ;;  %v5433_v46 = vrot.slane %v1259_v34, 2  ;;  %v4018_v48 = vpack.c.bf16 %v475_v38, %v472_v37  ;;  %v499_v37 = vld [vmem:[#allocation2 + $0x658] sm:$0xff]  ;;  %v1349_v38 = vld [vmem:[#allocation2 + $0xc70] sm:$0xff] }
  0xc2   : > { %4207 = vmatpush1.bf16.msra.mxu1 %v4206_v49  ;;  %3621 = vmatprep.mubr.msk.f32.mxu1 %vm635_vm1, %v282_v61  ;;  %v502_v49 = vld [vmem:[#allocation2 + $0x670] sm:$0xff]  ;;  %v511_v61 = vld [vmem:[#allocation2 + $0x6b8] sm:$0xff]  ;;  %v303_v11 = vld [vmem:[#allocation2 + $0x80] sm:$0xff] }
  0xc3   : > { %3979 = vmatpush1.bf16.msra.mxu0 %v3978_v50  ;;  %4208 = vmatprep.subr.bf16.mxu1 %v5165_v0  ;;  %v505_v50 = vld [vmem:[#allocation2 + $0x688] sm:$0xff]  ;;  %v4008_v6 = vpack.c.bf16 %v511_v61, %v508_v60  ;;  %v532_v60 = vld [vmem:[#allocation2 + $0x760] sm:$0xff]  ;;  %v535_v61 = vld [vmem:[#allocation2 + $0x778] sm:$0xff] }
  0xc4   : > { %3981 = vmatprep.subr.bf16.mxu0 %v3980_v53  ;;  %v433_v53 = vld [vmem:[#allocation2 + $0x490] sm:$0xff]  ;;  %v4004_v56 = vpack.c.bf16 %v505_v50, %v502_v49  ;;  %v1280_v50 = vld [vmem:[#allocation2 + $0xa48] sm:$0xff] }
  0xc5   : > { %v1277_v49 = vld [vmem:[#allocation2 + $0xa30] sm:$0xff] }
  0xc6   : > { %4210 = vmatpush1.bf16.msra.mxu1 %v4209_v62  ;;  %v4227_v62 = vpack.c.bf16 %v436_v57, %v433_v53  ;;  %v481_v57 = vld [vmem:[#allocation2 + $0x5c8] sm:$0xff] }
  0xc7   : > { %3983 = vmatpush1.bf16.msra.mxu0 %v3982_v63  ;;  %4211 = vmatprep.subr.bf16.mxu1 %v5165_v0  ;;  %v4006_v63 = vpack.c.bf16 %v457_v59, %v454_v58  ;;  %v1331_v58 = vld [vmem:[#allocation2 + $0xbe0] sm:$0xff]  ;;  %v1334_v59 = vld [vmem:[#allocation2 + $0xbf8] sm:$0xff] }
  0xc8   : > { %3985 = vmatprep.subr.bf16.mxu0 %v3984_v4  ;;  %v442_v4 = vld [vmem:[#allocation2 + $0x4d8] sm:$0xff] }
  0xc9   : > { %v4230_v14 = vpack.c.bf16 %v442_v4, %v439_v1  ;;  %v1283_v4 = vld [vmem:[#allocation2 + $0xa60] sm:$0xff] }
  0xca   : > { %4213 = vmatpush1.bf16.msra.mxu1 %v4212_v12  ;;  %v514_v12 = vld [vmem:[#allocation2 + $0x6d0] sm:$0xff] }
  0xcb   : > { %3987 = vmatpush1.bf16.msra.mxu0 %v3986_v13  ;;  %4214 = vmatprep.subr.bf16.mxu1 %v5165_v0  ;;  %v517_v13 = vld [vmem:[#allocation2 + $0x6e8] sm:$0xff] }
  0xcc   : > { %3989 = vmatprep.subr.bf16.mxu0 %v3988_v15  ;;  %v4010_v15 = vpack.c.bf16 %v463_v9, %v460_v8  ;;  %v4012_v21 = vpack.c.bf16 %v517_v13, %v514_v12  ;;  %v4348_v8 = vpack.c.bf16 %v1334_v59, %v1331_v58  ;;  %v4024_v9 = vpack.c.bf16 %v535_v61, %v532_v60  ;;  %v1337_v12 = vld [vmem:[#allocation2 + $0xc10] sm:$0xff]  ;;  %v1340_v13 = vld [vmem:[#allocation2 + $0xc28] sm:$0xff]  ;;  %v1307_v60 = vld [vmem:[#allocation2 + $0xb20] sm:$0xff] }
  0xcd   : > { %v1310_v61 = vld [vmem:[#allocation2 + $0xb38] sm:$0xff] }
  0xce   : > { %4216 = vmatpush1.bf16.msra.mxu1 %v4215_v23  ;;  %v469_v23 = vld [vmem:[#allocation2 + $0x568] sm:$0xff] }
  0xcf   : > { %3991 = vmatpush1.bf16.msra.mxu0 %v3990_v24  ;;  %4217 = vmatprep.subr.bf16.mxu1 %v5165_v0  ;;  %v1319_v24 = vld [vmem:[#allocation2 + $0xb80] sm:$0xff]  ;;  %v4014_v31 = vpack.c.bf16 %v469_v23, %v466_v22  ;;  %v4352_v22 = vpack.c.bf16 %v1340_v13, %v1337_v12  ;;  %v4366_v12 = vpack.c.bf16 %v1310_v61, %v1307_v60 }
  0xd0   : > { %3993 = vmatprep.subr.bf16.mxu0 %v3992_v26  ;;  %v520_v26 = vld [vmem:[#allocation2 + $0x700] sm:$0xff] }
  0xd1   : > { %v4016_v36 = vpack.c.bf16 %v523_v27, %v520_v26  ;;  %v1343_v26 = vld [vmem:[#allocation2 + $0xc40] sm:$0xff]  ;;  %v1346_v27 = vld [vmem:[#allocation2 + $0xc58] sm:$0xff] }
  0xd2   : > { %4219 = vmatpush1.bf16.msra.mxu1 %v4218_v32  ;;  %v1274_v32 = vld [vmem:[#allocation2 + $0xa18] sm:$0xff]  ;;  %v4356_v34 = vpack.c.bf16 %v1346_v27, %v1343_v26  ;;  %v327_v60 = vld [vmem:[#allocation2 + $0x140] sm:$0xff] }
  0xd3   : > { %3995 = vmatpush1.bf16.msra.mxu0 %v3994_v33  ;;  %4220 = vmatprep.subr.bf16.mxu1 %v5165_v0  ;;  %v1255_v33 = vld [vmem:[%s5354_s10 + $0x8] sm:$0xfc]  ;;  %v4342_v47 = vpack.c.bf16 %v1274_v32, %v1271_v29  ;;  %v547_v29 = vld [vmem:[#allocation2 + $0x7d8] sm:$0xff]  ;;  %v1295_v32 = vld [vmem:[#allocation2 + $0xac0] sm:$0xff] }
  0xd4   : > { %3997 = vmatprep.subr.bf16.mxu0 %v3996_v35  ;;  %v4340_v35 = vpack.c.bf16 %v1322_v25, %v1319_v24  ;;  %v490_v24 = vld [vmem:[#allocation2 + $0x610] sm:$0xff]  ;;  %v493_v25 = vld [vmem:[#allocation2 + $0x628] sm:$0xff] }
  0xd6   : > { %4222 = vmatpush1.bf16.msra.mxu1 %v4221_v42  ;;  %v526_v42 = vld [vmem:[#allocation2 + $0x730] sm:$0xff] }
  0xd7   : > { %3999 = vmatpush1.bf16.msra.mxu0 %v3998_v43  ;;  %4223 = vmatprep.subr.bf16.mxu1 %v5165_v0  ;;  %v529_v43 = vld [vmem:[#allocation2 + $0x748] sm:$0xff] }
  0xd8   : > { %4001 = vmatprep.subr.bf16.mxu0 %v4000_v45  ;;  %v1431_v45 = vrot.slane %v1255_v33, 2  ;;  %v4020_v53 = vpack.c.bf16 %v529_v43, %v526_v42  ;;  %v1298_v33 = vld [vmem:[#allocation2 + $0xad8] sm:$0xff]  ;;  %v291_v42 = vld [vmem:[#allocation2 + $0x20] sm:$0xff] }
  0xd9   : > { %v4358_v43 = vpack.c.bf16 %v1298_v33, %v1295_v32  ;;  %v1370_v32 = vld [vmem:[#allocation2 + $0xd18] sm:$0xff]  ;;  %v305_v33 = vld [vmem:[#allocation2 + $0x90] sm:$0xff] }
  0xda   : > { %4225 = vmatpush1.bf16.msra.mxu1 %v4224_v51  ;;  %v285_v51 = vld [vmem:[%s5354_s10 + $0x30] sm:$0x3] }
  0xdb   : > { %4003 = vmatpush1.bf16.msra.mxu0 %v4002_v52  ;;  %4226 = vmatprep.subr.bf16.mxu1 %v5165_v0  ;;  %v4344_v52 = vpack.c.bf16 %v1328_v40, %v1325_v39  ;;  %v1352_v39 = vld [vmem:[#allocation2 + $0xc88] sm:$0xff] }
  0xdc   : > { %4005 = vmatprep.subr.bf16.mxu0 %v4004_v56  ;;  %v478_v56 = vld [vmem:[#allocation2 + $0x5b0] sm:$0xff]  ;;  %v288_v40 = vld [vmem:[#allocation2 + $0x8] sm:$0xff] }
  0xdd   : > { %v4022_v1 = vpack.c.bf16 %v481_v57, %v478_v56  ;;  %v294_v56 = vld [vmem:[#allocation2 + $0x38] sm:$0xff]  ;;  %v297_v57 = vld [vmem:[#allocation2 + $0x50] sm:$0xff] }
  0xde   : > { %782 = vmatmul.mubr.f32.vlgmr.msra.gmra.mrb[0].mxu0 %v5381_v55  ;;  %4228 = vmatpush1.bf16.msra.mxu1 %v4227_v62  ;;  %v5439_v62 = vsel %vm1427_vm2, %v1431_v45, %v5433_v46  ;;  %v1301_v45 = vld [vmem:[#allocation2 + $0xaf0] sm:$0xff] }
  0xdf   : > { %4007 = vmatpush3.bf16.msra.mxu0 %v4006_v63  ;;  %4229 = vmatprep.subr.bf16.mxu1 %v5165_v0  ;;  %v4346_v63 = vpack.c.bf16 %v1280_v50, %v1277_v49  ;;  %v1304_v49 = vld [vmem:[#allocation2 + $0xb08] sm:$0xff]  ;;  %v287_v50 = vld [vmem:[#allocation2] sm:$0xff] }
  0xe0   : > { %4009 = vmatprep.subr.bf16.mxu0 %v4008_v6  ;;  %3616 = vmatprep.mubr.msk.f32.mxu0 %vm635_vm1, %v5359_v2  ;;  %v1286_v6 = vld [vmem:[#allocation2 + $0xa78] sm:$0xff]  ;;  %v4362_v58 = vpack.c.bf16 %v1304_v49, %v1301_v45  ;;  %v311_v45 = vld [vmem:[#allocation2 + $0xc0] sm:$0xff]  ;;  %v321_v49 = vld [vmem:[#allocation2 + $0x110] sm:$0xff] }
  0xe1   : > { %v4350_v16 = vpack.c.bf16 %v1286_v6, %v1283_v4  ;;  %v296_v4 = vld [vmem:[#allocation2 + $0x48] sm:$0xff]  ;;  %v1254_v6 = vld [vmem:[%s5354_s10] sm:$0xfc] }
  0xe2   : > { %788 = vmatmul.mubr.f32.gmra.mrb[2].mxu0 %v5372_v41  ;;  %4231 = vmatpush1.bf16.msra.mxu1 %v4230_v14  ;;  %v538_v14 = vld [vmem:[#allocation2 + $0x790] sm:$0xff] }
  0xe3   : > { %4011 = vmatpush3.bf16.msra.mxu0 %v4010_v15  ;;  %4337 = vmatprep.subr.bf16.mxu1 %v4336_v19  ;;  %v541_v15 = vld [vmem:[#allocation2 + $0x7a8] sm:$0xff]  ;;  %v1289_v19 = vld [vmem:[#allocation2 + $0xa90] sm:$0xff] }
  0xe4   : > { %4013 = vmatprep.subr.bf16.mxu0 %v4012_v21  ;;  %858 = vmatprep.mubr.f32.mxu0 %v5385_v3  ;;  %v1292_v21 = vld [vmem:[#allocation2 + $0xaa8] sm:$0xff]  ;;  %v4028_v23 = vpack.c.bf16 %v541_v15, %v538_v14  ;;  %v1428_v14 = vrot.slane %v1254_v6, 2 }
  0xe5   : > { %1244 = vmatmul.mubr.f32.vlgmr.msra.gmra.mrb[8].mxu1 %v281_v28  ;;  %v544_v28 = vld [vmem:[#allocation2 + $0x7c0] sm:$0xff]  ;;  %v1388_v6 = vld [vmem:[#allocation2 + $0xda8] sm:$0xff] }
  0xe6   : > { %4339 = vmatpush3.bf16.msra.mxu1 %v4338_v30  ;;  %3622 = vmatprep.mubr.msk.f32.mxu1 %vm635_vm1, %v286_v44  ;;  %v4354_v30 = vpack.c.bf16 %v1292_v21, %v1289_v19  ;;  %v1364_v19 = vld [vmem:[#allocation2 + $0xce8] sm:$0xff]  ;;  %v299_v21 = vld [vmem:[#allocation2 + $0x60] sm:$0xff] }
  0xe7   : > { %4015 = vmatpush3.bf16.msra.mxu0 %v4014_v31  ;;  %4341 = vmatprep.subr.bf16.mxu1 %v4340_v35  ;;  %v4030_v31 = vpack.c.bf16 %v493_v25, %v490_v24  ;;  %v4032_v35 = vpack.c.bf16 %v547_v29, %v544_v28  ;;  %v309_v24 = vld [vmem:[#allocation2 + $0xb0] sm:$0xff]  ;;  %v1367_v28 = vld [vmem:[#allocation2 + $0xd00] sm:$0xff]  ;;  %v1257_v29 = vld [vmem:[%s5354_s10 + $0x18] sm:$0xfc] }
  0xe8   : > { %4017 = vmatprep.subr.bf16.mxu0 %v4016_v36  ;;  %v496_v36 = vld [vmem:[#allocation2 + $0x640] sm:$0xff] }
  0xe9   : > { %1249 = vmatmul.mubr.f32.gmra.mrb[10].mxu1 %v285_v51  ;;  %v4034_v44 = vpack.c.bf16 %v499_v37, %v496_v36  ;;  %v290_v51 = vld [vmem:[#allocation2 + $0x18] sm:$0xff]  ;;  %v315_v36 = vld [vmem:[#allocation2 + $0xe0] sm:$0xff]  ;;  %v1437_v37 = vrot.slane %v1257_v29, 2  ;;  %v1400_v29 = vld [vmem:[#allocation2 + $0xe08] sm:$0xff] }
  0xea   : > { %4343 = vmatpush3.bf16.msra.mxu1 %v4342_v47  ;;  %1668 = vmatprep.mubr.f32.mxu1 %v5439_v62  ;;  %v4360_v47 = vpack.c.bf16 %v1352_v39, %v1349_v38  ;;  %v4068_v59 = vpack.c.bf16 %v290_v51, %v287_v50  ;;  %v4372_v39 = vpack.c.bf16 %v1370_v32, %v1367_v28  ;;  %v342_v32 = vld [vmem:[#allocation2 + $0x1b8] sm:$0xff] }
  0xeb   : > { %4019 = vmatpush3.bf16.msra.mxu0 %v4018_v48  ;;  %4345 = vmatprep.subr.bf16.mxu1 %v4344_v52  ;;  %v4066_v48 = vpack.c.bf16 %v291_v42, %v288_v40  ;;  %v1355_v52 = vld [vmem:[#allocation2 + $0xca0] sm:$0xff]  ;;  %v1373_v42 = vld [vmem:[#allocation2 + $0xd30] sm:$0xff] }
  0xec   : > { %4021 = vmatprep.subr.bf16.mxu0 %v4020_v53  ;;  %v1358_v53 = vld [vmem:[#allocation2 + $0xcb8] sm:$0xff] }
  0xee   : > { %4347 = vmatpush3.bf16.msra.mxu1 %v4346_v63  ;;  %v293_v63 = vld [vmem:[#allocation2 + $0x30] sm:$0xff] }
  0xef   : > { %4023 = vmatpush3.bf16.msra.mxu0 %v4022_v1  ;;  %4349 = vmatprep.subr.bf16.mxu1 %v4348_v8  ;;  %v4364_v1 = vpack.c.bf16 %v1358_v53, %v1355_v52  ;;  %v1258_v8 = vld [vmem:[%s5354_s10 + $0x20] sm:$0xf]  ;;  %v4072_v13 = vpack.c.bf16 %v296_v4, %v293_v63 }
  0xf0   : > { %4025 = vmatprep.subr.bf16.mxu0 %v4024_v9  ;;  %v4070_v9 = vpack.c.bf16 %v297_v57, %v294_v56  ;;  %v5445_v15 = vrot.slane %v1258_v8, 2  ;;  %v1379_v52 = vld [vmem:[#allocation2 + $0xd60] sm:$0xff]  ;;  %v1382_v56 = vld [vmem:[#allocation2 + $0xd78] sm:$0xff]  ;;  %v317_v57 = vld [vmem:[#allocation2 + $0xf0] sm:$0xff] }
  0xf1   : > { %v4378_v61 = vpack.c.bf16 %v1382_v56, %v1379_v52  ;;  %v323_v8 = vld [vmem:[#allocation2 + $0x120] sm:$0xff]  ;;  %v350_v52 = vld [vmem:[#allocation2 + $0x1f8] sm:$0xff]  ;;  %v357_v56 = vld [vmem:[#allocation2 + $0x230] sm:$0xff] }
  0xf2   : > { %4351 = vmatpush3.bf16.msra.mxu1 %v4350_v16  ;;  %v1361_v16 = vld [vmem:[#allocation2 + $0xcd0] sm:$0xff]  ;;  %v5451_v25 = vsel %vm1427_vm2, %v1428_v14, %v5445_v15  ;;  %v1391_v14 = vld [vmem:[#allocation2 + $0xdc0] sm:$0xff] }
  0xf3   : > { %4027 = vmatpush3.bf16.msra.mxu0 %v4026_v18  ;;  %4353 = vmatprep.subr.bf16.mxu1 %v4352_v22  ;;  %v4074_v18 = vpack.c.bf16 %v303_v11, %v300_v10  ;;  %v302_v22 = vld [vmem:[#allocation2 + $0x78] sm:$0xff]  ;;  %v4369_v26 = vpack.c.bf16 %v1364_v19, %v1361_v16  ;;  %v333_v11 = vld [vmem:[#allocation2 + $0x170] sm:$0xff] }
  0xf4   : > { %4029 = vmatprep.subr.bf16.mxu0 %v4028_v23  ;;  %v306_v23 = vld [vmem:[#allocation2 + $0x98] sm:$0xff]  ;;  %v4076_v27 = vpack.c.bf16 %v302_v22, %v299_v21  ;;  %v329_v19 = vld [vmem:[#allocation2 + $0x150] sm:$0xff]  ;;  %v332_v21 = vld [vmem:[#allocation2 + $0x168] sm:$0xff] }
  0xf5   : > { %v330_v10 = vld [vmem:[#allocation2 + $0x158] sm:$0xff]  ;;  %v336_v22 = vld [vmem:[#allocation2 + $0x188] sm:$0xff] }
  0xf6   : > { %4355 = vmatpush3.bf16.msra.mxu1 %v4354_v30  ;;  %v1261_v30 = vld [vmem:[%s5354_s10 + $0x38] sm:$0xf]  ;;  %v4094_v16 = vpack.c.bf16 %v333_v11, %v330_v10  ;;  %v360_v10 = vld [vmem:[#allocation2 + $0x248] sm:$0xff]  ;;  %v363_v11 = vld [vmem:[#allocation2 + $0x260] sm:$0xff] }
  0xf7   : > { %4031 = vmatpush3.bf16.msra.mxu0 %v4030_v31  ;;  %4357 = vmatprep.subr.bf16.mxu1 %v4356_v34  ;;  %v4078_v31 = vpack.c.bf16 %v309_v24, %v306_v23  ;;  %v308_v34 = vld [vmem:[#allocation2 + $0xa8] sm:$0xff]  ;;  %v5458_v38 = vrot.slane %v1261_v30, 2  ;;  %v339_v23 = vld [vmem:[#allocation2 + $0x1a0] sm:$0xff] }
  0xf8   : > { %4033 = vmatprep.subr.bf16.mxu0 %v4032_v35  ;;  %v312_v35 = vld [vmem:[#allocation2 + $0xc8] sm:$0xff]  ;;  %v4080_v40 = vpack.c.bf16 %v308_v34, %v305_v33  ;;  %v4098_v28 = vpack.c.bf16 %v339_v23, %v336_v22  ;;  %v335_v30 = vld [vmem:[#allocation2 + $0x180] sm:$0xff]  ;;  %v345_v33 = vld [vmem:[#allocation2 + $0x1d0] sm:$0xff] }
  0xf9   : > { %v1949_v22 = vld [vmem:[#allocation2 + $0x1398] sm:$0xff]  ;;  %v359_v23 = vld [vmem:[#allocation2 + $0x240] sm:$0xff] }
  0xfa   : > { %4359 = vmatpush3.bf16.msra.mxu1 %v4358_v43  ;;  %v4082_v43 = vpack.c.bf16 %v315_v36, %v312_v35  ;;  %v1403_v36 = vld [vmem:[#allocation2 + $0xe20] sm:$0xff] }
  0xfb   : > { %4035 = vmatpush3.bf16.msra.mxu0 %v4034_v44  ;;  %4361 = vmatprep.subr.bf16.mxu1 %v4360_v47  ;;  %v1376_v44 = vld [vmem:[#allocation2 + $0xd48] sm:$0xff]  ;;  %v314_v47 = vld [vmem:[#allocation2 + $0xd8] sm:$0xff] }
  0xfc   : > { %4067 = vmatprep.subr.bf16.mxu0 %v4066_v48  ;;  %v318_v48 = vld [vmem:[#allocation2 + $0xf8] sm:$0xff]  ;;  %v4375_v50 = vpack.c.bf16 %v1376_v44, %v1373_v42  ;;  %v4084_v51 = vpack.c.bf16 %v314_v47, %v311_v45  ;;  %v344_v42 = vld [vmem:[#allocation2 + $0x1c8] sm:$0xff]  ;;  %v351_v44 = vld [vmem:[#allocation2 + $0x200] sm:$0xff] }
  0xfd   : > { %v4086_v53 = vpack.c.bf16 %v321_v49, %v318_v48  ;;  %v1409_v48 = vld [vmem:[#allocation2 + $0xe50] sm:$0xff] }
  0xfe   : > { %859 = vmatmul.mubr.f32.vlgmr.msra.gmra.mrb[4].mxu0 %v5402_v17  ;;  %4363 = vmatpush3.bf16.msra.mxu1 %v4362_v58  ;;  %v320_v58 = vld [vmem:[#allocation2 + $0x108] sm:$0xff] }
  0xff   : > { %4069 = vmatpush1.bf16.msra.mxu0 %v4068_v59  ;;  %863 = vmatprep.mubr.f32.mxu0 %v5377_v54  ;;  %v324_v59 = vld [vmem:[#allocation2 + $0x128] sm:$0xff]  ;;  %v4088_v63 = vpack.c.bf16 %v320_v58, %v317_v57  ;;  %v1415_v57 = vld [vmem:[#allocation2 + $0xe80] sm:$0xff] }
 0x100   : > { %4365 = vmatprep.subr.bf16.mxu1 %v4364_v1  ;;  %4071 = vmatprep.subr.bf16.mxu0 %v4070_v9  ;;  %v1385_v1 = vld [vmem:[#allocation2 + $0xd90] sm:$0xff]  ;;  %v4090_v4 = vpack.c.bf16 %v327_v60, %v324_v59  ;;  %v326_v9 = vld [vmem:[#allocation2 + $0x138] sm:$0xff] }
 0x101   : > { %v1418_v60 = vld [vmem:[#allocation2 + $0xe98] sm:$0xff] }
 0x102   : > { %864 = vmatmul.mubr.f32.gmra.mrb[6].mxu0 %v5398_v7  ;;  %4367 = vmatpush3.bf16.msra.mxu1 %v4366_v12  ;;  %v4381_v12 = vpack.c.bf16 %v1388_v6, %v1385_v1  ;;  %v1260_v6 = vld [vmem:[%s5354_s10 + $0x30] sm:$0xf] }
 0x103   : > { %4073 = vmatpush1.bf16.msra.mxu0 %v4072_v13  ;;  %4368 = vmatprep.subr.bf16.mxu1 %v5165_v0  ;;  %v4092_v13 = vpack.c.bf16 %v326_v9, %v323_v8  ;;  %v1947_v8 = vld [vmem:[#allocation2 + $0x1388] sm:$0xff]  ;;  %v1950_v9 = vld [vmem:[#allocation2 + $0x13a0] sm:$0xff] }
 0x104   : > { %4075 = vmatprep.subr.bf16.mxu0 %v4074_v18  ;;  %1014 = vmatprep.mubr.f32.mxu0 %v5393_v20  ;;  %v5465_v20 = vsel %vm1427_vm2, %v1437_v37, %v5458_v38  ;;  %v1394_v18 = vld [vmem:[#allocation2 + $0xdd8] sm:$0xff]  ;;  %v4102_v37 = vpack.c.bf16 %v345_v33, %v342_v32  ;;  %v1952_v33 = vld [vmem:[#allocation2 + $0x13b0] sm:$0xff] }
 0x105   : > { %1669 = vmatmul.mubr.f32.vlgmr.msra.gmra.mrb[12].mxu1 %v5451_v25  ;;  %v4384_v24 = vpack.c.bf16 %v1394_v18, %v1391_v14  ;;  %v1946_v18 = vld [vmem:[#allocation2 + $0x1380] sm:$0xff] }
 0x106   : > { %4370 = vmatpush1.bf16.msra.mxu1 %v4369_v26  ;;  %1673 = vmatprep.mubr.f32.mxu1 %v5433_v46  ;;  %v4096_v26 = vpack.c.bf16 %v332_v21, %v329_v19  ;;  %v4398_v19 = vpack.c.bf16 %v1950_v9, %v1947_v8  ;;  %v4114_v21 = vpack.c.bf16 %v363_v11, %v360_v10  ;;  %v377_v8 = vld [vmem:[#allocation2 + $0x2d0] sm:$0xff]  ;;  %v380_v9 = vld [vmem:[#allocation2 + $0x2e8] sm:$0xff]  ;;  %v1974_v11 = vld [vmem:[#allocation2 + $0x1460] sm:$0xff] }
 0x107   : > { %4077 = vmatpush1.bf16.msra.mxu0 %v4076_v27  ;;  %4371 = vmatprep.subr.bf16.mxu1 %v5165_v0  ;;  %v1397_v27 = vld [vmem:[#allocation2 + $0xdf0] sm:$0xff]  ;;  %v1971_v10 = vld [vmem:[#allocation2 + $0x1448] sm:$0xff] }
 0x108   : > { %4079 = vmatprep.subr.bf16.mxu0 %v4078_v31  ;;  %v338_v31 = vld [vmem:[#allocation2 + $0x198] sm:$0xff]  ;;  %v4387_v34 = vpack.c.bf16 %v1400_v29, %v1397_v27  ;;  %v1956_v27 = vld [vmem:[#allocation2 + $0x13d0] sm:$0xff] }
 0x109   : > { %1674 = vmatmul.mubr.f32.gmra.mrb[14].mxu1 %v5445_v15  ;;  %v4100_v35 = vpack.c.bf16 %v338_v31, %v335_v30  ;;  %v369_v29 = vld [vmem:[#allocation2 + $0x290] sm:$0xff]  ;;  %v4400_v31 = vpack.c.bf16 %v1949_v22, %v1946_v18  ;;  %v4128_v18 = vpack.c.bf16 %v380_v9, %v377_v8  ;;  %v4414_v22 = vpack.c.bf16 %v1974_v11, %v1971_v10  ;;  %v1991_v9 = vld [vmem:[#allocation2 + $0x14e8] sm:$0xff] }
 0x10a   : > { %4373 = vmatpush1.bf16.msra.mxu1 %v4372_v39  ;;  %3625 = vmatprep.mubr.msk.f32.mxu1 %vm635_vm1, %v5465_v20  ;;  %v1406_v39 = vld [vmem:[#allocation2 + $0xe38] sm:$0xff]  ;;  %v1988_v8 = vld [vmem:[#allocation2 + $0x14d0] sm:$0xff] }
 0x10b   : > { %4081 = vmatpush1.bf16.msra.mxu0 %v4080_v40  ;;  %4374 = vmatprep.subr.bf16.mxu1 %v5165_v0  ;;  %v341_v40 = vld [vmem:[#allocation2 + $0x1b0] sm:$0xff]  ;;  %v4390_v45 = vpack.c.bf16 %v1406_v39, %v1403_v36  ;;  %v1959_v39 = vld [vmem:[#allocation2 + $0x13e8] sm:$0xff] }
 0x10c   : > { %4083 = vmatprep.subr.bf16.mxu0 %v4082_v43  ;;  %v348_v43 = vld [vmem:[#allocation2 + $0x1e8] sm:$0xff]  ;;  %v4104_v47 = vpack.c.bf16 %v344_v42, %v341_v40  ;;  %v365_v36 = vld [vmem:[#allocation2 + $0x270] sm:$0xff]  ;;  %v1962_v42 = vld [vmem:[#allocation2 + $0x1400] sm:$0xff] }
 0x10d   : > { %v4106_v49 = vpack.c.bf16 %v351_v44, %v348_v43  ;;  %v372_v43 = vld [vmem:[#allocation2 + $0x2a8] sm:$0xff]  ;;  %v375_v44 = vld [vmem:[#allocation2 + $0x2c0] sm:$0xff] }
 0x10e   : > { %4376 = vmatpush1.bf16.msra.mxu1 %v4375_v50  ;;  %v1412_v50 = vld [vmem:[#allocation2 + $0xe68] sm:$0xff] }
 0x10f   : > { %4085 = vmatpush1.bf16.msra.mxu0 %v4084_v51  ;;  %4377 = vmatprep.subr.bf16.mxu1 %v5165_v0  ;;  %v347_v51 = vld [vmem:[#allocation2 + $0x1e0] sm:$0xff]  ;;  %v4393_v58 = vpack.c.bf16 %v1412_v50, %v1409_v48  ;;  %v4406_v50 = vpack.c.bf16 %v1962_v42, %v1959_v39  ;;  %v389_v39 = vld [vmem:[#allocation2 + $0x330] sm:$0xff]  ;;  %v1983_v42 = vld [vmem:[#allocation2 + $0x14a8] sm:$0xff] }
 0x110   : > { %4087 = vmatprep.subr.bf16.mxu0 %v4086_v53  ;;  %v354_v53 = vld [vmem:[#allocation2 + $0x218] sm:$0xff]  ;;  %v4108_v59 = vpack.c.bf16 %v350_v52, %v347_v51  ;;  %v1958_v48 = vld [vmem:[#allocation2 + $0x13e0] sm:$0xff]  ;;  %v4122_v51 = vpack.c.bf16 %v375_v44, %v372_v43  ;;  %v396_v44 = vld [vmem:[#allocation2 + $0x368] sm:$0xff] }
 0x111   : > { %v4110_v1 = vpack.c.bf16 %v357_v56, %v354_v53  ;;  %v371_v52 = vld [vmem:[#allocation2 + $0x2a0] sm:$0xff]  ;;  %v374_v53 = vld [vmem:[#allocation2 + $0x2b8] sm:$0xff] }
 0x112   : > { %4379 = vmatpush1.bf16.msra.mxu1 %v4378_v61  ;;  %v353_v61 = vld [vmem:[#allocation2 + $0x210] sm:$0xff]  ;;  %v1965_v56 = vld [vmem:[#allocation2 + $0x1418] sm:$0xff]  ;;  %v1986_v43 = vld [vmem:[#allocation2 + $0x14c0] sm:$0xff] }
 0x113   : > { %4089 = vmatpush1.bf16.msra.mxu0 %v4088_v63  ;;  %4380 = vmatprep.subr.bf16.mxu1 %v5165_v0  ;;  %v356_v63 = vld [vmem:[#allocation2 + $0x228] sm:$0xff] }
 0x114   : > { %4091 = vmatprep.subr.bf16.mxu0 %v4090_v4  ;;  %v1256_v4 = vld [vmem:[%s5354_s10 + $0x10] sm:$0xfc] }
 0x115   : > { %v1434_v14 = vrot.slane %v1256_v4, 2 }
 0x116   : > { %4382 = vmatpush1.bf16.msra.mxu1 %v4381_v12  ;;  %v4396_v12 = vpack.c.bf16 %v1418_v60, %v1415_v57  ;;  %v1968_v57 = vld [vmem:[#allocation2 + $0x1430] sm:$0xff] }
 0x117   : > { %4093 = vmatpush1.bf16.msra.mxu0 %v4092_v13  ;;  %4383 = vmatprep.subr.bf16.mxu1 %v5165_v0  ;;  %v4112_v13 = vpack.c.bf16 %v356_v63, %v353_v61  ;;  %v4124_v61 = vpack.c.bf16 %v374_v53, %v371_v52  ;;  %v1964_v63 = vld [vmem:[#allocation2 + $0x1410] sm:$0xff]  ;;  %v4410_v4 = vpack.c.bf16 %v1968_v57, %v1965_v56  ;;  %v395_v56 = vld [vmem:[#allocation2 + $0x360] sm:$0xff]  ;;  %v398_v57 = vld [vmem:[#allocation2 + $0x378] sm:$0xff] }
 0x118   : > { %4095 = vmatprep.subr.bf16.mxu0 %v4094_v16  ;;  %v5478_v16 = vrot.slane %v1260_v6, 2  ;;  %v4422_v52 = vpack.c.bf16 %v1986_v43, %v1983_v42  ;;  %v2003_v42 = vld [vmem:[#allocation2 + $0x1548] sm:$0xff] }
 0x11a   : > { %4385 = vmatpush1.bf16.msra.mxu1 %v4384_v24  ;;  %v362_v24 = vld [vmem:[#allocation2 + $0x258] sm:$0xff]  ;;  %v5483_v30 = vsel %vm1427_vm2, %v1434_v14, %v5478_v16 }
 0x11b   : > { %4097 = vmatpush1.bf16.msra.mxu0 %v4096_v26  ;;  %4386 = vmatprep.subr.bf16.mxu1 %v5165_v0  ;;  %v1953_v26 = vld [vmem:[#allocation2 + $0x13b8] sm:$0xff]  ;;  %v4116_v32 = vpack.c.bf16 %v362_v24, %v359_v23  ;;  %v383_v24 = vld [vmem:[#allocation2 + $0x300] sm:$0xff] }
 0x11c   : > { %4099 = vmatprep.subr.bf16.mxu0 %v4098_v28  ;;  %v366_v28 = vld [vmem:[#allocation2 + $0x278] sm:$0xff] }
 0x11d   : > { %v4118_v40 = vpack.c.bf16 %v369_v29, %v366_v28  ;;  %v1980_v28 = vld [vmem:[#allocation2 + $0x1490] sm:$0xff]  ;;  %v390_v29 = vld [vmem:[#allocation2 + $0x338] sm:$0xff] }
 0x11e   : > { %4388 = vmatpush1.bf16.msra.mxu1 %v4387_v34  ;;  %v1955_v34 = vld [vmem:[#allocation2 + $0x13c8] sm:$0xff] }
 0x11f   : > { %4101 = vmatpush1.bf16.msra.mxu0 %v4100_v35  ;;  %4389 = vmatprep.subr.bf16.mxu1 %v5165_v0  ;;  %v4402_v35 = vpack.c.bf16 %v1956_v27, %v1953_v26  ;;  %v386_v26 = vld [vmem:[#allocation2 + $0x318] sm:$0xff] }
 0x120   : > { %4103 = vmatprep.subr.bf16.mxu0 %v4102_v37  ;;  %v368_v37 = vld [vmem:[#allocation2 + $0x288] sm:$0xff]  ;;  %v1977_v27 = vld [vmem:[#allocation2 + $0x1478] sm:$0xff] }
 0x122   : > { %4391 = vmatpush1.bf16.msra.mxu1 %v4390_v45  ;;  %v4404_v45 = vpack.c.bf16 %v1955_v34, %v1952_v33  ;;  %v4132_v33 = vpack.c.bf16 %v386_v26, %v383_v24  ;;  %v1976_v34 = vld [vmem:[#allocation2 + $0x1470] sm:$0xff]  ;;  %v1994_v26 = vld [vmem:[#allocation2 + $0x1500] sm:$0xff] }
 0x123   : > { %4105 = vmatpush1.bf16.msra.mxu0 %v4104_v47  ;;  %4392 = vmatprep.subr.bf16.mxu1 %v5165_v0  ;;  %v4120_v47 = vpack.c.bf16 %v368_v37, %v365_v36  ;;  %v4418_v36 = vpack.c.bf16 %v1980_v28, %v1977_v27  ;;  %v1997_v27 = vld [vmem:[#allocation2 + $0x1518] sm:$0xff] }
 0x124   : > { %4107 = vmatprep.subr.bf16.mxu0 %v4106_v49  ;;  %v1961_v49 = vld [vmem:[#allocation2 + $0x13f8] sm:$0xff] }
 0x125   : > { %v4408_v60 = vpack.c.bf16 %v1961_v49, %v1958_v48 }
 0x126   : > { %4394 = vmatpush1.bf16.msra.mxu1 %v4393_v58  ;;  %v378_v58 = vld [vmem:[#allocation2 + $0x2d8] sm:$0xff] }
 0x127   : > { %4109 = vmatpush1.bf16.msra.mxu0 %v4108_v59  ;;  %4395 = vmatprep.subr.bf16.mxu1 %v5165_v0  ;;  %v381_v59 = vld [vmem:[#allocation2 + $0x2f0] sm:$0xff] }
 0x128   : > { %4111 = vmatprep.subr.bf16.mxu0 %v4110_v1  ;;  %v1967_v1 = vld [vmem:[#allocation2 + $0x1428] sm:$0xff]  ;;  %v4126_v6 = vpack.c.bf16 %v381_v59, %v378_v58  ;;  %v1989_v58 = vld [vmem:[#allocation2 + $0x14d8] sm:$0xff]  ;;  %v1992_v59 = vld [vmem:[#allocation2 + $0x14f0] sm:$0xff] }
 0x129   : > { %v4412_v14 = vpack.c.bf16 %v1967_v1, %v1964_v63  ;;  %v5013_v63 = vld [vmem:[%s5354_s10 + $0x28] sm:$0x3]  ;;  %v5014_v1 = vld [vmem:[%s5354_s10 + $0x20] sm:$0x3]  ;;  %v4426_v10 = vpack.c.bf16 %v1992_v59, %v1989_v58 }
 0x12a   : > { %4397 = vmatpush1.bf16.msra.mxu1 %v4396_v12  ;;  %v384_v12 = vld [vmem:[#allocation2 + $0x308] sm:$0xff] }
 0x12b   : > { %4113 = vmatpush1.bf16.msra.mxu0 %v4112_v13  ;;  %4399 = vmatprep.subr.bf16.mxu1 %v4398_v19  ;;  %v387_v13 = vld [vmem:[#allocation2 + $0x320] sm:$0xff] }
 0x12c   : > { %4115 = vmatprep.subr.bf16.mxu0 %v4114_v21  ;;  %v1970_v19 = vld [vmem:[#allocation2 + $0x1440] sm:$0xff]  ;;  %v1973_v21 = vld [vmem:[#allocation2 + $0x1458] sm:$0xff]  ;;  %v4130_v23 = vpack.c.bf16 %v387_v13, %v384_v12  ;;  %v401_v12 = vld [vmem:[#allocation2 + $0x390] sm:$0xff] }
 0x12d   : > { %1744 = vmatmul.mubr.f32.vlgmr.msra.gmra.mrb[16].mxu1 %v5483_v30  ;;  %v404_v13 = vld [vmem:[#allocation2 + $0x3a8] sm:$0xff] }
 0x12e   : > { %4401 = vmatpush1.bf16.msra.mxu1 %v4400_v31  ;;  %3626 = vmatprep.mubr.msk.f32.mxu1 %vm635_vm1, %v5458_v38  ;;  %v393_v31 = vld [vmem:[#allocation2 + $0x350] sm:$0xff]  ;;  %v4144_v24 = vpack.c.bf16 %v404_v13, %v401_v12 }
 0x12f   : > { %4117 = vmatpush1.bf16.msra.mxu0 %v4116_v32  ;;  %4403 = vmatprep.subr.bf16.mxu1 %v4402_v35  ;;  %v4416_v32 = vpack.c.bf16 %v1973_v21, %v1970_v19  ;;  %v1979_v35 = vld [vmem:[#allocation2 + $0x1488] sm:$0xff]  ;;  %v4134_v37 = vpack.c.bf16 %v393_v31, %v390_v29  ;;  %v411_v21 = vld [vmem:[#allocation2 + $0x3e0] sm:$0xff] }
 0x130   : > { %4119 = vmatprep.subr.bf16.mxu0 %v4118_v40  ;;  %v392_v40 = vld [vmem:[#allocation2 + $0x348] sm:$0xff]  ;;  %v4420_v48 = vpack.c.bf16 %v1979_v35, %v1976_v34  ;;  %v407_v31 = vld [vmem:[#allocation2 + $0x3c0] sm:$0xff]  ;;  %v2004_v34 = vld [vmem:[#allocation2 + $0x1550] sm:$0xff] }
 0x131   : > { %1749 = vmatmul.mubr.f32.gmra.mrb[18].mxu1 %v5478_v16  ;;  %v4136_v49 = vpack.c.bf16 %v392_v40, %v389_v39  ;;  %v408_v19 = vld [vmem:[#allocation2 + $0x3c8] sm:$0xff]  ;;  %v414_v35 = vld [vmem:[#allocation2 + $0x3f8] sm:$0xff]  ;;  %v2000_v40 = vld [vmem:[#allocation2 + $0x1530] sm:$0xff] }
 0x132   : > { %4405 = vmatpush1.bf16.msra.mxu1 %v4404_v45  ;;  %2166 = vmatprep.mubr.f32.mxu1 %v5385_v3  ;;  %v399_v45 = vld [vmem:[#allocation2 + $0x380] sm:$0xff]  ;;  %v4146_v29 = vpack.c.bf16 %v411_v21, %v408_v19  ;;  %v2019_v19 = vld [vmem:[#allocation2 + $0x15c8] sm:$0xff] }
 0x133   : > { %4121 = vmatpush1.bf16.msra.mxu0 %v4120_v47  ;;  %4407 = vmatprep.subr.bf16.mxu1 %v4406_v50  ;;  %v5012_v47 = vld [vmem:[%s5354_s10] sm:$0xff]  ;;  %v4138_v53 = vpack.c.bf16 %v399_v45, %v396_v44  ;;  %v413_v45 = vld [vmem:[#allocation2 + $0x3f0] sm:$0xff] }
 0x134   : > { %4123 = vmatprep.subr.bf16.mxu0 %v4122_v51  ;;  %v1982_v50 = vld [vmem:[#allocation2 + $0x14a0] sm:$0xff]  ;;  %v1985_v51 = vld [vmem:[#allocation2 + $0x14b8] sm:$0xff] }
 0x135   : > { %v2022_v21 = vld [vmem:[#allocation2 + $0x15e0] sm:$0xff] }
 0x136   : > { %4409 = vmatpush1.bf16.msra.mxu1 %v4408_v60  ;;  %v402_v60 = vld [vmem:[#allocation2 + $0x398] sm:$0xff] }
 0x137   : > { %4125 = vmatpush1.bf16.msra.mxu0 %v4124_v61  ;;  %4411 = vmatprep.subr.bf16.mxu1 %v4410_v4  ;;  %v405_v61 = vld [vmem:[#allocation2 + $0x3b0] sm:$0xff]  ;;  %v4424_v4 = vpack.c.bf16 %v1985_v51, %v1982_v50  ;;  %v420_v50 = vld [vmem:[#allocation2 + $0x428] sm:$0xff]  ;;  %v423_v51 = vld [vmem:[#allocation2 + $0x440] sm:$0xff] }
 0x138   : > { %4127 = vmatprep.subr.bf16.mxu0 %v4126_v6  ;;  %v4140_v6 = vpack.c.bf16 %v398_v57, %v395_v56  ;;  %v4142_v11 = vpack.c.bf16 %v405_v61, %v402_v60  ;;  %v2006_v56 = vld [vmem:[#allocation2 + $0x1560] sm:$0xff]  ;;  %v2009_v57 = vld [vmem:[#allocation2 + $0x1578] sm:$0xff]  ;;  %v4154_v59 = vpack.c.bf16 %v423_v51, %v420_v50  ;;  %v1264_v51 = vld [vmem:[#allocation2 + $0x9c8] sm:$0xff] }
 0x139   : > { %v419_v60 = vld [vmem:[#allocation2 + $0x420] sm:$0xff]  ;;  %v422_v61 = vld [vmem:[#allocation2 + $0x438] sm:$0xff] }
 0x13a   : > { %4413 = vmatpush1.bf16.msra.mxu1 %v4412_v14  ;;  %v1995_v14 = vld [vmem:[#allocation2 + $0x1508] sm:$0xff]  ;;  %v2034_v50 = vld [vmem:[#allocation2 + $0x1640] sm:$0xff] }
 0x13b   : > { %4129 = vmatpush1.bf16.msra.mxu0 %v4128_v18  ;;  %4415 = vmatprep.subr.bf16.mxu1 %v4414_v22  ;;  %v1998_v18 = vld [vmem:[#allocation2 + $0x1520] sm:$0xff]  ;;  %v5015_v22 = vld [vmem:[%s5354_s10 + $0x18] sm:$0xff] }
 0x13c   : > { %4131 = vmatprep.subr.bf16.mxu0 %v4130_v23  ;;  %v4428_v23 = vpack.c.bf16 %v1991_v9, %v1988_v8  ;;  %v4430_v28 = vpack.c.bf16 %v1998_v18, %v1995_v14  ;;  %v4440_v8 = vpack.c.bf16 %v2009_v57, %v2006_v56  ;;  %v4156_v9 = vpack.c.bf16 %v422_v61, %v419_v60  ;;  %v425_v14 = vld [vmem:[#allocation2 + $0x450] sm:$0xff]  ;;  %v428_v18 = vld [vmem:[#allocation2 + $0x468] sm:$0xff]  ;;  %v2030_v57 = vld [vmem:[#allocation2 + $0x1620] sm:$0xff] }
 0x13d   : > { %v1263_v61 = vld [vmem:[#allocation2 + $0x9c0] sm:$0xff] }
 0x13e   : > { %1015 = vmatmul.mubr.f32.vlgmr.msra.gmra.mrb[0].mxu0 %v5012_v47  ;;  %4417 = vmatpush1.bf16.msra.mxu1 %v4416_v32  ;;  %v410_v32 = vld [vmem:[#allocation2 + $0x3d8] sm:$0xff]  ;;  %v416_v47 = vld [vmem:[#allocation2 + $0x408] sm:$0xff] }
 0x13f   : > { %4133 = vmatpush1.bf16.msra.mxu0 %v4132_v33  ;;  %4419 = vmatprep.subr.bf16.mxu1 %v4418_v36  ;;  %v2001_v33 = vld [vmem:[#allocation2 + $0x1538] sm:$0xff]  ;;  %v417_v36 = vld [vmem:[#allocation2 + $0x410] sm:$0xff]  ;;  %v4148_v39 = vpack.c.bf16 %v410_v32, %v407_v31  ;;  %v431_v32 = vld [vmem:[#allocation2 + $0x480] sm:$0xff] }
 0x140   : > { %4135 = vmatprep.subr.bf16.mxu0 %v4134_v37  ;;  %1020 = vmatprep.mubr.f32.mxu0 %v5013_v63  ;;  %v4432_v37 = vpack.c.bf16 %v1997_v27, %v1994_v26  ;;  %v4434_v43 = vpack.c.bf16 %v2004_v34, %v2001_v33  ;;  %v4150_v44 = vpack.c.bf16 %v417_v36, %v414_v35  ;;  %v2013_v63 = vld [vmem:[#allocation2 + $0x1598] sm:$0xff]  ;;  %v2018_v27 = vld [vmem:[#allocation2 + $0x15c0] sm:$0xff]  ;;  %v2028_v35 = vld [vmem:[#allocation2 + $0x1610] sm:$0xff] }
 0x141   : > { %v4160_v26 = vpack.c.bf16 %v428_v18, %v425_v14  ;;  %v434_v33 = vld [vmem:[#allocation2 + $0x498] sm:$0xff]  ;;  %v1269_v18 = vld [vmem:[#allocation2 + $0x9f0] sm:$0xff] }
 0x142   : > { %1021 = vmatmul.mubr.f32.gmra.mrb[2].mxu0 %v5014_v1  ;;  %4421 = vmatpush1.bf16.msra.mxu1 %v4420_v48  ;;  %v2007_v48 = vld [vmem:[#allocation2 + $0x1568] sm:$0xff]  ;;  %v2016_v1 = vld [vmem:[#allocation2 + $0x15b0] sm:$0xff]  ;;  %v2025_v34 = vld [vmem:[#allocation2 + $0x15f8] sm:$0xff] }
 0x143   : > { %4137 = vmatpush1.bf16.msra.mxu0 %v4136_v49  ;;  %4423 = vmatprep.subr.bf16.mxu1 %v4422_v52  ;;  %v2010_v49 = vld [vmem:[#allocation2 + $0x1580] sm:$0xff]  ;;  %v4436_v52 = vpack.c.bf16 %v2003_v42, %v2000_v40  ;;  %v4442_v12 = vpack.c.bf16 %v2016_v1, %v2013_v63  ;;  %v438_v36 = vld [vmem:[#allocation2 + $0x4b8] sm:$0xff]  ;;  %v4164_v40 = vpack.c.bf16 %v434_v33, %v431_v32  ;;  %v2024_v42 = vld [vmem:[#allocation2 + $0x15f0] sm:$0xff] }
 0x144   : > { %4139 = vmatprep.subr.bf16.mxu0 %v4138_v53  ;;  %3619 = vmatprep.mubr.msk.f32.mxu0 %vm635_vm1, %v5015_v22  ;;  %v4152_v53 = vpack.c.bf16 %v416_v47, %v413_v45  ;;  %v4438_v58 = vpack.c.bf16 %v2010_v49, %v2007_v48  ;;  %v432_v22 = vld [vmem:[#allocation2 + $0x488] sm:$0xff]  ;;  %v437_v47 = vld [vmem:[#allocation2 + $0x4b0] sm:$0xff]  ;;  %v1266_v63 = vld [vmem:[#allocation2 + $0x9d8] sm:$0xff] }
 0x145   : > { %v440_v48 = vld [vmem:[#allocation2 + $0x4c8] sm:$0xff]  ;;  %v2037_v1 = vld [vmem:[#allocation2 + $0x1658] sm:$0xff] }
 0x146   : > { %4425 = vmatpush1.bf16.msra.mxu1 %v4424_v4  ;;  %v426_v4 = vld [vmem:[#allocation2 + $0x458] sm:$0xff]  ;;  %v2031_v49 = vld [vmem:[#allocation2 + $0x1628] sm:$0xff]  ;;  %v4168_v56 = vpack.c.bf16 %v440_v48, %v437_v47  ;;  %v2048_v47 = vld [vmem:[#allocation2 + $0x16b0] sm:$0xff] }
 0x147   : > { %4141 = vmatpush1.bf16.msra.mxu0 %v4140_v6  ;;  %4427 = vmatprep.subr.bf16.mxu1 %v4426_v10  ;;  %v429_v6 = vld [vmem:[#allocation2 + $0x470] sm:$0xff]  ;;  %v2051_v48 = vld [vmem:[#allocation2 + $0x16c8] sm:$0xff] }
 0x148   : > { %4143 = vmatprep.subr.bf16.mxu0 %v4142_v11  ;;  %v2012_v10 = vld [vmem:[#allocation2 + $0x1590] sm:$0xff]  ;;  %v2015_v11 = vld [vmem:[#allocation2 + $0x15a8] sm:$0xff]  ;;  %v4158_v13 = vpack.c.bf16 %v429_v6, %v426_v4  ;;  %v1270_v6 = vld [vmem:[#allocation2 + $0x9f8] sm:$0xff] }
 0x149   : > { %v2040_v4 = vld [vmem:[#allocation2 + $0x1670] sm:$0xff] }
 0x14a   : > { %4429 = vmatpush1.bf16.msra.mxu1 %v4428_v23  ;;  %v435_v23 = vld [vmem:[#allocation2 + $0x4a0] sm:$0xff] }
 0x14b   : > { %4145 = vmatpush1.bf16.msra.mxu0 %v4144_v24  ;;  %4431 = vmatprep.subr.bf16.mxu1 %v4430_v28  ;;  %v4444_v24 = vpack.c.bf16 %v2015_v11, %v2012_v10  ;;  %v2021_v28 = vld [vmem:[#allocation2 + $0x15d8] sm:$0xff]  ;;  %v4162_v31 = vpack.c.bf16 %v435_v23, %v432_v22  ;;  %v4234_v10 = vpack.c.bf16 %v1266_v63, %v1263_v61  ;;  %v2036_v11 = vld [vmem:[#allocation2 + $0x1650] sm:$0xff]  ;;  %v2046_v22 = vld [vmem:[#allocation2 + $0x16a0] sm:$0xff] }
 0x14c   : > { %4147 = vmatprep.subr.bf16.mxu0 %v4146_v29  ;;  %v4446_v29 = vpack.c.bf16 %v2022_v21, %v2019_v19  ;;  %v1272_v19 = vld [vmem:[#allocation2 + $0xa08] sm:$0xff]  ;;  %v2054_v61 = vld [vmem:[#allocation2 + $0x16e0] sm:$0xff]  ;;  %v2057_v63 = vld [vmem:[#allocation2 + $0x16f8] sm:$0xff] }
 0x14d   : > { %v2043_v21 = vld [vmem:[#allocation2 + $0x1688] sm:$0xff] }
 0x14e   : > { %4433 = vmatpush1.bf16.msra.mxu1 %v4432_v37  ;;  %v441_v37 = vld [vmem:[#allocation2 + $0x4d0] sm:$0xff]  ;;  %v1276_v23 = vld [vmem:[#allocation2 + $0xa28] sm:$0xff]  ;;  %v4462_v32 = vpack.c.bf16 %v2046_v22, %v2043_v21 }
 0x14f   : > { %4149 = vmatpush1.bf16.msra.mxu0 %v4148_v39  ;;  %4435 = vmatprep.subr.bf16.mxu1 %v4434_v43  ;;  %v4448_v39 = vpack.c.bf16 %v2021_v28, %v2018_v27  ;;  %v2027_v43 = vld [vmem:[#allocation2 + $0x1608] sm:$0xff]  ;;  %v4166_v45 = vpack.c.bf16 %v441_v37, %v438_v36  ;;  %v4238_v28 = vpack.c.bf16 %v1272_v19, %v1269_v18  ;;  %v2049_v36 = vld [vmem:[#allocation2 + $0x16b8] sm:$0xff]  ;;  %v2052_v37 = vld [vmem:[#allocation2 + $0x16d0] sm:$0xff] }
 0x150   : > { %4151 = vmatprep.subr.bf16.mxu0 %v4150_v44  ;;  %v4450_v44 = vpack.c.bf16 %v2028_v35, %v2025_v34  ;;  %v1275_v34 = vld [vmem:[#allocation2 + $0xa20] sm:$0xff]  ;;  %v1278_v35 = vld [vmem:[#allocation2 + $0xa38] sm:$0xff]  ;;  %v4472_v18 = vpack.c.bf16 %v2057_v63, %v2054_v61  ;;  %v2060_v21 = vld [vmem:[#allocation2 + $0x1710] sm:$0xff] }
 0x151   : > { %v2063_v22 = vld [vmem:[#allocation2 + $0x1728] sm:$0xff]  ;;  %v2082_v61 = vld [vmem:[#allocation2 + $0x17c0] sm:$0xff] }
 0x152   : > { %4437 = vmatpush1.bf16.msra.mxu1 %v4436_v52  ;;  %v1267_v52 = vld [vmem:[#allocation2 + $0x9e0] sm:$0xff]  ;;  %v1312_v63 = vld [vmem:[#allocation2 + $0xb48] sm:$0xff] }
 0x153   : > { %4153 = vmatpush1.bf16.msra.mxu0 %v4152_v53  ;;  %4439 = vmatprep.subr.bf16.mxu1 %v4438_v58  ;;  %v4452_v53 = vpack.c.bf16 %v2027_v43, %v2024_v42  ;;  %v2033_v58 = vld [vmem:[#allocation2 + $0x1638] sm:$0xff]  ;;  %v4232_v60 = vpack.c.bf16 %v1267_v52, %v1264_v51  ;;  %v5018_v43 = vld [vmem:[%s5354_s10 + $0x30] sm:$0x3]  ;;  %v1284_v52 = vld [vmem:[#allocation2 + $0xa68] sm:$0xff] }
 0x154   : > { %4155 = vmatprep.subr.bf16.mxu0 %v4154_v59  ;;  %v4454_v59 = vpack.c.bf16 %v2034_v50, %v2031_v49  ;;  %v5017_v42 = vld [vmem:[%s5354_s10 + $0x38] sm:$0x3]  ;;  %v4466_v49 = vpack.c.bf16 %v2052_v37, %v2049_v36  ;;  %v1281_v51 = vld [vmem:[#allocation2 + $0xa50] sm:$0xff]  ;;  %v2066_v37 = vld [vmem:[#allocation2 + $0x1740] sm:$0xff] }
 0x156   : > { %4441 = vmatpush1.bf16.msra.mxu1 %v4440_v8  ;;  %v1273_v8 = vld [vmem:[#allocation2 + $0xa10] sm:$0xff] }
 0x157   : > { %4157 = vmatpush1.bf16.msra.mxu0 %v4156_v9  ;;  %4443 = vmatprep.subr.bf16.mxu1 %v4442_v12  ;;  %v4456_v9 = vpack.c.bf16 %v2033_v58, %v2030_v57  ;;  %v2039_v12 = vld [vmem:[#allocation2 + $0x1668] sm:$0xff]  ;;  %v4236_v14 = vpack.c.bf16 %v1273_v8, %v1270_v6  ;;  %v1291_v58 = vld [vmem:[#allocation2 + $0xaa0] sm:$0xff]  ;;  %v1290_v8 = vld [vmem:[#allocation2 + $0xa98] sm:$0xff] }
 0x158   : > { %4159 = vmatprep.subr.bf16.mxu0 %v4158_v13  ;;  %v4458_v13 = vpack.c.bf16 %v2040_v4, %v2037_v1  ;;  %v4460_v27 = vpack.c.bf16 %v2039_v12, %v2036_v11  ;;  %v1288_v57 = vld [vmem:[#allocation2 + $0xa88] sm:$0xff]  ;;  %v1287_v6 = vld [vmem:[#allocation2 + $0xa80] sm:$0xff]  ;;  %v2064_v11 = vld [vmem:[#allocation2 + $0x1730] sm:$0xff] }
 0x159   : > { %v4248_v4 = vpack.c.bf16 %v1291_v58, %v1288_v57  ;;  %v1294_v12 = vld [vmem:[#allocation2 + $0xab8] sm:$0xff]  ;;  %v4250_v19 = vpack.c.bf16 %v1290_v8, %v1287_v6  ;;  %v1305_v58 = vld [vmem:[#allocation2 + $0xb10] sm:$0xff]  ;;  %v2078_v8 = vld [vmem:[#allocation2 + $0x17a0] sm:$0xff] }
 0x15a   : > { %4445 = vmatpush1.bf16.msra.mxu1 %v4444_v24  ;;  %v1279_v24 = vld [vmem:[#allocation2 + $0xa40] sm:$0xff] }
 0x15b   : > { %4161 = vmatpush1.bf16.msra.mxu0 %v4160_v26  ;;  %4447 = vmatprep.subr.bf16.mxu1 %v4446_v29  ;;  %v5016_v26 = vld [vmem:[%s5354_s10 + $0x10] sm:$0xff]  ;;  %v2042_v29 = vld [vmem:[#allocation2 + $0x1680] sm:$0xff]  ;;  %v4240_v33 = vpack.c.bf16 %v1279_v24, %v1276_v23 }
 0x15c   : > { %4163 = vmatprep.subr.bf16.mxu0 %v4162_v31  ;;  %v2045_v31 = vld [vmem:[#allocation2 + $0x1698] sm:$0xff] }
 0x15e   : > { %4449 = vmatpush1.bf16.msra.mxu1 %v4448_v39  ;;  %v1282_v39 = vld [vmem:[#allocation2 + $0xa58] sm:$0xff] }
 0x15f   : > { %4165 = vmatpush1.bf16.msra.mxu0 %v4164_v40  ;;  %4451 = vmatprep.subr.bf16.mxu1 %v4450_v44  ;;  %v1285_v40 = vld [vmem:[#allocation2 + $0xa70] sm:$0xff]  ;;  %v4464_v44 = vpack.c.bf16 %v2045_v31, %v2042_v29  ;;  %v2070_v29 = vld [vmem:[#allocation2 + $0x1760] sm:$0xff]  ;;  %v1300_v31 = vld [vmem:[#allocation2 + $0xae8] sm:$0xff] }
 0x160   : > { %4167 = vmatprep.subr.bf16.mxu0 %v4166_v45  ;;  %v4242_v45 = vpack.c.bf16 %v1278_v35, %v1275_v34  ;;  %v4244_v50 = vpack.c.bf16 %v1285_v40, %v1282_v39  ;;  %v4476_v35 = vpack.c.bf16 %v2063_v22, %v2060_v21  ;;  %v2069_v39 = vld [vmem:[#allocation2 + $0x1758] sm:$0xff]  ;;  %v1321_v22 = vld [vmem:[#allocation2 + $0xb90] sm:$0xff] }
 0x161   : > { %v1318_v21 = vld [vmem:[#allocation2 + $0xb78] sm:$0xff] }
 0x162   : > { %4453 = vmatpush1.bf16.msra.mxu1 %v4452_v53  ;;  %v2055_v53 = vld [vmem:[#allocation2 + $0x16e8] sm:$0xff] }
 0x163   : > { %4169 = vmatpush1.bf16.msra.mxu0 %v4168_v56  ;;  %4455 = vmatprep.subr.bf16.mxu1 %v4454_v59  ;;  %v2058_v56 = vld [vmem:[#allocation2 + $0x1700] sm:$0xff]  ;;  %v4468_v59 = vpack.c.bf16 %v2051_v48, %v2048_v47  ;;  %v2076_v47 = vld [vmem:[#allocation2 + $0x1790] sm:$0xff]  ;;  %v1306_v48 = vld [vmem:[#allocation2 + $0xb18] sm:$0xff] }
 0x164   : > { %4233 = vmatprep.subr.bf16.mxu0 %v4232_v60  ;;  %v4246_v60 = vpack.c.bf16 %v1284_v52, %v1281_v51  ;;  %v4470_v1 = vpack.c.bf16 %v2058_v56, %v2055_v53  ;;  %v2072_v52 = vld [vmem:[#allocation2 + $0x1770] sm:$0xff]  ;;  %v2075_v53 = vld [vmem:[#allocation2 + $0x1788] sm:$0xff] }
 0x166   : > { %1092 = vmatmul.mubr.f32.vlgmr.msra.gmra.mrb[0].mxu0 %v5016_v26  ;;  %4457 = vmatpush1.bf16.msra.mxu1 %v4456_v9  ;;  %v2061_v9 = vld [vmem:[#allocation2 + $0x1718] sm:$0xff]  ;;  %v1293_v26 = vld [vmem:[#allocation2 + $0xab0] sm:$0xff] }
 0x167   : > { %4235 = vmatpush1.bf16.msra.mxu0 %v4234_v10  ;;  %4459 = vmatprep.subr.bf16.mxu1 %v4458_v13  ;;  %v1297_v13 = vld [vmem:[#allocation2 + $0xad0] sm:$0xff]  ;;  %v4474_v23 = vpack.c.bf16 %v2064_v11, %v2061_v9  ;;  %v2081_v9 = vld [vmem:[#allocation2 + $0x17b8] sm:$0xff] }
 0x168   : > { %4237 = vmatprep.subr.bf16.mxu0 %v4236_v14  ;;  %3620 = vmatprep.mubr.msk.f32.mxu0 %vm635_vm1, %v5017_v42  ;;  %v4252_v24 = vpack.c.bf16 %v1297_v13, %v1294_v12  ;;  %v1311_v13 = vld [vmem:[#allocation2 + $0xb40] sm:$0xff] }
 0x16a   : > { %1098 = vmatmul.mubr.f32.gmra.mrb[2].mxu0 %v5018_v43  ;;  %4461 = vmatpush1.bf16.msra.mxu1 %v4460_v27  ;;  %v1296_v27 = vld [vmem:[#allocation2 + $0xac8] sm:$0xff]  ;;  %v1299_v43 = vld [vmem:[#allocation2 + $0xae0] sm:$0xff] }
 0x16b   : > { %4239 = vmatpush1.bf16.msra.mxu0 %v4238_v28  ;;  %4463 = vmatprep.subr.bf16.mxu1 %v4462_v32  ;;  %v2067_v28 = vld [vmem:[#allocation2 + $0x1748] sm:$0xff]  ;;  %v1303_v32 = vld [vmem:[#allocation2 + $0xb00] sm:$0xff]  ;;  %v4254_v36 = vpack.c.bf16 %v1296_v27, %v1293_v26  ;;  %v2084_v26 = vld [vmem:[#allocation2 + $0x17d0] sm:$0xff] }
 0x16c   : > { %4241 = vmatprep.subr.bf16.mxu0 %v4240_v33  ;;  %1514 = vmatprep.mubr.f32.mxu0 %v5439_v62  ;;  %v4478_v40 = vpack.c.bf16 %v2070_v29, %v2067_v28  ;;  %v4256_v42 = vpack.c.bf16 %v1303_v32, %v1300_v31  ;;  %v2087_v27 = vld [vmem:[#allocation2 + $0x17e8] sm:$0xff]  ;;  %v4268_v29 = vpack.c.bf16 %v1321_v22, %v1318_v21  ;;  %v1317_v31 = vld [vmem:[#allocation2 + $0xb70] sm:$0xff] }
 0x16d   : > { %2167 = vmatmul.mubr.f32.vlgmr.msra.gmra.mrb[20].mxu1 %v5402_v17  ;;  %v1320_v32 = vld [vmem:[#allocation2 + $0xb88] sm:$0xff]  ;;  %v1345_v21 = vld [vmem:[#allocation2 + $0xc50] sm:$0xff] }
 0x16e   : > { %4465 = vmatpush1.bf16.msra.mxu1 %v4464_v44  ;;  %2172 = vmatprep.mubr.f32.mxu1 %v5377_v54  ;;  %v1302_v44 = vld [vmem:[#allocation2 + $0xaf8] sm:$0xff] }
 0x16f   : > { %4243 = vmatpush1.bf16.msra.mxu0 %v4242_v45  ;;  %4467 = vmatprep.subr.bf16.mxu1 %v4466_v49  ;;  %v2073_v45 = vld [vmem:[#allocation2 + $0x1778] sm:$0xff]  ;;  %v1309_v49 = vld [vmem:[#allocation2 + $0xb30] sm:$0xff]  ;;  %v4258_v51 = vpack.c.bf16 %v1302_v44, %v1299_v43 }
 0x170   : > { %4245 = vmatprep.subr.bf16.mxu0 %v4244_v50  ;;  %v5501_v10 = vpop.f32.mrb[0].mxu1  ;;  %v4480_v50 = vpack.c.bf16 %v2069_v39, %v2066_v37  ;;  %v4482_v56 = vpack.c.bf16 %v2076_v47, %v2073_v45  ;;  %v4260_v57 = vpack.c.bf16 %v1309_v49, %v1306_v48  ;;  %v1327_v37 = vld [vmem:[#allocation2 + $0xbc0] sm:$0xff]  ;;  %v4492_v39 = vpack.c.bf16 %v2087_v27, %v2084_v26  ;;  %v2093_v43 = vld [vmem:[#allocation2 + $0x1818] sm:$0xff] }
 0x171   : > { %v937_v14 = vpop.f32.mrb[1].mxu1  ;;  %2173 = vmatmul.mubr.f32.gmra.mrb[22].mxu1 %v5398_v7  ;;  %v1323_v47 = vld [vmem:[#allocation2 + $0xba0] sm:$0xff]  ;;  %v1326_v48 = vld [vmem:[#allocation2 + $0xbb8] sm:$0xff] }
 0x172   : > { %4469 = vmatpush1.bf16.msra.mxu1 %v4468_v59  ;;  %3627 = vmatprep.mubr.msk.f32.mxu1 %vm635_vm1, %v5363_v5  ;;  %v1308_v59 = vld [vmem:[#allocation2 + $0xb28] sm:$0xff]  ;;  %v1314_v14 = vld [vmem:[#allocation2 + $0xb58] sm:$0xff]  ;;  %v2050_v27 = vld [vmem:[#allocation2 + $0x16c0] sm:$0xff] }
 0x173   : > { %4247 = vmatpush1.bf16.msra.mxu0 %v4246_v60  ;;  %4471 = vmatprep.subr.bf16.mxu1 %v4470_v1  ;;  %v2079_v60 = vld [vmem:[#allocation2 + $0x17a8] sm:$0xff]  ;;  %v1315_v1 = vld [vmem:[#allocation2 + $0xb60] sm:$0xff]  ;;  %v4262_v6 = vpack.c.bf16 %v1308_v59, %v1305_v58  ;;  %v2097_v49 = vld [vmem:[#allocation2 + $0x1838] sm:$0xff] }
 0x174   : > { %4249 = vmatprep.subr.bf16.mxu0 %v4248_v4  ;;  %v5505_v33 = vpop.f32.mrb[2].mxu1  ;;  %v4484_v4 = vpack.c.bf16 %v2075_v53, %v2072_v52  ;;  %v4486_v11 = vpack.c.bf16 %v2082_v61, %v2079_v60  ;;  %v4264_v12 = vpack.c.bf16 %v1315_v1, %v1312_v63  ;;  %v1333_v52 = vld [vmem:[#allocation2 + $0xbf0] sm:$0xff]  ;;  %v2099_v60 = vld [vmem:[#allocation2 + $0x1848] sm:$0xff] }
 0x175   : > { %v942_v34 = vpop.f32.mrb[3].mxu1  ;;  %v1329_v61 = vld [vmem:[#allocation2 + $0xbd0] sm:$0xff]  ;;  %v1332_v63 = vld [vmem:[#allocation2 + $0xbe8] sm:$0xff] }
 0x176   : > { %4473 = vmatpush1.bf16.msra.mxu1 %v4472_v18  ;;  %v2085_v18 = vld [vmem:[#allocation2 + $0x17d8] sm:$0xff]  ;;  %v2091_v34 = vld [vmem:[#allocation2 + $0x1808] sm:$0xff] }
 0x177   : > { %4251 = vmatpush1.bf16.msra.mxu0 %v4250_v19  ;;  %4475 = vmatprep.subr.bf16.mxu1 %v4474_v23  ;;  %v2088_v19 = vld [vmem:[#allocation2 + $0x17f0] sm:$0xff]  ;;  %v4488_v23 = vpack.c.bf16 %v2081_v9, %v2078_v8  ;;  %v1336_v1 = vld [vmem:[#allocation2 + $0xc08] sm:$0xff]  ;;  %v4278_v8 = vpack.c.bf16 %v1332_v63, %v1329_v61  ;;  %v1363_v61 = vld [vmem:[#allocation2 + $0xce0] sm:$0xff] }
 0x178   : > { %4253 = vmatprep.subr.bf16.mxu0 %v4252_v24  ;;  %v4266_v24 = vpack.c.bf16 %v1314_v14, %v1311_v13  ;;  %v4490_v28 = vpack.c.bf16 %v2088_v19, %v2085_v18  ;;  %v2044_v9 = vld [vmem:[#allocation2 + $0x1690] sm:$0xff]  ;;  %v1335_v13 = vld [vmem:[#allocation2 + $0xc00] sm:$0xff]  ;;  %v1338_v14 = vld [vmem:[#allocation2 + $0xc18] sm:$0xff] }
 0x179   : > { %v1342_v19 = vld [vmem:[#allocation2 + $0xc38] sm:$0xff]  ;;  %v4282_v26 = vpack.c.bf16 %v1338_v14, %v1335_v13  ;;  %v1369_v13 = vld [vmem:[#allocation2 + $0xd10] sm:$0xff] }
 0x17a   : > { %4477 = vmatpush1.bf16.msra.mxu1 %v4476_v35  ;;  %v2094_v35 = vld [vmem:[#allocation2 + $0x1820] sm:$0xff] }
 0x17b   : > { %4255 = vmatpush1.bf16.msra.mxu0 %v4254_v36  ;;  %4479 = vmatprep.subr.bf16.mxu1 %v4478_v40  ;;  %v1324_v36 = vld [vmem:[#allocation2 + $0xba8] sm:$0xff]  ;;  %v4270_v40 = vpack.c.bf16 %v1320_v32, %v1317_v31  ;;  %v4494_v44 = vpack.c.bf16 %v2094_v35, %v2091_v34  ;;  %v1341_v31 = vld [vmem:[#allocation2 + $0xc30] sm:$0xff]  ;;  %v1351_v35 = vld [vmem:[#allocation2 + $0xc80] sm:$0xff] }
 0x17c   : > { %4257 = vmatprep.subr.bf16.mxu0 %v4256_v42  ;;  %v2090_v42 = vld [vmem:[#allocation2 + $0x1800] sm:$0xff]  ;;  %v4272_v45 = vpack.c.bf16 %v1327_v37, %v1324_v36  ;;  %v1344_v32 = vld [vmem:[#allocation2 + $0xc48] sm:$0xff] }
 0x17d   : > { %v4496_v53 = vpack.c.bf16 %v2093_v43, %v2090_v42  ;;  %v1348_v34 = vld [vmem:[#allocation2 + $0xc68] sm:$0xff]  ;;  %v2056_v42 = vld [vmem:[#allocation2 + $0x16f0] sm:$0xff] }
 0x17e   : > { %4481 = vmatpush1.bf16.msra.mxu1 %v4480_v50  ;;  %v2100_v50 = vld [vmem:[#allocation2 + $0x1850] sm:$0xff] }
 0x17f   : > { %4259 = vmatpush1.bf16.msra.mxu0 %v4258_v51  ;;  %4483 = vmatprep.subr.bf16.mxu1 %v4482_v56  ;;  %v1330_v51 = vld [vmem:[#allocation2 + $0xbd8] sm:$0xff]  ;;  %v4274_v56 = vpack.c.bf16 %v1326_v48, %v1323_v47  ;;  %v4498_v58 = vpack.c.bf16 %v2100_v50, %v2097_v49  ;;  %v1347_v47 = vld [vmem:[#allocation2 + $0xc60] sm:$0xff]  ;;  %v1357_v50 = vld [vmem:[#allocation2 + $0xcb0] sm:$0xff] }
 0x180   : > { %4261 = vmatprep.subr.bf16.mxu0 %v4260_v57  ;;  %v2096_v57 = vld [vmem:[#allocation2 + $0x1830] sm:$0xff]  ;;  %v4276_v59 = vpack.c.bf16 %v1333_v52, %v1330_v51  ;;  %v1350_v48 = vld [vmem:[#allocation2 + $0xc78] sm:$0xff] }
 0x181   : > { %v1354_v49 = vld [vmem:[#allocation2 + $0xc98] sm:$0xff]  ;;  %v4290_v52 = vpack.c.bf16 %v1350_v48, %v1347_v47  ;;  %v1377_v48 = vld [vmem:[#allocation2 + $0xd50] sm:$0xff] }
 0x182   : > { %4485 = vmatpush1.bf16.msra.mxu1 %v4484_v4  ;;  %v1339_v4 = vld [vmem:[#allocation2 + $0xc20] sm:$0xff]  ;;  %v2089_v47 = vld [vmem:[#allocation2 + $0x17f8] sm:$0xff] }
 0x183   : > { %4263 = vmatpush1.bf16.msra.mxu0 %v4262_v6  ;;  %4487 = vmatprep.subr.bf16.mxu1 %v4486_v11  ;;  %v4500_v6 = vpack.c.bf16 %v2099_v60, %v2096_v57  ;;  %v4280_v11 = vpack.c.bf16 %v1339_v4, %v1336_v1  ;;  %v2065_v57 = vld [vmem:[#allocation2 + $0x1738] sm:$0xff]  ;;  %v1360_v60 = vld [vmem:[#allocation2 + $0xcc8] sm:$0xff]  ;;  %v2068_v4 = vld [vmem:[#allocation2 + $0x1750] sm:$0xff] }
 0x184   : > { %4265 = vmatprep.subr.bf16.mxu0 %v4264_v12  ;;  %v2047_v12 = vld [vmem:[#allocation2 + $0x16a8] sm:$0xff] }
 0x186   : > { %4489 = vmatpush1.bf16.msra.mxu1 %v4488_v23 }
 0x187   : > { %4267 = vmatpush1.bf16.msra.mxu0 %v4266_v24  ;;  %4491 = vmatprep.subr.bf16.mxu1 %v4490_v28  ;;  %v4535_v24 = vpack.c.bf16 %v2047_v12, %v2044_v9  ;;  %v4284_v28 = vpack.c.bf16 %v1345_v21, %v1342_v19  ;;  %v1359_v9 = vld [vmem:[#allocation2 + $0xcc0] sm:$0xff]  ;;  %v1366_v12 = vld [vmem:[#allocation2 + $0xcf8] sm:$0xff] }
 0x188   : > { %4269 = vmatprep.subr.bf16.mxu0 %v4268_v29  ;;  %v2053_v29 = vld [vmem:[#allocation2 + $0x16d8] sm:$0xff]  ;;  %v2074_v19 = vld [vmem:[#allocation2 + $0x1780] sm:$0xff] }
 0x189   : > { %v2077_v21 = vld [vmem:[#allocation2 + $0x1798] sm:$0xff] }
 0x18a   : > { %4493 = vmatpush1.bf16.msra.mxu1 %v4492_v39  ;;  %v4538_v39 = vpack.c.bf16 %v2053_v29, %v2050_v27  ;;  %v1375_v27 = vld [vmem:[#allocation2 + $0xd40] sm:$0xff] }
 0x18b   : > { %4271 = vmatpush1.bf16.msra.mxu0 %v4270_v40  ;;  %4495 = vmatprep.subr.bf16.mxu1 %v4494_v44  ;;  %v4286_v40 = vpack.c.bf16 %v1344_v32, %v1341_v31  ;;  %v4288_v44 = vpack.c.bf16 %v1351_v35, %v1348_v34  ;;  %v2080_v31 = vld [vmem:[#allocation2 + $0x17b0] sm:$0xff]  ;;  %v2083_v34 = vld [vmem:[#allocation2 + $0x17c8] sm:$0xff]  ;;  %v1371_v35 = vld [vmem:[#allocation2 + $0xd20] sm:$0xff] }
 0x18c   : > { %4273 = vmatprep.subr.bf16.mxu0 %v4272_v45  ;;  %v2059_v45 = vld [vmem:[#allocation2 + $0x1708] sm:$0xff] }
 0x18d   : > { %v4541_v51 = vpack.c.bf16 %v2059_v45, %v2056_v42 }
 0x18e   : > { %4497 = vmatpush1.bf16.msra.mxu1 %v4496_v53  ;;  %v2062_v53 = vld [vmem:[#allocation2 + $0x1720] sm:$0xff] }
 0x18f   : > { %4275 = vmatpush1.bf16.msra.mxu0 %v4274_v56  ;;  %4499 = vmatprep.subr.bf16.mxu1 %v4498_v58  ;;  %v4292_v56 = vpack.c.bf16 %v1357_v50, %v1354_v49  ;;  %v1353_v58 = vld [vmem:[#allocation2 + $0xc90] sm:$0xff]  ;;  %v4544_v63 = vpack.c.bf16 %v2065_v57, %v2062_v53  ;;  %v1380_v49 = vld [vmem:[#allocation2 + $0xd68] sm:$0xff] }
 0x190   : > { %4277 = vmatprep.subr.bf16.mxu0 %v4276_v59  ;;  %v3722_v18 = vpop.f32.mrb[4].mxu1  ;;  %v1356_v59 = vld [vmem:[#allocation2 + $0xca8] sm:$0xff]  ;;  %v4310_v53 = vpack.c.bf16 %v1380_v49, %v1377_v48  ;;  %v1401_v48 = vld [vmem:[#allocation2 + $0xe10] sm:$0xff] }
 0x191   : > { %v3723_v22 = vpop.f32.mrb[5].mxu1  ;;  %v4294_v1 = vpack.c.bf16 %v1356_v59, %v1353_v58  ;;  %v1384_v50 = vld [vmem:[#allocation2 + $0xd88] sm:$0xff]  ;;  %v1383_v59 = vld [vmem:[#allocation2 + $0xd80] sm:$0xff] }
 0x192   : > { %v5509_v23 = vadd.f32 %v3723_v22, %v3722_v18  ;;  %4501 = vmatpush1.bf16.msra.mxu1 %v4500_v6  ;;  %v4296_v6 = vpack.c.bf16 %v1363_v61, %v1360_v60  ;;  %v1365_v22 = vld [vmem:[#allocation2 + $0xcf0] sm:$0xff]  ;;  %v2095_v58 = vld [vmem:[#allocation2 + $0x1828] sm:$0xff]  ;;  %v1386_v60 = vld [vmem:[#allocation2 + $0xd98] sm:$0xff] }
 0x193   : > { %4279 = vmatpush1.bf16.msra.mxu0 %v4278_v8  ;;  %4534 = vmatprep.subr.bf16.mxu1 %v5165_v0  ;;  %v2071_v8 = vld [vmem:[#allocation2 + $0x1768] sm:$0xff]  ;;  %v1390_v61 = vld [vmem:[#allocation2 + $0xdb8] sm:$0xff] }
 0x194   : > { %4281 = vmatprep.subr.bf16.mxu0 %v4280_v11  ;;  %v3725_v36 = vpop.f32.mrb[6].mxu1  ;;  %v1362_v11 = vld [vmem:[#allocation2 + $0xcd8] sm:$0xff]  ;;  %v4547_v14 = vpack.c.bf16 %v2071_v8, %v2068_v4  ;;  %v4314_v4 = vpack.c.bf16 %v1386_v60, %v1383_v59  ;;  %v1404_v49 = vld [vmem:[#allocation2 + $0xe28] sm:$0xff]  ;;  %v1801_v60 = vld [vmem:[#allocation2 + $0xf00] sm:$0xff] }
 0x195   : > { %2244 = vmatmul.mubr.f32.vlgmr.msra.gmra.mrb[20].mxu1 %v5381_v55  ;;  %v3726_v37 = vpop.f32.mrb[7].mxu1  ;;  %v4298_v18 = vpack.c.bf16 %v1362_v11, %v1359_v9  ;;  %v2101_v8 = vld [vmem:[#allocation2 + $0x1858] sm:$0xff]  ;;  %v1389_v11 = vld [vmem:[#allocation2 + $0xdb0] sm:$0xff]  ;;  %v4326_v59 = vpack.c.bf16 %v1404_v49, %v1401_v48 }
 0x196   : > { %4536 = vmatpush1.bf16.msra.mxu1 %v4535_v24  ;;  %v5513_v43 = vadd.f32 %v3726_v37, %v3725_v36  ;;  %3628 = vmatprep.mubr.msk.f32.mxu1 %vm635_vm1, %v5359_v2  ;;  %v1368_v24 = vld [vmem:[#allocation2 + $0xd08] sm:$0xff]  ;;  %v1374_v36 = vld [vmem:[#allocation2 + $0xd38] sm:$0xff]  ;;  %v1819_v49 = vld [vmem:[#allocation2 + $0xf90] sm:$0xff] }
 0x197   : > { %4283 = vmatpush1.bf16.msra.mxu0 %v4282_v26  ;;  %4537 = vmatprep.subr.bf16.mxu1 %v5165_v0  ;;  %v1372_v26 = vld [vmem:[#allocation2 + $0xd28] sm:$0xff]  ;;  %v4302_v29 = vpack.c.bf16 %v1368_v24, %v1365_v22  ;;  %v1378_v37 = vld [vmem:[#allocation2 + $0xd58] sm:$0xff]  ;;  %v4306_v42 = vpack.c.bf16 %v1374_v36, %v1371_v35  ;;  %v1789_v22 = vld [vmem:[#allocation2 + $0xea0] sm:$0xff] }
 0x198   : > { %4285 = vmatprep.subr.bf16.mxu0 %v4284_v28  ;;  %v4550_v28 = vpack.c.bf16 %v2077_v21, %v2074_v19  ;;  %v4304_v32 = vpack.c.bf16 %v1375_v27, %v1372_v26  ;;  %v1399_v19 = vld [vmem:[#allocation2 + $0xe00] sm:$0xff]  ;;  %v1792_v24 = vld [vmem:[#allocation2 + $0xeb8] sm:$0xff]  ;;  %v1405_v36 = vld [vmem:[#allocation2 + $0xe30] sm:$0xff] }
 0x199   : > { %2250 = vmatmul.mubr.f32.gmra.mrb[22].mxu1 %v5372_v41  ;;  %v1402_v35 = vld [vmem:[#allocation2 + $0xe18] sm:$0xff] }
 0x19a   : > { %4539 = vmatpush1.bf16.msra.mxu1 %v4538_v39  ;;  %3629 = vmatprep.mubr.msk.f32.mxu1 %vm635_vm1, %v5363_v5  ;;  %v4300_v5 = vpack.c.bf16 %v1369_v13, %v1366_v12  ;;  %v1381_v39 = vld [vmem:[#allocation2 + $0xd70] sm:$0xff]  ;;  %v1392_v12 = vld [vmem:[#allocation2 + $0xdc8] sm:$0xff] }
 0x19b   : > { %4287 = vmatpush1.bf16.msra.mxu0 %v4286_v40  ;;  %4540 = vmatprep.subr.bf16.mxu1 %v5165_v0  ;;  %v4553_v40 = vpack.c.bf16 %v2083_v34, %v2080_v31  ;;  %v4308_v45 = vpack.c.bf16 %v1381_v39, %v1378_v37  ;;  %v1790_v13 = vld [vmem:[#allocation2 + $0xea8] sm:$0xff]  ;;  %v4318_v21 = vpack.c.bf16 %v1392_v12, %v1389_v11  ;;  %v1796_v31 = vld [vmem:[#allocation2 + $0xed8] sm:$0xff]  ;;  %v1799_v34 = vld [vmem:[#allocation2 + $0xef0] sm:$0xff] }
 0x19c   : > { %4289 = vmatprep.subr.bf16.mxu0 %v4288_v44  ;;  %v2086_v44 = vld [vmem:[#allocation2 + $0x17e0] sm:$0xff]  ;;  %v4566_v39 = vpack.c.bf16 %v1792_v24, %v1789_v22  ;;  %v1414_v11 = vld [vmem:[#allocation2 + $0xe78] sm:$0xff]  ;;  %v1417_v12 = vld [vmem:[#allocation2 + $0xe90] sm:$0xff] }
 0x19d   : > { %v1416_v22 = vld [vmem:[#allocation2 + $0xe88] sm:$0xff] }
 0x19e   : > { %4542 = vmatpush1.bf16.msra.mxu1 %v4541_v51  ;;  %v1387_v51 = vld [vmem:[#allocation2 + $0xda0] sm:$0xff]  ;;  %v1814_v24 = vld [vmem:[#allocation2 + $0xf68] sm:$0xff] }
 0x19f   : > { %4291 = vmatpush1.bf16.msra.mxu0 %v4290_v52  ;;  %4543 = vmatprep.subr.bf16.mxu1 %v5165_v0  ;;  %v4556_v52 = vpack.c.bf16 %v2089_v47, %v2086_v44  ;;  %v4312_v57 = vpack.c.bf16 %v1387_v51, %v1384_v50  ;;  %v1798_v44 = vld [vmem:[#allocation2 + $0xee8] sm:$0xff]  ;;  %v4324_v47 = vpack.c.bf16 %v1405_v36, %v1402_v35  ;;  %v1805_v51 = vld [vmem:[#allocation2 + $0xf20] sm:$0xff]  ;;  %v1816_v36 = vld [vmem:[#allocation2 + $0xf78] sm:$0xff] }
 0x1a0   : > { %4293 = vmatprep.subr.bf16.mxu0 %v4292_v56  ;;  %v2092_v56 = vld [vmem:[#allocation2 + $0x1810] sm:$0xff]  ;;  %v1802_v50 = vld [vmem:[#allocation2 + $0xf08] sm:$0xff] }
 0x1a2   : > { %4545 = vmatpush1.bf16.msra.mxu1 %v4544_v63  ;;  %v1393_v63 = vld [vmem:[#allocation2 + $0xdd0] sm:$0xff] }
 0x1a3   : > { %4295 = vmatpush1.bf16.msra.mxu0 %v4294_v1  ;;  %4546 = vmatprep.subr.bf16.mxu1 %v5165_v0  ;;  %v4559_v1 = vpack.c.bf16 %v2095_v58, %v2092_v56  ;;  %v4316_v9 = vpack.c.bf16 %v1393_v63, %v1390_v61  ;;  %v1804_v61 = vld [vmem:[#allocation2 + $0xf18] sm:$0xff]  ;;  %v4572_v63 = vpack.c.bf16 %v1805_v51, %v1802_v50  ;;  %v1822_v50 = vld [vmem:[#allocation2 + $0xfa8] sm:$0xff] }
 0x1a4   : > { %4297 = vmatprep.subr.bf16.mxu0 %v4296_v6  ;;  %v2098_v6 = vld [vmem:[#allocation2 + $0x1840] sm:$0xff] }
 0x1a6   : > { %1515 = vmatmul.mubr.f32.vlgmr.msra.gmra.mrb[0].mxu0 %v5451_v25  ;;  %4548 = vmatpush1.bf16.msra.mxu1 %v4547_v14  ;;  %v1793_v14 = vld [vmem:[#allocation2 + $0xec0] sm:$0xff] }
 0x1a7   : > { %4299 = vmatpush1.bf16.msra.mxu0 %v4298_v18  ;;  %4549 = vmatprep.subr.bf16.mxu1 %v5165_v0  ;;  %v1396_v18 = vld [vmem:[#allocation2 + $0xde8] sm:$0xff]  ;;  %v4564_v26 = vpack.c.bf16 %v1793_v14, %v1790_v13  ;;  %v1807_v14 = vld [vmem:[#allocation2 + $0xf30] sm:$0xff] }
 0x1a8   : > { %4301 = vmatprep.subr.bf16.mxu0 %v4300_v5  ;;  %1520 = vmatprep.mubr.f32.mxu0 %v5433_v46  ;;  %v4562_v5 = vpack.c.bf16 %v2101_v8, %v2098_v6  ;;  %v4320_v27 = vpack.c.bf16 %v1399_v19, %v1396_v18  ;;  %v1410_v6 = vld [vmem:[#allocation2 + $0xe58] sm:$0xff]  ;;  %v1810_v18 = vld [vmem:[#allocation2 + $0xf48] sm:$0xff] }
 0x1a9   : > { %v1808_v8 = vld [vmem:[#allocation2 + $0xf38] sm:$0xff] }
 0x1aa   : > { %1521 = vmatmul.mubr.f32.gmra.mrb[2].mxu0 %v5445_v15  ;;  %4551 = vmatpush1.bf16.msra.mxu1 %v4550_v28  ;;  %v1395_v28 = vld [vmem:[#allocation2 + $0xde0] sm:$0xff] }
 0x1ab   : > { %4303 = vmatpush1.bf16.msra.mxu0 %v4302_v29  ;;  %4552 = vmatprep.subr.bf16.mxu1 %v5165_v0  ;;  %v1398_v29 = vld [vmem:[#allocation2 + $0xdf8] sm:$0xff] }
 0x1ac   : > { %4305 = vmatprep.subr.bf16.mxu0 %v4304_v32  ;;  %3623 = vmatprep.mubr.msk.f32.mxu0 %vm635_vm1, %v5465_v20 }
 0x1ae   : > { %4554 = vmatpush1.bf16.msra.mxu1 %v4553_v40  ;;  %v4322_v40 = vpack.c.bf16 %v1398_v29, %v1395_v28  ;;  %v1999_v28 = vld [vmem:[#allocation2 + $0x1528] sm:$0xff] }
 0x1af   : > { %4307 = vmatpush1.bf16.msra.mxu0 %v4306_v42  ;;  %4555 = vmatprep.subr.bf16.mxu1 %v5165_v0  ;;  %v1795_v42 = vld [vmem:[#allocation2 + $0xed0] sm:$0xff] }
 0x1b0   : > { %4309 = vmatprep.subr.bf16.mxu0 %v4308_v45  ;;  %v4568_v45 = vpack.c.bf16 %v1799_v34, %v1796_v31  ;;  %v4570_v58 = vpack.c.bf16 %v1798_v44, %v1795_v42  ;;  %v1813_v31 = vld [vmem:[#allocation2 + $0xf60] sm:$0xff]  ;;  %v1823_v42 = vld [vmem:[#allocation2 + $0xfb0] sm:$0xff] }
 0x1b1   : > { %v2002_v44 = vld [vmem:[#allocation2 + $0x1540] sm:$0xff] }
 0x1b2   : > { %4557 = vmatpush1.bf16.msra.mxu1 %v4556_v52  ;;  %v1408_v52 = vld [vmem:[#allocation2 + $0xe48] sm:$0xff] }
 0x1b3   : > { %4311 = vmatpush1.bf16.msra.mxu0 %v4310_v53  ;;  %4558 = vmatprep.subr.bf16.mxu1 %v5165_v0  ;;  %v1411_v53 = vld [vmem:[#allocation2 + $0xe60] sm:$0xff] }
 0x1b4   : > { %4313 = vmatprep.subr.bf16.mxu0 %v4312_v57 }
 0x1b6   : > { %4560 = vmatpush1.bf16.msra.mxu1 %v4559_v1  ;;  %v4328_v1 = vpack.c.bf16 %v1411_v53, %v1408_v52  ;;  %v1954_v52 = vld [vmem:[#allocation2 + $0x13c0] sm:$0xff]  ;;  %v1957_v53 = vld [vmem:[#allocation2 + $0x13d8] sm:$0xff] }
 0x1b7   : > { %4315 = vmatpush1.bf16.msra.mxu0 %v4314_v4  ;;  %4561 = vmatprep.subr.bf16.mxu1 %v5165_v0  ;;  %v1407_v4 = vld [vmem:[#allocation2 + $0xe40] sm:$0xff] }
 0x1b8   : > { %4317 = vmatprep.subr.bf16.mxu0 %v4316_v9  ;;  %v5534_v32 = vpop.f32.mrb[8].mxu1  ;;  %v1811_v9 = vld [vmem:[#allocation2 + $0xf50] sm:$0xff]  ;;  %v4330_v13 = vpack.c.bf16 %v1410_v6, %v1407_v4  ;;  %v1825_v4 = vld [vmem:[#allocation2 + $0xfc0] sm:$0xff]  ;;  %v1828_v6 = vld [vmem:[#allocation2 + $0xfd8] sm:$0xff] }
 0x1b9   : > { %v1247_v37 = vpop.f32.mrb[9].mxu1  ;;  %v4576_v19 = vpack.c.bf16 %v1811_v9, %v1808_v8 }
 0x1ba   : > { %4563 = vmatpush1.bf16.msra.mxu1 %v4562_v5  ;;  %v4332_v5 = vpack.c.bf16 %v1417_v12, %v1414_v11  ;;  %v1948_v37 = vld [vmem:[#allocation2 + $0x1390] sm:$0xff]  ;;  %v1963_v12 = vld [vmem:[#allocation2 + $0x1408] sm:$0xff] }
 0x1bb   : > { %4319 = vmatpush1.bf16.msra.mxu0 %v4318_v21  ;;  %4565 = vmatprep.subr.bf16.mxu1 %v4564_v26  ;;  %v1413_v21 = vld [vmem:[#allocation2 + $0xe70] sm:$0xff]  ;;  %v1817_v26 = vld [vmem:[#allocation2 + $0xf80] sm:$0xff] }
 0x1bc   : > { %4321 = vmatprep.subr.bf16.mxu0 %v4320_v27  ;;  %v5536_v56 = vpop.f32.mrb[10].mxu1  ;;  %v1996_v27 = vld [vmem:[#allocation2 + $0x1510] sm:$0xff]  ;;  %v4334_v29 = vpack.c.bf16 %v1416_v22, %v1413_v21  ;;  %v4580_v34 = vpack.c.bf16 %v1817_v26, %v1814_v24  ;;  %v4590_v22 = vpack.c.bf16 %v1828_v6, %v1825_v4 }
 0x1bd   : > { %2396 = vmatmul.mubr.f32.vlgmr.msra.gmra.mrb[24].mxu1 %v5381_v55  ;;  %v1252_v57 = vpop.f32.mrb[11].mxu1  ;;  %v4574_v55 = vpack.c.bf16 %v1804_v61, %v1801_v60  ;;  %v4502_v35 = vpack.c.bf16 %v1999_v28, %v1996_v27  ;;  %v2008_v60 = vld [vmem:[#allocation2 + $0x1570] sm:$0xff]  ;;  %v2011_v61 = vld [vmem:[#allocation2 + $0x1588] sm:$0xff] }
 0x1be   : > { %4567 = vmatpush1.bf16.msra.mxu1 %v4566_v39  ;;  %3630 = vmatprep.mubr.msk.f32.mxu1 %vm635_vm1, %v5359_v2  ;;  %v5543_v2 = vld [vmem:[%s5354_s10 + $0x8] sm:$0xff]  ;;  %v4510_v9 = vpack.c.bf16 %v2011_v61, %v2008_v60  ;;  %v1960_v11 = vld [vmem:[#allocation2 + $0x13f0] sm:$0xff]  ;;  %v2026_v60 = vld [vmem:[#allocation2 + $0x1600] sm:$0xff] }
 0x1bf   : > { %4323 = vmatpush1.bf16.msra.mxu0 %v4322_v40  ;;  %4569 = vmatprep.subr.bf16.mxu1 %v4568_v45  ;;  %v1951_v39 = vld [vmem:[#allocation2 + $0x13a8] sm:$0xff]  ;;  %v1820_v40 = vld [vmem:[#allocation2 + $0xf98] sm:$0xff]  ;;  %v4512_v24 = vpack.c.bf16 %v1963_v12, %v1960_v11  ;;  %v1831_v26 = vld [vmem:[#allocation2 + $0xff0] sm:$0xff] }
 0x1c0   : > { %4325 = vmatprep.subr.bf16.mxu0 %v4324_v47  ;;  %v2005_v45 = vld [vmem:[#allocation2 + $0x1558] sm:$0xff]  ;;  %v4582_v47 = vpack.c.bf16 %v1816_v36, %v1813_v31  ;;  %v4504_v48 = vpack.c.bf16 %v1951_v39, %v1948_v37  ;;  %v4584_v51 = vpack.c.bf16 %v1823_v42, %v1820_v40  ;;  %v1826_v57 = vld [vmem:[#allocation2 + $0xfc8] sm:$0xff]  ;;  %v1841_v37 = vld [vmem:[#allocation2 + $0x1040] sm:$0xff] }
 0x1c1   : > { %2401 = vmatmul.mubr.f32.gmra.mrb[26].mxu1 %v5372_v41  ;;  %v4578_v41 = vpack.c.bf16 %v1810_v18, %v1807_v14  ;;  %v1835_v14 = vld [vmem:[#allocation2 + $0x1010] sm:$0xff]  ;;  %v2014_v18 = vld [vmem:[#allocation2 + $0x15a0] sm:$0xff]  ;;  %v1834_v27 = vld [vmem:[#allocation2 + $0x1008] sm:$0xff] }
 0x1c2   : > { %4571 = vmatpush1.bf16.msra.mxu1 %v4570_v58  ;;  %2470 = vmatprep.mubr.f32.mxu1 %v5543_v2  ;;  %v4506_v58 = vpack.c.bf16 %v2005_v45, %v2002_v44  ;;  %v1969_v31 = vld [vmem:[#allocation2 + $0x1438] sm:$0xff]  ;;  %v2020_v39 = vld [vmem:[#allocation2 + $0x15d0] sm:$0xff]  ;;  %v2023_v40 = vld [vmem:[#allocation2 + $0x15e8] sm:$0xff]  ;;  %v4594_v44 = vpack.c.bf16 %v1834_v27, %v1831_v26 }
 0x1c3   : > { %4327 = vmatpush1.bf16.msra.mxu0 %v4326_v59  ;;  %4573 = vmatprep.subr.bf16.mxu1 %v4572_v63  ;;  %v1829_v59 = vld [vmem:[#allocation2 + $0xfe0] sm:$0xff]  ;;  %v4586_v63 = vpack.c.bf16 %v1822_v50, %v1819_v49  ;;  %v1840_v50 = vld [vmem:[#allocation2 + $0x1038] sm:$0xff]  ;;  %v1846_v11 = vld [vmem:[#allocation2 + $0x1068] sm:$0xff] }
 0x1c4   : > { %4329 = vmatprep.subr.bf16.mxu0 %v4328_v1  ;;  %v4508_v1 = vpack.c.bf16 %v1957_v53, %v1954_v52  ;;  %v4588_v8 = vpack.c.bf16 %v1829_v59, %v1826_v57  ;;  %v1837_v49 = vld [vmem:[#allocation2 + $0x1020] sm:$0xff]  ;;  %v1972_v52 = vld [vmem:[#allocation2 + $0x1450] sm:$0xff]  ;;  %v1975_v53 = vld [vmem:[#allocation2 + $0x1468] sm:$0xff] }
 0x1c5   : > { %v1844_v57 = vld [vmem:[#allocation2 + $0x1058] sm:$0xff]  ;;  %v1847_v59 = vld [vmem:[#allocation2 + $0x1070] sm:$0xff]  ;;  %v1849_v26 = vld [vmem:[#allocation2 + $0x1080] sm:$0xff] }
 0x1c6   : > { %4575 = vmatpush1.bf16.msra.mxu1 %v4574_v55  ;;  %v1832_v55 = vld [vmem:[#allocation2 + $0xff8] sm:$0xff] }
 0x1c7   : > { %4331 = vmatpush1.bf16.msra.mxu0 %v4330_v13  ;;  %4577 = vmatprep.subr.bf16.mxu1 %v4576_v19  ;;  %v2017_v19 = vld [vmem:[#allocation2 + $0x15b8] sm:$0xff]  ;;  %v4592_v28 = vpack.c.bf16 %v1835_v14, %v1832_v55  ;;  %v1978_v55 = vld [vmem:[#allocation2 + $0x1480] sm:$0xff]  ;;  %v1850_v14 = vld [vmem:[#allocation2 + $0x1088] sm:$0xff] }
 0x1c8   : > { %4333 = vmatprep.subr.bf16.mxu0 %v4332_v5  ;;  %v2029_v61 = vld [vmem:[#allocation2 + $0x1618] sm:$0xff] }
 0x1c9   : > { %v4522_v12 = vpack.c.bf16 %v2029_v61, %v2026_v60  ;;  %v1852_v27 = vld [vmem:[#allocation2 + $0x1098] sm:$0xff]  ;;  %v1791_v61 = vld [vmem:[#allocation2 + $0xeb0] sm:$0xff] }
 0x1ca   : > { %4579 = vmatpush1.bf16.msra.mxu1 %v4578_v41  ;;  %v4514_v41 = vpack.c.bf16 %v2017_v19, %v2014_v18  ;;  %v2032_v18 = vld [vmem:[#allocation2 + $0x1630] sm:$0xff]  ;;  %v2035_v19 = vld [vmem:[#allocation2 + $0x1648] sm:$0xff] }
 0x1cb   : > { %4335 = vmatpush1.bf16.msra.mxu0 %v4334_v29  ;;  %4581 = vmatprep.subr.bf16.mxu1 %v4580_v34  ;;  %v1966_v29 = vld [vmem:[#allocation2 + $0x1420] sm:$0xff]  ;;  %v1838_v34 = vld [vmem:[#allocation2 + $0x1028] sm:$0xff] }
 0x1cc   : > { %4503 = vmatprep.subr.bf16.mxu0 %v4502_v35 }
 0x1ce   : > { %1592 = vmatmul.mubr.f32.vlgmr.msra.gmra.mrb[0].mxu0 %v5483_v30  ;;  %4583 = vmatpush1.bf16.msra.mxu1 %v4582_v47 }
 0x1cf   : > { %4505 = vmatpush3.bf16.msra.mxu0 %v4504_v48  ;;  %3624 = vmatprep.mubr.msk.f32.mxu0 %vm635_vm1, %v5458_v38  ;;  %v4516_v48 = vpack.c.bf16 %v1969_v31, %v1966_v29  ;;  %v4526_v29 = vpack.c.bf16 %v2035_v19, %v2032_v18  ;;  %v1984_v31 = vld [vmem:[#allocation2 + $0x14b0] sm:$0xff]  ;;  %v1800_v18 = vld [vmem:[#allocation2 + $0xef8] sm:$0xff]  ;;  %v1874_v19 = vld [vmem:[#allocation2 + $0x1148] sm:$0xff] }
 0x1d0   : > { %4585 = vmatprep.subr.bf16.mxu1 %v4584_v51  ;;  %4507 = vmatprep.subr.bf16.mxu0 %v4506_v58  ;;  %v4596_v51 = vpack.c.bf16 %v1841_v37, %v1838_v34  ;;  %v1987_v34 = vld [vmem:[#allocation2 + $0x14c8] sm:$0xff]  ;;  %v2038_v37 = vld [vmem:[#allocation2 + $0x1660] sm:$0xff] }
 0x1d1   : > { %v3684_v13 = vpop.f32.mrb[4].mxu0 }
 0x1d2   : > { %v3685_v5 = vpop.f32.mrb[5].mxu0  ;;  %1598 = vmatmul.mubr.f32.gmra.mrb[2].mxu0 %v5478_v16  ;;  %4587 = vmatpush1.bf16.msra.mxu1 %v4586_v63 }
 0x1d3   : > { %v3686_v21 = vadd.f32 %v3685_v5, %v3684_v13  ;;  %4509 = vmatpush3.bf16.msra.mxu0 %v4508_v1  ;;  %4589 = vmatprep.subr.bf16.mxu1 %v4588_v8  ;;  %v4598_v1 = vpack.c.bf16 %v1840_v50, %v1837_v49  ;;  %v4520_v8 = vpack.c.bf16 %v1975_v53, %v1972_v52  ;;  %v1981_v13 = vld [vmem:[#allocation2 + $0x1498] sm:$0xff]  ;;  %v1862_v50 = vld [vmem:[#allocation2 + $0x10e8] sm:$0xff] }
 0x1d4   : > { %4511 = vmatprep.subr.bf16.mxu0 %v4510_v9  ;;  %2320 = vmatprep.mubr.f32.mxu0 %v5385_v3  ;;  %v1843_v9 = vld [vmem:[#allocation2 + $0x1050] sm:$0xff]  ;;  %v1993_v49 = vld [vmem:[#allocation2 + $0x14f8] sm:$0xff]  ;;  %v1842_v52 = vld [vmem:[#allocation2 + $0x1048] sm:$0xff] }
 0x1d5   : > { %v936_v35 = vadd.f32 %v3686_v21, %v5501_v10  ;;  %v3687_v36 = vpop.f32.mrb[6].mxu0  ;;  %v4518_v10 = vpack.c.bf16 %v2023_v40, %v2020_v39  ;;  %v4606_v39 = vpack.c.bf16 %v1852_v27, %v1849_v26  ;;  %v4528_v40 = vpack.c.bf16 %v1987_v34, %v1984_v31  ;;  %v1873_v27 = vld [vmem:[#allocation2 + $0x1140] sm:$0xff]  ;;  %v1803_v34 = vld [vmem:[#allocation2 + $0xf10] sm:$0xff] }
 0x1d6   : > { %v3688_v42 = vpop.f32.mrb[7].mxu0  ;;  %4591 = vmatpush1.bf16.msra.mxu1 %v4590_v22  ;;  %v4602_v22 = vpack.c.bf16 %v1846_v11, %v1843_v9  ;;  %v1848_v9 = vld [vmem:[#allocation2 + $0x1078] sm:$0xff] }
 0x1d7   : > { %v1171_v45 = vadd.f32 %v5509_v23, %v936_v35  ;;  %v3689_v47 = vadd.f32 %v3688_v42, %v3687_v36  ;;  %4513 = vmatpush3.bf16.msra.mxu0 %v4512_v24  ;;  %4593 = vmatprep.subr.bf16.mxu1 %v4592_v28  ;;  %v4524_v24 = vpack.c.bf16 %v1981_v13, %v1978_v55  ;;  %v1856_v35 = vld [vmem:[#allocation2 + $0x10b8] sm:$0xff]  ;;  %v1859_v36 = vld [vmem:[#allocation2 + $0x10d0] sm:$0xff]  ;;  %v1870_v55 = vld [vmem:[#allocation2 + $0x1128] sm:$0xff] }
 0x1d8   : > { %4515 = vmatprep.subr.bf16.mxu0 %v4514_v41  ;;  %v3760_v3 = vpop.f32.mrb[12].mxu1  ;;  %v1855_v42 = vld [vmem:[#allocation2 + $0x10b0] sm:$0xff] }
 0x1d9   : > { %v941_v58 = vadd.f32 %v3689_v47, %v5505_v33  ;;  %v5555_v23 = vadd.f32 %v5534_v32, %v1171_v45  ;;  %v3761_v63 = vpop.f32.mrb[13].mxu1  ;;  %v4600_v33 = vpack.c.bf16 %v1847_v59, %v1844_v57  ;;  %v1853_v32 = vld [vmem:[#allocation2 + $0x10a0] sm:$0xff]  ;;  %v4608_v45 = vpack.c.bf16 %v1859_v36, %v1856_v35  ;;  %v1806_v35 = vld [vmem:[#allocation2 + $0xf28] sm:$0xff]  ;;  %v1880_v36 = vld [vmem:[#allocation2 + $0x1178] sm:$0xff] }
 0x1da   : > { %v5558_v6 = vadd.f32 %v3761_v63, %v3760_v3  ;;  %4595 = vmatpush1.bf16.msra.mxu1 %v4594_v44  ;;  %v4604_v41 = vpack.c.bf16 %v1853_v32, %v1850_v14  ;;  %v1858_v44 = vld [vmem:[#allocation2 + $0x10c8] sm:$0xff]  ;;  %v1864_v3 = vld [vmem:[#allocation2 + $0x10f8] sm:$0xff]  ;;  %v1797_v32 = vld [vmem:[#allocation2 + $0xee0] sm:$0xff] }
 0x1db   : > { %v1176_v4 = vadd.f32 %v5513_v43, %v941_v58  ;;  %4517 = vmatpush3.bf16.msra.mxu0 %v4516_v48  ;;  %4597 = vmatprep.subr.bf16.mxu1 %v4596_v51  ;;  %v1990_v48 = vld [vmem:[#allocation2 + $0x14e0] sm:$0xff]  ;;  %v4610_v53 = vpack.c.bf16 %v1858_v44, %v1855_v42  ;;  %v1794_v63 = vld [vmem:[#allocation2 + $0xec8] sm:$0xff]  ;;  %v4674_v26 = vpack.c.bf16 %v1800_v18, %v1797_v32  ;;  %v1879_v42 = vld [vmem:[#allocation2 + $0x1170] sm:$0xff] }
 0x1dc   : > { %4519 = vmatprep.subr.bf16.mxu0 %v4518_v10  ;;  %v3763_v5 = vpop.f32.mrb[14].mxu1  ;;  %v1865_v51 = vld [vmem:[#allocation2 + $0x1100] sm:$0xff]  ;;  %v1839_v10 = vld [vmem:[#allocation2 + $0x1030] sm:$0xff]  ;;  %v4532_v57 = vpack.c.bf16 %v1993_v49, %v1990_v48  ;;  %v1882_v44 = vld [vmem:[#allocation2 + $0x1188] sm:$0xff] }
 0x1dd   : > { %v5561_v43 = vadd.f32 %v5536_v56, %v1176_v4  ;;  %v3764_v21 = vpop.f32.mrb[15].mxu1  ;;  %v2041_v56 = vld [vmem:[#allocation2 + $0x1678] sm:$0xff]  ;;  %v1861_v58 = vld [vmem:[#allocation2 + $0x10e0] sm:$0xff]  ;;  %v4612_v59 = vpack.c.bf16 %v1865_v51, %v1862_v50  ;;  %v4668_v60 = vpack.c.bf16 %v1842_v52, %v1839_v10  ;;  %v1871_v4 = vld [vmem:[#allocation2 + $0x1130] sm:$0xff] }
 0x1de   : > { %4599 = vmatpush1.bf16.msra.mxu1 %v4598_v1  ;;  %v5563_v28 = vadd.f32 %v3764_v21, %v3763_v5  ;;  %v4530_v47 = vpack.c.bf16 %v2041_v56, %v2038_v37  ;;  %v1868_v1 = vld [vmem:[#allocation2 + $0x1118] sm:$0xff]  ;;  %v4614_v11 = vpack.c.bf16 %v1864_v3, %v1861_v58  ;;  %v1877_v5 = vld [vmem:[#allocation2 + $0x1160] sm:$0xff]  ;;  %v1851_v21 = vld [vmem:[#allocation2 + $0x1090] sm:$0xff] }
 0x1df   : > { %4521 = vmatpush3.bf16.msra.mxu0 %v4520_v8  ;;  %4601 = vmatprep.subr.bf16.mxu1 %v4600_v33  ;;  %v1845_v8 = vld [vmem:[#allocation2 + $0x1060] sm:$0xff]  ;;  %v4670_v33 = vpack.c.bf16 %v1794_v63, %v1791_v61  ;;  %v4616_v13 = vpack.c.bf16 %v1871_v4, %v1868_v1  ;;  %v1883_v37 = vld [vmem:[#allocation2 + $0x1190] sm:$0xff]  ;;  %v1812_v49 = vld [vmem:[#allocation2 + $0xf58] sm:$0xff] }
 0x1e0   : > { %4523 = vmatprep.subr.bf16.mxu0 %v4522_v12  ;;  %v1867_v12 = vld [vmem:[#allocation2 + $0x1110] sm:$0xff]  ;;  %v4672_v14 = vpack.c.bf16 %v1848_v9, %v1845_v8  ;;  %v1857_v56 = vld [vmem:[#allocation2 + $0x10c0] sm:$0xff]  ;;  %v1886_v50 = vld [vmem:[#allocation2 + $0x11a8] sm:$0xff] }
 0x1e1   : > { %v1809_v48 = vld [vmem:[#allocation2 + $0xf40] sm:$0xff]  ;;  %v1866_v10 = vld [vmem:[#allocation2 + $0x1108] sm:$0xff]  ;;  %v1892_v61 = vld [vmem:[#allocation2 + $0x11d8] sm:$0xff] }
 0x1e2   : > { %4603 = vmatpush1.bf16.msra.mxu1 %v4602_v22  ;;  %v1854_v22 = vld [vmem:[#allocation2 + $0x10a8] sm:$0xff]  ;;  %v1889_v51 = vld [vmem:[#allocation2 + $0x11c0] sm:$0xff]  ;;  %v4682_v52 = vpack.c.bf16 %v1812_v49, %v1809_v48  ;;  %v1895_v63 = vld [vmem:[#allocation2 + $0x11f0] sm:$0xff] }
 0x1e3   : > { %4525 = vmatpush3.bf16.msra.mxu0 %v4524_v24  ;;  %4605 = vmatprep.subr.bf16.mxu1 %v4604_v41  ;;  %v4618_v24 = vpack.c.bf16 %v1870_v55, %v1867_v12  ;;  %v1876_v41 = vld [vmem:[#allocation2 + $0x1158] sm:$0xff]  ;;  %v4676_v31 = vpack.c.bf16 %v1854_v22, %v1851_v21  ;;  %v4628_v58 = vpack.c.bf16 %v1889_v51, %v1886_v50  ;;  %v1869_v1 = vld [vmem:[#allocation2 + $0x1120] sm:$0xff]  ;;  %v1891_v9 = vld [vmem:[#allocation2 + $0x11d0] sm:$0xff] }
 0x1e4   : > { %4527 = vmatprep.subr.bf16.mxu0 %v4526_v29  ;;  %v4620_v29 = vpack.c.bf16 %v1877_v5, %v1874_v19  ;;  %v1872_v4 = vld [vmem:[#allocation2 + $0x1138] sm:$0xff]  ;;  %v1821_v55 = vld [vmem:[#allocation2 + $0xfa0] sm:$0xff]  ;;  %v1875_v18 = vld [vmem:[#allocation2 + $0x1150] sm:$0xff] }
 0x1e5   : > { %v4688_v12 = vpack.c.bf16 %v1872_v4, %v1869_v1  ;;  %v1901_v32 = vld [vmem:[#allocation2 + $0x1220] sm:$0xff]  ;;  %v1878_v19 = vld [vmem:[#allocation2 + $0x1168] sm:$0xff]  ;;  %v1887_v1 = vld [vmem:[#allocation2 + $0x11b0] sm:$0xff] }
 0x1e6   : > { %4607 = vmatpush1.bf16.msra.mxu1 %v4606_v39  ;;  %v1860_v39 = vld [vmem:[#allocation2 + $0x10d8] sm:$0xff]  ;;  %v5570_v5 = vld [vmem:[%s5354_s10] sm:$0xff]  ;;  %v1906_v50 = vld [vmem:[#allocation2 + $0x1248] sm:$0xff] }
 0x1e7   : > { %4529 = vmatpush3.bf16.msra.mxu0 %v4528_v40  ;;  %4609 = vmatprep.subr.bf16.mxu1 %v4608_v45  ;;  %v4678_v40 = vpack.c.bf16 %v1806_v35, %v1803_v34  ;;  %v4624_v45 = vpack.c.bf16 %v1883_v37, %v1880_v36  ;;  %v1904_v34 = vld [vmem:[#allocation2 + $0x1238] sm:$0xff]  ;;  %v1907_v36 = vld [vmem:[#allocation2 + $0x1250] sm:$0xff]  ;;  %v1881_v37 = vld [vmem:[#allocation2 + $0x1180] sm:$0xff] }
 0x1e8   : > { %4531 = vmatprep.subr.bf16.mxu0 %v4530_v47  ;;  %v4680_v47 = vpack.c.bf16 %v1860_v39, %v1857_v56  ;;  %v1884_v56 = vld [vmem:[#allocation2 + $0x1198] sm:$0xff]  ;;  %v5021_v39 = vld [vmem:[%s5354_s10 + $0x28] sm:$0x3]  ;;  %v4640_v49 = vpack.c.bf16 %v1907_v36, %v1904_v34  ;;  %v1905_v36 = vld [vmem:[#allocation2 + $0x1240] sm:$0xff] }
 0x1e9   : > { %v4696_v51 = vpack.c.bf16 %v1884_v56, %v1881_v37  ;;  %v1890_v4 = vld [vmem:[#allocation2 + $0x11c8] sm:$0xff]  ;;  %v1908_v37 = vld [vmem:[#allocation2 + $0x1258] sm:$0xff] }
 0x1ea   : > { %4611 = vmatpush1.bf16.msra.mxu1 %v4610_v53  ;;  %v1885_v53 = vld [vmem:[#allocation2 + $0x11a0] sm:$0xff]  ;;  %v1934_v56 = vld [vmem:[#allocation2 + $0x1328] sm:$0xff] }
 0x1eb   : > { %4533 = vmatpush3.bf16.msra.mxu0 %v4532_v57  ;;  %4613 = vmatprep.subr.bf16.mxu1 %v4612_v59  ;;  %v1888_v57 = vld [vmem:[#allocation2 + $0x11b8] sm:$0xff]  ;;  %v1815_v59 = vld [vmem:[#allocation2 + $0xf70] sm:$0xff] }
 0x1ec   : > { %4669 = vmatprep.subr.bf16.mxu0 %v4668_v60  ;;  %v1818_v60 = vld [vmem:[#allocation2 + $0xf88] sm:$0xff] }
 0x1ed   : > { %v4686_v8 = vpack.c.bf16 %v1818_v60, %v1815_v59  ;;  %v1909_v59 = vld [vmem:[#allocation2 + $0x1260] sm:$0xff] }
 0x1ee   : > { %2321 = vmatmul.mubr.f32.vlgmr.msra.gmra.mrb[8].mxu0 %v5402_v17  ;;  %4615 = vmatpush1.bf16.msra.mxu1 %v4614_v11  ;;  %v4622_v17 = vpack.c.bf16 %v1876_v41, %v1873_v27  ;;  %v1894_v11 = vld [vmem:[#allocation2 + $0x11e8] sm:$0xff]  ;;  %v4692_v41 = vpack.c.bf16 %v1878_v19, %v1875_v18  ;;  %v1921_v19 = vld [vmem:[#allocation2 + $0x12c0] sm:$0xff] }
 0x1ef   : > { %4671 = vmatpush3.bf16.msra.mxu0 %v4670_v33  ;;  %4617 = vmatprep.subr.bf16.mxu1 %v4616_v13  ;;  %v4632_v33 = vpack.c.bf16 %v1895_v63, %v1892_v61  ;;  %v1824_v13 = vld [vmem:[#allocation2 + $0xfb8] sm:$0xff]  ;;  %v4634_v21 = vpack.c.bf16 %v1894_v11, %v1891_v9  ;;  %v4701_v9 = vpack.c.bf16 %v1890_v4, %v1887_v1  ;;  %v1915_v11 = vld [vmem:[#allocation2 + $0x1290] sm:$0xff] }
 0x1f0   : > { %4673 = vmatprep.subr.bf16.mxu0 %v4672_v14  ;;  %2325 = vmatprep.mubr.f32.mxu0 %v5377_v54  ;;  %v1863_v54 = vld [vmem:[#allocation2 + $0x10f0] sm:$0xff]  ;;  %v1898_v14 = vld [vmem:[#allocation2 + $0x1208] sm:$0xff]  ;;  %v4690_v22 = vpack.c.bf16 %v1824_v13, %v1821_v55  ;;  %v1912_v63 = vld [vmem:[#allocation2 + $0x1278] sm:$0xff] }
 0x1f1   : > { %v4684_v3 = vpack.c.bf16 %v1866_v10, %v1863_v54  ;;  %v4636_v27 = vpack.c.bf16 %v1901_v32, %v1898_v14  ;;  %v1836_v54 = vld [vmem:[#allocation2 + $0x1018] sm:$0xff]  ;;  %v1922_v13 = vld [vmem:[#allocation2 + $0x12c8] sm:$0xff]  ;;  %v1925_v14 = vld [vmem:[#allocation2 + $0x12e0] sm:$0xff] }
 0x1f2   : > { %2326 = vmatmul.mubr.f32.gmra.mrb[10].mxu0 %v5398_v7  ;;  %4619 = vmatpush1.bf16.msra.mxu1 %v4618_v24  ;;  %v4626_v7 = vpack.c.bf16 %v1882_v44, %v1879_v42  ;;  %v1897_v24 = vld [vmem:[#allocation2 + $0x1200] sm:$0xff]  ;;  %v1896_v55 = vld [vmem:[#allocation2 + $0x11f8] sm:$0xff]  ;;  %v1923_v4 = vld [vmem:[#allocation2 + $0x12d0] sm:$0xff] }
 0x1f3   : > { %4675 = vmatpush3.bf16.msra.mxu0 %v4674_v26  ;;  %4621 = vmatprep.subr.bf16.mxu1 %v4620_v29  ;;  %v1900_v26 = vld [vmem:[#allocation2 + $0x1218] sm:$0xff]  ;;  %v1827_v29 = vld [vmem:[#allocation2 + $0xfd0] sm:$0xff]  ;;  %v5576_v42 = vld [vmem:[%s5354_s10 + $0x20] sm:$0x3] }
 0x1f4   : > { %4677 = vmatprep.subr.bf16.mxu0 %v4676_v31  ;;  %2624 = vmatprep.mubr.f32.mxu0 %v5543_v2  ;;  %v4630_v2 = vpack.c.bf16 %v1888_v57, %v1885_v53  ;;  %v1830_v31 = vld [vmem:[#allocation2 + $0xfe8] sm:$0xff]  ;;  %v4638_v44 = vpack.c.bf16 %v1900_v26, %v1897_v24  ;;  %v5023_v53 = vld [vmem:[%s5354_s10 + $0x18] sm:$0xff]  ;;  %v1899_v24 = vld [vmem:[#allocation2 + $0x1210] sm:$0xff] }
 0x1f5   : > { %v1902_v26 = vld [vmem:[#allocation2 + $0x1228] sm:$0xff]  ;;  %v2714_v1 = vld [vmem:[#allocation2 + $0x1878] sm:$0xff] }
 0x1f6   : > { %4623 = vmatpush1.bf16.msra.mxu1 %v4622_v17 }
 0x1f7   : > { %4679 = vmatpush3.bf16.msra.mxu0 %v4678_v40  ;;  %4625 = vmatprep.subr.bf16.mxu1 %v4624_v45  ;;  %v4694_v45 = vpack.c.bf16 %v1830_v31, %v1827_v29  ;;  %v4707_v29 = vpack.c.bf16 %v1902_v26, %v1899_v24  ;;  %v1927_v31 = vld [vmem:[#allocation2 + $0x12f0] sm:$0xff]  ;;  %v2726_v26 = vld [vmem:[#allocation2 + $0x18d8] sm:$0xff] }
 0x1f8   : > { %4681 = vmatprep.subr.bf16.mxu0 %v4680_v47  ;;  %v1903_v47 = vld [vmem:[#allocation2 + $0x1230] sm:$0xff] }
 0x1fa   : > { %4627 = vmatpush1.bf16.msra.mxu1 %v4626_v7  ;;  %v1910_v7 = vld [vmem:[#allocation2 + $0x1268] sm:$0xff] }
 0x1fb   : > { %4683 = vmatpush3.bf16.msra.mxu0 %v4682_v52  ;;  %4629 = vmatprep.subr.bf16.mxu1 %v4628_v58  ;;  %v1913_v52 = vld [vmem:[#allocation2 + $0x1280] sm:$0xff] }
 0x1fc   : > { %4685 = vmatprep.subr.bf16.mxu0 %v4684_v3  ;;  %v4644_v61 = vpack.c.bf16 %v1913_v52, %v1910_v7  ;;  %v1942_v52 = vld [vmem:[#allocation2 + $0x1368] sm:$0xff] }
 0x1fd   : > { %2471 = vmatmul.mubr.f32.vlgmr.msra.gmra.mrb[20].mxu1 %v5570_v5 }
 0x1fe   : > { %4631 = vmatpush1.bf16.msra.mxu1 %v4630_v2  ;;  %2476 = vmatprep.mubr.f32.mxu1 %v5021_v39  ;;  %v1916_v2 = vld [vmem:[#allocation2 + $0x1298] sm:$0xff] }
 0x1ff   : > { %4687 = vmatpush3.bf16.msra.mxu0 %v4686_v8  ;;  %4633 = vmatprep.subr.bf16.mxu1 %v4632_v33  ;;  %v1919_v8 = vld [vmem:[#allocation2 + $0x12b0] sm:$0xff] }
 0x200   : > { %4689 = vmatprep.subr.bf16.mxu0 %v4688_v12  ;;  %v1745_v35 = vpop.f32.mrb[16].mxu1  ;;  %v4648_v33 = vpack.c.bf16 %v1919_v8, %v1916_v2  ;;  %v1918_v12 = vld [vmem:[#allocation2 + $0x12a8] sm:$0xff]  ;;  %v2718_v8 = vld [vmem:[#allocation2 + $0x1898] sm:$0xff] }
 0x201   : > { %v1746_v17 = vadd.f32 %v5558_v6, %v1745_v35  ;;  %v1747_v40 = vpop.f32.mrb[17].mxu1  ;;  %2477 = vmatmul.mubr.f32.gmra.mrb[22].mxu1 %v5576_v42  ;;  %v1833_v6 = vld [vmem:[#allocation2 + $0x1000] sm:$0xff]  ;;  %v4650_v32 = vpack.c.bf16 %v1918_v12, %v1915_v11  ;;  %v1930_v35 = vld [vmem:[#allocation2 + $0x1308] sm:$0xff] }
 0x202   : > { %4635 = vmatpush1.bf16.msra.mxu1 %v4634_v21  ;;  %3631 = vmatprep.mubr.msk.f32.mxu1 %vm635_vm1, %v5023_v53  ;;  %v4698_v3 = vpack.c.bf16 %v1836_v54, %v1833_v6  ;;  %v4652_v21 = vpack.c.bf16 %v1925_v14, %v1922_v13  ;;  %v4710_v40 = vpack.c.bf16 %v1908_v37, %v1905_v36  ;;  %v1926_v2 = vld [vmem:[#allocation2 + $0x12e8] sm:$0xff]  ;;  %v1932_v13 = vld [vmem:[#allocation2 + $0x1318] sm:$0xff]  ;;  %v2729_v37 = vld [vmem:[#allocation2 + $0x18f0] sm:$0xff] }
 0x203   : > { %4691 = vmatpush3.bf16.msra.mxu0 %v4690_v22  ;;  %v5580_v48 = vadd.f32 %v1746_v17, %v5555_v23  ;;  %4637 = vmatprep.subr.bf16.mxu1 %v4636_v27  ;;  %v4642_v23 = vpack.c.bf16 %v1906_v50, %v1903_v47  ;;  %v1924_v22 = vld [vmem:[#allocation2 + $0x12d8] sm:$0xff]  ;;  %v4658_v17 = vpack.c.bf16 %v1930_v35, %v1927_v31  ;;  %v1911_v47 = vld [vmem:[#allocation2 + $0x1270] sm:$0xff]  ;;  %v2724_v14 = vld [vmem:[#allocation2 + $0x18c8] sm:$0xff] }
 0x204   : > { %4693 = vmatprep.subr.bf16.mxu0 %v4692_v41  ;;  %v1750_v10 = vpop.f32.mrb[18].mxu1  ;;  %v1928_v27 = vld [vmem:[#allocation2 + $0x12f8] sm:$0xff]  ;;  %v1931_v41 = vld [vmem:[#allocation2 + $0x1310] sm:$0xff]  ;;  %v4719_v11 = vpack.c.bf16 %v1926_v2, %v1923_v4  ;;  %v2719_v4 = vld [vmem:[#allocation2 + $0x18a0] sm:$0xff] }
 0x205   : > { %v1751_v57 = vadd.f32 %v5563_v28, %v1750_v10  ;;  %v1752_v58 = vpop.f32.mrb[19].mxu1  ;;  %v4646_v28 = vpack.c.bf16 %v1912_v63, %v1909_v59  ;;  %v4656_v34 = vpack.c.bf16 %v1931_v41, %v1928_v27  ;;  %v1940_v50 = vld [vmem:[#allocation2 + $0x1358] sm:$0xff]  ;;  %v1939_v10 = vld [vmem:[#allocation2 + $0x1350] sm:$0xff]  ;;  %v1938_v41 = vld [vmem:[#allocation2 + $0x1348] sm:$0xff] }
 0x206   : > { %4639 = vmatpush1.bf16.msra.mxu1 %v4638_v44  ;;  %v2712_v58 = vld [vmem:[#allocation2 + $0x1868] sm:$0xff]  ;;  %v1935_v27 = vld [vmem:[#allocation2 + $0x1330] sm:$0xff]  ;;  %v5025_v31 = vld [vmem:[%s5354_s10 + $0x38] sm:$0x3] }
 0x207   : > { %4695 = vmatpush3.bf16.msra.mxu0 %v4694_v45  ;;  %v5586_v60 = vadd.f32 %v1751_v57, %v5561_v43  ;;  %4641 = vmatprep.subr.bf16.mxu1 %v4640_v49  ;;  %v1893_v43 = vld [vmem:[#allocation2 + $0x11e0] sm:$0xff]  ;;  %v1936_v45 = vld [vmem:[#allocation2 + $0x1338] sm:$0xff]  ;;  %v1914_v49 = vld [vmem:[#allocation2 + $0x1288] sm:$0xff]  ;;  %v4725_v36 = vpack.c.bf16 %v1938_v41, %v1935_v27 }
 0x208   : > { %4697 = vmatprep.subr.bf16.mxu0 %v4696_v51  ;;  %v4704_v18 = vpack.c.bf16 %v1896_v55, %v1893_v43  ;;  %v1943_v51 = vld [vmem:[#allocation2 + $0x1370] sm:$0xff]  ;;  %v4713_v54 = vpack.c.bf16 %v1914_v49, %v1911_v47  ;;  %v1920_v57 = vld [vmem:[#allocation2 + $0x12b8] sm:$0xff]  ;;  %v2720_v43 = vld [vmem:[#allocation2 + $0x18a8] sm:$0xff] }
 0x209   : > { %v4664_v7 = vpack.c.bf16 %v1943_v51, %v1940_v50  ;;  %v1929_v55 = vld [vmem:[#allocation2 + $0x1300] sm:$0xff]  ;;  %v2764_v47 = vld [vmem:[#allocation2 + $0x1a08] sm:$0xff]  ;;  %v2722_v2 = vld [vmem:[#allocation2 + $0x18b8] sm:$0xff] }
 0x20a   : > { %4643 = vmatpush1.bf16.msra.mxu1 %v4642_v23  ;;  %v2715_v23 = vld [vmem:[#allocation2 + $0x1880] sm:$0xff]  ;;  %v2782_v27 = vld [vmem:[#allocation2 + $0x1a98] sm:$0xff] }
 0x20b   : > { %4699 = vmatpush3.bf16.msra.mxu0 %v4698_v3  ;;  %4645 = vmatprep.subr.bf16.mxu1 %v4644_v61  ;;  %v4666_v3 = vpack.c.bf16 %v1942_v52, %v1939_v10  ;;  %v2711_v61 = vld [vmem:[#allocation2 + $0x1860] sm:$0xff]  ;;  %v4730_v63 = vpack.c.bf16 %v2715_v23, %v2712_v58  ;;  %v2716_v52 = vld [vmem:[#allocation2 + $0x1888] sm:$0xff]  ;;  %v2770_v23 = vld [vmem:[#allocation2 + $0x1a38] sm:$0xff] }
 0x20c   : > { %4700 = vmatprep.subr.bf16.mxu0 %v5165_v0  ;;  %v2735_v51 = vld [vmem:[#allocation2 + $0x1920] sm:$0xff] }
 0x20d   : > { %v2767_v58 = vld [vmem:[#allocation2 + $0x1a20] sm:$0xff] }
 0x20e   : > { %2625 = vmatmul.mubr.f32.vlgmr.msra.gmra.mrb[12].mxu0 %v5570_v5  ;;  %4647 = vmatpush1.bf16.msra.mxu1 %v4646_v28  ;;  %v4654_v5 = vpack.c.bf16 %v1924_v22, %v1921_v19  ;;  %v2721_v28 = vld [vmem:[#allocation2 + $0x18b0] sm:$0xff]  ;;  %v2723_v22 = vld [vmem:[#allocation2 + $0x18c0] sm:$0xff] }
 0x20f   : > { %4702 = vmatpush1.bf16.msra.mxu0 %v4701_v9  ;;  %4649 = vmatprep.subr.bf16.mxu1 %v4648_v33  ;;  %v4732_v9 = vpack.c.bf16 %v2714_v1, %v2711_v61  ;;  %v2717_v33 = vld [vmem:[#allocation2 + $0x1890] sm:$0xff]  ;;  %v4734_v12 = vpack.c.bf16 %v2721_v28, %v2718_v8  ;;  %v4740_v35 = vpack.c.bf16 %v2726_v26, %v2723_v22  ;;  %v2748_v8 = vld [vmem:[#allocation2 + $0x1988] sm:$0xff]  ;;  %v2754_v22 = vld [vmem:[#allocation2 + $0x19b8] sm:$0xff] }
 0x210   : > { %2629 = vmatprep.mubr.f32.mxu0 %v5021_v39  ;;  %4703 = vmatprep.subr.bf16.mxu0 %v5165_v0  ;;  %v1937_v39 = vld [vmem:[#allocation2 + $0x1340] sm:$0xff]  ;;  %v4736_v19 = vpack.c.bf16 %v2720_v43, %v2717_v33  ;;  %v2741_v61 = vld [vmem:[#allocation2 + $0x1950] sm:$0xff]  ;;  %v4838_v28 = vpack.c.bf16 %v2770_v23, %v2767_v58  ;;  %v2776_v33 = vld [vmem:[#allocation2 + $0x1a68] sm:$0xff]  ;;  %v4840_v43 = vpack.c.bf16 %v2722_v2, %v2719_v4 }
 0x211   : > { %v4660_v44 = vpack.c.bf16 %v1937_v39, %v1934_v56  ;;  %v2732_v56 = vld [vmem:[#allocation2 + $0x1908] sm:$0xff]  ;;  %v2779_v26 = vld [vmem:[#allocation2 + $0x1a80] sm:$0xff] }
 0x212   : > { %2630 = vmatmul.mubr.f32.gmra.mrb[14].mxu0 %v5576_v42  ;;  %4651 = vmatpush1.bf16.msra.mxu1 %v4650_v32  ;;  %v1933_v42 = vld [vmem:[#allocation2 + $0x1320] sm:$0xff]  ;;  %v4744_v49 = vpack.c.bf16 %v2732_v56, %v2729_v37  ;;  %v2734_v37 = vld [vmem:[#allocation2 + $0x1918] sm:$0xff]  ;;  %v2760_v56 = vld [vmem:[#allocation2 + $0x19e8] sm:$0xff] }
 0x213   : > { %4705 = vmatpush1.bf16.msra.mxu0 %v4704_v18  ;;  %4653 = vmatprep.subr.bf16.mxu1 %v4652_v21  ;;  %v4662_v6 = vpack.c.bf16 %v1936_v45, %v1933_v42  ;;  %v2727_v32 = vld [vmem:[#allocation2 + $0x18e0] sm:$0xff]  ;;  %v5599_v18 = vld [vmem:[%s5354_s10 + $0x10] sm:$0xff]  ;;  %v4722_v21 = vpack.c.bf16 %v1932_v13, %v1929_v55  ;;  %v2736_v42 = vld [vmem:[#allocation2 + $0x1928] sm:$0xff] }
 0x214   : > { %4706 = vmatprep.subr.bf16.mxu0 %v5165_v0  ;;  %3633 = vmatprep.mubr.msk.f32.mxu0 %vm635_vm1, %v5023_v53  ;;  %v1917_v53 = vld [vmem:[#allocation2 + $0x12a0] sm:$0xff]  ;;  %v4738_v24 = vpack.c.bf16 %v2727_v32, %v2724_v14  ;;  %v2761_v45 = vld [vmem:[#allocation2 + $0x19f0] sm:$0xff]  ;;  %v2750_v13 = vld [vmem:[#allocation2 + $0x1998] sm:$0xff] }
 0x215   : > { %v4716_v59 = vpack.c.bf16 %v1920_v57, %v1917_v53  ;;  %v4834_v10 = vpack.c.bf16 %v2764_v47, %v2761_v45  ;;  %v2742_v53 = vld [vmem:[#allocation2 + $0x1958] sm:$0xff]  ;;  %v2745_v57 = vld [vmem:[#allocation2 + $0x1970] sm:$0xff]  ;;  %v2747_v55 = vld [vmem:[#allocation2 + $0x1980] sm:$0xff] }
 0x216   : > { %4655 = vmatpush1.bf16.msra.mxu1 %v4654_v5  ;;  %v2730_v5 = vld [vmem:[#allocation2 + $0x18f8] sm:$0xff]  ;;  %v4750_v1 = vpack.c.bf16 %v2745_v57, %v2742_v53  ;;  %v2765_v53 = vld [vmem:[#allocation2 + $0x1a10] sm:$0xff]  ;;  %v2768_v57 = vld [vmem:[#allocation2 + $0x1a28] sm:$0xff] }
 0x217   : > { %4708 = vmatpush1.bf16.msra.mxu0 %v4707_v29  ;;  %4657 = vmatprep.subr.bf16.mxu1 %v4656_v34  ;;  %v2733_v29 = vld [vmem:[#allocation2 + $0x1910] sm:$0xff]  ;;  %v2762_v45 = vld [vmem:[#allocation2 + $0x19f8] sm:$0xff]  ;;  %v2800_v4 = vld [vmem:[#allocation2 + $0x1b28] sm:$0xff]  ;;  %v4768_v2 = vpack.c.bf16 %v2768_v57, %v2765_v53 }
 0x218   : > { %4709 = vmatprep.subr.bf16.mxu0 %v5165_v0  ;;  %v5606_v34 = vld [vmem:[%s5354_s10 + $0x30] sm:$0x3]  ;;  %v4742_v39 = vpack.c.bf16 %v2733_v29, %v2730_v5  ;;  %v2756_v29 = vld [vmem:[#allocation2 + $0x19c8] sm:$0xff]  ;;  %v2798_v53 = vld [vmem:[#allocation2 + $0x1b18] sm:$0xff] }
 0x219   : > { %v2753_v5 = vld [vmem:[#allocation2 + $0x19b0] sm:$0xff] }
 0x21a   : > { %4659 = vmatpush1.bf16.msra.mxu1 %v4658_v17  ;;  %v1941_v17 = vld [vmem:[#allocation2 + $0x1360] sm:$0xff]  ;;  %v2821_v57 = vld [vmem:[#allocation2 + $0x1bd0] sm:$0xff] }
 0x21b   : > { %4711 = vmatpush1.bf16.msra.mxu0 %v4710_v40  ;;  %4661 = vmatprep.subr.bf16.mxu1 %v4660_v44  ;;  %v1944_v40 = vld [vmem:[#allocation2 + $0x1378] sm:$0xff]  ;;  %v2739_v44 = vld [vmem:[#allocation2 + $0x1940] sm:$0xff] }
 0x21c   : > { %4712 = vmatprep.subr.bf16.mxu0 %v5165_v0  ;;  %v4728_v50 = vpack.c.bf16 %v1944_v40, %v1941_v17  ;;  %v2785_v17 = vld [vmem:[#allocation2 + $0x1ab0] sm:$0xff]  ;;  %v2788_v40 = vld [vmem:[#allocation2 + $0x1ac8] sm:$0xff] }
 0x21e   : > { %4663 = vmatpush1.bf16.msra.mxu1 %v4662_v6  ;;  %v4746_v6 = vpack.c.bf16 %v2739_v44, %v2736_v42  ;;  %v2759_v44 = vld [vmem:[#allocation2 + $0x19e0] sm:$0xff] }
 0x21f   : > { %4714 = vmatpush1.bf16.msra.mxu0 %v4713_v54  ;;  %4665 = vmatprep.subr.bf16.mxu1 %v4664_v7  ;;  %v2738_v54 = vld [vmem:[#allocation2 + $0x1938] sm:$0xff]  ;;  %v2713_v7 = vld [vmem:[#allocation2 + $0x1870] sm:$0xff] }
 0x220   : > { %4715 = vmatprep.subr.bf16.mxu0 %v5165_v0 }
 0x222   : > { %4667 = vmatpush1.bf16.msra.mxu1 %v4666_v3  ;;  %v4748_v3 = vpack.c.bf16 %v2738_v54, %v2735_v51  ;;  %v2740_v51 = vld [vmem:[#allocation2 + $0x1948] sm:$0xff]  ;;  %v2769_v54 = vld [vmem:[#allocation2 + $0x1a30] sm:$0xff] }
 0x223   : > { %4717 = vmatpush1.bf16.msra.mxu0 %v4716_v59  ;;  %4731 = vmatprep.subr.bf16.mxu1 %v4730_v63  ;;  %v4836_v59 = vpack.c.bf16 %v2716_v52, %v2713_v7  ;;  %v2744_v63 = vld [vmem:[#allocation2 + $0x1968] sm:$0xff]  ;;  %v2794_v7 = vld [vmem:[#allocation2 + $0x1af8] sm:$0xff]  ;;  %v4764_v52 = vpack.c.bf16 %v2762_v45, %v2759_v44  ;;  %v2789_v45 = vld [vmem:[#allocation2 + $0x1ad0] sm:$0xff] }
 0x224   : > { %4718 = vmatprep.subr.bf16.mxu0 %v5165_v0 }
 0x225   : > { %2548 = vmatmul.mubr.f32.vlgmr.msra.gmra.mrb[20].mxu1 %v5599_v18 }
 0x226   : > { %4733 = vmatpush1.bf16.msra.mxu1 %v4732_v9  ;;  %3632 = vmatprep.mubr.msk.f32.mxu1 %vm635_vm1, %v5025_v31  ;;  %v2751_v9 = vld [vmem:[#allocation2 + $0x19a0] sm:$0xff] }
 0x227   : > { %4720 = vmatpush1.bf16.msra.mxu0 %v4719_v11  ;;  %4735 = vmatprep.subr.bf16.mxu1 %v4734_v12  ;;  %v2773_v11 = vld [vmem:[#allocation2 + $0x1a50] sm:$0xff]  ;;  %v4752_v12 = vpack.c.bf16 %v2744_v63, %v2741_v61  ;;  %v4754_v14 = vpack.c.bf16 %v2751_v9, %v2748_v8  ;;  %v2772_v61 = vld [vmem:[#allocation2 + $0x1a48] sm:$0xff]  ;;  %v2775_v63 = vld [vmem:[#allocation2 + $0x1a60] sm:$0xff] }
 0x228   : > { %4721 = vmatprep.subr.bf16.mxu0 %v5165_v0  ;;  %v4842_v32 = vpack.c.bf16 %v2776_v33, %v2773_v11  ;;  %v2774_v9 = vld [vmem:[#allocation2 + $0x1a58] sm:$0xff]  ;;  %v4770_v11 = vpack.c.bf16 %v2775_v63, %v2772_v61  ;;  %v2801_v63 = vld [vmem:[#allocation2 + $0x1b30] sm:$0xff] }
 0x229   : > { %2554 = vmatmul.mubr.f32.gmra.mrb[22].mxu1 %v5606_v34 }
 0x22a   : > { %4737 = vmatpush1.bf16.msra.mxu1 %v4736_v19  ;;  %2931 = vmatprep.mubr.f32.mxu1 %v5439_v62  ;;  %v2725_v19 = vld [vmem:[#allocation2 + $0x18d0] sm:$0xff] }
 0x22b   : > { %4723 = vmatpush1.bf16.msra.mxu0 %v4722_v21  ;;  %4739 = vmatprep.subr.bf16.mxu1 %v4738_v24  ;;  %v2728_v21 = vld [vmem:[#allocation2 + $0x18e8] sm:$0xff]  ;;  %v2757_v24 = vld [vmem:[#allocation2 + $0x19d0] sm:$0xff] }
 0x22c   : > { %4724 = vmatprep.subr.bf16.mxu0 %v5165_v0  ;;  %v4844_v41 = vpack.c.bf16 %v2728_v21, %v2725_v19 }
 0x22e   : > { %4741 = vmatpush1.bf16.msra.mxu1 %v4740_v35  ;;  %v4846_v35 = vpack.c.bf16 %v2782_v27, %v2779_v26  ;;  %v2780_v26 = vld [vmem:[#allocation2 + $0x1a88] sm:$0xff] }
 0x22f   : > { %4726 = vmatpush1.bf16.msra.mxu0 %v4725_v36  ;;  %4743 = vmatprep.subr.bf16.mxu1 %v4742_v39  ;;  %v2731_v36 = vld [vmem:[#allocation2 + $0x1900] sm:$0xff] }
 0x230   : > { %4727 = vmatprep.subr.bf16.mxu0 %v5165_v0  ;;  %v2763_v39 = vld [vmem:[#allocation2 + $0x1a00] sm:$0xff]  ;;  %v4848_v42 = vpack.c.bf16 %v2734_v37, %v2731_v36 }
 0x231   : > { %v4762_v47 = vpack.c.bf16 %v2763_v39, %v2760_v56  ;;  %v2783_v36 = vld [vmem:[#allocation2 + $0x1aa0] sm:$0xff]  ;;  %v2786_v56 = vld [vmem:[#allocation2 + $0x1ab8] sm:$0xff]  ;;  %v2809_v39 = vld [vmem:[#allocation2 + $0x1b70] sm:$0xff] }
 0x232   : > { %4745 = vmatpush1.bf16.msra.mxu1 %v4744_v49  ;;  %v4850_v49 = vpack.c.bf16 %v2788_v40, %v2785_v17  ;;  %v2812_v17 = vld [vmem:[#allocation2 + $0x1b88] sm:$0xff]  ;;  %v2790_v40 = vld [vmem:[#allocation2 + $0x1ad8] sm:$0xff] }
 0x233   : > { %4729 = vmatpush1.bf16.msra.mxu0 %v4728_v50  ;;  %4747 = vmatprep.subr.bf16.mxu1 %v4746_v6  ;;  %v2737_v50 = vld [vmem:[#allocation2 + $0x1930] sm:$0xff]  ;;  %v2766_v6 = vld [vmem:[#allocation2 + $0x1a18] sm:$0xff]  ;;  %v4867_v44 = vpack.c.bf16 %v2812_v17, %v2809_v39  ;;  %v2848_v17 = vld [vmem:[#allocation2 + $0x1ca8] sm:$0xff] }
 0x234   : > { %4835 = vmatprep.subr.bf16.mxu0 %v4834_v10  ;;  %v2791_v10 = vld [vmem:[#allocation2 + $0x1ae0] sm:$0xff]  ;;  %v4766_v58 = vpack.c.bf16 %v2769_v54, %v2766_v6  ;;  %v2796_v6 = vld [vmem:[#allocation2 + $0x1b08] sm:$0xff]  ;;  %v2845_v39 = vld [vmem:[#allocation2 + $0x1c90] sm:$0xff] }
 0x235   : > { %v4854_v23 = vpack.c.bf16 %v2794_v7, %v2791_v10  ;;  %v2799_v54 = vld [vmem:[#allocation2 + $0x1b20] sm:$0xff] }
 0x236   : > { %2700 = vmatmul.mubr.f32.vlgmr.msra.gmra.mrb[16].mxu0 %v5599_v18  ;;  %4749 = vmatpush1.bf16.msra.mxu1 %v4748_v3  ;;  %v4756_v18 = vpack.c.bf16 %v2750_v13, %v2747_v55  ;;  %v2743_v3 = vld [vmem:[#allocation2 + $0x1960] sm:$0xff]  ;;  %v2778_v55 = vld [vmem:[#allocation2 + $0x1a78] sm:$0xff]  ;;  %v2781_v13 = vld [vmem:[#allocation2 + $0x1a90] sm:$0xff] }
 0x237   : > { %4837 = vmatpush3.bf16.msra.mxu0 %v4836_v59  ;;  %3634 = vmatprep.mubr.msk.f32.mxu0 %vm635_vm1, %v5025_v31  ;;  %v4758_v31 = vpack.c.bf16 %v2757_v24, %v2754_v22  ;;  %v2746_v59 = vld [vmem:[#allocation2 + $0x1978] sm:$0xff]  ;;  %v2777_v22 = vld [vmem:[#allocation2 + $0x1a70] sm:$0xff]  ;;  %v4774_v24 = vpack.c.bf16 %v2781_v13, %v2778_v55 }
 0x238   : > { %4751 = vmatprep.subr.bf16.mxu1 %v4750_v1  ;;  %4839 = vmatprep.subr.bf16.mxu0 %v4838_v28  ;;  %v2797_v1 = vld [vmem:[#allocation2 + $0x1b10] sm:$0xff]  ;;  %v4856_v8 = vpack.c.bf16 %v2746_v59, %v2743_v3  ;;  %v2771_v28 = vld [vmem:[#allocation2 + $0x1a40] sm:$0xff]  ;;  %v2810_v55 = vld [vmem:[#allocation2 + $0x1b78] sm:$0xff] }
 0x239   : > { %v4858_v33 = vpack.c.bf16 %v2800_v4, %v2797_v1  ;;  %v4772_v19 = vpack.c.bf16 %v2774_v9, %v2771_v28  ;;  %v2805_v3 = vld [vmem:[#allocation2 + $0x1b50] sm:$0xff]  ;;  %v2804_v4 = vld [vmem:[#allocation2 + $0x1b48] sm:$0xff]  ;;  %v2811_v9 = vld [vmem:[#allocation2 + $0x1b80] sm:$0xff] }
 0x23a   : > { %2705 = vmatmul.mubr.f32.gmra.mrb[18].mxu0 %v5606_v34  ;;  %4753 = vmatpush1.bf16.msra.mxu1 %v4752_v12  ;;  %v4760_v34 = vpack.c.bf16 %v2756_v29, %v2753_v5  ;;  %v2749_v12 = vld [vmem:[#allocation2 + $0x1990] sm:$0xff]  ;;  %v2784_v5 = vld [vmem:[#allocation2 + $0x1aa8] sm:$0xff]  ;;  %v2787_v29 = vld [vmem:[#allocation2 + $0x1ac0] sm:$0xff] }
 0x23b   : > { %4841 = vmatpush3.bf16.msra.mxu0 %v4840_v43  ;;  %4755 = vmatprep.subr.bf16.mxu1 %v4754_v14  ;;  %v2752_v43 = vld [vmem:[#allocation2 + $0x19a8] sm:$0xff]  ;;  %v2803_v14 = vld [vmem:[#allocation2 + $0x1b40] sm:$0xff]  ;;  %v4778_v37 = vpack.c.bf16 %v2787_v29, %v2784_v5  ;;  %v2833_v13 = vld [vmem:[#allocation2 + $0x1c30] sm:$0xff] }
 0x23c   : > { %4843 = vmatprep.subr.bf16.mxu0 %v4842_v32  ;;  %3085 = vmatprep.mubr.f32.mxu0 %v5439_v62  ;;  %v4852_v62 = vpack.c.bf16 %v2740_v51, %v2737_v50  ;;  %v2806_v32 = vld [vmem:[#allocation2 + $0x1b58] sm:$0xff]  ;;  %v4860_v21 = vpack.c.bf16 %v2752_v43, %v2749_v12  ;;  %v2815_v50 = vld [vmem:[#allocation2 + $0x1ba0] sm:$0xff]  ;;  %v2808_v28 = vld [vmem:[#allocation2 + $0x1b68] sm:$0xff] }
 0x23d   : > { %v4862_v27 = vpack.c.bf16 %v2806_v32, %v2803_v14  ;;  %v2818_v51 = vld [vmem:[#allocation2 + $0x1bb8] sm:$0xff]  ;;  %v2807_v12 = vld [vmem:[#allocation2 + $0x1b60] sm:$0xff]  ;;  %v4794_v43 = vpack.c.bf16 %v2811_v9, %v2808_v28  ;;  %v2836_v14 = vld [vmem:[#allocation2 + $0x1c48] sm:$0xff] }
 0x23e   : > { %4757 = vmatpush1.bf16.msra.mxu1 %v4756_v18  ;;  %v2755_v18 = vld [vmem:[#allocation2 + $0x19c0] sm:$0xff]  ;;  %v4870_v7 = vpack.c.bf16 %v2818_v51, %v2815_v50  ;;  %v2814_v32 = vld [vmem:[#allocation2 + $0x1b98] sm:$0xff]  ;;  %v2820_v5 = vld [vmem:[#allocation2 + $0x1bc8] sm:$0xff] }
 0x23f   : > { %4845 = vmatpush3.bf16.msra.mxu0 %v4844_v41  ;;  %4759 = vmatprep.subr.bf16.mxu1 %v4758_v31  ;;  %v2758_v41 = vld [vmem:[#allocation2 + $0x19d8] sm:$0xff]  ;;  %v4776_v31 = vpack.c.bf16 %v2780_v26, %v2777_v22  ;;  %v4879_v22 = vpack.c.bf16 %v2836_v14, %v2833_v13  ;;  %v2823_v29 = vld [vmem:[#allocation2 + $0x1be0] sm:$0xff]  ;;  %v2832_v51 = vld [vmem:[#allocation2 + $0x1c28] sm:$0xff] }
 0x240   : > { %4847 = vmatprep.subr.bf16.mxu0 %v4846_v35  ;;  %v4864_v35 = vpack.c.bf16 %v2758_v41, %v2755_v18  ;;  %v2839_v18 = vld [vmem:[#allocation2 + $0x1c60] sm:$0xff]  ;;  %v2842_v41 = vld [vmem:[#allocation2 + $0x1c78] sm:$0xff]  ;;  %v2849_v13 = vld [vmem:[#allocation2 + $0x1cb0] sm:$0xff] }
 0x241   : > { %v2854_v50 = vld [vmem:[#allocation2 + $0x1cd8] sm:$0xff]  ;;  %v2843_v9 = vld [vmem:[#allocation2 + $0x1c80] sm:$0xff]  ;;  %v2852_v14 = vld [vmem:[#allocation2 + $0x1cc8] sm:$0xff] }
 0x242   : > { %4761 = vmatpush1.bf16.msra.mxu1 %v4760_v34  ;;  %v2793_v34 = vld [vmem:[#allocation2 + $0x1af0] sm:$0xff] }
 0x243   : > { %4849 = vmatpush3.bf16.msra.mxu0 %v4848_v42  ;;  %4763 = vmatprep.subr.bf16.mxu1 %v4762_v47  ;;  %v4780_v42 = vpack.c.bf16 %v2786_v56, %v2783_v36  ;;  %v4782_v47 = vpack.c.bf16 %v2793_v34, %v2790_v40  ;;  %v2819_v36 = vld [vmem:[#allocation2 + $0x1bc0] sm:$0xff]  ;;  %v2822_v56 = vld [vmem:[#allocation2 + $0x1bd8] sm:$0xff]  ;;  %v2829_v34 = vld [vmem:[#allocation2 + $0x1c10] sm:$0xff] }
 0x244   : > { %4851 = vmatprep.subr.bf16.mxu0 %v4850_v49  ;;  %v2792_v49 = vld [vmem:[#allocation2 + $0x1ae8] sm:$0xff]  ;;  %v2826_v40 = vld [vmem:[#allocation2 + $0x1bf8] sm:$0xff] }
 0x245   : > { %v4784_v10 = vpack.c.bf16 %v2792_v49, %v2789_v45  ;;  %v4806_v45 = vpack.c.bf16 %v2829_v34, %v2826_v40  ;;  %v2851_v49 = vld [vmem:[#allocation2 + $0x1cc0] sm:$0xff] }
 0x246   : > { %4765 = vmatpush1.bf16.msra.mxu1 %v4764_v52  ;;  %v2795_v52 = vld [vmem:[#allocation2 + $0x1b00] sm:$0xff] }
 0x247   : > { %4853 = vmatpush3.bf16.msra.mxu0 %v4852_v62  ;;  %4767 = vmatprep.subr.bf16.mxu1 %v4766_v58  ;;  %v4786_v62 = vpack.c.bf16 %v2799_v54, %v2796_v6  ;;  %v2824_v58 = vld [vmem:[#allocation2 + $0x1be8] sm:$0xff]  ;;  %v4788_v59 = vpack.c.bf16 %v2798_v53, %v2795_v52  ;;  %v2835_v6 = vld [vmem:[#allocation2 + $0x1c40] sm:$0xff]  ;;  %v2857_v52 = vld [vmem:[#allocation2 + $0x1cf0] sm:$0xff] }
 0x248   : > { %4855 = vmatprep.subr.bf16.mxu0 %v4854_v23  ;;  %v2802_v23 = vld [vmem:[#allocation2 + $0x1b38] sm:$0xff]  ;;  %v4873_v61 = vpack.c.bf16 %v2824_v58, %v2821_v57  ;;  %v2831_v54 = vld [vmem:[#allocation2 + $0x1c20] sm:$0xff]  ;;  %v2841_v57 = vld [vmem:[#allocation2 + $0x1c70] sm:$0xff] }
 0x249   : > { %v4790_v1 = vpack.c.bf16 %v2805_v3, %v2802_v23  ;;  %v2838_v53 = vld [vmem:[#allocation2 + $0x1c58] sm:$0xff]  ;;  %v2837_v3 = vld [vmem:[#allocation2 + $0x1c50] sm:$0xff] }
 0x24a   : > { %4769 = vmatpush1.bf16.msra.mxu1 %v4768_v2  ;;  %v2827_v2 = vld [vmem:[#allocation2 + $0x1c00] sm:$0xff] }
 0x24b   : > { %4857 = vmatpush3.bf16.msra.mxu0 %v4856_v8  ;;  %4771 = vmatprep.subr.bf16.mxu1 %v4770_v11  ;;  %v2830_v8 = vld [vmem:[#allocation2 + $0x1c18] sm:$0xff]  ;;  %v4792_v11 = vpack.c.bf16 %v2804_v4, %v2801_v63  ;;  %v2847_v4 = vld [vmem:[#allocation2 + $0x1ca0] sm:$0xff] }
 0x24c   : > { %4859 = vmatprep.subr.bf16.mxu0 %v4858_v33  ;;  %v4876_v33 = vpack.c.bf16 %v2830_v8, %v2827_v2  ;;  %v2866_v63 = vld [vmem:[#allocation2 + $0x1d38] sm:$0xff] }
 0x24e   : > { %4773 = vmatpush1.bf16.msra.mxu1 %v4772_v19  ;;  %v2817_v19 = vld [vmem:[#allocation2 + $0x1bb0] sm:$0xff] }
 0x24f   : > { %4861 = vmatpush3.bf16.msra.mxu0 %v4860_v21  ;;  %4775 = vmatprep.subr.bf16.mxu1 %v4774_v24  ;;  %v4796_v21 = vpack.c.bf16 %v2810_v55, %v2807_v12  ;;  %v2813_v24 = vld [vmem:[#allocation2 + $0x1b90] sm:$0xff]  ;;  %v4798_v26 = vpack.c.bf16 %v2817_v19, %v2814_v32  ;;  %v2856_v32 = vld [vmem:[#allocation2 + $0x1ce8] sm:$0xff]  ;;  %v2859_v19 = vld [vmem:[#allocation2 + $0x1d00] sm:$0xff] }
 0x250   : > { %4863 = vmatprep.subr.bf16.mxu0 %v4862_v27  ;;  %v2816_v27 = vld [vmem:[#allocation2 + $0x1ba8] sm:$0xff]  ;;  %v2853_v12 = vld [vmem:[#allocation2 + $0x1cd0] sm:$0xff] }
 0x252   : > { %4777 = vmatpush1.bf16.msra.mxu1 %v4776_v31  ;;  %v4800_v31 = vpack.c.bf16 %v2816_v27, %v2813_v24  ;;  %v2855_v24 = vld [vmem:[#allocation2 + $0x1ce0] sm:$0xff]  ;;  %v2862_v27 = vld [vmem:[#allocation2 + $0x1d18] sm:$0xff] }
 0x253   : > { %4865 = vmatpush3.bf16.msra.mxu0 %v4864_v35  ;;  %4779 = vmatprep.subr.bf16.mxu1 %v4778_v37  ;;  %v4882_v35 = vpack.c.bf16 %v2842_v41, %v2839_v18  ;;  %v4802_v37 = vpack.c.bf16 %v2823_v29, %v2820_v5  ;;  %v2865_v18 = vld [vmem:[#allocation2 + $0x1d30] sm:$0xff] }
 0x254   : > { %4866 = vmatprep.subr.bf16.mxu0 %v5165_v0  ;;  %v4830_v5 = vpack.c.bf16 %v2865_v18, %v2862_v27  ;;  %v2861_v29 = vld [vmem:[#allocation2 + $0x1d10] sm:$0xff] }
 0x256   : > { %3086 = vmatmul.mubr.f32.vlgmr.msra.gmra.mrb[20].mxu0 %v5451_v25  ;;  %4781 = vmatpush1.bf16.msra.mxu1 %v4780_v42  ;;  %v4885_v42 = vpack.c.bf16 %v2848_v17, %v2845_v39 }
 0x257   : > { %4868 = vmatpush1.bf16.msra.mxu0 %v4867_v44  ;;  %4783 = vmatprep.subr.bf16.mxu1 %v4782_v47  ;;  %v2825_v44 = vld [vmem:[#allocation2 + $0x1bf0] sm:$0xff]  ;;  %v2828_v47 = vld [vmem:[#allocation2 + $0x1c08] sm:$0xff] }
 0x258   : > { %4869 = vmatprep.subr.bf16.mxu0 %v5165_v0  ;;  %3090 = vmatprep.mubr.f32.mxu0 %v5433_v46 }
 0x25a   : > { %3091 = vmatmul.mubr.f32.gmra.mrb[22].mxu0 %v5445_v15  ;;  %4785 = vmatpush1.bf16.msra.mxu1 %v4784_v10  ;;  %v4810_v10 = vpack.c.bf16 %v2835_v6, %v2832_v51 }
 0x25b   : > { %4871 = vmatpush1.bf16.msra.mxu0 %v4870_v7  ;;  %4787 = vmatprep.subr.bf16.mxu1 %v4786_v62  ;;  %v2834_v7 = vld [vmem:[#allocation2 + $0x1c38] sm:$0xff]  ;;  %v2860_v62 = vld [vmem:[#allocation2 + $0x1d08] sm:$0xff] }
 0x25c   : > { %4872 = vmatprep.subr.bf16.mxu0 %v5165_v0  ;;  %3637 = vmatprep.mubr.msk.f32.mxu0 %vm635_vm1, %v5465_v20  ;;  %v4812_v58 = vpack.c.bf16 %v2834_v7, %v2831_v54  ;;  %v4891_v23 = vpack.c.bf16 %v2860_v62, %v2857_v52  ;;  %v5166_v52 = vmov 0.0  }
 0x25e   : > { %4789 = vmatpush1.bf16.msra.mxu1 %v4788_v59  ;;  %v2840_v59 = vld [vmem:[#allocation2 + $0x1c68] sm:$0xff] }
 0x25f   : > { %4874 = vmatpush1.bf16.msra.mxu0 %v4873_v61  ;;  %4791 = vmatprep.subr.bf16.mxu1 %v4790_v1  ;;  %v2863_v61 = vld [vmem:[#allocation2 + $0x1d20] sm:$0xff]  ;;  %v2844_v1 = vld [vmem:[#allocation2 + $0x1c88] sm:$0xff]  ;;  %v4816_v2 = vpack.c.bf16 %v2840_v59, %v2837_v3 }
 0x260   : > { %4875 = vmatprep.subr.bf16.mxu0 %v5165_v0  ;;  %v4894_v8 = vpack.c.bf16 %v2866_v63, %v2863_v61  ;;  %v4818_v28 = vpack.c.bf16 %v2847_v4, %v2844_v1 }
 0x262   : > { %4793 = vmatpush1.bf16.msra.mxu1 %v4792_v11  ;;  %v2846_v11 = vld [vmem:[#allocation2 + $0x1c98] sm:$0xff] }
 0x263   : > { %4877 = vmatpush1.bf16.msra.mxu0 %v4876_v33  ;;  %4795 = vmatprep.subr.bf16.mxu1 %v4794_v43  ;;  %v2850_v33 = vld [vmem:[#allocation2 + $0x1cb8] sm:$0xff]  ;;  %v4820_v43 = vpack.c.bf16 %v2846_v11, %v2843_v9  ;;  %v278_v9 = vld [vmem:[#allocation4] sm:$0x7] }
 0x264   : > { %4878 = vmatprep.subr.bf16.mxu0 %v5165_v0  ;;  %v4822_v55 = vpack.c.bf16 %v2853_v12, %v2850_v33 }
 0x265   : > { %2932 = vmatmul.mubr.f32.vlgmr.msra.gmra.mrb[20].mxu1 %v5451_v25  ;;  %v4804_v25 = vpack.c.bf16 %v2822_v56, %v2819_v36 }
 0x266   : > { %4797 = vmatpush1.bf16.msra.mxu1 %v4796_v21  ;;  %2937 = vmatprep.mubr.f32.mxu1 %v5433_v46  ;;  %v4808_v46 = vpack.c.bf16 %v2828_v47, %v2825_v44  ;;  %v4824_v21 = vpack.c.bf16 %v2852_v14, %v2849_v13 }
 0x267   : > { %4880 = vmatpush1.bf16.msra.mxu0 %v4879_v22  ;;  %4799 = vmatprep.subr.bf16.mxu1 %v4798_v26  ;;  %v4826_v22 = vpack.c.bf16 %v2859_v19, %v2856_v32  ;;  %v2858_v26 = vld [vmem:[#allocation2 + $0x1cf8] sm:$0xff] }
 0x268   : > { %4881 = vmatprep.subr.bf16.mxu0 %v5165_v0  ;;  %v4828_v41 = vpack.c.bf16 %v2858_v26, %v2855_v24 }
 0x269   : > { %2938 = vmatmul.mubr.f32.gmra.mrb[22].mxu1 %v5445_v15  ;;  %v4888_v15 = vpack.c.bf16 %v2854_v50, %v2851_v49 }
 0x26a   : > { %4801 = vmatpush1.bf16.msra.mxu1 %v4800_v31  ;;  %3635 = vmatprep.mubr.msk.f32.mxu1 %vm635_vm1, %v5465_v20  ;;  %v4814_v20 = vpack.c.bf16 %v2841_v57, %v2838_v53  ;;  %v2864_v31 = vld [vmem:[#allocation2 + $0x1d28] sm:$0xff] }
 0x26b   : > { %4883 = vmatpush1.bf16.msra.mxu0 %v4882_v35  ;;  %4803 = vmatprep.subr.bf16.mxu1 %v4802_v37  ;;  %v4832_v35 = vpack.c.bf16 %v2864_v31, %v2861_v29 }
 0x26c   : > { %4884 = vmatprep.subr.bf16.mxu0 %v5165_v0 }
 0x26e   : > { %4805 = vmatpush1.bf16.msra.mxu1 %v4804_v25 }
 0x26f   : > { %4886 = vmatpush1.bf16.msra.mxu0 %v4885_v42  ;;  %4807 = vmatprep.subr.bf16.mxu1 %v4806_v45 }
 0x270   : > { %4887 = vmatprep.subr.bf16.mxu0 %v5165_v0 }
 0x272   : > { %4809 = vmatpush1.bf16.msra.mxu1 %v4808_v46 }
 0x273   : > { %4889 = vmatpush1.bf16.msra.mxu0 %v4888_v15  ;;  %4811 = vmatprep.subr.bf16.mxu1 %v4810_v10 }
 0x274   : > { %4890 = vmatprep.subr.bf16.mxu0 %v5165_v0 }
 0x276   : > { %4813 = vmatpush1.bf16.msra.mxu1 %v4812_v58 }
 0x277   : > { %4892 = vmatpush1.bf16.msra.mxu0 %v4891_v23  ;;  %4815 = vmatprep.subr.bf16.mxu1 %v4814_v20 }
 0x278   : > { %4893 = vmatprep.subr.bf16.mxu0 %v5165_v0 }
 0x27a   : > { %4817 = vmatpush1.bf16.msra.mxu1 %v4816_v2  ;;  %v1761_v2 = vlaneseq }
 0x27b   : > { %4895 = vmatpush1.bf16.msra.mxu0 %v4894_v8  ;;  %4819 = vmatprep.subr.bf16.mxu1 %v4818_v28 }
 0x27c   : > { %v1762_v8 = vshrl.u32 %v1761_v2, 7 }
 0x27e   : > { %3161 = vmatmul.mubr.f32.vlgmr.msra.gmra.mrb[24].mxu0 %v5483_v30  ;;  %4821 = vmatpush1.bf16.msra.mxu1 %v4820_v43  ;;  %v1771_v28 = vsub.s32 2, %v1762_v8  ;;  %v1763_v26 = vsub.s32 0, %v1762_v8 }
 0x27f   : > { %3638 = vmatprep.mubr.msk.f32.mxu0 %vm635_vm1, %v5458_v38  ;;  %4823 = vmatprep.subr.bf16.mxu1 %v4822_v55 }
 0x280   : > { %v1772_v11 = vrot.slane %v278_v9, %v1771_v28 }
 0x282   : > { %3166 = vmatmul.mubr.f32.gmra.mrb[26].mxu0 %v5478_v16  ;;  %4825 = vmatpush1.bf16.msra.mxu1 %v4824_v21  ;;  %v1778_v55 = vadd.f32 %v1772_v11, %v5580_v48  ;;  %v1781_v24 = vadd.f32 %v1772_v11, %v5586_v60 }
 0x283   : > { %4827 = vmatprep.subr.bf16.mxu1 %v4826_v22  ;;  %3274 = vmatprep.mubr.f32.mxu0 %v5166_v52 }
 0x284   : > { %v1784_v22 = vmax.f32 %v1778_v55, 0.0  ;;  %v1787_v31 = vmax.f32 %v1781_v24, 0.0 }
 0x286   : > { %4829 = vmatpush1.bf16.msra.mxu1 %v4828_v41  ;;  %v1767_v41 = vsub.s32 1, %v1762_v8 }
 0x287   : > { %4831 = vmatprep.subr.bf16.mxu1 %v4830_v5 }
 0x28a   : > { %4833 = vmatpush1.bf16.msra.mxu1 %v4832_v35  ;;  %v1764_v35 = vrot.slane %v278_v9, %v1763_v26 }
 0x28d   : > { %3009 = vmatmul.mubr.f32.vlgmr.msra.gmra.mrb[20].mxu1 %v5483_v30 }
 0x28e   : > { %3636 = vmatprep.mubr.msk.f32.mxu1 %vm635_vm1, %v5458_v38 }
 0x290   : > { %v2397_v36 = vpop.f32.mrb[24].mxu1 }
 0x291   : > { %v2399_v37 = vpop.f32.mrb[25].mxu1  ;;  %3015 = vmatmul.mubr.f32.gmra.mrb[22].mxu1 %v5478_v16 }
 0x292   : > { %v1768_v37 = vrot.slane %v278_v9, %v1767_v41 }
 0x294   : > { %v2402_v56 = vpop.f32.mrb[26].mxu1 }
 0x295   : > { %v2404_v39 = vpop.f32.mrb[27].mxu1 }
 0x2a1   : > { %v1593_v17 = vpop.f32.mrb[0].mxu0 }
 0x2a2   : > { %v1595_v40 = vpop.f32.mrb[1].mxu0  ;;  %v1776_v48 = vadd.f32 %v1764_v35, %v1593_v17 }
 0x2a5   : > { %v5644_v34 = vpop.f32.mrb[2].mxu0 }
 0x2a6   : > { %v5646_v25 = vpop.f32.mrb[3].mxu0  ;;  %v1779_v60 = vadd.f32 %v1764_v35, %v5644_v34 }
 0x2c1   : > { %v3798_v42 = vpop.f32.mrb[8].mxu0 }
 0x2c2   : > { %v3799_v44 = vpop.f32.mrb[9].mxu0 }
 0x2c3   : > { %v3800_v45 = vadd.f32 %v3799_v44, %v3798_v42  ;;  %v1777_v42 = vadd.f32 %v1768_v37, %v1595_v40 }
 0x2c5   : > { %v2398_v47 = vadd.f32 %v3800_v45, %v2397_v36  ;;  %v3801_v30 = vpop.f32.mrb[10].mxu0 }
 0x2c6   : > { %v3802_v49 = vpop.f32.mrb[11].mxu0 }
 0x2c7   : > { %v3803_v50 = vadd.f32 %v3802_v49, %v3801_v30  ;;  %v1782_v49 = vmax.f32 %v1776_v48, 0.0 }
 0x2c9   : > { %v2403_v38 = vadd.f32 %v3803_v50, %v2402_v56 }
 0x2e1   : > { %v3836_v51 = vpop.f32.mrb[12].mxu0 }
 0x2e2   : > { %v3837_v6 = vpop.f32.mrb[13].mxu0 }
 0x2e3   : > { %v3838_v46 = vadd.f32 %v3837_v6, %v3836_v51  ;;  %v1780_v51 = vadd.f32 %v1768_v37, %v5646_v25 }
 0x2e5   : > { %v3839_v16 = vpop.f32.mrb[14].mxu0  ;;  %v2627_v15 = vadd.f32 %v3838_v46, %v2398_v47 }
 0x2e6   : > { %v3840_v54 = vpop.f32.mrb[15].mxu0 }
 0x2e7   : > { %v3841_v10 = vadd.f32 %v3840_v54, %v3839_v16 }
 0x2e9   : > { %v2632_v7 = vadd.f32 %v3841_v10, %v2403_v38  ;;  %v1783_v38 = vmax.f32 %v1777_v42, 0.0 }
 0x309   : > { %v2701_v62 = vpop.f32.mrb[16].mxu0 }
 0x30a   : > { %v2702_v53 = vadd.f32 %v2701_v62, %v2627_v15  ;;  %v2703_v57 = vpop.f32.mrb[17].mxu0  ;;  %v1786_v62 = vmax.f32 %v1780_v51, 0.0 }
 0x30d   : > { %v2706_v58 = vpop.f32.mrb[18].mxu0 }
 0x30e   : > { %v2707_v23 = vadd.f32 %v2706_v58, %v2632_v7  ;;  %v2708_v3 = vpop.f32.mrb[19].mxu0  ;;  %v1785_v7 = vmax.f32 %v1779_v60, 0.0 }
 0x30f   : > { %v3195_v3 = vld [vmem:[#allocation6] sm:$0x1f] }
 0x329   : > { %v3874_v20 = vpop.f32.mrb[20].mxu0 }
 0x32a   : > { %v3875_v59 = vpop.f32.mrb[21].mxu0 }
 0x32b   : > { %v3876_v61 = vadd.f32 %v3875_v59, %v3874_v20  ;;  %v3351_v20 = vld [vmem:[#allocation7] sm:$0x1f] }
 0x32d   : > { %v3877_v63 = vpop.f32.mrb[22].mxu0 }
 0x32e   : > { %v3878_v1 = vpop.f32.mrb[23].mxu0 }
 0x32f   : > { %v3879_v4 = vadd.f32 %v3878_v1, %v3877_v63 }
 0x351   : > { %v3162_v33 = vpop.f32.mrb[24].mxu0 }
 0x352   : > { %v3163_v12 = vadd.f32 %v3876_v61, %v3162_v33  ;;  %v3164_v43 = vpop.f32.mrb[25].mxu0 }
 0x354   : > { %v3173_v13 = vadd.f32 %v3163_v12, %v2702_v53 }
 0x355   : > { %v3167_v14 = vpop.f32.mrb[26].mxu0 }
 0x356   : > { %v3179_v32 = vadd.f32 %v3173_v13, %v1772_v11  ;;  %v3168_v19 = vadd.f32 %v3879_v4, %v3167_v14  ;;  %v3169_v21 = vpop.f32.mrb[27].mxu0 }
 0x358   : > { %v3185_v27 = vmax.f32 %v3179_v32, 0.0  ;;  %v3176_v18 = vadd.f32 %v3168_v19, %v2707_v23 }
 0x35a   : > { %v3191_v5 = vmax.f32 %v1784_v22, %v3185_v27  ;;  %v3182_v29 = vadd.f32 %v3176_v18, %v1772_v11 }
 0x35c   : > { %v3188_v36 = vmax.f32 %v3182_v29, 0.0 }
 0x35e   : > { %v3194_v56 = vmax.f32 %v1787_v31, %v3188_v36 }
 0x360   : > { %v4903_v39 = vpack.c.bf16 %v3194_v56, %v3191_v5  ;;  %v3010_v44 = vpop.f32.mrb[20].mxu1 }
 0x361   : > { %v3177_v45 = vadd.f32 %v3010_v44, %v1764_v35  ;;  %v3012_v47 = vpop.f32.mrb[21].mxu1 }
 0x362   : > { %v3178_v30 = vadd.f32 %v3012_v47, %v1768_v37 }
 0x363   : > { %v3183_v50 = vmax.f32 %v3177_v45, 0.0 }
 0x364   : > { %v3184_v6 = vmax.f32 %v3178_v30, 0.0  ;;  %v3016_v46 = vpop.f32.mrb[22].mxu1 }
 0x365   : > { %v3189_v16 = vmax.f32 %v1782_v49, %v3183_v50  ;;  %v3180_v15 = vadd.f32 %v3016_v46, %v1764_v35  ;;  %v3018_v54 = vpop.f32.mrb[23].mxu1 }
 0x366   : > { %v3190_v10 = vmax.f32 %v1783_v38, %v3184_v6  ;;  %v3181_v17 = vadd.f32 %v3018_v54, %v1768_v37 }
 0x367   : > { %v3186_v40 = vmax.f32 %v3180_v15, 0.0 }
 0x368   : > { %v3187_v53 = vmax.f32 %v3181_v17, 0.0 }
 0x369   : > { %v3192_v57 = vmax.f32 %v1785_v7, %v3186_v40 }
 0x36a   : > { %v3193_v58 = vmax.f32 %v1786_v62, %v3187_v53 }
 0x36b   : > { %v4899_v23 = vpack.c.bf16 %v3192_v57, %v3189_v16 }
 0x36c   : > { %v4896_v25 = vpack.c.bf16 %v3193_v58, %v3190_v10 }
 0x36e   : > { %4898 = vmatprep.subr.msk.bf16.mxu0 %vm5653_vm5, %v4896_v25 }
 0x36f   : > { %4901 = vmatpush1.bf16.msk.msra.mxu0 %vm5653_vm5, %v4899_v23 }
 0x370   : > { %4902 = vmatprep.subr.bf16.mxu0 %v5165_v0 }
 0x372   : > { %3641 = vmatmul.mubr.msk.f32.vlgmr.msra.gmra.mrb[28].mxu0 %vm3196_vm6, %v3195_v3 }
 0x373   : > { %4905 = vmatpush3.bf16.msk.msra.mxu0 %vm5653_vm5, %v4903_v39  ;;  %3890 = vmatprep.mubr.msk.f32.mxu0 %vm5168_vm7, %v5166_v52 }
 0x374   : > { %4908 = vmatprep.subr.msk.bf16.mxu0 %vm5653_vm5, %v4896_v25 }
 0x376   : > { %3891 = vmatmul.mubr.msk.f32.vlgmr.msra.gmra.mrb[30].mxu0 %vm3196_vm6, %v3195_v3 }
 0x377   : > { %4911 = vmatpush1.bf16.msk.msra.mxu0 %vm5653_vm5, %v4899_v23  ;;  %3419 = vmatprep.mubr.f32.mxu0 %v5166_v52 }
 0x378   : > { %4912 = vmatprep.subr.bf16.mxu0 %v5165_v0 }
 0x37a   : > { %3646 = vmatmul.mubr.msk.f32.vlgmr.msra.gmra.mrb[32].mxu0 %vm3196_vm6, %v3351_v20 }
 0x37b   : > { %4915 = vmatpush3.bf16.msk.msra.mxu0 %vm5653_vm5, %v4903_v39  ;;  %3897 = vmatprep.mubr.msk.f32.mxu0 %vm5168_vm7, %v5166_v52 }
 0x37e   : > { %3898 = vmatmul.mubr.msk.f32.vlgmr.msra.gmra.mrb[34].mxu0 %vm3196_vm6, %v3351_v20 }
 0x445   : > { %v3276_v59 = vpop.f32.mrb[28].mxu0 }
 0x446   : > { %v3278_v61 = vpop.f32.mrb[29].mxu0 }
 0x449   : > { %v3347_v63 = vpop.f32.mrb[30].mxu0 }
 0x44a   : > { %v3892_v1 = vpop.f32.mrb[31].mxu0 }
 0x44d   : > { %v3421_v4 = vpop.f32.mrb[32].mxu0 }
 0x44e   : > { %v3496_v2 = vmax.f32 %v3276_v59, %v3421_v4  ;;  %v3423_v8 = vpop.f32.mrb[33].mxu0 }
 0x44f   : > { %v3497_v0 = vmax.f32 %v3278_v61, %v3423_v8 }
 0x450   : > { %3499 = vst [vmem:[%s277_s16] sm:$0x1f] %v3496_v2 }
 0x451   : > { %3500 = vst [vmem:[%s277_s16 + $0x8] sm:$0x1f] %v3497_v0  ;;  %v3492_v28 = vpop.f32.mrb[34].mxu0 }
 0x452   : > { %v3498_v9 = vmax.f32 %v3347_v63, %v3492_v28  ;;  %v3899_v52 = vpop.f32.mrb[35].mxu0 }
 0x454   : > { %3502 = vst.msk [vmem:[%s277_s16 + $0x10] sm:$0x1f] %vm3501_vm8, %v3498_v9 }
 0x455 PF: > { %s18_s18 = sadd.s32 1, %s5157_s18  }
 0x456   : > { %p15_p6 = scmp.ge.s32.totalorder %s18_s18, 4  }
 0x458   :  { %17 = sbr.rel (!%p15_p6) target bundleno = 3 (0x3), region = 92 }
 0x45f   :  { %3524 = vsyncpa [#allocation3], 1 }
 0x460   :  { %3526 = vsyncpa [#allocation3 + $0x1], 1 }
 0x461   :  { %3527 = vsyncpa [#allocation5], 1 }
 0x462   :  { %3528 = vsyncpa [#allocation8], 1 }

</bundles_post_ra>
